<compile_context>
chip_gen: v6e
topology: v6e:2x2x1
jax: 0.10.0
libtpu: 0.0.40
codegen_flags: <defaults>
</compile_context>

<pallas_src>
import jax
import jax.numpy as jnp
from jax.experimental import pallas as pl
from jax.experimental.pallas import tpu as pltpu

_SUBLANE = 8
_LANE = 128


def _round_up(x, m):
    return ((x + m - 1) // m) * m


def _largest_divisor(n, cap, multiple_of=1):
    """Largest d <= cap with n % d == 0 and d % multiple_of == 0."""
    best = multiple_of
    d = multiple_of
    top = min(n, cap)
    while d <= top:
        if n % d == 0:
            best = d
        d += multiple_of
    return best


def _vmem_budget_bytes():
    default = 128 * 1024 * 1024  # v5e/v6e physical; v7x reports 64 MiB itself
    try:
        cap = int(pltpu.get_tpu_info().vmem_capacity_bytes)
        return cap if cap > 0 else default
    except Exception:
        return default


def _vmem_limit(bytes_needed):
    # 2x headroom, floored at 32 MiB, capped at ~3/4 of this generation's
    # physical VMEM (so the same code stays inside v7x's 64 MiB).
    budget = (_vmem_budget_bytes() * 3) // 4
    return int(min(max(2 * bytes_needed, 32 * 1024 * 1024), budget))


# --------------------------------------------------------------------------- #
# Fused kernel: in-kernel one-hot embedding matmul (prologue) + sequential
# tanh recurrence (serial chain) + output projection (epilogue).
# Grid = (batch blocks [parallel], time blocks [arbitrary]).
# --------------------------------------------------------------------------- #
def _rnn_fused_kernel(tok_ref, h0_ref, wih_ref, bias_ref, whh_ref,
                      wout_ref, bout_ref, y_ref, hn_ref,
                      h_carry, xp_ref, hseq_ref):
    t_blk, b_blk, _ = tok_ref.shape
    v_pad, h_pad = wih_ref.shape

    # Re-initialize the carried hidden state at the first time block of every
    # batch block.
    @pl.when(pl.program_id(1) == 0)
    def _():
        h_carry[...] = h0_ref[...]

    # ---- Prologue (off the serial chain): x_proj = one_hot(tok) @ W_ih^T + b.
    tok = tok_ref[...]                                           # (T, B, 1) int32
    lane = jax.lax.broadcasted_iota(jnp.int32, (t_blk, b_blk, v_pad), 2)
    onehot = (lane == tok).astype(jnp.float32)                   # (T, B, V_pad)
    xp = jnp.dot(onehot.reshape(t_blk * b_blk, v_pad), wih_ref[...],
                 preferred_element_type=jnp.float32)             # (T*B, H_pad)
    xp_ref[...] = xp.reshape(t_blk, b_blk, h_pad) + bias_ref[...]

    # ---- Serial recurrence: h_t = tanh(x_t + h_{t-1} @ W_hh^T). -------------
    def step(t, h):
        pre = xp_ref[t] + jnp.dot(h, whh_ref[...],
                                  preferred_element_type=jnp.float32)
        h = jnp.tanh(pre)
        hseq_ref[t] = h
        return h

    h_last = jax.lax.fori_loop(0, t_blk, step, h_carry[...], unroll=True)
    h_carry[...] = h_last
    hn_ref[...] = h_last     # constant block index along t -> final value wins

    # ---- Epilogue: fused output projection (no h_seq HBM round trip). -------
    hs = hseq_ref[...].reshape(t_blk * b_blk, h_pad)
    y = jnp.dot(hs, wout_ref[...], preferred_element_type=jnp.float32)
    y_ref[...] = (y.reshape(t_blk, b_blk, wout_ref.shape[1])
                  + bout_ref[...]).astype(y_ref.dtype)


def rnn_model_forward(inputs, state, params, *, t_blk_cap=32, b_blk_cap=128):
    """Forward pass of RNNModel.

    inputs: (seq, batch) int32 token ids
    state : (1, batch, hidden) float32
    params: (w_ih (H,V), w_hh (H,H), b_ih (H,), b_hh (H,), w_out (V,H), b_out (V,))
    returns (output (seq*batch, vocab), state_out (1, batch, hidden))
    """
    w_ih, w_hh, b_ih, b_hh, w_out, b_out = params
    S, B = inputs.shape
    H, V = w_ih.shape
    f32 = jnp.float32

    B_pad = _round_up(B, _SUBLANE)      # sublane-align batch
    H_pad = _round_up(H, _LANE)         # lane-align hidden
    V_pad = _round_up(V, _LANE)         # lane-align vocab (lane-dense logits)
    # TODO(synk): for prime S this degenerates to T_BLK=1 (correct but slow);
    # pad S and mask the tail for ragged sequence lengths.
    T_BLK = _largest_divisor(S, t_blk_cap)
    B_BLK = _largest_divisor(B_pad, b_blk_cap, multiple_of=_SUBLANE)

    # ---- JAX glue: only pad / transpose, no one-hot and no x_proj gather. ---
    tok = jnp.pad(inputs.astype(jnp.int32), ((0, 0), (0, B_pad - B)))
    tok = tok[:, :, None]                                              # (S, B_pad, 1)
    h0 = jnp.pad(state[0].astype(f32), ((0, B_pad - B), (0, H_pad - H)))
    wih_t = jnp.pad(w_ih.T.astype(f32), ((0, V_pad - V), (0, H_pad - H)))
    bias = jnp.pad((b_ih + b_hh).astype(f32), (0, H_pad - H)).reshape(1, H_pad)
    whh_t = jnp.pad(w_hh.T.astype(f32), ((0, H_pad - H), (0, H_pad - H)))
    wout_t = jnp.pad(w_out.T.astype(f32), ((0, H_pad - H), (0, V_pad - V)))
    bout = jnp.pad(b_out.astype(f32), (0, V_pad - V)).reshape(1, V_pad)

    vmem_bytes = 4 * (
        2 * T_BLK * B_BLK                 # tok block (double-buffered)
        + 2 * B_BLK * H_pad               # h0
        + 2 * V_pad * H_pad               # W_ih^T (resident)
        + 2 * H_pad                       # bias
        + 2 * H_pad * H_pad               # W_hh^T (resident)
        + 2 * H_pad * V_pad               # W_out^T (resident)
        + 2 * V_pad                       # b_out
        + 2 * T_BLK * B_BLK * V_pad       # logits out block
        + 2 * B_BLK * H_pad               # final-state out block
        + B_BLK * H_pad                   # carry scratch
        + 2 * T_BLK * B_BLK * H_pad)      # x_proj + h_seq scratch

    y_pad, hn_pad = pl.pallas_call(
        _rnn_fused_kernel,
        out_shape=(jax.ShapeDtypeStruct((S, B_pad, V_pad), f32),
                   jax.ShapeDtypeStruct((B_pad, H_pad), f32)),
        grid=(B_pad // B_BLK, S // T_BLK),
        in_specs=[
            pl.BlockSpec((T_BLK, B_BLK, 1), lambda b, t: (t, b, 0)),   # token ids
            pl.BlockSpec((B_BLK, H_pad), lambda b, t: (b, 0)),         # h0
            pl.BlockSpec((V_pad, H_pad), lambda b, t: (0, 0)),         # W_ih^T
            pl.BlockSpec((1, H_pad), lambda b, t: (0, 0)),             # b_ih + b_hh
            pl.BlockSpec((H_pad, H_pad), lambda b, t: (0, 0)),         # W_hh^T
            pl.BlockSpec((H_pad, V_pad), lambda b, t: (0, 0)),         # W_out^T
            pl.BlockSpec((1, V_pad), lambda b, t: (0, 0)),             # b_out
        ],
        out_specs=[
            pl.BlockSpec((T_BLK, B_BLK, V_pad), lambda b, t: (t, b, 0)),  # logits
            pl.BlockSpec((B_BLK, H_pad), lambda b, t: (b, 0)),            # final h
        ],
        scratch_shapes=[
            pltpu.VMEM((B_BLK, H_pad), f32),          # carried hidden state
            pltpu.VMEM((T_BLK, B_BLK, H_pad), f32),   # x_proj block
            pltpu.VMEM((T_BLK, B_BLK, H_pad), f32),   # hidden sequence block
        ],
        compiler_params=pltpu.CompilerParams(
            dimension_semantics=("parallel", "arbitrary"),
            vmem_limit_bytes=_vmem_limit(vmem_bytes)),
    )(tok, h0, wih_t, bias, whh_t, wout_t, bout)

    # Only pay the un-padding slice when padding actually exists.
    y = y_pad
    if B_pad != B or V_pad != V:
        y = y[:, :B, :V]
    output = y.reshape(S * B, V)

    hn = hn_pad
    if B_pad != B or H_pad != H:
        hn = hn[:B, :H]
    return output, hn[None]


def _reference_forward(inputs, state, params):
    """Plain-JAX reference mirroring the PyTorch semantics."""
    w_ih, w_hh, b_ih, b_hh, w_out, b_out = params
    V = w_ih.shape[1]
    x = jax.nn.one_hot(inputs, V, dtype=jnp.float32)        # (S, B, V)
    h = state[0]                                             # (B, H)

    def step(h, x_t):
        h = jnp.tanh(x_t @ w_ih.T + b_ih + h @ w_hh.T + b_hh)
        return h, h

    h_last, ys = jax.lax.scan(step, h, x)                    # ys: (S, B, H)
    out = ys.reshape(-1, ys.shape[-1]) @ w_out.T + b_out
    return out, h_last[None]


if __name__ == "__main__":
    seq, batch = 32, 2
    vocab_size = 28          # small vocab (padded to 128 lanes internally)
    num_hiddens = 256        # matches the PyTorch spec (num_hiddens = 256)

    key = jax.random.PRNGKey(0)
    k_tok, k1, k2, k3, k4, k5, k6 = jax.random.split(key, 7)

    scale = 1.0 / jnp.sqrt(num_hiddens)
    w_ih = jax.random.uniform(k1, (num_hiddens, vocab_size), jnp.float32, -scale, scale)
    w_hh = jax.random.uniform(k2, (num_hiddens, num_hiddens), jnp.float32, -scale, scale)
    b_ih = jax.random.uniform(k3, (num_hiddens,), jnp.float32, -scale, scale)
    b_hh = jax.random.uniform(k4, (num_hiddens,), jnp.float32, -scale, scale)
    w_out = jax.random.uniform(k5, (vocab_size, num_hiddens), jnp.float32, -scale, scale)
    b_out = jax.random.uniform(k6, (vocab_size,), jnp.float32, -scale, scale)
    params = (w_ih, w_hh, b_ih, b_hh, w_out, b_out)

    inputs = jax.random.randint(k_tok, (seq, batch), 0, vocab_size, dtype=jnp.int32)
    state = jnp.zeros((1, batch, num_hiddens), jnp.float32)   # begin_state()

    fwd = jax.jit(rnn_model_forward)
    out, new_state = fwd(inputs, state, params)
    out = jax.block_until_ready(out)
    new_state = jax.block_until_ready(new_state)

    ref_out, ref_state = _reference_forward(inputs, state, params)
    assert out.shape == (seq * batch, vocab_size)
    assert new_state.shape == (1, batch, num_hiddens)
    assert jnp.allclose(out, ref_out, atol=1e-4, rtol=1e-4), \
        float(jnp.abs(out - ref_out).max())
    assert jnp.allclose(new_state, ref_state, atol=1e-4, rtol=1e-4), \
        float(jnp.abs(new_state - ref_state).max())

    print("KERNEL_OK")
</pallas_src>

<mosaic_0001>
module attributes {stable_mosaic.version = 11 : i64} {
  func.func @_rnn_fused_kernel(%arg0: i32, %arg1: i32, %arg2: memref<32x8x1xi32, #tpu.memory_space<vmem>>, %arg3: memref<8x256xf32, #tpu.memory_space<vmem>>, %arg4: memref<128x256xf32, #tpu.memory_space<vmem>>, %arg5: memref<1x256xf32, #tpu.memory_space<vmem>>, %arg6: memref<256x256xf32, #tpu.memory_space<vmem>>, %arg7: memref<256x128xf32, #tpu.memory_space<vmem>>, %arg8: memref<1x128xf32, #tpu.memory_space<vmem>>, %arg9: memref<32x8x128xf32, #tpu.memory_space<vmem>>, %arg10: memref<8x256xf32, #tpu.memory_space<vmem>>, %arg11: memref<8x256xf32, #tpu.memory_space<vmem>>, %arg12: memref<32x8x256xf32, #tpu.memory_space<vmem>>, %arg13: memref<32x8x256xf32, #tpu.memory_space<vmem>>) attributes {dimension_semantics = [#tpu.dimension_semantics<parallel>, #tpu.dimension_semantics<arbitrary>], iteration_bounds = array<i64: 1, 1>, scalar_prefetch = 0 : i64, scratch_operands = 3 : i64, tpu.core_type = #tpu.core_type<tc>, window_params = [{transform_indices = @transform_0, window_bounds = array<i64: 32, 8, 1>}, {transform_indices = @transform_1, window_bounds = array<i64: 8, 256>}, {pipeline_mode = #tpu.pipeline_mode<synchronous>, transform_indices = @transform_2, window_bounds = array<i64: 128, 256>}, {pipeline_mode = #tpu.pipeline_mode<synchronous>, transform_indices = @transform_3, window_bounds = array<i64: 1, 256>}, {pipeline_mode = #tpu.pipeline_mode<synchronous>, transform_indices = @transform_4, window_bounds = array<i64: 256, 256>}, {pipeline_mode = #tpu.pipeline_mode<synchronous>, transform_indices = @transform_5, window_bounds = array<i64: 256, 128>}, {pipeline_mode = #tpu.pipeline_mode<synchronous>, transform_indices = @transform_6, window_bounds = array<i64: 1, 128>}, {transform_indices = @transform_7, window_bounds = array<i64: 32, 8, 128>}, {transform_indices = @transform_8, window_bounds = array<i64: 8, 256>}]} {
    %c0_i32 = arith.constant 0 : i32
    %0 = arith.cmpi eq, %arg1, %c0_i32 : i32
    %1 = arith.extui %0 : i1 to i32
    %c0_i32_0 = arith.constant 0 : i32
    %2 = arith.cmpi ne, %1, %c0_i32_0 : i32
    scf.if %2 {
      %c0_252 = arith.constant 0 : index
      %c0_253 = arith.constant 0 : index
      %383 = vector.load %arg3[%c0_252, %c0_253] : memref<8x256xf32, #tpu.memory_space<vmem>>, vector<8x256xf32>
      %c0_254 = arith.constant 0 : index
      %c0_255 = arith.constant 0 : index
      %384 = vector.load %arg11[%c0_254, %c0_255] : memref<8x256xf32, #tpu.memory_space<vmem>>, vector<8x256xf32>
      tpu.vector_store %arg11[%c0_254, %c0_255], %383 {strides = array<i32>} : memref<8x256xf32, #tpu.memory_space<vmem>>, vector<8x256xf32>,
    } else {
    }
    %c0 = arith.constant 0 : index
    %c0_1 = arith.constant 0 : index
    %c0_2 = arith.constant 0 : index
    %3 = vector.load %arg2[%c0, %c0_1, %c0_2] : memref<32x8x1xi32, #tpu.memory_space<vmem>>, vector<32x8x1xi32>
    %4 = tpu.iota {dimensions = array<i32: 2>} : vector<32x8x128xi32>
    %5 = vector.broadcast %3 : vector<32x8x1xi32> to vector<32x8x128xi32>
    %6 = arith.cmpi eq, %4, %5 : vector<32x8x128xi32>
    %7 = arith.extui %6 : vector<32x8x128xi1> to vector<32x8x128xi32>
    %8 = arith.sitofp %7 : vector<32x8x128xi32> to vector<32x8x128xf32>
    %9 = vector.shape_cast %8 : vector<32x8x128xf32> to vector<256x128xf32>
    %c0_3 = arith.constant 0 : index
    %c0_4 = arith.constant 0 : index
    %10 = vector.load %arg4[%c0_3, %c0_4] : memref<128x256xf32, #tpu.memory_space<vmem>>, vector<128x256xf32>
    %cst = arith.constant dense<0.000000e+00> : vector<256x256xf32>
    %11 = tpu.matmul %9, %10, %cst {dimension_numbers = #tpu.dot_dimension_numbers<[1], [0], [0], [1], [0, 0, 1, 1], [], []>} : vector<256x128xf32>, vector<128x256xf32>, vector<256x256xf32> -> vector<256x256xf32>
    %12 = vector.shape_cast %11 : vector<256x256xf32> to vector<32x8x256xf32>
    %c0_5 = arith.constant 0 : index
    %c0_6 = arith.constant 0 : index
    %13 = vector.load %arg5[%c0_5, %c0_6] : memref<1x256xf32, #tpu.memory_space<vmem>>, vector<1x256xf32>
    %14 = vector.shape_cast %13 : vector<1x256xf32> to vector<1x1x256xf32>
    %15 = vector.broadcast %14 : vector<1x1x256xf32> to vector<32x8x256xf32>
    %16 = arith.addf %12, %15 : vector<32x8x256xf32>
    %c0_7 = arith.constant 0 : index
    %c0_8 = arith.constant 0 : index
    %c0_9 = arith.constant 0 : index
    %17 = vector.load %arg12[%c0_7, %c0_8, %c0_9] : memref<32x8x256xf32, #tpu.memory_space<vmem>>, vector<32x8x256xf32>
    tpu.vector_store %arg12[%c0_7, %c0_8, %c0_9], %16 {strides = array<i32>} : memref<32x8x256xf32, #tpu.memory_space<vmem>>, vector<32x8x256xf32>,
    %c0_10 = arith.constant 0 : index
    %c0_11 = arith.constant 0 : index
    %18 = vector.load %arg11[%c0_10, %c0_11] : memref<8x256xf32, #tpu.memory_space<vmem>>, vector<8x256xf32>
    %c0_i32_12 = arith.constant 0 : i32
    %19 = arith.index_cast %c0_i32_12 : i32 to index
    %c0_13 = arith.constant 0 : index
    %c0_14 = arith.constant 0 : index
    %20 = vector.load %arg12[%19, %c0_13, %c0_14] : memref<32x8x256xf32, #tpu.memory_space<vmem>>, vector<1x8x256xf32>
    %21 = vector.shape_cast %20 : vector<1x8x256xf32> to vector<8x256xf32>
    %c0_15 = arith.constant 0 : index
    %c0_16 = arith.constant 0 : index
    %22 = vector.load %arg6[%c0_15, %c0_16] : memref<256x256xf32, #tpu.memory_space<vmem>>, vector<256x256xf32>
    %cst_17 = arith.constant dense<0.000000e+00> : vector<8x256xf32>
    %23 = tpu.matmul %18, %22, %cst_17 {dimension_numbers = #tpu.dot_dimension_numbers<[1], [0], [0], [1], [0, 0, 1, 1], [], []>} : vector<8x256xf32>, vector<256x256xf32>, vector<8x256xf32> -> vector<8x256xf32>
    %24 = arith.addf %21, %23 : vector<8x256xf32>
    %25 = math.tanh %24 : vector<8x256xf32>
    %26 = arith.index_cast %c0_i32_12 : i32 to index
    %c0_18 = arith.constant 0 : index
    %c0_19 = arith.constant 0 : index
    %27 = vector.load %arg13[%26, %c0_18, %c0_19] : memref<32x8x256xf32, #tpu.memory_space<vmem>>, vector<1x8x256xf32>
    %28 = vector.shape_cast %27 : vector<1x8x256xf32> to vector<8x256xf32>
    %29 = vector.shape_cast %25 : vector<8x256xf32> to vector<1x8x256xf32>
    tpu.vector_store %arg13[%26, %c0_18, %c0_19], %29 {strides = array<i32>} : memref<32x8x256xf32, #tpu.memory_space<vmem>>, vector<1x8x256xf32>,
    %c1_i32 = arith.constant 1 : i32
    %30 = arith.index_cast %c1_i32 : i32 to index
    %c0_20 = arith.constant 0 : index
    %c0_21 = arith.constant 0 : index
    %31 = vector.load %arg12[%30, %c0_20, %c0_21] : memref<32x8x256xf32, #tpu.memory_space<vmem>>, vector<1x8x256xf32>
    %32 = vector.shape_cast %31 : vector<1x8x256xf32> to vector<8x256xf32>
    %c0_22 = arith.constant 0 : index
    %c0_23 = arith.constant 0 : index
    %33 = vector.load %arg6[%c0_22, %c0_23] : memref<256x256xf32, #tpu.memory_space<vmem>>, vector<256x256xf32>
    %cst_24 = arith.constant dense<0.000000e+00> : vector<8x256xf32>
    %34 = tpu.matmul %25, %33, %cst_24 {dimension_numbers = #tpu.dot_dimension_numbers<[1], [0], [0], [1], [0, 0, 1, 1], [], []>} : vector<8x256xf32>, vector<256x256xf32>, vector<8x256xf32> -> vector<8x256xf32>
    %35 = arith.addf %32, %34 : vector<8x256xf32>
    %36 = math.tanh %35 : vector<8x256xf32>
    %37 = arith.index_cast %c1_i32 : i32 to index
    %c0_25 = arith.constant 0 : index
    %c0_26 = arith.constant 0 : index
    %38 = vector.load %arg13[%37, %c0_25, %c0_26] : memref<32x8x256xf32, #tpu.memory_space<vmem>>, vector<1x8x256xf32>
    %39 = vector.shape_cast %38 : vector<1x8x256xf32> to vector<8x256xf32>
    %40 = vector.shape_cast %36 : vector<8x256xf32> to vector<1x8x256xf32>
    tpu.vector_store %arg13[%37, %c0_25, %c0_26], %40 {strides = array<i32>} : memref<32x8x256xf32, #tpu.memory_space<vmem>>, vector<1x8x256xf32>,
    %c2_i32 = arith.constant 2 : i32
    %41 = arith.index_cast %c2_i32 : i32 to index
    %c0_27 = arith.constant 0 : index
    %c0_28 = arith.constant 0 : index
    %42 = vector.load %arg12[%41, %c0_27, %c0_28] : memref<32x8x256xf32, #tpu.memory_space<vmem>>, vector<1x8x256xf32>
    %43 = vector.shape_cast %42 : vector<1x8x256xf32> to vector<8x256xf32>
    %c0_29 = arith.constant 0 : index
    %c0_30 = arith.constant 0 : index
    %44 = vector.load %arg6[%c0_29, %c0_30] : memref<256x256xf32, #tpu.memory_space<vmem>>, vector<256x256xf32>
    %cst_31 = arith.constant dense<0.000000e+00> : vector<8x256xf32>
    %45 = tpu.matmul %36, %44, %cst_31 {dimension_numbers = #tpu.dot_dimension_numbers<[1], [0], [0], [1], [0, 0, 1, 1], [], []>} : vector<8x256xf32>, vector<256x256xf32>, vector<8x256xf32> -> vector<8x256xf32>
    %46 = arith.addf %43, %45 : vector<8x256xf32>
    %47 = math.tanh %46 : vector<8x256xf32>
    %48 = arith.index_cast %c2_i32 : i32 to index
    %c0_32 = arith.constant 0 : index
    %c0_33 = arith.constant 0 : index
    %49 = vector.load %arg13[%48, %c0_32, %c0_33] : memref<32x8x256xf32, #tpu.memory_space<vmem>>, vector<1x8x256xf32>
    %50 = vector.shape_cast %49 : vector<1x8x256xf32> to vector<8x256xf32>
    %51 = vector.shape_cast %47 : vector<8x256xf32> to vector<1x8x256xf32>
    tpu.vector_store %arg13[%48, %c0_32, %c0_33], %51 {strides = array<i32>} : memref<32x8x256xf32, #tpu.memory_space<vmem>>, vector<1x8x256xf32>,
    %c3_i32 = arith.constant 3 : i32
    %52 = arith.index_cast %c3_i32 : i32 to index
    %c0_34 = arith.constant 0 : index
    %c0_35 = arith.constant 0 : index
    %53 = vector.load %arg12[%52, %c0_34, %c0_35] : memref<32x8x256xf32, #tpu.memory_space<vmem>>, vector<1x8x256xf32>
    %54 = vector.shape_cast %53 : vector<1x8x256xf32> to vector<8x256xf32>
    %c0_36 = arith.constant 0 : index
    %c0_37 = arith.constant 0 : index
    %55 = vector.load %arg6[%c0_36, %c0_37] : memref<256x256xf32, #tpu.memory_space<vmem>>, vector<256x256xf32>
    %cst_38 = arith.constant dense<0.000000e+00> : vector<8x256xf32>
    %56 = tpu.matmul %47, %55, %cst_38 {dimension_numbers = #tpu.dot_dimension_numbers<[1], [0], [0], [1], [0, 0, 1, 1], [], []>} : vector<8x256xf32>, vector<256x256xf32>, vector<8x256xf32> -> vector<8x256xf32>
    %57 = arith.addf %54, %56 : vector<8x256xf32>
    %58 = math.tanh %57 : vector<8x256xf32>
    %59 = arith.index_cast %c3_i32 : i32 to index
    %c0_39 = arith.constant 0 : index
    %c0_40 = arith.constant 0 : index
    %60 = vector.load %arg13[%59, %c0_39, %c0_40] : memref<32x8x256xf32, #tpu.memory_space<vmem>>, vector<1x8x256xf32>
    %61 = vector.shape_cast %60 : vector<1x8x256xf32> to vector<8x256xf32>
    %62 = vector.shape_cast %58 : vector<8x256xf32> to vector<1x8x256xf32>
    tpu.vector_store %arg13[%59, %c0_39, %c0_40], %62 {strides = array<i32>} : memref<32x8x256xf32, #tpu.memory_space<vmem>>, vector<1x8x256xf32>,
    %c4_i32 = arith.constant 4 : i32
    %63 = arith.index_cast %c4_i32 : i32 to index
    %c0_41 = arith.constant 0 : index
    %c0_42 = arith.constant 0 : index
    %64 = vector.load %arg12[%63, %c0_41, %c0_42] : memref<32x8x256xf32, #tpu.memory_space<vmem>>, vector<1x8x256xf32>
    %65 = vector.shape_cast %64 : vector<1x8x256xf32> to vector<8x256xf32>
    %c0_43 = arith.constant 0 : index
    %c0_44 = arith.constant 0 : index
    %66 = vector.load %arg6[%c0_43, %c0_44] : memref<256x256xf32, #tpu.memory_space<vmem>>, vector<256x256xf32>
    %cst_45 = arith.constant dense<0.000000e+00> : vector<8x256xf32>
    %67 = tpu.matmul %58, %66, %cst_45 {dimension_numbers = #tpu.dot_dimension_numbers<[1], [0], [0], [1], [0, 0, 1, 1], [], []>} : vector<8x256xf32>, vector<256x256xf32>, vector<8x256xf32> -> vector<8x256xf32>
    %68 = arith.addf %65, %67 : vector<8x256xf32>
    %69 = math.tanh %68 : vector<8x256xf32>
    %70 = arith.index_cast %c4_i32 : i32 to index
    %c0_46 = arith.constant 0 : index
    %c0_47 = arith.constant 0 : index
    %71 = vector.load %arg13[%70, %c0_46, %c0_47] : memref<32x8x256xf32, #tpu.memory_space<vmem>>, vector<1x8x256xf32>
    %72 = vector.shape_cast %71 : vector<1x8x256xf32> to vector<8x256xf32>
    %73 = vector.shape_cast %69 : vector<8x256xf32> to vector<1x8x256xf32>
    tpu.vector_store %arg13[%70, %c0_46, %c0_47], %73 {strides = array<i32>} : memref<32x8x256xf32, #tpu.memory_space<vmem>>, vector<1x8x256xf32>,
    %c5_i32 = arith.constant 5 : i32
    %74 = arith.index_cast %c5_i32 : i32 to index
    %c0_48 = arith.constant 0 : index
    %c0_49 = arith.constant 0 : index
    %75 = vector.load %arg12[%74, %c0_48, %c0_49] : memref<32x8x256xf32, #tpu.memory_space<vmem>>, vector<1x8x256xf32>
    %76 = vector.shape_cast %75 : vector<1x8x256xf32> to vector<8x256xf32>
    %c0_50 = arith.constant 0 : index
    %c0_51 = arith.constant 0 : index
    %77 = vector.load %arg6[%c0_50, %c0_51] : memref<256x256xf32, #tpu.memory_space<vmem>>, vector<256x256xf32>
    %cst_52 = arith.constant dense<0.000000e+00> : vector<8x256xf32>
    %78 = tpu.matmul %69, %77, %cst_52 {dimension_numbers = #tpu.dot_dimension_numbers<[1], [0], [0], [1], [0, 0, 1, 1], [], []>} : vector<8x256xf32>, vector<256x256xf32>, vector<8x256xf32> -> vector<8x256xf32>
    %79 = arith.addf %76, %78 : vector<8x256xf32>
    %80 = math.tanh %79 : vector<8x256xf32>
    %81 = arith.index_cast %c5_i32 : i32 to index
    %c0_53 = arith.constant 0 : index
    %c0_54 = arith.constant 0 : index
    %82 = vector.load %arg13[%81, %c0_53, %c0_54] : memref<32x8x256xf32, #tpu.memory_space<vmem>>, vector<1x8x256xf32>
    %83 = vector.shape_cast %82 : vector<1x8x256xf32> to vector<8x256xf32>
    %84 = vector.shape_cast %80 : vector<8x256xf32> to vector<1x8x256xf32>
    tpu.vector_store %arg13[%81, %c0_53, %c0_54], %84 {strides = array<i32>} : memref<32x8x256xf32, #tpu.memory_space<vmem>>, vector<1x8x256xf32>,
    %c6_i32 = arith.constant 6 : i32
    %85 = arith.index_cast %c6_i32 : i32 to index
    %c0_55 = arith.constant 0 : index
    %c0_56 = arith.constant 0 : index
    %86 = vector.load %arg12[%85, %c0_55, %c0_56] : memref<32x8x256xf32, #tpu.memory_space<vmem>>, vector<1x8x256xf32>
    %87 = vector.shape_cast %86 : vector<1x8x256xf32> to vector<8x256xf32>
    %c0_57 = arith.constant 0 : index
    %c0_58 = arith.constant 0 : index
    %88 = vector.load %arg6[%c0_57, %c0_58] : memref<256x256xf32, #tpu.memory_space<vmem>>, vector<256x256xf32>
    %cst_59 = arith.constant dense<0.000000e+00> : vector<8x256xf32>
    %89 = tpu.matmul %80, %88, %cst_59 {dimension_numbers = #tpu.dot_dimension_numbers<[1], [0], [0], [1], [0, 0, 1, 1], [], []>} : vector<8x256xf32>, vector<256x256xf32>, vector<8x256xf32> -> vector<8x256xf32>
    %90 = arith.addf %87, %89 : vector<8x256xf32>
    %91 = math.tanh %90 : vector<8x256xf32>
    %92 = arith.index_cast %c6_i32 : i32 to index
    %c0_60 = arith.constant 0 : index
    %c0_61 = arith.constant 0 : index
    %93 = vector.load %arg13[%92, %c0_60, %c0_61] : memref<32x8x256xf32, #tpu.memory_space<vmem>>, vector<1x8x256xf32>
    %94 = vector.shape_cast %93 : vector<1x8x256xf32> to vector<8x256xf32>
    %95 = vector.shape_cast %91 : vector<8x256xf32> to vector<1x8x256xf32>
    tpu.vector_store %arg13[%92, %c0_60, %c0_61], %95 {strides = array<i32>} : memref<32x8x256xf32, #tpu.memory_space<vmem>>, vector<1x8x256xf32>,
    %c7_i32 = arith.constant 7 : i32
    %96 = arith.index_cast %c7_i32 : i32 to index
    %c0_62 = arith.constant 0 : index
    %c0_63 = arith.constant 0 : index
    %97 = vector.load %arg12[%96, %c0_62, %c0_63] : memref<32x8x256xf32, #tpu.memory_space<vmem>>, vector<1x8x256xf32>
    %98 = vector.shape_cast %97 : vector<1x8x256xf32> to vector<8x256xf32>
    %c0_64 = arith.constant 0 : index
    %c0_65 = arith.constant 0 : index
    %99 = vector.load %arg6[%c0_64, %c0_65] : memref<256x256xf32, #tpu.memory_space<vmem>>, vector<256x256xf32>
    %cst_66 = arith.constant dense<0.000000e+00> : vector<8x256xf32>
    %100 = tpu.matmul %91, %99, %cst_66 {dimension_numbers = #tpu.dot_dimension_numbers<[1], [0], [0], [1], [0, 0, 1, 1], [], []>} : vector<8x256xf32>, vector<256x256xf32>, vector<8x256xf32> -> vector<8x256xf32>
    %101 = arith.addf %98, %100 : vector<8x256xf32>
    %102 = math.tanh %101 : vector<8x256xf32>
    %103 = arith.index_cast %c7_i32 : i32 to index
    %c0_67 = arith.constant 0 : index
    %c0_68 = arith.constant 0 : index
    %104 = vector.load %arg13[%103, %c0_67, %c0_68] : memref<32x8x256xf32, #tpu.memory_space<vmem>>, vector<1x8x256xf32>
    %105 = vector.shape_cast %104 : vector<1x8x256xf32> to vector<8x256xf32>
    %106 = vector.shape_cast %102 : vector<8x256xf32> to vector<1x8x256xf32>
    tpu.vector_store %arg13[%103, %c0_67, %c0_68], %106 {strides = array<i32>} : memref<32x8x256xf32, #tpu.memory_space<vmem>>, vector<1x8x256xf32>,
    %c8_i32 = arith.constant 8 : i32
    %107 = arith.index_cast %c8_i32 : i32 to index
    %c0_69 = arith.constant 0 : index
    %c0_70 = arith.constant 0 : index
    %108 = vector.load %arg12[%107, %c0_69, %c0_70] : memref<32x8x256xf32, #tpu.memory_space<vmem>>, vector<1x8x256xf32>
    %109 = vector.shape_cast %108 : vector<1x8x256xf32> to vector<8x256xf32>
    %c0_71 = arith.constant 0 : index
    %c0_72 = arith.constant 0 : index
    %110 = vector.load %arg6[%c0_71, %c0_72] : memref<256x256xf32, #tpu.memory_space<vmem>>, vector<256x256xf32>
    %cst_73 = arith.constant dense<0.000000e+00> : vector<8x256xf32>
    %111 = tpu.matmul %102, %110, %cst_73 {dimension_numbers = #tpu.dot_dimension_numbers<[1], [0], [0], [1], [0, 0, 1, 1], [], []>} : vector<8x256xf32>, vector<256x256xf32>, vector<8x256xf32> -> vector<8x256xf32>
    %112 = arith.addf %109, %111 : vector<8x256xf32>
    %113 = math.tanh %112 : vector<8x256xf32>
    %114 = arith.index_cast %c8_i32 : i32 to index
    %c0_74 = arith.constant 0 : index
    %c0_75 = arith.constant 0 : index
    %115 = vector.load %arg13[%114, %c0_74, %c0_75] : memref<32x8x256xf32, #tpu.memory_space<vmem>>, vector<1x8x256xf32>
    %116 = vector.shape_cast %115 : vector<1x8x256xf32> to vector<8x256xf32>
    %117 = vector.shape_cast %113 : vector<8x256xf32> to vector<1x8x256xf32>
    tpu.vector_store %arg13[%114, %c0_74, %c0_75], %117 {strides = array<i32>} : memref<32x8x256xf32, #tpu.memory_space<vmem>>, vector<1x8x256xf32>,
    %c9_i32 = arith.constant 9 : i32
    %118 = arith.index_cast %c9_i32 : i32 to index
    %c0_76 = arith.constant 0 : index
    %c0_77 = arith.constant 0 : index
    %119 = vector.load %arg12[%118, %c0_76, %c0_77] : memref<32x8x256xf32, #tpu.memory_space<vmem>>, vector<1x8x256xf32>
    %120 = vector.shape_cast %119 : vector<1x8x256xf32> to vector<8x256xf32>
    %c0_78 = arith.constant 0 : index
    %c0_79 = arith.constant 0 : index
    %121 = vector.load %arg6[%c0_78, %c0_79] : memref<256x256xf32, #tpu.memory_space<vmem>>, vector<256x256xf32>
    %cst_80 = arith.constant dense<0.000000e+00> : vector<8x256xf32>
    %122 = tpu.matmul %113, %121, %cst_80 {dimension_numbers = #tpu.dot_dimension_numbers<[1], [0], [0], [1], [0, 0, 1, 1], [], []>} : vector<8x256xf32>, vector<256x256xf32>, vector<8x256xf32> -> vector<8x256xf32>
    %123 = arith.addf %120, %122 : vector<8x256xf32>
    %124 = math.tanh %123 : vector<8x256xf32>
    %125 = arith.index_cast %c9_i32 : i32 to index
    %c0_81 = arith.constant 0 : index
    %c0_82 = arith.constant 0 : index
    %126 = vector.load %arg13[%125, %c0_81, %c0_82] : memref<32x8x256xf32, #tpu.memory_space<vmem>>, vector<1x8x256xf32>
    %127 = vector.shape_cast %126 : vector<1x8x256xf32> to vector<8x256xf32>
    %128 = vector.shape_cast %124 : vector<8x256xf32> to vector<1x8x256xf32>
    tpu.vector_store %arg13[%125, %c0_81, %c0_82], %128 {strides = array<i32>} : memref<32x8x256xf32, #tpu.memory_space<vmem>>, vector<1x8x256xf32>,
    %c10_i32 = arith.constant 10 : i32
    %129 = arith.index_cast %c10_i32 : i32 to index
    %c0_83 = arith.constant 0 : index
    %c0_84 = arith.constant 0 : index
    %130 = vector.load %arg12[%129, %c0_83, %c0_84] : memref<32x8x256xf32, #tpu.memory_space<vmem>>, vector<1x8x256xf32>
    %131 = vector.shape_cast %130 : vector<1x8x256xf32> to vector<8x256xf32>
    %c0_85 = arith.constant 0 : index
    %c0_86 = arith.constant 0 : index
    %132 = vector.load %arg6[%c0_85, %c0_86] : memref<256x256xf32, #tpu.memory_space<vmem>>, vector<256x256xf32>
    %cst_87 = arith.constant dense<0.000000e+00> : vector<8x256xf32>
    %133 = tpu.matmul %124, %132, %cst_87 {dimension_numbers = #tpu.dot_dimension_numbers<[1], [0], [0], [1], [0, 0, 1, 1], [], []>} : vector<8x256xf32>, vector<256x256xf32>, vector<8x256xf32> -> vector<8x256xf32>
    %134 = arith.addf %131, %133 : vector<8x256xf32>
    %135 = math.tanh %134 : vector<8x256xf32>
    %136 = arith.index_cast %c10_i32 : i32 to index
    %c0_88 = arith.constant 0 : index
    %c0_89 = arith.constant 0 : index
    %137 = vector.load %arg13[%136, %c0_88, %c0_89] : memref<32x8x256xf32, #tpu.memory_space<vmem>>, vector<1x8x256xf32>
    %138 = vector.shape_cast %137 : vector<1x8x256xf32> to vector<8x256xf32>
    %139 = vector.shape_cast %135 : vector<8x256xf32> to vector<1x8x256xf32>
    tpu.vector_store %arg13[%136, %c0_88, %c0_89], %139 {strides = array<i32>} : memref<32x8x256xf32, #tpu.memory_space<vmem>>, vector<1x8x256xf32>,
    %c11_i32 = arith.constant 11 : i32
    %140 = arith.index_cast %c11_i32 : i32 to index
    %c0_90 = arith.constant 0 : index
    %c0_91 = arith.constant 0 : index
    %141 = vector.load %arg12[%140, %c0_90, %c0_91] : memref<32x8x256xf32, #tpu.memory_space<vmem>>, vector<1x8x256xf32>
    %142 = vector.shape_cast %141 : vector<1x8x256xf32> to vector<8x256xf32>
    %c0_92 = arith.constant 0 : index
    %c0_93 = arith.constant 0 : index
    %143 = vector.load %arg6[%c0_92, %c0_93] : memref<256x256xf32, #tpu.memory_space<vmem>>, vector<256x256xf32>
    %cst_94 = arith.constant dense<0.000000e+00> : vector<8x256xf32>
    %144 = tpu.matmul %135, %143, %cst_94 {dimension_numbers = #tpu.dot_dimension_numbers<[1], [0], [0], [1], [0, 0, 1, 1], [], []>} : vector<8x256xf32>, vector<256x256xf32>, vector<8x256xf32> -> vector<8x256xf32>
    %145 = arith.addf %142, %144 : vector<8x256xf32>
    %146 = math.tanh %145 : vector<8x256xf32>
    %147 = arith.index_cast %c11_i32 : i32 to index
    %c0_95 = arith.constant 0 : index
    %c0_96 = arith.constant 0 : index
    %148 = vector.load %arg13[%147, %c0_95, %c0_96] : memref<32x8x256xf32, #tpu.memory_space<vmem>>, vector<1x8x256xf32>
    %149 = vector.shape_cast %148 : vector<1x8x256xf32> to vector<8x256xf32>
    %150 = vector.shape_cast %146 : vector<8x256xf32> to vector<1x8x256xf32>
    tpu.vector_store %arg13[%147, %c0_95, %c0_96], %150 {strides = array<i32>} : memref<32x8x256xf32, #tpu.memory_space<vmem>>, vector<1x8x256xf32>,
    %c12_i32 = arith.constant 12 : i32
    %151 = arith.index_cast %c12_i32 : i32 to index
    %c0_97 = arith.constant 0 : index
    %c0_98 = arith.constant 0 : index
    %152 = vector.load %arg12[%151, %c0_97, %c0_98] : memref<32x8x256xf32, #tpu.memory_space<vmem>>, vector<1x8x256xf32>
    %153 = vector.shape_cast %152 : vector<1x8x256xf32> to vector<8x256xf32>
    %c0_99 = arith.constant 0 : index
    %c0_100 = arith.constant 0 : index
    %154 = vector.load %arg6[%c0_99, %c0_100] : memref<256x256xf32, #tpu.memory_space<vmem>>, vector<256x256xf32>
    %cst_101 = arith.constant dense<0.000000e+00> : vector<8x256xf32>
    %155 = tpu.matmul %146, %154, %cst_101 {dimension_numbers = #tpu.dot_dimension_numbers<[1], [0], [0], [1], [0, 0, 1, 1], [], []>} : vector<8x256xf32>, vector<256x256xf32>, vector<8x256xf32> -> vector<8x256xf32>
    %156 = arith.addf %153, %155 : vector<8x256xf32>
    %157 = math.tanh %156 : vector<8x256xf32>
    %158 = arith.index_cast %c12_i32 : i32 to index
    %c0_102 = arith.constant 0 : index
    %c0_103 = arith.constant 0 : index
    %159 = vector.load %arg13[%158, %c0_102, %c0_103] : memref<32x8x256xf32, #tpu.memory_space<vmem>>, vector<1x8x256xf32>
    %160 = vector.shape_cast %159 : vector<1x8x256xf32> to vector<8x256xf32>
    %161 = vector.shape_cast %157 : vector<8x256xf32> to vector<1x8x256xf32>
    tpu.vector_store %arg13[%158, %c0_102, %c0_103], %161 {strides = array<i32>} : memref<32x8x256xf32, #tpu.memory_space<vmem>>, vector<1x8x256xf32>,
    %c13_i32 = arith.constant 13 : i32
    %162 = arith.index_cast %c13_i32 : i32 to index
    %c0_104 = arith.constant 0 : index
    %c0_105 = arith.constant 0 : index
    %163 = vector.load %arg12[%162, %c0_104, %c0_105] : memref<32x8x256xf32, #tpu.memory_space<vmem>>, vector<1x8x256xf32>
    %164 = vector.shape_cast %163 : vector<1x8x256xf32> to vector<8x256xf32>
    %c0_106 = arith.constant 0 : index
    %c0_107 = arith.constant 0 : index
    %165 = vector.load %arg6[%c0_106, %c0_107] : memref<256x256xf32, #tpu.memory_space<vmem>>, vector<256x256xf32>
    %cst_108 = arith.constant dense<0.000000e+00> : vector<8x256xf32>
    %166 = tpu.matmul %157, %165, %cst_108 {dimension_numbers = #tpu.dot_dimension_numbers<[1], [0], [0], [1], [0, 0, 1, 1], [], []>} : vector<8x256xf32>, vector<256x256xf32>, vector<8x256xf32> -> vector<8x256xf32>
    %167 = arith.addf %164, %166 : vector<8x256xf32>
    %168 = math.tanh %167 : vector<8x256xf32>
    %169 = arith.index_cast %c13_i32 : i32 to index
    %c0_109 = arith.constant 0 : index
    %c0_110 = arith.constant 0 : index
    %170 = vector.load %arg13[%169, %c0_109, %c0_110] : memref<32x8x256xf32, #tpu.memory_space<vmem>>, vector<1x8x256xf32>
    %171 = vector.shape_cast %170 : vector<1x8x256xf32> to vector<8x256xf32>
    %172 = vector.shape_cast %168 : vector<8x256xf32> to vector<1x8x256xf32>
    tpu.vector_store %arg13[%169, %c0_109, %c0_110], %172 {strides = array<i32>} : memref<32x8x256xf32, #tpu.memory_space<vmem>>, vector<1x8x256xf32>,
    %c14_i32 = arith.constant 14 : i32
    %173 = arith.index_cast %c14_i32 : i32 to index
    %c0_111 = arith.constant 0 : index
    %c0_112 = arith.constant 0 : index
    %174 = vector.load %arg12[%173, %c0_111, %c0_112] : memref<32x8x256xf32, #tpu.memory_space<vmem>>, vector<1x8x256xf32>
    %175 = vector.shape_cast %174 : vector<1x8x256xf32> to vector<8x256xf32>
    %c0_113 = arith.constant 0 : index
    %c0_114 = arith.constant 0 : index
    %176 = vector.load %arg6[%c0_113, %c0_114] : memref<256x256xf32, #tpu.memory_space<vmem>>, vector<256x256xf32>
    %cst_115 = arith.constant dense<0.000000e+00> : vector<8x256xf32>
    %177 = tpu.matmul %168, %176, %cst_115 {dimension_numbers = #tpu.dot_dimension_numbers<[1], [0], [0], [1], [0, 0, 1, 1], [], []>} : vector<8x256xf32>, vector<256x256xf32>, vector<8x256xf32> -> vector<8x256xf32>
    %178 = arith.addf %175, %177 : vector<8x256xf32>
    %179 = math.tanh %178 : vector<8x256xf32>
    %180 = arith.index_cast %c14_i32 : i32 to index
    %c0_116 = arith.constant 0 : index
    %c0_117 = arith.constant 0 : index
    %181 = vector.load %arg13[%180, %c0_116, %c0_117] : memref<32x8x256xf32, #tpu.memory_space<vmem>>, vector<1x8x256xf32>
    %182 = vector.shape_cast %181 : vector<1x8x256xf32> to vector<8x256xf32>
    %183 = vector.shape_cast %179 : vector<8x256xf32> to vector<1x8x256xf32>
    tpu.vector_store %arg13[%180, %c0_116, %c0_117], %183 {strides = array<i32>} : memref<32x8x256xf32, #tpu.memory_space<vmem>>, vector<1x8x256xf32>,
    %c15_i32 = arith.constant 15 : i32
    %184 = arith.index_cast %c15_i32 : i32 to index
    %c0_118 = arith.constant 0 : index
    %c0_119 = arith.constant 0 : index
    %185 = vector.load %arg12[%184, %c0_118, %c0_119] : memref<32x8x256xf32, #tpu.memory_space<vmem>>, vector<1x8x256xf32>
    %186 = vector.shape_cast %185 : vector<1x8x256xf32> to vector<8x256xf32>
    %c0_120 = arith.constant 0 : index
    %c0_121 = arith.constant 0 : index
    %187 = vector.load %arg6[%c0_120, %c0_121] : memref<256x256xf32, #tpu.memory_space<vmem>>, vector<256x256xf32>
    %cst_122 = arith.constant dense<0.000000e+00> : vector<8x256xf32>
    %188 = tpu.matmul %179, %187, %cst_122 {dimension_numbers = #tpu.dot_dimension_numbers<[1], [0], [0], [1], [0, 0, 1, 1], [], []>} : vector<8x256xf32>, vector<256x256xf32>, vector<8x256xf32> -> vector<8x256xf32>
    %189 = arith.addf %186, %188 : vector<8x256xf32>
    %190 = math.tanh %189 : vector<8x256xf32>
    %191 = arith.index_cast %c15_i32 : i32 to index
    %c0_123 = arith.constant 0 : index
    %c0_124 = arith.constant 0 : index
    %192 = vector.load %arg13[%191, %c0_123, %c0_124] : memref<32x8x256xf32, #tpu.memory_space<vmem>>, vector<1x8x256xf32>
    %193 = vector.shape_cast %192 : vector<1x8x256xf32> to vector<8x256xf32>
    %194 = vector.shape_cast %190 : vector<8x256xf32> to vector<1x8x256xf32>
    tpu.vector_store %arg13[%191, %c0_123, %c0_124], %194 {strides = array<i32>} : memref<32x8x256xf32, #tpu.memory_space<vmem>>, vector<1x8x256xf32>,
    %c16_i32 = arith.constant 16 : i32
    %195 = arith.index_cast %c16_i32 : i32 to index
    %c0_125 = arith.constant 0 : index
    %c0_126 = arith.constant 0 : index
    %196 = vector.load %arg12[%195, %c0_125, %c0_126] : memref<32x8x256xf32, #tpu.memory_space<vmem>>, vector<1x8x256xf32>
    %197 = vector.shape_cast %196 : vector<1x8x256xf32> to vector<8x256xf32>
    %c0_127 = arith.constant 0 : index
    %c0_128 = arith.constant 0 : index
    %198 = vector.load %arg6[%c0_127, %c0_128] : memref<256x256xf32, #tpu.memory_space<vmem>>, vector<256x256xf32>
    %cst_129 = arith.constant dense<0.000000e+00> : vector<8x256xf32>
    %199 = tpu.matmul %190, %198, %cst_129 {dimension_numbers = #tpu.dot_dimension_numbers<[1], [0], [0], [1], [0, 0, 1, 1], [], []>} : vector<8x256xf32>, vector<256x256xf32>, vector<8x256xf32> -> vector<8x256xf32>
    %200 = arith.addf %197, %199 : vector<8x256xf32>
    %201 = math.tanh %200 : vector<8x256xf32>
    %202 = arith.index_cast %c16_i32 : i32 to index
    %c0_130 = arith.constant 0 : index
    %c0_131 = arith.constant 0 : index
    %203 = vector.load %arg13[%202, %c0_130, %c0_131] : memref<32x8x256xf32, #tpu.memory_space<vmem>>, vector<1x8x256xf32>
    %204 = vector.shape_cast %203 : vector<1x8x256xf32> to vector<8x256xf32>
    %205 = vector.shape_cast %201 : vector<8x256xf32> to vector<1x8x256xf32>
    tpu.vector_store %arg13[%202, %c0_130, %c0_131], %205 {strides = array<i32>} : memref<32x8x256xf32, #tpu.memory_space<vmem>>, vector<1x8x256xf32>,
    %c17_i32 = arith.constant 17 : i32
    %206 = arith.index_cast %c17_i32 : i32 to index
    %c0_132 = arith.constant 0 : index
    %c0_133 = arith.constant 0 : index
    %207 = vector.load %arg12[%206, %c0_132, %c0_133] : memref<32x8x256xf32, #tpu.memory_space<vmem>>, vector<1x8x256xf32>
    %208 = vector.shape_cast %207 : vector<1x8x256xf32> to vector<8x256xf32>
    %c0_134 = arith.constant 0 : index
    %c0_135 = arith.constant 0 : index
    %209 = vector.load %arg6[%c0_134, %c0_135] : memref<256x256xf32, #tpu.memory_space<vmem>>, vector<256x256xf32>
    %cst_136 = arith.constant dense<0.000000e+00> : vector<8x256xf32>
    %210 = tpu.matmul %201, %209, %cst_136 {dimension_numbers = #tpu.dot_dimension_numbers<[1], [0], [0], [1], [0, 0, 1, 1], [], []>} : vector<8x256xf32>, vector<256x256xf32>, vector<8x256xf32> -> vector<8x256xf32>
    %211 = arith.addf %208, %210 : vector<8x256xf32>
    %212 = math.tanh %211 : vector<8x256xf32>
    %213 = arith.index_cast %c17_i32 : i32 to index
    %c0_137 = arith.constant 0 : index
    %c0_138 = arith.constant 0 : index
    %214 = vector.load %arg13[%213, %c0_137, %c0_138] : memref<32x8x256xf32, #tpu.memory_space<vmem>>, vector<1x8x256xf32>
    %215 = vector.shape_cast %214 : vector<1x8x256xf32> to vector<8x256xf32>
    %216 = vector.shape_cast %212 : vector<8x256xf32> to vector<1x8x256xf32>
    tpu.vector_store %arg13[%213, %c0_137, %c0_138], %216 {strides = array<i32>} : memref<32x8x256xf32, #tpu.memory_space<vmem>>, vector<1x8x256xf32>,
    %c18_i32 = arith.constant 18 : i32
    %217 = arith.index_cast %c18_i32 : i32 to index
    %c0_139 = arith.constant 0 : index
    %c0_140 = arith.constant 0 : index
    %218 = vector.load %arg12[%217, %c0_139, %c0_140] : memref<32x8x256xf32, #tpu.memory_space<vmem>>, vector<1x8x256xf32>
    %219 = vector.shape_cast %218 : vector<1x8x256xf32> to vector<8x256xf32>
    %c0_141 = arith.constant 0 : index
    %c0_142 = arith.constant 0 : index
    %220 = vector.load %arg6[%c0_141, %c0_142] : memref<256x256xf32, #tpu.memory_space<vmem>>, vector<256x256xf32>
    %cst_143 = arith.constant dense<0.000000e+00> : vector<8x256xf32>
    %221 = tpu.matmul %212, %220, %cst_143 {dimension_numbers = #tpu.dot_dimension_numbers<[1], [0], [0], [1], [0, 0, 1, 1], [], []>} : vector<8x256xf32>, vector<256x256xf32>, vector<8x256xf32> -> vector<8x256xf32>
    %222 = arith.addf %219, %221 : vector<8x256xf32>
    %223 = math.tanh %222 : vector<8x256xf32>
    %224 = arith.index_cast %c18_i32 : i32 to index
    %c0_144 = arith.constant 0 : index
    %c0_145 = arith.constant 0 : index
    %225 = vector.load %arg13[%224, %c0_144, %c0_145] : memref<32x8x256xf32, #tpu.memory_space<vmem>>, vector<1x8x256xf32>
    %226 = vector.shape_cast %225 : vector<1x8x256xf32> to vector<8x256xf32>
    %227 = vector.shape_cast %223 : vector<8x256xf32> to vector<1x8x256xf32>
    tpu.vector_store %arg13[%224, %c0_144, %c0_145], %227 {strides = array<i32>} : memref<32x8x256xf32, #tpu.memory_space<vmem>>, vector<1x8x256xf32>,
    %c19_i32 = arith.constant 19 : i32
    %228 = arith.index_cast %c19_i32 : i32 to index
    %c0_146 = arith.constant 0 : index
    %c0_147 = arith.constant 0 : index
    %229 = vector.load %arg12[%228, %c0_146, %c0_147] : memref<32x8x256xf32, #tpu.memory_space<vmem>>, vector<1x8x256xf32>
    %230 = vector.shape_cast %229 : vector<1x8x256xf32> to vector<8x256xf32>
    %c0_148 = arith.constant 0 : index
    %c0_149 = arith.constant 0 : index
    %231 = vector.load %arg6[%c0_148, %c0_149] : memref<256x256xf32, #tpu.memory_space<vmem>>, vector<256x256xf32>
    %cst_150 = arith.constant dense<0.000000e+00> : vector<8x256xf32>
    %232 = tpu.matmul %223, %231, %cst_150 {dimension_numbers = #tpu.dot_dimension_numbers<[1], [0], [0], [1], [0, 0, 1, 1], [], []>} : vector<8x256xf32>, vector<256x256xf32>, vector<8x256xf32> -> vector<8x256xf32>
    %233 = arith.addf %230, %232 : vector<8x256xf32>
    %234 = math.tanh %233 : vector<8x256xf32>
    %235 = arith.index_cast %c19_i32 : i32 to index
    %c0_151 = arith.constant 0 : index
    %c0_152 = arith.constant 0 : index
    %236 = vector.load %arg13[%235, %c0_151, %c0_152] : memref<32x8x256xf32, #tpu.memory_space<vmem>>, vector<1x8x256xf32>
    %237 = vector.shape_cast %236 : vector<1x8x256xf32> to vector<8x256xf32>
    %238 = vector.shape_cast %234 : vector<8x256xf32> to vector<1x8x256xf32>
    tpu.vector_store %arg13[%235, %c0_151, %c0_152], %238 {strides = array<i32>} : memref<32x8x256xf32, #tpu.memory_space<vmem>>, vector<1x8x256xf32>,
    %c20_i32 = arith.constant 20 : i32
    %239 = arith.index_cast %c20_i32 : i32 to index
    %c0_153 = arith.constant 0 : index
    %c0_154 = arith.constant 0 : index
    %240 = vector.load %arg12[%239, %c0_153, %c0_154] : memref<32x8x256xf32, #tpu.memory_space<vmem>>, vector<1x8x256xf32>
    %241 = vector.shape_cast %240 : vector<1x8x256xf32> to vector<8x256xf32>
    %c0_155 = arith.constant 0 : index
    %c0_156 = arith.constant 0 : index
    %242 = vector.load %arg6[%c0_155, %c0_156] : memref<256x256xf32, #tpu.memory_space<vmem>>, vector<256x256xf32>
    %cst_157 = arith.constant dense<0.000000e+00> : vector<8x256xf32>
    %243 = tpu.matmul %234, %242, %cst_157 {dimension_numbers = #tpu.dot_dimension_numbers<[1], [0], [0], [1], [0, 0, 1, 1], [], []>} : vector<8x256xf32>, vector<256x256xf32>, vector<8x256xf32> -> vector<8x256xf32>
    %244 = arith.addf %241, %243 : vector<8x256xf32>
    %245 = math.tanh %244 : vector<8x256xf32>
    %246 = arith.index_cast %c20_i32 : i32 to index
    %c0_158 = arith.constant 0 : index
    %c0_159 = arith.constant 0 : index
    %247 = vector.load %arg13[%246, %c0_158, %c0_159] : memref<32x8x256xf32, #tpu.memory_space<vmem>>, vector<1x8x256xf32>
    %248 = vector.shape_cast %247 : vector<1x8x256xf32> to vector<8x256xf32>
    %249 = vector.shape_cast %245 : vector<8x256xf32> to vector<1x8x256xf32>
    tpu.vector_store %arg13[%246, %c0_158, %c0_159], %249 {strides = array<i32>} : memref<32x8x256xf32, #tpu.memory_space<vmem>>, vector<1x8x256xf32>,
    %c21_i32 = arith.constant 21 : i32
    %250 = arith.index_cast %c21_i32 : i32 to index
    %c0_160 = arith.constant 0 : index
    %c0_161 = arith.constant 0 : index
    %251 = vector.load %arg12[%250, %c0_160, %c0_161] : memref<32x8x256xf32, #tpu.memory_space<vmem>>, vector<1x8x256xf32>
    %252 = vector.shape_cast %251 : vector<1x8x256xf32> to vector<8x256xf32>
    %c0_162 = arith.constant 0 : index
    %c0_163 = arith.constant 0 : index
    %253 = vector.load %arg6[%c0_162, %c0_163] : memref<256x256xf32, #tpu.memory_space<vmem>>, vector<256x256xf32>
    %cst_164 = arith.constant dense<0.000000e+00> : vector<8x256xf32>
    %254 = tpu.matmul %245, %253, %cst_164 {dimension_numbers = #tpu.dot_dimension_numbers<[1], [0], [0], [1], [0, 0, 1, 1], [], []>} : vector<8x256xf32>, vector<256x256xf32>, vector<8x256xf32> -> vector<8x256xf32>
    %255 = arith.addf %252, %254 : vector<8x256xf32>
    %256 = math.tanh %255 : vector<8x256xf32>
    %257 = arith.index_cast %c21_i32 : i32 to index
    %c0_165 = arith.constant 0 : index
    %c0_166 = arith.constant 0 : index
    %258 = vector.load %arg13[%257, %c0_165, %c0_166] : memref<32x8x256xf32, #tpu.memory_space<vmem>>, vector<1x8x256xf32>
    %259 = vector.shape_cast %258 : vector<1x8x256xf32> to vector<8x256xf32>
    %260 = vector.shape_cast %256 : vector<8x256xf32> to vector<1x8x256xf32>
    tpu.vector_store %arg13[%257, %c0_165, %c0_166], %260 {strides = array<i32>} : memref<32x8x256xf32, #tpu.memory_space<vmem>>, vector<1x8x256xf32>,
    %c22_i32 = arith.constant 22 : i32
    %261 = arith.index_cast %c22_i32 : i32 to index
    %c0_167 = arith.constant 0 : index
    %c0_168 = arith.constant 0 : index
    %262 = vector.load %arg12[%261, %c0_167, %c0_168] : memref<32x8x256xf32, #tpu.memory_space<vmem>>, vector<1x8x256xf32>
    %263 = vector.shape_cast %262 : vector<1x8x256xf32> to vector<8x256xf32>
    %c0_169 = arith.constant 0 : index
    %c0_170 = arith.constant 0 : index
    %264 = vector.load %arg6[%c0_169, %c0_170] : memref<256x256xf32, #tpu.memory_space<vmem>>, vector<256x256xf32>
    %cst_171 = arith.constant dense<0.000000e+00> : vector<8x256xf32>
    %265 = tpu.matmul %256, %264, %cst_171 {dimension_numbers = #tpu.dot_dimension_numbers<[1], [0], [0], [1], [0, 0, 1, 1], [], []>} : vector<8x256xf32>, vector<256x256xf32>, vector<8x256xf32> -> vector<8x256xf32>
    %266 = arith.addf %263, %265 : vector<8x256xf32>
    %267 = math.tanh %266 : vector<8x256xf32>
    %268 = arith.index_cast %c22_i32 : i32 to index
    %c0_172 = arith.constant 0 : index
    %c0_173 = arith.constant 0 : index
    %269 = vector.load %arg13[%268, %c0_172, %c0_173] : memref<32x8x256xf32, #tpu.memory_space<vmem>>, vector<1x8x256xf32>
    %270 = vector.shape_cast %269 : vector<1x8x256xf32> to vector<8x256xf32>
    %271 = vector.shape_cast %267 : vector<8x256xf32> to vector<1x8x256xf32>
    tpu.vector_store %arg13[%268, %c0_172, %c0_173], %271 {strides = array<i32>} : memref<32x8x256xf32, #tpu.memory_space<vmem>>, vector<1x8x256xf32>,
    %c23_i32 = arith.constant 23 : i32
    %272 = arith.index_cast %c23_i32 : i32 to index
    %c0_174 = arith.constant 0 : index
    %c0_175 = arith.constant 0 : index
    %273 = vector.load %arg12[%272, %c0_174, %c0_175] : memref<32x8x256xf32, #tpu.memory_space<vmem>>, vector<1x8x256xf32>
    %274 = vector.shape_cast %273 : vector<1x8x256xf32> to vector<8x256xf32>
    %c0_176 = arith.constant 0 : index
    %c0_177 = arith.constant 0 : index
    %275 = vector.load %arg6[%c0_176, %c0_177] : memref<256x256xf32, #tpu.memory_space<vmem>>, vector<256x256xf32>
    %cst_178 = arith.constant dense<0.000000e+00> : vector<8x256xf32>
    %276 = tpu.matmul %267, %275, %cst_178 {dimension_numbers = #tpu.dot_dimension_numbers<[1], [0], [0], [1], [0, 0, 1, 1], [], []>} : vector<8x256xf32>, vector<256x256xf32>, vector<8x256xf32> -> vector<8x256xf32>
    %277 = arith.addf %274, %276 : vector<8x256xf32>
    %278 = math.tanh %277 : vector<8x256xf32>
    %279 = arith.index_cast %c23_i32 : i32 to index
    %c0_179 = arith.constant 0 : index
    %c0_180 = arith.constant 0 : index
    %280 = vector.load %arg13[%279, %c0_179, %c0_180] : memref<32x8x256xf32, #tpu.memory_space<vmem>>, vector<1x8x256xf32>
    %281 = vector.shape_cast %280 : vector<1x8x256xf32> to vector<8x256xf32>
    %282 = vector.shape_cast %278 : vector<8x256xf32> to vector<1x8x256xf32>
    tpu.vector_store %arg13[%279, %c0_179, %c0_180], %282 {strides = array<i32>} : memref<32x8x256xf32, #tpu.memory_space<vmem>>, vector<1x8x256xf32>,
    %c24_i32 = arith.constant 24 : i32
    %283 = arith.index_cast %c24_i32 : i32 to index
    %c0_181 = arith.constant 0 : index
    %c0_182 = arith.constant 0 : index
    %284 = vector.load %arg12[%283, %c0_181, %c0_182] : memref<32x8x256xf32, #tpu.memory_space<vmem>>, vector<1x8x256xf32>
    %285 = vector.shape_cast %284 : vector<1x8x256xf32> to vector<8x256xf32>
    %c0_183 = arith.constant 0 : index
    %c0_184 = arith.constant 0 : index
    %286 = vector.load %arg6[%c0_183, %c0_184] : memref<256x256xf32, #tpu.memory_space<vmem>>, vector<256x256xf32>
    %cst_185 = arith.constant dense<0.000000e+00> : vector<8x256xf32>
    %287 = tpu.matmul %278, %286, %cst_185 {dimension_numbers = #tpu.dot_dimension_numbers<[1], [0], [0], [1], [0, 0, 1, 1], [], []>} : vector<8x256xf32>, vector<256x256xf32>, vector<8x256xf32> -> vector<8x256xf32>
    %288 = arith.addf %285, %287 : vector<8x256xf32>
    %289 = math.tanh %288 : vector<8x256xf32>
    %290 = arith.index_cast %c24_i32 : i32 to index
    %c0_186 = arith.constant 0 : index
    %c0_187 = arith.constant 0 : index
    %291 = vector.load %arg13[%290, %c0_186, %c0_187] : memref<32x8x256xf32, #tpu.memory_space<vmem>>, vector<1x8x256xf32>
    %292 = vector.shape_cast %291 : vector<1x8x256xf32> to vector<8x256xf32>
    %293 = vector.shape_cast %289 : vector<8x256xf32> to vector<1x8x256xf32>
    tpu.vector_store %arg13[%290, %c0_186, %c0_187], %293 {strides = array<i32>} : memref<32x8x256xf32, #tpu.memory_space<vmem>>, vector<1x8x256xf32>,
    %c25_i32 = arith.constant 25 : i32
    %294 = arith.index_cast %c25_i32 : i32 to index
    %c0_188 = arith.constant 0 : index
    %c0_189 = arith.constant 0 : index
    %295 = vector.load %arg12[%294, %c0_188, %c0_189] : memref<32x8x256xf32, #tpu.memory_space<vmem>>, vector<1x8x256xf32>
    %296 = vector.shape_cast %295 : vector<1x8x256xf32> to vector<8x256xf32>
    %c0_190 = arith.constant 0 : index
    %c0_191 = arith.constant 0 : index
    %297 = vector.load %arg6[%c0_190, %c0_191] : memref<256x256xf32, #tpu.memory_space<vmem>>, vector<256x256xf32>
    %cst_192 = arith.constant dense<0.000000e+00> : vector<8x256xf32>
    %298 = tpu.matmul %289, %297, %cst_192 {dimension_numbers = #tpu.dot_dimension_numbers<[1], [0], [0], [1], [0, 0, 1, 1], [], []>} : vector<8x256xf32>, vector<256x256xf32>, vector<8x256xf32> -> vector<8x256xf32>
    %299 = arith.addf %296, %298 : vector<8x256xf32>
    %300 = math.tanh %299 : vector<8x256xf32>
    %301 = arith.index_cast %c25_i32 : i32 to index
    %c0_193 = arith.constant 0 : index
    %c0_194 = arith.constant 0 : index
    %302 = vector.load %arg13[%301, %c0_193, %c0_194] : memref<32x8x256xf32, #tpu.memory_space<vmem>>, vector<1x8x256xf32>
    %303 = vector.shape_cast %302 : vector<1x8x256xf32> to vector<8x256xf32>
    %304 = vector.shape_cast %300 : vector<8x256xf32> to vector<1x8x256xf32>
    tpu.vector_store %arg13[%301, %c0_193, %c0_194], %304 {strides = array<i32>} : memref<32x8x256xf32, #tpu.memory_space<vmem>>, vector<1x8x256xf32>,
    %c26_i32 = arith.constant 26 : i32
    %305 = arith.index_cast %c26_i32 : i32 to index
    %c0_195 = arith.constant 0 : index
    %c0_196 = arith.constant 0 : index
    %306 = vector.load %arg12[%305, %c0_195, %c0_196] : memref<32x8x256xf32, #tpu.memory_space<vmem>>, vector<1x8x256xf32>
    %307 = vector.shape_cast %306 : vector<1x8x256xf32> to vector<8x256xf32>
    %c0_197 = arith.constant 0 : index
    %c0_198 = arith.constant 0 : index
    %308 = vector.load %arg6[%c0_197, %c0_198] : memref<256x256xf32, #tpu.memory_space<vmem>>, vector<256x256xf32>
    %cst_199 = arith.constant dense<0.000000e+00> : vector<8x256xf32>
    %309 = tpu.matmul %300, %308, %cst_199 {dimension_numbers = #tpu.dot_dimension_numbers<[1], [0], [0], [1], [0, 0, 1, 1], [], []>} : vector<8x256xf32>, vector<256x256xf32>, vector<8x256xf32> -> vector<8x256xf32>
    %310 = arith.addf %307, %309 : vector<8x256xf32>
    %311 = math.tanh %310 : vector<8x256xf32>
    %312 = arith.index_cast %c26_i32 : i32 to index
    %c0_200 = arith.constant 0 : index
    %c0_201 = arith.constant 0 : index
    %313 = vector.load %arg13[%312, %c0_200, %c0_201] : memref<32x8x256xf32, #tpu.memory_space<vmem>>, vector<1x8x256xf32>
    %314 = vector.shape_cast %313 : vector<1x8x256xf32> to vector<8x256xf32>
    %315 = vector.shape_cast %311 : vector<8x256xf32> to vector<1x8x256xf32>
    tpu.vector_store %arg13[%312, %c0_200, %c0_201], %315 {strides = array<i32>} : memref<32x8x256xf32, #tpu.memory_space<vmem>>, vector<1x8x256xf32>,
    %c27_i32 = arith.constant 27 : i32
    %316 = arith.index_cast %c27_i32 : i32 to index
    %c0_202 = arith.constant 0 : index
    %c0_203 = arith.constant 0 : index
    %317 = vector.load %arg12[%316, %c0_202, %c0_203] : memref<32x8x256xf32, #tpu.memory_space<vmem>>, vector<1x8x256xf32>
    %318 = vector.shape_cast %317 : vector<1x8x256xf32> to vector<8x256xf32>
    %c0_204 = arith.constant 0 : index
    %c0_205 = arith.constant 0 : index
    %319 = vector.load %arg6[%c0_204, %c0_205] : memref<256x256xf32, #tpu.memory_space<vmem>>, vector<256x256xf32>
    %cst_206 = arith.constant dense<0.000000e+00> : vector<8x256xf32>
    %320 = tpu.matmul %311, %319, %cst_206 {dimension_numbers = #tpu.dot_dimension_numbers<[1], [0], [0], [1], [0, 0, 1, 1], [], []>} : vector<8x256xf32>, vector<256x256xf32>, vector<8x256xf32> -> vector<8x256xf32>
    %321 = arith.addf %318, %320 : vector<8x256xf32>
    %322 = math.tanh %321 : vector<8x256xf32>
    %323 = arith.index_cast %c27_i32 : i32 to index
    %c0_207 = arith.constant 0 : index
    %c0_208 = arith.constant 0 : index
    %324 = vector.load %arg13[%323, %c0_207, %c0_208] : memref<32x8x256xf32, #tpu.memory_space<vmem>>, vector<1x8x256xf32>
    %325 = vector.shape_cast %324 : vector<1x8x256xf32> to vector<8x256xf32>
    %326 = vector.shape_cast %322 : vector<8x256xf32> to vector<1x8x256xf32>
    tpu.vector_store %arg13[%323, %c0_207, %c0_208], %326 {strides = array<i32>} : memref<32x8x256xf32, #tpu.memory_space<vmem>>, vector<1x8x256xf32>,
    %c28_i32 = arith.constant 28 : i32
    %327 = arith.index_cast %c28_i32 : i32 to index
    %c0_209 = arith.constant 0 : index
    %c0_210 = arith.constant 0 : index
    %328 = vector.load %arg12[%327, %c0_209, %c0_210] : memref<32x8x256xf32, #tpu.memory_space<vmem>>, vector<1x8x256xf32>
    %329 = vector.shape_cast %328 : vector<1x8x256xf32> to vector<8x256xf32>
    %c0_211 = arith.constant 0 : index
    %c0_212 = arith.constant 0 : index
    %330 = vector.load %arg6[%c0_211, %c0_212] : memref<256x256xf32, #tpu.memory_space<vmem>>, vector<256x256xf32>
    %cst_213 = arith.constant dense<0.000000e+00> : vector<8x256xf32>
    %331 = tpu.matmul %322, %330, %cst_213 {dimension_numbers = #tpu.dot_dimension_numbers<[1], [0], [0], [1], [0, 0, 1, 1], [], []>} : vector<8x256xf32>, vector<256x256xf32>, vector<8x256xf32> -> vector<8x256xf32>
    %332 = arith.addf %329, %331 : vector<8x256xf32>
    %333 = math.tanh %332 : vector<8x256xf32>
    %334 = arith.index_cast %c28_i32 : i32 to index
    %c0_214 = arith.constant 0 : index
    %c0_215 = arith.constant 0 : index
    %335 = vector.load %arg13[%334, %c0_214, %c0_215] : memref<32x8x256xf32, #tpu.memory_space<vmem>>, vector<1x8x256xf32>
    %336 = vector.shape_cast %335 : vector<1x8x256xf32> to vector<8x256xf32>
    %337 = vector.shape_cast %333 : vector<8x256xf32> to vector<1x8x256xf32>
    tpu.vector_store %arg13[%334, %c0_214, %c0_215], %337 {strides = array<i32>} : memref<32x8x256xf32, #tpu.memory_space<vmem>>, vector<1x8x256xf32>,
    %c29_i32 = arith.constant 29 : i32
    %338 = arith.index_cast %c29_i32 : i32 to index
    %c0_216 = arith.constant 0 : index
    %c0_217 = arith.constant 0 : index
    %339 = vector.load %arg12[%338, %c0_216, %c0_217] : memref<32x8x256xf32, #tpu.memory_space<vmem>>, vector<1x8x256xf32>
    %340 = vector.shape_cast %339 : vector<1x8x256xf32> to vector<8x256xf32>
    %c0_218 = arith.constant 0 : index
    %c0_219 = arith.constant 0 : index
    %341 = vector.load %arg6[%c0_218, %c0_219] : memref<256x256xf32, #tpu.memory_space<vmem>>, vector<256x256xf32>
    %cst_220 = arith.constant dense<0.000000e+00> : vector<8x256xf32>
    %342 = tpu.matmul %333, %341, %cst_220 {dimension_numbers = #tpu.dot_dimension_numbers<[1], [0], [0], [1], [0, 0, 1, 1], [], []>} : vector<8x256xf32>, vector<256x256xf32>, vector<8x256xf32> -> vector<8x256xf32>
    %343 = arith.addf %340, %342 : vector<8x256xf32>
    %344 = math.tanh %343 : vector<8x256xf32>
    %345 = arith.index_cast %c29_i32 : i32 to index
    %c0_221 = arith.constant 0 : index
    %c0_222 = arith.constant 0 : index
    %346 = vector.load %arg13[%345, %c0_221, %c0_222] : memref<32x8x256xf32, #tpu.memory_space<vmem>>, vector<1x8x256xf32>
    %347 = vector.shape_cast %346 : vector<1x8x256xf32> to vector<8x256xf32>
    %348 = vector.shape_cast %344 : vector<8x256xf32> to vector<1x8x256xf32>
    tpu.vector_store %arg13[%345, %c0_221, %c0_222], %348 {strides = array<i32>} : memref<32x8x256xf32, #tpu.memory_space<vmem>>, vector<1x8x256xf32>,
    %c30_i32 = arith.constant 30 : i32
    %349 = arith.index_cast %c30_i32 : i32 to index
    %c0_223 = arith.constant 0 : index
    %c0_224 = arith.constant 0 : index
    %350 = vector.load %arg12[%349, %c0_223, %c0_224] : memref<32x8x256xf32, #tpu.memory_space<vmem>>, vector<1x8x256xf32>
    %351 = vector.shape_cast %350 : vector<1x8x256xf32> to vector<8x256xf32>
    %c0_225 = arith.constant 0 : index
    %c0_226 = arith.constant 0 : index
    %352 = vector.load %arg6[%c0_225, %c0_226] : memref<256x256xf32, #tpu.memory_space<vmem>>, vector<256x256xf32>
    %cst_227 = arith.constant dense<0.000000e+00> : vector<8x256xf32>
    %353 = tpu.matmul %344, %352, %cst_227 {dimension_numbers = #tpu.dot_dimension_numbers<[1], [0], [0], [1], [0, 0, 1, 1], [], []>} : vector<8x256xf32>, vector<256x256xf32>, vector<8x256xf32> -> vector<8x256xf32>
    %354 = arith.addf %351, %353 : vector<8x256xf32>
    %355 = math.tanh %354 : vector<8x256xf32>
    %356 = arith.index_cast %c30_i32 : i32 to index
    %c0_228 = arith.constant 0 : index
    %c0_229 = arith.constant 0 : index
    %357 = vector.load %arg13[%356, %c0_228, %c0_229] : memref<32x8x256xf32, #tpu.memory_space<vmem>>, vector<1x8x256xf32>
    %358 = vector.shape_cast %357 : vector<1x8x256xf32> to vector<8x256xf32>
    %359 = vector.shape_cast %355 : vector<8x256xf32> to vector<1x8x256xf32>
    tpu.vector_store %arg13[%356, %c0_228, %c0_229], %359 {strides = array<i32>} : memref<32x8x256xf32, #tpu.memory_space<vmem>>, vector<1x8x256xf32>,
    %c31_i32 = arith.constant 31 : i32
    %360 = arith.index_cast %c31_i32 : i32 to index
    %c0_230 = arith.constant 0 : index
    %c0_231 = arith.constant 0 : index
    %361 = vector.load %arg12[%360, %c0_230, %c0_231] : memref<32x8x256xf32, #tpu.memory_space<vmem>>, vector<1x8x256xf32>
    %362 = vector.shape_cast %361 : vector<1x8x256xf32> to vector<8x256xf32>
    %c0_232 = arith.constant 0 : index
    %c0_233 = arith.constant 0 : index
    %363 = vector.load %arg6[%c0_232, %c0_233] : memref<256x256xf32, #tpu.memory_space<vmem>>, vector<256x256xf32>
    %cst_234 = arith.constant dense<0.000000e+00> : vector<8x256xf32>
    %364 = tpu.matmul %355, %363, %cst_234 {dimension_numbers = #tpu.dot_dimension_numbers<[1], [0], [0], [1], [0, 0, 1, 1], [], []>} : vector<8x256xf32>, vector<256x256xf32>, vector<8x256xf32> -> vector<8x256xf32>
    %365 = arith.addf %362, %364 : vector<8x256xf32>
    %366 = math.tanh %365 : vector<8x256xf32>
    %367 = arith.index_cast %c31_i32 : i32 to index
    %c0_235 = arith.constant 0 : index
    %c0_236 = arith.constant 0 : index
    %368 = vector.load %arg13[%367, %c0_235, %c0_236] : memref<32x8x256xf32, #tpu.memory_space<vmem>>, vector<1x8x256xf32>
    %369 = vector.shape_cast %368 : vector<1x8x256xf32> to vector<8x256xf32>
    %370 = vector.shape_cast %366 : vector<8x256xf32> to vector<1x8x256xf32>
    tpu.vector_store %arg13[%367, %c0_235, %c0_236], %370 {strides = array<i32>} : memref<32x8x256xf32, #tpu.memory_space<vmem>>, vector<1x8x256xf32>,
    %c32_i32 = arith.constant 32 : i32
    %c0_237 = arith.constant 0 : index
    %c0_238 = arith.constant 0 : index
    %371 = vector.load %arg11[%c0_237, %c0_238] : memref<8x256xf32, #tpu.memory_space<vmem>>, vector<8x256xf32>
    tpu.vector_store %arg11[%c0_237, %c0_238], %366 {strides = array<i32>} : memref<8x256xf32, #tpu.memory_space<vmem>>, vector<8x256xf32>,
    %c0_239 = arith.constant 0 : index
    %c0_240 = arith.constant 0 : index
    %372 = vector.load %arg10[%c0_239, %c0_240] : memref<8x256xf32, #tpu.memory_space<vmem>>, vector<8x256xf32>
    tpu.vector_store %arg10[%c0_239, %c0_240], %366 {strides = array<i32>} : memref<8x256xf32, #tpu.memory_space<vmem>>, vector<8x256xf32>,
    %c0_241 = arith.constant 0 : index
    %c0_242 = arith.constant 0 : index
    %c0_243 = arith.constant 0 : index
    %373 = vector.load %arg13[%c0_241, %c0_242, %c0_243] : memref<32x8x256xf32, #tpu.memory_space<vmem>>, vector<32x8x256xf32>
    %374 = vector.shape_cast %373 : vector<32x8x256xf32> to vector<256x256xf32>
    %c0_244 = arith.constant 0 : index
    %c0_245 = arith.constant 0 : index
    %375 = vector.load %arg7[%c0_244, %c0_245] : memref<256x128xf32, #tpu.memory_space<vmem>>, vector<256x128xf32>
    %cst_246 = arith.constant dense<0.000000e+00> : vector<256x128xf32>
    %376 = tpu.matmul %374, %375, %cst_246 {dimension_numbers = #tpu.dot_dimension_numbers<[1], [0], [0], [1], [0, 0, 1, 1], [], []>} : vector<256x256xf32>, vector<256x128xf32>, vector<256x128xf32> -> vector<256x128xf32>
    %377 = vector.shape_cast %376 : vector<256x128xf32> to vector<32x8x128xf32>
    %c0_247 = arith.constant 0 : index
    %c0_248 = arith.constant 0 : index
    %378 = vector.load %arg8[%c0_247, %c0_248] : memref<1x128xf32, #tpu.memory_space<vmem>>, vector<1x128xf32>
    %379 = vector.shape_cast %378 : vector<1x128xf32> to vector<1x1x128xf32>
    %380 = vector.broadcast %379 : vector<1x1x128xf32> to vector<32x8x128xf32>
    %381 = arith.addf %377, %380 : vector<32x8x128xf32>
    %c0_249 = arith.constant 0 : index
    %c0_250 = arith.constant 0 : index
    %c0_251 = arith.constant 0 : index
    %382 = vector.load %arg9[%c0_249, %c0_250, %c0_251] : memref<32x8x128xf32, #tpu.memory_space<vmem>>, vector<32x8x128xf32>
    tpu.vector_store %arg9[%c0_249, %c0_250, %c0_251], %381 {strides = array<i32>} : memref<32x8x128xf32, #tpu.memory_space<vmem>>, vector<32x8x128xf32>,
    return
  }
  func.func @transform_0(%arg0: i32, %arg1: i32) -> (i32, i32, i32) {
    %c0_i32 = arith.constant 0 : i32
    %c0_i32_0 = arith.constant 0 : i32
    return %arg1, %arg0, %c0_i32 : i32, i32, i32
  }
  func.func @transform_1(%arg0: i32, %arg1: i32) -> (i32, i32) {
    %c0_i32 = arith.constant 0 : i32
    %c0_i32_0 = arith.constant 0 : i32
    return %arg0, %c0_i32 : i32, i32
  }
  func.func @transform_2(%arg0: i32, %arg1: i32) -> (i32, i32) {
    %c0_i32 = arith.constant 0 : i32
    %c0_i32_0 = arith.constant 0 : i32
    %c0_i32_1 = arith.constant 0 : i32
    return %c0_i32, %c0_i32_0 : i32, i32
  }
  func.func @transform_3(%arg0: i32, %arg1: i32) -> (i32, i32) {
    %c0_i32 = arith.constant 0 : i32
    %c0_i32_0 = arith.constant 0 : i32
    %c0_i32_1 = arith.constant 0 : i32
    return %c0_i32, %c0_i32_0 : i32, i32
  }
  func.func @transform_4(%arg0: i32, %arg1: i32) -> (i32, i32) {
    %c0_i32 = arith.constant 0 : i32
    %c0_i32_0 = arith.constant 0 : i32
    %c0_i32_1 = arith.constant 0 : i32
    return %c0_i32, %c0_i32_0 : i32, i32
  }
  func.func @transform_5(%arg0: i32, %arg1: i32) -> (i32, i32) {
    %c0_i32 = arith.constant 0 : i32
    %c0_i32_0 = arith.constant 0 : i32
    %c0_i32_1 = arith.constant 0 : i32
    return %c0_i32, %c0_i32_0 : i32, i32
  }
  func.func @transform_6(%arg0: i32, %arg1: i32) -> (i32, i32) {
    %c0_i32 = arith.constant 0 : i32
    %c0_i32_0 = arith.constant 0 : i32
    %c0_i32_1 = arith.constant 0 : i32
    return %c0_i32, %c0_i32_0 : i32, i32
  }
  func.func @transform_7(%arg0: i32, %arg1: i32) -> (i32, i32, i32) {
    %c0_i32 = arith.constant 0 : i32
    %c0_i32_0 = arith.constant 0 : i32
    return %arg1, %arg0, %c0_i32 : i32, i32, i32
  }
  func.func @transform_8(%arg0: i32, %arg1: i32) -> (i32, i32) {
    %c0_i32 = arith.constant 0 : i32
    %c0_i32_0 = arith.constant 0 : i32
    return %arg0, %c0_i32 : i32, i32
  }
}

</mosaic_0001>

<bundles_post_ra>
// kernel: rnn_model_forward.1
= control target key start
LH: loop header
LB: loop body
LE: loop exit
PB: predicated region body
PF: predicated region fallthrough
CT: control target
= control target key end

     0   :  { %v5965_v0 = vmov 0   ;;  %v11887_v5 = vmov 0.0   ;;  %s11873_s0 = inlined_call_operand.vmem [shape: s32[32,8,1], index: 0, kind: input, shape index: {}]   ;;  %s11874_s2 = inlined_call_operand.vmem [shape: f32[128,256], index: 2, kind: input, shape index: {}]   ;;  %s11875_s4 = inlined_call_operand.vmem [shape: f32[256,256], index: 4, kind: input, shape index: {}]   ;;  %s11876_s1 = inlined_call_operand.vmem [shape: f32[8,256], index: 1, kind: input, shape index: {}]   ;;  %s11877_s3 = inlined_call_operand.vmem [shape: f32[1,256], index: 3, kind: input, shape index: {}]   ;;  %s11878_s5 = inlined_call_operand.vmem [shape: f32[256,128], index: 5, kind: input, shape index: {}]   ;;  %s11879_s6 = inlined_call_operand.vmem [shape: f32[1,128], index: 6, kind: input, shape index: {}]   ;;  %s11880_s7 = inlined_call_operand.vmem [shape: f32[32,8,128], index: 7, kind: output, shape index: {0}]   ;;  %s11881_s8 = inlined_call_operand.vmem [shape: f32[8,256], index: 8, kind: output, shape index: {1}]  }
   0x1   :  { %5836 = vset.pattern.permute.xlu1 %v5965_v0  ;;  %5835 = vset.pattern.permute.xlu0 %v5965_v0  ;;  %v54_v1 = vld [vmem:[%s11873_s0 + $0x90] sm:$0xff]  ;;  %v52_v2 = vld [vmem:[%s11873_s0 + $0x80] sm:$0xff]  ;;  %v55_v3 = vld [vmem:[%s11873_s0 + $0x98] sm:$0xff] }
   0x2   :  { %125 = vperm.xlu1 %5836, %v54_v1   ;;  %119 = vperm.xlu0 %5835, %v52_v2   ;;  %v53_v4 = vld [vmem:[%s11873_s0 + $0x88] sm:$0xff]  ;;  %v56_v7 = vld [vmem:[%s11873_s0 + $0xa0] sm:$0xff]  ;;  %v59_v8 = vld [vmem:[%s11873_s0 + $0xb8] sm:$0xff] }
   0x3   :  { %454 = vmatprep.mubr.f32.mxu1 %v11887_v5  ;;  %358 = vmatprep.mubr.f32.mxu0 %v11887_v5  ;;  %v57_v6 = vld [vmem:[%s11873_s0 + $0xa8] sm:$0xff]  ;;  %v58_v9 = vld [vmem:[%s11873_s0 + $0xb0] sm:$0xff]  ;;  %v293_v10 = vld [vmem:[%s11874_s2 + $0xf8] sm:$0xff] }
   0x4   :  { %5800 = vmatprep.subr.mxu1 %v293_v10  ;;  %v292_v11 = vld [vmem:[%s11874_s2 + $0xf0] sm:$0xff]  ;;  %v291_v12 = vld [vmem:[%s11874_s2 + $0xe8] sm:$0xff]  ;;  %294 = vmatprep.subr.mxu0 %v293_v10  ;;  %v290_v13 = vld [vmem:[%s11874_s2 + $0xe0] sm:$0xff]  ;;  %v11883_v10 = vmov 1.0  }
   0x5   :  { %5816 = vmatpush1.msra.mxu1 %v292_v11  ;;  %295 = vmatpush1.msra.mxu0 %v292_v11  ;;  %v289_v14 = vld [vmem:[%s11874_s2 + $0xd8] sm:$0xff]  ;;  %v61_v15 = vld [vmem:[%s11873_s0 + $0xc8] sm:$0xff]  ;;  %v60_v16 = vld [vmem:[%s11873_s0 + $0xc0] sm:$0xff] }
   0x6   :  { %128 = vperm.xlu1 %5836, %v55_v3   ;;  %122 = vperm.xlu0 %5835, %v53_v4   ;;  %v288_v17 = vld [vmem:[%s11874_s2 + $0xd0] sm:$0xff]  ;;  %v287_v18 = vld [vmem:[%s11874_s2 + $0xc8] sm:$0xff]  ;;  %v286_v19 = vld [vmem:[%s11874_s2 + $0xc0] sm:$0xff]  ;;  %v11882_v3 = vlaneseq }
   0x7   :  { %5801 = vmatprep.subr.mxu1 %v291_v12  ;;  %296 = vmatprep.subr.mxu0 %v291_v12  ;;  %v63_v20 = vld [vmem:[%s11873_s0 + $0xd8] sm:$0xff]  ;;  %v62_v21 = vld [vmem:[%s11873_s0 + $0xd0] sm:$0xff]  ;;  %v283_v24 = vld [vmem:[%s11874_s2 + $0xa8] sm:$0xff] }
   0x8   :  { %5817 = vmatpush1.msra.mxu1 %v290_v13  ;;  %297 = vmatpush1.msra.mxu0 %v290_v13  ;;  %v285_v22 = vld [vmem:[%s11874_s2 + $0xb8] sm:$0xff]  ;;  %v284_v23 = vld [vmem:[%s11874_s2 + $0xb0] sm:$0xff]  ;;  %v65_v25 = vld [vmem:[%s11873_s0 + $0xe8] sm:$0xff]  ;;  %v6214_v4 = vand.u32 127, %v11882_v3 }
   0x9   :  { %5802 = vmatprep.subr.mxu1 %v289_v14  ;;  %298 = vmatprep.subr.mxu0 %v289_v14  ;;  %v64_v26 = vld [vmem:[%s11873_s0 + $0xe0] sm:$0xff]  ;;  %v281_v28 = vld [vmem:[%s11874_s2 + $0x98] sm:$0xff]  ;;  %v280_v29 = vld [vmem:[%s11874_s2 + $0x90] sm:$0xff] }
   0xa   :  { %134 = vperm.xlu1 %5836, %v57_v6   ;;  %131 = vperm.xlu0 %5835, %v56_v7   ;;  %v282_v27 = vld [vmem:[%s11874_s2 + $0xa0] sm:$0xff]  ;;  %v67_v30 = vld [vmem:[%s11873_s0 + $0xf8] sm:$0xff]  ;;  %v66_v31 = vld [vmem:[%s11873_s0 + $0xf0] sm:$0xff] }
   0xb   :  { %5818 = vmatpush1.msra.mxu1 %v288_v17  ;;  %299 = vmatpush1.msra.mxu0 %v288_v17  ;;  %v279_v32 = vld [vmem:[%s11874_s2 + $0x88] sm:$0xff]  ;;  %v278_v33 = vld [vmem:[%s11874_s2 + $0x80] sm:$0xff]  ;;  %v277_v34 = vld [vmem:[%s11874_s2 + $0x78] sm:$0xff] }
   0xc   :  { %5803 = vmatprep.subr.mxu1 %v287_v18  ;;  %300 = vmatprep.subr.mxu0 %v287_v18  ;;  %v37_v35 = vld [vmem:[%s11873_s0 + $0x8] sm:$0xff]  ;;  %v36_v36 = vld [vmem:[%s11873_s0] sm:$0xff]  ;;  %v276_v37 = vld [vmem:[%s11874_s2 + $0x70] sm:$0xff] }
   0xd   :  { %5819 = vmatpush1.msra.mxu1 %v286_v19  ;;  %301 = vmatpush1.msra.mxu0 %v286_v19  ;;  %v275_v38 = vld [vmem:[%s11874_s2 + $0x68] sm:$0xff]  ;;  %v274_v39 = vld [vmem:[%s11874_s2 + $0x60] sm:$0xff]  ;;  %v39_v40 = vld [vmem:[%s11873_s0 + $0x18] sm:$0xff] }
   0xe   :  { %140 = vperm.xlu1 %5836, %v59_v8   ;;  %137 = vperm.xlu0 %5835, %v58_v9   ;;  %v38_v41 = vld [vmem:[%s11873_s0 + $0x10] sm:$0xff]  ;;  %v273_v42 = vld [vmem:[%s11874_s2 + $0x58] sm:$0xff]  ;;  %v271_v44 = vld [vmem:[%s11874_s2 + $0x48] sm:$0xff] }
   0xf   :  { %5804 = vmatprep.subr.mxu1 %v285_v22  ;;  %302 = vmatprep.subr.mxu0 %v285_v22  ;;  %v272_v43 = vld [vmem:[%s11874_s2 + $0x50] sm:$0xff]  ;;  %v41_v45 = vld [vmem:[%s11873_s0 + $0x28] sm:$0xff]  ;;  %v40_v46 = vld [vmem:[%s11873_s0 + $0x20] sm:$0xff] }
  0x10   :  { %5820 = vmatpush1.msra.mxu1 %v284_v23  ;;  %303 = vmatpush1.msra.mxu0 %v284_v23  ;;  %v270_v47 = vld [vmem:[%s11874_s2 + $0x40] sm:$0xff]  ;;  %v269_v48 = vld [vmem:[%s11874_s2 + $0x38] sm:$0xff]  ;;  %v268_v49 = vld [vmem:[%s11874_s2 + $0x30] sm:$0xff] }
  0x11   :  { %5805 = vmatprep.subr.mxu1 %v283_v24  ;;  %304 = vmatprep.subr.mxu0 %v283_v24  ;;  %v43_v50 = vld [vmem:[%s11873_s0 + $0x38] sm:$0xff]  ;;  %v42_v51 = vld [vmem:[%s11873_s0 + $0x30] sm:$0xff]  ;;  %v267_v52 = vld [vmem:[%s11874_s2 + $0x28] sm:$0xff] }
  0x12   :  { %146 = vperm.xlu1 %5836, %v61_v15   ;;  %143 = vperm.xlu0 %5835, %v60_v16   ;;  %v266_v53 = vld [vmem:[%s11874_s2 + $0x20] sm:$0xff]  ;;  %v265_v54 = vld [vmem:[%s11874_s2 + $0x18] sm:$0xff]  ;;  %v45_v55 = vld [vmem:[%s11873_s0 + $0x48] sm:$0xff] }
  0x13   :  { %5821 = vmatpush1.msra.mxu1 %v282_v27  ;;  %305 = vmatpush1.msra.mxu0 %v282_v27  ;;  %v44_v56 = vld [vmem:[%s11873_s0 + $0x40] sm:$0xff]  ;;  %v264_v57 = vld [vmem:[%s11874_s2 + $0x10] sm:$0xff]  ;;  %v263_v58 = vld [vmem:[%s11874_s2 + $0x8] sm:$0xff] }
  0x14   :  { %5806 = vmatprep.subr.mxu1 %v281_v28  ;;  %306 = vmatprep.subr.mxu0 %v281_v28  ;;  %v262_v59 = vld [vmem:[%s11874_s2] sm:$0xff]  ;;  %v47_v60 = vld [vmem:[%s11873_s0 + $0x58] sm:$0xff]  ;;  %v46_v61 = vld [vmem:[%s11873_s0 + $0x50] sm:$0xff] }
  0x15   :  { %5822 = vmatpush1.msra.mxu1 %v280_v29  ;;  %307 = vmatpush1.msra.mxu0 %v280_v29  ;;  %v6198_v62 = vld [vmem:[%s11875_s4 + $0xf8] sm:$0xff]  ;;  %v49_v63 = vld [vmem:[%s11873_s0 + $0x68] sm:$0xff]  ;;  %v48_v0 = vld [vmem:[%s11873_s0 + $0x60] sm:$0xff] }
  0x16   :  { %152 = vperm.xlu1 %5836, %v63_v20   ;;  %149 = vperm.xlu0 %5835, %v62_v21   ;;  %v51_v1 = vld [vmem:[%s11873_s0 + $0x78] sm:$0xff]  ;;  %v50_v2 = vld [vmem:[%s11873_s0 + $0x70] sm:$0xff]  ;;  %v6225_v9 = vld [vmem:[%s11875_s4 + $0xe8] sm:$0xff] }
  0x17   :  { %5807 = vmatprep.subr.mxu1 %v279_v32  ;;  %308 = vmatprep.subr.mxu0 %v279_v32  ;;  %v6219_v8 = vld [vmem:[%s11875_s4 + $0xf0] sm:$0xff]  ;;  %v6231_v11 = vld [vmem:[%s11875_s4 + $0xe0] sm:$0xff]  ;;  %v6238_v12 = vld [vmem:[%s11875_s4 + $0xd8] sm:$0xff] }
  0x18   :  { %5823 = vmatpush1.msra.mxu1 %v278_v33  ;;  %309 = vmatpush1.msra.mxu0 %v278_v33  ;;  %v6244_v15 = vld [vmem:[%s11875_s4 + $0xd0] sm:$0xff]  ;;  %v6251_v16 = vld [vmem:[%s11875_s4 + $0xc8] sm:$0xff]  ;;  %v6258_v17 = vld [vmem:[%s11875_s4 + $0xc0] sm:$0xff] }
  0x19   :  { %5808 = vmatprep.subr.mxu1 %v277_v34  ;;  %310 = vmatprep.subr.mxu0 %v277_v34  ;;  %v6266_v18 = vld [vmem:[%s11875_s4 + $0xb8] sm:$0xff]  ;;  %v6272_v21 = vld [vmem:[%s11875_s4 + $0xb0] sm:$0xff]  ;;  %v6278_v22 = vld [vmem:[%s11875_s4 + $0xa8] sm:$0xff] }
  0x1a   :  { %158 = vperm.xlu1 %5836, %v65_v25   ;;  %155 = vperm.xlu0 %5835, %v64_v26   ;;  %v6285_v23 = vld [vmem:[%s11875_s4 + $0xa0] sm:$0xff]  ;;  %v6292_v24 = vld [vmem:[%s11875_s4 + $0x98] sm:$0xff]  ;;  %v6298_v27 = vld [vmem:[%s11875_s4 + $0x90] sm:$0xff] }
  0x1b   :  { %5824 = vmatpush1.msra.mxu1 %v276_v37  ;;  %311 = vmatpush1.msra.mxu0 %v276_v37  ;;  %v6305_v28 = vld [vmem:[%s11875_s4 + $0x88] sm:$0xff]  ;;  %v6312_v29 = vld [vmem:[%s11875_s4 + $0x80] sm:$0xff]  ;;  %v6327_v33 = vld [vmem:[%s11875_s4 + $0x70] sm:$0xff] }
  0x1c   :  { %5809 = vmatprep.subr.mxu1 %v275_v38  ;;  %312 = vmatprep.subr.mxu0 %v275_v38  ;;  %v6334_v34 = vld [vmem:[%s11875_s4 + $0x68] sm:$0xff]  ;;  %v6633_v3 = vld [vmem:[%s11875_s4 + $0x130] sm:$0xff] }
  0x1d   :  { %5825 = vmatpush1.msra.mxu1 %v274_v39  ;;  %313 = vmatpush1.msra.mxu0 %v274_v39  ;;  %v6358_v39 = vld [vmem:[%s11875_s4 + $0x50] sm:$0xff]  ;;  %12162 = vst [vmem:[#allocation8_spill] sm:$0xff] %v6633_v3 }
  0x1e   :  { %164 = vperm.xlu1 %5836, %v67_v30   ;;  %161 = vperm.xlu0 %5835, %v66_v31   ;;  %v6319_v30 = vld [vmem:[%s11875_s4 + $0x78] sm:$0xff] }
  0x1f   :  { %5810 = vmatprep.subr.mxu1 %v273_v42  ;;  %314 = vmatprep.subr.mxu0 %v273_v42  ;;  %v6379_v42 = vld [vmem:[%s11875_s4 + $0x38] sm:$0xff] }
  0x20   :  { %5826 = vmatpush1.msra.mxu1 %v272_v43  ;;  %315 = vmatpush1.msra.mxu0 %v272_v43 }
  0x21   :  { %5811 = vmatprep.subr.mxu1 %v271_v44  ;;  %316 = vmatprep.subr.mxu0 %v271_v44 }
  0x22   :  { %74 = vperm.xlu1 %5836, %v37_v35   ;;  %71 = vperm.xlu0 %5835, %v36_v36   ;;  %v6341_v35 = vld [vmem:[%s11875_s4 + $0x60] sm:$0xff]  ;;  %v6348_v36 = vld [vmem:[%s11875_s4 + $0x58] sm:$0xff] }
  0x23   :  { %5827 = vmatpush1.msra.mxu1 %v270_v47  ;;  %317 = vmatpush1.msra.mxu0 %v270_v47  ;;  %v6403_v47 = vld [vmem:[%s11875_s4 + $0x20] sm:$0xff] }
  0x24   :  { %5812 = vmatprep.subr.mxu1 %v269_v48  ;;  %318 = vmatprep.subr.mxu0 %v269_v48  ;;  %v6410_v48 = vld [vmem:[%s11875_s4 + $0x18] sm:$0xff] }
  0x25   :  { %5828 = vmatpush1.msra.mxu1 %v268_v49  ;;  %319 = vmatpush1.msra.mxu0 %v268_v49 }
  0x26   :  { %80 = vperm.xlu1 %5836, %v39_v40   ;;  %77 = vperm.xlu0 %5835, %v38_v41   ;;  %v6365_v40 = vld [vmem:[%s11875_s4 + $0x48] sm:$0xff]  ;;  %v6372_v41 = vld [vmem:[%s11875_s4 + $0x40] sm:$0xff] }
  0x27   :  { %5813 = vmatprep.subr.mxu1 %v267_v52  ;;  %320 = vmatprep.subr.mxu0 %v267_v52  ;;  %v6427_v52 = vld [vmem:[%s11875_s4 + $0x8] sm:$0xff] }
  0x28   :  { %5829 = vmatpush1.msra.mxu1 %v266_v53  ;;  %321 = vmatpush1.msra.mxu0 %v266_v53  ;;  %v6434_v53 = vld [vmem:[%s11875_s4] sm:$0xff] }
  0x29   :  { %5814 = vmatprep.subr.mxu1 %v265_v54  ;;  %322 = vmatprep.subr.mxu0 %v265_v54  ;;  %v6441_v54 = vld [vmem:[%s11875_s4 + $0x1f8] sm:$0xff] }
  0x2a   :  { %86 = vperm.xlu1 %5836, %v41_v45   ;;  %83 = vperm.xlu0 %5835, %v40_v46   ;;  %v6389_v45 = vld [vmem:[%s11875_s4 + $0x30] sm:$0xff]  ;;  %v6396_v46 = vld [vmem:[%s11875_s4 + $0x28] sm:$0xff] }
  0x2b   :  { %5830 = vmatpush1.msra.mxu1 %v264_v57  ;;  %323 = vmatpush1.msra.mxu0 %v264_v57 }
  0x2c   :  { %5815 = vmatprep.subr.mxu1 %v263_v58  ;;  %324 = vmatprep.subr.mxu0 %v263_v58  ;;  %v6457_v58 = vld [vmem:[%s11875_s4 + $0x1e8] sm:$0xff] }
  0x2d   :  { %5831 = vmatpush1.msra.mxu1 %v262_v59  ;;  %325 = vmatpush1.msra.mxu0 %v262_v59  ;;  %v6463_v59 = vld [vmem:[%s11875_s4 + $0x1e0] sm:$0xff] }
  0x2e   :  { %92 = vperm.xlu1 %5836, %v43_v50   ;;  %89 = vperm.xlu0 %5835, %v42_v51   ;;  %v6420_v51 = vld [vmem:[%s11875_s4 + $0x10] sm:$0xff] }
  0x2f   :  { %759 = vmatprep.subr.mxu1 %v6198_v62 }
  0x32   :  { %98 = vperm.xlu1 %5836, %v45_v55   ;;  %95 = vperm.xlu0 %5835, %v44_v56   ;;  %v6449_v56 = vld [vmem:[%s11875_s4 + $0x1f0] sm:$0xff] }
  0x36   :  { %104 = vperm.xlu1 %5836, %v47_v60   ;;  %101 = vperm.xlu0 %5835, %v46_v61   ;;  %v6471_v60 = vld [vmem:[%s11875_s4 + $0x1d8] sm:$0xff]  ;;  %v6478_v61 = vld [vmem:[%s11875_s4 + $0x1d0] sm:$0xff] }
  0x3a   :  { %110 = vperm.xlu1 %5836, %v49_v63   ;;  %107 = vperm.xlu0 %5835, %v48_v0   ;;  %v6487_v0 = vld [vmem:[%s11875_s4 + $0x1c8] sm:$0xff] }
  0x3e   :  { %116 = vperm.xlu1 %5836, %v51_v1   ;;  %113 = vperm.xlu0 %5835, %v50_v2   ;;  %v6494_v1 = vld [vmem:[%s11875_s4 + $0x1c0] sm:$0xff]  ;;  %v6501_v2 = vld [vmem:[%s11875_s4 + $0x1b8] sm:$0xff] }
  0x7d   :  { %v126_v6 = vpop.permute.xlu1 %125  ;;  %v120_v7 = vpop.permute.xlu0 %119 }
  0x7e   :  { %vm182_vm0 = vcmp.eq.s32.totalorder %v6214_v4, %v120_v7  ;;  %vm184_vm2 = vcmp.eq.s32.totalorder %v6214_v4, %v126_v6  ;;  %v6509_v6 = vld [vmem:[%s11875_s4 + $0x1b0] sm:$0xff] }
  0x7f   :  { %5783 = vmatmul.mubr.msk.f32.vlgmr.msra.gmra.mxu1 %vm182_vm0, %v11883_v10 }
  0x80   :  { %760 = vmatpush1.msra.mxu1 %v6219_v8  ;;  %460 = vmatprep.mubr.f32.mxu1 %v11887_v5 }
  0x81   :  { %761 = vmatprep.subr.mxu1 %v6225_v9  ;;  %v129_v13 = vpop.permute.xlu1 %128  ;;  %v123_v14 = vpop.permute.xlu0 %122 }
  0x82   :  { %762 = vmatpush1.msra.mxu1 %v6231_v11  ;;  %vm183_vm1 = vcmp.eq.s32.totalorder %v6214_v4, %v123_v14  ;;  %vm185_vm3 = vcmp.eq.s32.totalorder %v6214_v4, %v129_v13  ;;  %v6518_v13 = vld [vmem:[%s11875_s4 + $0x1a8] sm:$0xff]  ;;  %v6525_v14 = vld [vmem:[%s11875_s4 + $0x1a0] sm:$0xff] }
  0x83   :  { %763 = vmatprep.subr.mxu1 %v6238_v12  ;;  %5784 = vmatmul.mubr.msk.f32.gmra.mxu1 %vm183_vm1, %v11883_v10 }
  0x84   :  { %764 = vmatpush1.msra.mxu1 %v6244_v15  ;;  %466 = vmatprep.mubr.f32.mxu1 %v11887_v5 }
  0x85   :  { %765 = vmatprep.subr.mxu1 %v6251_v16  ;;  %v135_v19 = vpop.permute.xlu1 %134  ;;  %v132_v20 = vpop.permute.xlu0 %131 }
  0x86   :  { %766 = vmatpush1.msra.mxu1 %v6258_v17  ;;  %vm186_vm4 = vcmp.eq.s32.totalorder %v6214_v4, %v132_v20  ;;  %vm187_vm5 = vcmp.eq.s32.totalorder %v6214_v4, %v135_v19  ;;  %v6532_v19 = vld [vmem:[%s11875_s4 + $0x198] sm:$0xff]  ;;  %v6540_v20 = vld [vmem:[%s11875_s4 + $0x190] sm:$0xff] }
  0x87   :  { %767 = vmatprep.subr.mxu1 %v6266_v18  ;;  %5785 = vmatmul.mubr.msk.f32.gmra.mxu1 %vm184_vm2, %v11883_v10 }
  0x88   :  { %768 = vmatpush1.msra.mxu1 %v6272_v21  ;;  %472 = vmatprep.mubr.f32.mxu1 %v11887_v5 }
  0x89   :  { %769 = vmatprep.subr.mxu1 %v6278_v22  ;;  %v141_v25 = vpop.permute.xlu1 %140  ;;  %v138_v26 = vpop.permute.xlu0 %137 }
  0x8a   :  { %770 = vmatpush1.msra.mxu1 %v6285_v23  ;;  %vm188_vm6 = vcmp.eq.s32.totalorder %v6214_v4, %v138_v26  ;;  %vm189_vm7 = vcmp.eq.s32.totalorder %v6214_v4, %v141_v25  ;;  %v6549_v26 = vld [vmem:[%s11875_s4 + $0x188] sm:$0xff] }
  0x8b   :  { %771 = vmatprep.subr.mxu1 %v6292_v24  ;;  %5786 = vmatmul.mubr.msk.f32.gmra.mxu1 %vm185_vm3, %v11883_v10 }
  0x8c   :  { %772 = vmatpush1.msra.mxu1 %v6298_v27  ;;  %478 = vmatprep.mubr.f32.mxu1 %v11887_v5 }
  0x8d   :  { %773 = vmatprep.subr.mxu1 %v6305_v28  ;;  %v6322_v31 = vpop.permute.xlu1 %146  ;;  %v144_v32 = vpop.permute.xlu0 %143 }
  0x8e   :  { %774 = vmatpush1.msra.mxu1 %v6312_v29  ;;  %vm190_vm9 = vcmp.eq.s32.totalorder %v6214_v4, %v144_v32  ;;  %vm191_vm11 = vcmp.eq.s32.totalorder %v6214_v4, %v6322_v31  ;;  %v6556_v31 = vld [vmem:[%s11875_s4 + $0x180] sm:$0xff]  ;;  %v6563_v32 = vld [vmem:[%s11875_s4 + $0x178] sm:$0xff] }
  0x8f   :  { %775 = vmatprep.subr.mxu1 %v6319_v30  ;;  %5787 = vmatmul.mubr.msk.f32.gmra.mxu1 %vm186_vm4, %v11883_v10 }
  0x90   :  { %776 = vmatpush1.msra.mxu1 %v6327_v33  ;;  %484 = vmatprep.mubr.f32.mxu1 %v11887_v5 }
  0x91   :  { %777 = vmatprep.subr.mxu1 %v6334_v34  ;;  %v6351_v37 = vpop.permute.xlu1 %152  ;;  %v6353_v38 = vpop.permute.xlu0 %149 }
  0x92   :  { %778 = vmatpush1.msra.mxu1 %v6341_v35  ;;  %vm192_vm13 = vcmp.eq.s32.totalorder %v6214_v4, %v6353_v38  ;;  %vm193_vm15 = vcmp.eq.s32.totalorder %v6214_v4, %v6351_v37  ;;  %v6571_v37 = vld [vmem:[%s11875_s4 + $0x170] sm:$0xff] }
  0x93   :  { %779 = vmatprep.subr.mxu1 %v6348_v36  ;;  %5788 = vmatmul.mubr.msk.f32.gmra.mxu1 %vm187_vm5, %v11883_v10 }
  0x94   :  { %780 = vmatpush1.msra.mxu1 %v6358_v39  ;;  %490 = vmatprep.mubr.f32.mxu1 %v11887_v5 }
  0x95   :  { %781 = vmatprep.subr.mxu1 %v6365_v40  ;;  %v6382_v43 = vpop.permute.xlu1 %158  ;;  %v6384_v44 = vpop.permute.xlu0 %155 }
  0x96   :  { %782 = vmatpush1.msra.mxu1 %v6372_v41  ;;  %vm194_vm1 = vcmp.eq.s32.totalorder %v6214_v4, %v6384_v44  ;;  %v6594_v44 = vld [vmem:[%s11875_s4 + $0x158] sm:$0xff]  ;;  %vm195_vm3 = vcmp.eq.s32.totalorder %v6214_v4, %v6382_v43 }
  0x97   :  { %783 = vmatprep.subr.mxu1 %v6379_v42  ;;  %5789 = vmatmul.mubr.msk.f32.gmra.mxu1 %vm188_vm6, %v11883_v10  ;;  %v6625_v43 = vld [vmem:[%s11875_s4 + $0x138] sm:$0xff] }
  0x98   :  { %784 = vmatpush1.msra.mxu1 %v6389_v45  ;;  %496 = vmatprep.mubr.f32.mxu1 %v11887_v5  ;;  %12161 = vst [vmem:[#allocation7_spill] sm:$0xff] %v6625_v43 }
  0x99   :  { %785 = vmatprep.subr.mxu1 %v6396_v46  ;;  %v6413_v49 = vpop.permute.xlu1 %164  ;;  %v6415_v50 = vpop.permute.xlu0 %161 }
  0x9a   :  { %786 = vmatpush1.msra.mxu1 %v6403_v47  ;;  %vm196_vm5 = vcmp.eq.s32.totalorder %v6214_v4, %v6415_v50  ;;  %v12166_v50 = vmov 0.0  }
  0x9b   :  { %787 = vmatprep.subr.mxu1 %v6410_v48  ;;  %5790 = vmatmul.mubr.msk.f32.gmra.mxu1 %vm189_vm7, %v11883_v10  ;;  %vm197_vm7 = vcmp.eq.s32.totalorder %v6214_v4, %v6413_v49  ;;  %v6683_v49 = vld [vmem:[%s11875_s4 + $0x100] sm:$0xff] }
  0x9c   :  { %788 = vmatpush1.msra.mxu1 %v6420_v51  ;;  %502 = vmatprep.mubr.f32.mxu1 %v11887_v5 }
  0x9d   :  { %789 = vmatprep.subr.mxu1 %v6427_v52  ;;  %v72_v55 = vpop.permute.xlu0 %71  ;;  %v75_v57 = vpop.permute.xlu1 %74 }
  0x9e   :  { %790 = vmatpush1.msra.mxu1 %v6434_v53  ;;  %vm166_vm8 = vcmp.eq.s32.totalorder %v6214_v4, %v72_v55  ;;  %vm167_vm10 = vcmp.eq.s32.totalorder %v6214_v4, %v75_v57  ;;  %v6580_v55 = vld [vmem:[%s11875_s4 + $0x168] sm:$0xff]  ;;  %v6587_v57 = vld [vmem:[%s11875_s4 + $0x160] sm:$0xff] }
  0x9f   :  { %791 = vmatprep.subr.mxu1 %v6441_v54  ;;  %5767 = vmatmul.mubr.msk.f32.vlgmr.msra.gmra.mxu0 %vm166_vm8, %v11883_v10 }
  0xa0   :  { %5791 = vmatmul.mubr.msk.f32.gmra.mxu1 %vm190_vm9, %v11883_v10  ;;  %364 = vmatprep.mubr.f32.mxu0 %v11887_v5 }
  0xa1   :  { %792 = vmatpush2.msra.mxu1 %v6449_v56  ;;  %508 = vmatprep.mubr.f32.mxu1 %v11887_v5  ;;  %v78_v63 = vpop.permute.xlu0 %77  ;;  %v81_v7 = vpop.permute.xlu1 %80 }
  0xa2   :  { %793 = vmatprep.subr.mxu1 %v6457_v58  ;;  %vm168_vm12 = vcmp.eq.s32.totalorder %v6214_v4, %v78_v63  ;;  %vm169_vm14 = vcmp.eq.s32.totalorder %v6214_v4, %v81_v7  ;;  %v6602_v63 = vld [vmem:[%s11875_s4 + $0x150] sm:$0xff] }
  0xa3   :  { %794 = vmatpush2.msra.mxu1 %v6463_v59  ;;  %5768 = vmatmul.mubr.msk.f32.gmra.mxu0 %vm167_vm10, %v11883_v10  ;;  %12159 = vst [vmem:[#allocation5_spill] sm:$0xff] %v6602_v63 }
  0xa4   :  { %795 = vmatprep.subr.mxu1 %v6471_v60  ;;  %5792 = vmatmul.mubr.msk.f32.gmra.mxu1 %vm191_vm11, %v11883_v10 }
  0xa5   :  { %796 = vmatpush2.msra.mxu1 %v6478_v61  ;;  %370 = vmatprep.mubr.f32.mxu0 %v11887_v5  ;;  %v84_v25 = vpop.permute.xlu0 %83  ;;  %v87_v38 = vpop.permute.xlu1 %86 }
  0xa6   :  { %797 = vmatprep.subr.mxu1 %v6487_v0  ;;  %514 = vmatprep.mubr.f32.mxu1 %v11887_v5  ;;  %vm170_vm0 = vcmp.eq.s32.totalorder %v6214_v4, %v84_v25  ;;  %vm171_vm2 = vcmp.eq.s32.totalorder %v6214_v4, %v87_v38  ;;  %v6611_v25 = vld [vmem:[%s11875_s4 + $0x148] sm:$0xff]  ;;  %v6618_v38 = vld [vmem:[%s11875_s4 + $0x140] sm:$0xff] }
  0xa7   :  { %798 = vmatpush2.msra.mxu1 %v6494_v1  ;;  %5769 = vmatmul.mubr.msk.f32.gmra.mxu0 %vm168_vm12, %v11883_v10  ;;  %12160 = vst [vmem:[#allocation6_spill] sm:$0xff] %v6618_v38 }
  0xa8   :  { %799 = vmatprep.subr.mxu1 %v6501_v2  ;;  %5793 = vmatmul.mubr.msk.f32.gmra.mxu1 %vm192_vm13, %v11883_v10 }
  0xa9   :  { %800 = vmatpush2.msra.mxu1 %v6509_v6  ;;  %376 = vmatprep.mubr.f32.mxu0 %v11887_v5  ;;  %v90_v7 = vpop.permute.xlu0 %89 }
  0xaa   :  { %801 = vmatprep.subr.mxu1 %v6518_v13  ;;  %520 = vmatprep.mubr.f32.mxu1 %v11887_v5  ;;  %vm172_vm4 = vcmp.eq.s32.totalorder %v6214_v4, %v90_v7  ;;  %v6642_v7 = vld [vmem:[%s11875_s4 + $0x128] sm:$0xff] }
  0xab   :  { %802 = vmatpush2.msra.mxu1 %v6525_v14  ;;  %5770 = vmatmul.mubr.msk.f32.gmra.mxu0 %vm169_vm14, %v11883_v10  ;;  %12164 = vst [vmem:[#allocation9_spill] sm:$0xff] %v6642_v7 }
  0xac   :  { %803 = vmatprep.subr.mxu1 %v6532_v19  ;;  %5794 = vmatmul.mubr.msk.f32.gmra.mxu1 %vm193_vm15, %v11883_v10 }
  0xad   :  { %804 = vmatpush2.msra.mxu1 %v6540_v20  ;;  %382 = vmatprep.mubr.f32.mxu0 %v11887_v5 }
  0xae   :  { %805 = vmatprep.subr.mxu1 %v6549_v26  ;;  %526 = vmatprep.mubr.f32.mxu1 %v11887_v5 }
  0xaf   :  { %806 = vmatpush2.msra.mxu1 %v6556_v31  ;;  %5771 = vmatmul.mubr.msk.f32.gmra.mxu0 %vm170_vm0, %v11883_v10 }
  0xb0   :  { %807 = vmatprep.subr.mxu1 %v6563_v32  ;;  %5795 = vmatmul.mubr.msk.f32.gmra.mxu1 %vm194_vm1, %v11883_v10 }
  0xb1   :  { %808 = vmatpush2.msra.mxu1 %v6571_v37  ;;  %388 = vmatprep.mubr.f32.mxu0 %v11887_v5 }
  0xb2   :  { %809 = vmatprep.subr.mxu1 %v6580_v55  ;;  %532 = vmatprep.mubr.f32.mxu1 %v11887_v5 }
  0xb3   :  { %810 = vmatpush2.msra.mxu1 %v6587_v57  ;;  %5772 = vmatmul.mubr.msk.f32.gmra.mxu0 %vm171_vm2, %v11883_v10 }
  0xb4   :  { %811 = vmatprep.subr.mxu1 %v6594_v44  ;;  %5796 = vmatmul.mubr.msk.f32.gmra.mxu1 %vm195_vm3, %v11883_v10  ;;  %v93_v10 = vpop.permute.xlu1 %92 }
  0xb5   :  { %812 = vmatpush2.msra.mxu1 %v6602_v63  ;;  %394 = vmatprep.mubr.f32.mxu0 %v11887_v5  ;;  %v12163_v63 = vmov 1.0   ;;  %vm173_vm6 = vcmp.eq.s32.totalorder %v6214_v4, %v93_v10  ;;  %v6673_v10 = vld [vmem:[%s11875_s4 + $0x108] sm:$0xff] }
  0xb6   :  { %813 = vmatprep.subr.mxu1 %v6611_v25  ;;  %538 = vmatprep.mubr.f32.mxu1 %v11887_v5  ;;  %v6649_v5 = vld [vmem:[%s11875_s4 + $0x120] sm:$0xff] }
  0xb7   :  { %814 = vmatpush2.msra.mxu1 %v6618_v38  ;;  %5773 = vmatmul.mubr.msk.f32.gmra.mxu0 %vm172_vm4, %v12163_v63  ;;  %12165 = vst [vmem:[#allocation10_spill] sm:$0xff] %v6649_v5  ;;  %v6656_v38 = vld [vmem:[%s11875_s4 + $0x118] sm:$0xff] }
  0xb8   :  { %815 = vmatprep.subr.mxu1 %v6625_v43  ;;  %5797 = vmatmul.mubr.msk.f32.gmra.mxu1 %vm196_vm5, %v12163_v63  ;;  %12167 = vst [vmem:[#allocation11_spill] sm:$0xff] %v6656_v38  ;;  %v6664_v43 = vld [vmem:[%s11875_s4 + $0x110] sm:$0xff] }
  0xb9   :  { %816 = vmatpush2.msra.mxu1 %v6633_v3  ;;  %400 = vmatprep.mubr.f32.mxu0 %v12166_v50  ;;  %12168 = vst [vmem:[#allocation12_spill] sm:$0xff] %v6664_v43  ;;  %v96_v3 = vpop.permute.xlu0 %95 }
  0xba   :  { %817 = vmatprep.subr.mxu1 %v6642_v7  ;;  %544 = vmatprep.mubr.f32.mxu1 %v12166_v50  ;;  %v33_v7 = vld [vmem:[%s11876_s1 + $0x8] sm:$0xff]  ;;  %vm174_vm8 = vcmp.eq.s32.totalorder %v6214_v4, %v96_v3 }
  0xbb   :  { %818 = vmatpush2.msra.mxu1 %v6649_v5  ;;  %5774 = vmatmul.mubr.msk.f32.gmra.mxu0 %vm173_vm6, %v12163_v63  ;;  %v32_v5 = vld [vmem:[%s11876_s1] sm:$0xff] }
  0xbc   :  { %819 = vmatprep.subr.mxu1 %v6656_v38  ;;  %5798 = vmatmul.mubr.msk.f32.gmra.mxu1 %vm197_vm7, %v12163_v63  ;;  %v99_v38 = vpop.permute.xlu1 %98 }
  0xbd   :  { %820 = vmatpush2.msra.mxu1 %v6664_v43  ;;  %406 = vmatprep.mubr.f32.mxu0 %v12166_v50  ;;  %vm175_vm9 = vcmp.eq.s32.totalorder %v6214_v4, %v99_v38  ;;  %v102_v43 = vpop.permute.xlu0 %101  ;;  %v6841_v38 = vld [vmem:[%s11875_s4 + $0xa8] sm:$0xff] }
  0xbe   :  { %821 = vmatprep.subr.mxu1 %v6673_v10  ;;  %823 = vmatprep.mubr.f32.mxu1 %v33_v7  ;;  %vm176_vm10 = vcmp.eq.s32.totalorder %v6214_v4, %v102_v43  ;;  %v6847_v43 = vld [vmem:[%s11875_s4 + $0xa0] sm:$0xff]  ;;  %v6853_v7 = vld [vmem:[%s11875_s4 + $0x98] sm:$0xff] }
  0xbf   :  { %822 = vmatpush2.msra.mxu1 %v6683_v49  ;;  %5775 = vmatmul.mubr.msk.f32.gmra.mxu0 %vm174_vm8, %v12163_v63 }
  0xc0   :  { %824 = vmatmul.mubr.f32.vlgmr.msra.gmra.mxu1 %v32_v5  ;;  %412 = vmatprep.mubr.f32.mxu0 %v12166_v50  ;;  %v105_v5 = vpop.permute.xlu1 %104 }
  0xc1   :  { %903 = vmatprep.subr.mxu1 %v6198_v62  ;;  %vm177_vm11 = vcmp.eq.s32.totalorder %v6214_v4, %v105_v5  ;;  %v108_v62 = vpop.permute.xlu0 %107  ;;  %v6859_v5 = vld [vmem:[%s11875_s4 + $0x90] sm:$0xff] }
  0xc2   :  { %904 = vmatpush1.msra.mxu1 %v6219_v8  ;;  %vm178_vm12 = vcmp.eq.s32.totalorder %v6214_v4, %v108_v62  ;;  %v6865_v62 = vld [vmem:[%s11875_s4 + $0x88] sm:$0xff] }
  0xc3   :  { %5776 = vmatmul.mubr.msk.f32.gmra.mxu0 %vm175_vm9, %v12163_v63  ;;  %905 = vmatprep.subr.mxu1 %v6225_v9 }
  0xc4   :  { %418 = vmatprep.mubr.f32.mxu0 %v12166_v50  ;;  %906 = vmatpush1.msra.mxu1 %v6231_v11  ;;  %v111_v3 = vpop.permute.xlu1 %110  ;;  %v12170_v11 = vld [vmem:[#allocation6_spill] sm:$0xff] }
  0xc5   :  { %907 = vmatprep.subr.mxu1 %v6238_v12  ;;  %vm179_vm13 = vcmp.eq.s32.totalorder %v6214_v4, %v111_v3  ;;  %v114_v8 = vpop.permute.xlu0 %113  ;;  %v12171_v12 = vld [vmem:[#allocation7_spill] sm:$0xff]  ;;  %v6871_v3 = vld [vmem:[%s11875_s4 + $0x80] sm:$0xff] }
  0xc6   :  { %908 = vmatpush1.msra.mxu1 %v6244_v15  ;;  %vm180_vm14 = vcmp.eq.s32.totalorder %v6214_v4, %v114_v8  ;;  %v12172_v15 = vld [vmem:[#allocation8_spill] sm:$0xff] }
  0xc7   :  { %5777 = vmatmul.mubr.msk.f32.gmra.mxu0 %vm176_vm10, %v12163_v63  ;;  %909 = vmatprep.subr.mxu1 %v6251_v16  ;;  %v12173_v16 = vld [vmem:[#allocation9_spill] sm:$0xff]  ;;  %v6877_v8 = vld [vmem:[%s11875_s4 + $0x78] sm:$0xff] }
  0xc8   :  { %424 = vmatprep.mubr.f32.mxu0 %v12166_v50  ;;  %910 = vmatpush1.msra.mxu1 %v6258_v17  ;;  %v117_v9 = vpop.permute.xlu1 %116  ;;  %v12174_v17 = vld [vmem:[#allocation10_spill] sm:$0xff] }
  0xc9   :  { %911 = vmatprep.subr.mxu1 %v6266_v18  ;;  %vm181_vm15 = vcmp.eq.s32.totalorder %v6214_v4, %v117_v9  ;;  %v12169_v4 = vld [vmem:[#allocation5_spill] sm:$0xff]  ;;  %v12175_v18 = vld [vmem:[#allocation11_spill] sm:$0xff] }
  0xca   :  { %912 = vmatpush1.msra.mxu1 %v6272_v21  ;;  %v12176_v21 = vld [vmem:[#allocation12_spill] sm:$0xff]  ;;  %v6883_v9 = vld [vmem:[%s11875_s4 + $0x70] sm:$0xff] }
  0xcb   :  { %5778 = vmatmul.mubr.msk.f32.gmra.mxu0 %vm177_vm11, %v12163_v63  ;;  %913 = vmatprep.subr.mxu1 %v6278_v22  ;;  %v6782_v22 = vld [vmem:[%s11875_s4 + $0xf8] sm:$0xff] }
  0xcc   :  { %430 = vmatprep.mubr.f32.mxu0 %v12166_v50  ;;  %914 = vmatpush1.msra.mxu1 %v6285_v23  ;;  %v6787_v23 = vld [vmem:[%s11875_s4 + $0xf0] sm:$0xff] }
  0xcd   :  { %915 = vmatprep.subr.mxu1 %v6292_v24  ;;  %v6792_v24 = vld [vmem:[%s11875_s4 + $0xe8] sm:$0xff]  ;;  %1048 = vmatprep.subr.mxu0 %v6782_v22 }
  0xce   :  { %916 = vmatpush1.msra.mxu1 %v6298_v27  ;;  %v6798_v27 = vld [vmem:[%s11875_s4 + $0xe0] sm:$0xff]  ;;  %1049 = vmatpush1.msra.mxu0 %v6787_v23 }
  0xcf   :  { %5779 = vmatmul.mubr.msk.f32.gmra.mxu0 %vm178_vm12, %v12163_v63  ;;  %917 = vmatprep.subr.mxu1 %v6305_v28  ;;  %v6805_v28 = vld [vmem:[%s11875_s4 + $0xd8] sm:$0xff] }
  0xd0   :  { %436 = vmatprep.mubr.f32.mxu0 %v12166_v50  ;;  %918 = vmatpush1.msra.mxu1 %v6312_v29  ;;  %v6811_v29 = vld [vmem:[%s11875_s4 + $0xd0] sm:$0xff] }
  0xd1   :  { %919 = vmatprep.subr.mxu1 %v6319_v30  ;;  %1050 = vmatprep.subr.mxu0 %v6792_v24  ;;  %v6817_v30 = vld [vmem:[%s11875_s4 + $0xc8] sm:$0xff] }
  0xd2   :  { %920 = vmatpush1.msra.mxu1 %v6327_v33  ;;  %1051 = vmatpush1.msra.mxu0 %v6798_v27  ;;  %v6823_v33 = vld [vmem:[%s11875_s4 + $0xc0] sm:$0xff] }
  0xd3   :  { %5780 = vmatmul.mubr.msk.f32.gmra.mxu0 %vm179_vm13, %v12163_v63  ;;  %921 = vmatprep.subr.mxu1 %v6334_v34  ;;  %v6829_v34 = vld [vmem:[%s11875_s4 + $0xb8] sm:$0xff] }
  0xd4   :  { %442 = vmatprep.mubr.f32.mxu0 %v12166_v50  ;;  %922 = vmatpush1.msra.mxu1 %v6341_v35 }
  0xd5   :  { %923 = vmatprep.subr.mxu1 %v6348_v36  ;;  %1052 = vmatprep.subr.mxu0 %v6805_v28 }
  0xd6   :  { %924 = vmatpush1.msra.mxu1 %v6358_v39  ;;  %1053 = vmatpush1.msra.mxu0 %v6811_v29 }
  0xd7   :  { %5781 = vmatmul.mubr.msk.f32.gmra.mxu0 %vm180_vm14, %v12163_v63  ;;  %925 = vmatprep.subr.mxu1 %v6365_v40 }
  0xd8   :  { %448 = vmatprep.mubr.f32.mxu0 %v12166_v50  ;;  %926 = vmatpush1.msra.mxu1 %v6372_v41  ;;  %v6889_v50 = vld [vmem:[%s11875_s4 + $0x68] sm:$0xff] }
  0xd9   :  { %927 = vmatprep.subr.mxu1 %v6379_v42  ;;  %1054 = vmatprep.subr.mxu0 %v6817_v30 }
  0xda   :  { %928 = vmatpush1.msra.mxu1 %v6389_v45  ;;  %1055 = vmatpush1.msra.mxu0 %v6823_v33 }
  0xdb   :  { %5782 = vmatmul.mubr.msk.f32.gmra.mxu0 %vm181_vm15, %v12163_v63  ;;  %929 = vmatprep.subr.mxu1 %v6396_v46  ;;  %v6835_v63 = vld [vmem:[%s11875_s4 + $0xb0] sm:$0xff] }
  0xdc   :  { %930 = vmatpush1.msra.mxu1 %v6403_v47  ;;  %1056 = vmatprep.subr.mxu0 %v6829_v34 }
  0xdd   :  { %931 = vmatprep.subr.mxu1 %v6410_v48  ;;  %1057 = vmatpush1.msra.mxu0 %v6835_v63 }
  0xde   :  { %932 = vmatpush1.msra.mxu1 %v6420_v51  ;;  %1058 = vmatprep.subr.mxu0 %v6841_v38 }
  0xdf   :  { %933 = vmatprep.subr.mxu1 %v6427_v52  ;;  %1059 = vmatpush1.msra.mxu0 %v6847_v43 }
  0xe0   :  { %934 = vmatpush1.msra.mxu1 %v6434_v53  ;;  %1060 = vmatprep.subr.mxu0 %v6853_v7 }
  0xe1   :  { %935 = vmatprep.subr.mxu1 %v6441_v54  ;;  %1061 = vmatpush1.msra.mxu0 %v6859_v5 }
  0xe2   :  { %936 = vmatpush2.msra.mxu1 %v6449_v56  ;;  %1062 = vmatprep.subr.mxu0 %v6865_v62 }
  0xe3   :  { %937 = vmatprep.subr.mxu1 %v6457_v58  ;;  %1063 = vmatpush1.msra.mxu0 %v6871_v3 }
  0xe4   :  { %938 = vmatpush2.msra.mxu1 %v6463_v59  ;;  %1064 = vmatprep.subr.mxu0 %v6877_v8 }
  0xe5   :  { %939 = vmatprep.subr.mxu1 %v6471_v60  ;;  %1065 = vmatpush1.msra.mxu0 %v6883_v9 }
  0xe6   :  { %940 = vmatpush2.msra.mxu1 %v6478_v61  ;;  %1066 = vmatprep.subr.mxu0 %v6889_v50 }
  0xe7   :  { %941 = vmatprep.subr.mxu1 %v6487_v0  ;;  %1067 = vmatpush1.msra.mxu0 %v6341_v35 }
  0xe8   :  { %942 = vmatpush2.msra.mxu1 %v6494_v1  ;;  %1068 = vmatprep.subr.mxu0 %v6348_v36 }
  0xe9   :  { %943 = vmatprep.subr.mxu1 %v6501_v2  ;;  %1069 = vmatpush1.msra.mxu0 %v6358_v39 }
  0xea   :  { %944 = vmatpush2.msra.mxu1 %v6509_v6  ;;  %1070 = vmatprep.subr.mxu0 %v6365_v40 }
  0xeb   :  { %945 = vmatprep.subr.mxu1 %v6518_v13  ;;  %1071 = vmatpush1.msra.mxu0 %v6372_v41 }
  0xec   :  { %946 = vmatpush2.msra.mxu1 %v6525_v14  ;;  %1072 = vmatprep.subr.mxu0 %v6379_v42 }
  0xed   :  { %947 = vmatprep.subr.mxu1 %v6532_v19  ;;  %1073 = vmatpush1.msra.mxu0 %v6389_v45 }
  0xee   :  { %948 = vmatpush2.msra.mxu1 %v6540_v20  ;;  %1074 = vmatprep.subr.mxu0 %v6396_v46 }
  0xef   :  { %949 = vmatprep.subr.mxu1 %v6549_v26  ;;  %1075 = vmatpush1.msra.mxu0 %v6403_v47 }
  0xf0   :  { %950 = vmatpush2.msra.mxu1 %v6556_v31  ;;  %1076 = vmatprep.subr.mxu0 %v6410_v48 }
  0xf1   :  { %951 = vmatprep.subr.mxu1 %v6563_v32  ;;  %1077 = vmatpush1.msra.mxu0 %v6420_v51 }
  0xf2   :  { %952 = vmatpush2.msra.mxu1 %v6571_v37  ;;  %1078 = vmatprep.subr.mxu0 %v6427_v52 }
  0xf3   :  { %953 = vmatprep.subr.mxu1 %v6580_v55  ;;  %1079 = vmatpush1.msra.mxu0 %v6434_v53 }
  0xf4   :  { %954 = vmatpush2.msra.mxu1 %v6587_v57  ;;  %1080 = vmatprep.subr.mxu0 %v6441_v54 }
  0xf5   :  { %955 = vmatprep.subr.mxu1 %v6594_v44  ;;  %1081 = vmatpush2.msra.mxu0 %v6449_v56 }
  0xf6   :  { %956 = vmatpush2.msra.mxu1 %v12169_v4  ;;  %1082 = vmatprep.subr.mxu0 %v6457_v58 }
  0xf7   :  { %957 = vmatprep.subr.mxu1 %v6611_v25  ;;  %1083 = vmatpush2.msra.mxu0 %v6463_v59 }
  0xf8   :  { %958 = vmatpush2.msra.mxu1 %v12170_v11  ;;  %1084 = vmatprep.subr.mxu0 %v6471_v60 }
  0xf9   :  { %959 = vmatprep.subr.mxu1 %v12171_v12  ;;  %1085 = vmatpush2.msra.mxu0 %v6478_v61 }
  0xfa   :  { %960 = vmatpush2.msra.mxu1 %v12172_v15  ;;  %1086 = vmatprep.subr.mxu0 %v6487_v0 }
  0xfb   :  { %961 = vmatprep.subr.mxu1 %v12173_v16  ;;  %1087 = vmatpush2.msra.mxu0 %v6494_v1 }
  0xfc   :  { %962 = vmatpush2.msra.mxu1 %v12174_v17  ;;  %1088 = vmatprep.subr.mxu0 %v6501_v2 }
  0xfd   :  { %963 = vmatprep.subr.mxu1 %v12175_v18  ;;  %1089 = vmatpush2.msra.mxu0 %v6509_v6 }
  0xfe   :  { %964 = vmatpush2.msra.mxu1 %v12176_v21  ;;  %1090 = vmatprep.subr.mxu0 %v6518_v13 }
  0xff   :  { %965 = vmatprep.subr.mxu1 %v6673_v10  ;;  %1091 = vmatpush2.msra.mxu0 %v6525_v14 }
 0x100   :  { %966 = vmatpush2.msra.mxu1 %v6683_v49  ;;  %1092 = vmatprep.subr.mxu0 %v6532_v19 }
 0x101   :  { %1193 = vmatprep.subr.mxu1 %v6782_v22  ;;  %1093 = vmatpush2.msra.mxu0 %v6540_v20 }
 0x102   :  { %1094 = vmatprep.subr.mxu0 %v6549_v26  ;;  %v12204_v26 = vlaneseq }
 0x103   :  { %1095 = vmatpush2.msra.mxu0 %v6556_v31 }
 0x104   :  { %1096 = vmatprep.subr.mxu0 %v6563_v32  ;;  %v554_v31 = vshrl.u32 %v12204_v26, 7 }
 0x105   :  { %1097 = vmatpush2.msra.mxu0 %v6571_v37 }
 0x106   :  { %1098 = vmatprep.subr.mxu0 %v6580_v55  ;;  %v555_v55 = vsub.s32 0, %v554_v31 }
 0x107   :  { %1099 = vmatpush2.msra.mxu0 %v6587_v57 }
 0x108   :  { %1100 = vmatprep.subr.mxu0 %v6594_v44 }
 0x109   :  { %1101 = vmatpush2.msra.mxu0 %v12169_v4 }
 0x10a   :  { %1102 = vmatprep.subr.mxu0 %v6611_v25  ;;  %v559_v25 = vsub.s32 1, %v554_v31 }
 0x10b   :  { %1103 = vmatpush2.msra.mxu0 %v12170_v11 }
 0x10c   :  { %1104 = vmatprep.subr.mxu0 %v12171_v12 }
 0x10d   :  { %1105 = vmatpush2.msra.mxu0 %v12172_v15 }
 0x10e   :  { %1106 = vmatprep.subr.mxu0 %v12173_v16 }
 0x10f   :  { %1107 = vmatpush2.msra.mxu0 %v12174_v17 }
 0x110   :  { %1108 = vmatprep.subr.mxu0 %v12175_v18 }
 0x111   :  { %1109 = vmatpush2.msra.mxu0 %v12176_v21 }
 0x112   :  { %1110 = vmatprep.subr.mxu0 %v6673_v10  ;;  %v551_v10 = vld [vmem:[%s11877_s3] sm:$0x3] }
 0x113   :  { %1111 = vmatpush2.msra.mxu0 %v6683_v49  ;;  %v7006_v4 = vrot.slane %v551_v10, %v555_v55  ;;  %v7010_v15 = vrot.slane %v551_v10, %v559_v25  ;;  %v7041_v55 = vld [vmem:[%s11875_s4 + $0x60] sm:$0xff]  ;;  %v7051_v25 = vld [vmem:[%s11875_s4 + $0x50] sm:$0xff]  ;;  %v7057_v10 = vld [vmem:[%s11875_s4 + $0x48] sm:$0xff] }
 0x114   :  { %1338 = vmatprep.subr.mxu0 %v6782_v22 }
 0x13f   :  { %v6907_v35 = vpop.f32.mrf.mxu1 }
 0x140   :  { %12177 = vst [vmem:[#allocation5_spill] sm:$0xff] %v6907_v35  ;;  %v7356_v35 = vld [vmem:[%s11875_s4 + $0x110] sm:$0xff] }
 0x141   :  { %v6911_v36 = vpop.f32.mrf.mxu1  ;;  %12226 = vst [vmem:[#allocation53_spill] sm:$0xff] %v7356_v35 }
 0x142   :  { %12178 = vst [vmem:[#allocation6_spill] sm:$0xff] %v6911_v36  ;;  %v7349_v36 = vld [vmem:[%s11875_s4 + $0x118] sm:$0xff] }
 0x143   :  { %v6915_v39 = vpop.f32.mrf.mxu1  ;;  %12225 = vst [vmem:[#allocation52_spill] sm:$0xff] %v7349_v36 }
 0x144   :  { %12179 = vst [vmem:[#allocation7_spill] sm:$0xff] %v6915_v39  ;;  %v7342_v39 = vld [vmem:[%s11875_s4 + $0x120] sm:$0xff] }
 0x145   :  { %v6919_v40 = vpop.f32.mrf.mxu1  ;;  %12224 = vst [vmem:[#allocation51_spill] sm:$0xff] %v7342_v39 }
 0x146   :  { %12180 = vst [vmem:[#allocation8_spill] sm:$0xff] %v6919_v40  ;;  %v7335_v40 = vld [vmem:[%s11875_s4 + $0x128] sm:$0xff] }
 0x147   :  { %v6923_v41 = vpop.f32.mrf.mxu1  ;;  %12223 = vst [vmem:[#allocation50_spill] sm:$0xff] %v7335_v40 }
 0x148   :  { %12181 = vst [vmem:[#allocation9_spill] sm:$0xff] %v6923_v41  ;;  %v7328_v41 = vld [vmem:[%s11875_s4 + $0x130] sm:$0xff] }
 0x149   :  { %v6927_v42 = vpop.f32.mrf.mxu1  ;;  %12222 = vst [vmem:[#allocation49_spill] sm:$0xff] %v7328_v41 }
 0x14a   :  { %12182 = vst [vmem:[#allocation10_spill] sm:$0xff] %v6927_v42  ;;  %v7321_v42 = vld [vmem:[%s11875_s4 + $0x138] sm:$0xff] }
 0x14b   :  { %v6931_v45 = vpop.f32.mrf.mxu1  ;;  %12221 = vst [vmem:[#allocation48_spill] sm:$0xff] %v7321_v42 }
 0x14c   :  { %12183 = vst [vmem:[#allocation11_spill] sm:$0xff] %v6931_v45  ;;  %v7314_v45 = vld [vmem:[%s11875_s4 + $0x140] sm:$0xff] }
 0x14d   :  { %v6935_v46 = vpop.f32.mrf.mxu1  ;;  %12220 = vst [vmem:[#allocation47_spill] sm:$0xff] %v7314_v45 }
 0x14e   :  { %12184 = vst [vmem:[#allocation12_spill] sm:$0xff] %v6935_v46  ;;  %v7307_v46 = vld [vmem:[%s11875_s4 + $0x148] sm:$0xff] }
 0x14f   :  { %v6939_v47 = vpop.f32.mrf.mxu1  ;;  %12219 = vst [vmem:[#allocation46_spill] sm:$0xff] %v7307_v46 }
 0x150   :  { %12185 = vst [vmem:[#allocation13_spill] sm:$0xff] %v6939_v47 }
 0x151   :  { %v6943_v48 = vpop.f32.mrf.mxu1 }
 0x152   :  { %12186 = vst [vmem:[#allocation14_spill] sm:$0xff] %v6943_v48 }
 0x153   :  { %v6947_v51 = vpop.f32.mrf.mxu1 }
 0x154   :  { %12187 = vst [vmem:[#allocation15_spill] sm:$0xff] %v6947_v51 }
 0x155   :  { %v6951_v52 = vpop.f32.mrf.mxu1 }
 0x156   :  { %12188 = vst [vmem:[#allocation16_spill] sm:$0xff] %v6951_v52 }
 0x157   :  { %v6955_v53 = vpop.f32.mrf.mxu1 }
 0x158   :  { %12189 = vst [vmem:[#allocation17_spill] sm:$0xff] %v6955_v53 }
 0x159   :  { %v6959_v54 = vpop.f32.mrf.mxu1 }
 0x15a   :  { %12190 = vst [vmem:[#allocation18_spill] sm:$0xff] %v6959_v54 }
 0x15b   :  { %v6963_v56 = vpop.f32.mrf.mxu1 }
 0x15c   :  { %12191 = vst [vmem:[#allocation19_spill] sm:$0xff] %v6963_v56 }
 0x15d   :  { %v6967_v58 = vpop.f32.mrf.mxu1 }
 0x15e   :  { %12192 = vst [vmem:[#allocation20_spill] sm:$0xff] %v6967_v58 }
 0x15f   :  { %v360_v57 = vpop.f32.mrf.mxu0 }
 0x160   :  { %v6972_v59 = vpop.f32.mrf.mxu1  ;;  %v563_v16 = vadd.f32 %v7006_v4, %v360_v57  ;;  %v7046_v57 = vld [vmem:[%s11875_s4 + $0x58] sm:$0xff] }
 0x161   :  { %12193 = vst [vmem:[#allocation21_spill] sm:$0xff] %v6972_v59  ;;  %v362_v11 = vpop.f32.mrf.mxu0 }
 0x162   :  { %v6974_v60 = vpop.f32.mrf.mxu1  ;;  %v564_v18 = vadd.f32 %v7010_v15, %v362_v11  ;;  %v7063_v11 = vld [vmem:[%s11875_s4 + $0x40] sm:$0xff] }
 0x163   :  { %12194 = vst [vmem:[#allocation22_spill] sm:$0xff] %v6974_v60  ;;  %v366_v60 = vpop.f32.mrf.mxu0 }
 0x164   :  { %v6976_v61 = vpop.f32.mrf.mxu1  ;;  %v565_v58 = vadd.f32 %v7006_v4, %v366_v60  ;;  %v7288_v60 = vld [vmem:[%s11875_s4 + $0x160] sm:$0xff] }
 0x165   :  { %12195 = vst [vmem:[#allocation23_spill] sm:$0xff] %v6976_v61  ;;  %v7183_v61 = vld [vmem:[%s11875_s4 + $0x1a0] sm:$0xff]  ;;  %v368_v59 = vpop.f32.mrf.mxu0  ;;  %12216 = vst [vmem:[#allocation43_spill] sm:$0xff] %v7288_v60 }
 0x166   :  { %v6978_v0 = vpop.f32.mrf.mxu1  ;;  %v566_v54 = vadd.f32 %v7010_v15, %v368_v59  ;;  %v7283_v59 = vld [vmem:[%s11875_s4 + $0x168] sm:$0xff] }
 0x167   :  { %12196 = vst [vmem:[#allocation24_spill] sm:$0xff] %v6978_v0  ;;  %v7177_v0 = vld [vmem:[%s11875_s4 + $0x1a8] sm:$0xff]  ;;  %12215 = vst [vmem:[#allocation42_spill] sm:$0xff] %v7283_v59 }
 0x168   :  { %v6980_v1 = vpop.f32.mrf.mxu1 }
 0x169   :  { %12197 = vst [vmem:[#allocation25_spill] sm:$0xff] %v6980_v1  ;;  %v7171_v1 = vld [vmem:[%s11875_s4 + $0x1b0] sm:$0xff] }
 0x16a   :  { %v6982_v2 = vpop.f32.mrf.mxu1 }
 0x16b   :  { %12198 = vst [vmem:[#allocation26_spill] sm:$0xff] %v6982_v2  ;;  %v7165_v2 = vld [vmem:[%s11875_s4 + $0x1b8] sm:$0xff] }
 0x16c   :  { %v6984_v6 = vpop.f32.mrf.mxu1 }
 0x16d   :  { %12199 = vst [vmem:[#allocation27_spill] sm:$0xff] %v6984_v6  ;;  %v7159_v6 = vld [vmem:[%s11875_s4 + $0x1c0] sm:$0xff] }
 0x16e   :  { %v6986_v13 = vpop.f32.mrf.mxu1 }
 0x16f   :  { %12200 = vst [vmem:[#allocation28_spill] sm:$0xff] %v6986_v13  ;;  %v7153_v13 = vld [vmem:[%s11875_s4 + $0x1c8] sm:$0xff] }
 0x170   :  { %v6988_v14 = vpop.f32.mrf.mxu1 }
 0x171   :  { %12201 = vst [vmem:[#allocation29_spill] sm:$0xff] %v6988_v14  ;;  %v7147_v14 = vld [vmem:[%s11875_s4 + $0x1d0] sm:$0xff] }
 0x172   :  { %v6990_v19 = vpop.f32.mrf.mxu1 }
 0x173   :  { %12202 = vst [vmem:[#allocation30_spill] sm:$0xff] %v6990_v19  ;;  %v7141_v19 = vld [vmem:[%s11875_s4 + $0x1d8] sm:$0xff] }
 0x174   :  { %v6992_v20 = vpop.f32.mrf.mxu1 }
 0x175   :  { %12203 = vst [vmem:[#allocation31_spill] sm:$0xff] %v6992_v20  ;;  %v7135_v20 = vld [vmem:[%s11875_s4 + $0x1e0] sm:$0xff] }
 0x176   :  { %v6995_v32 = vpop.f32.mrf.mxu1 }
 0x177   :  { %12205 = vst [vmem:[#allocation32_spill] sm:$0xff] %v6995_v32  ;;  %v7129_v32 = vld [vmem:[%s11875_s4 + $0x1e8] sm:$0xff] }
 0x178   :  { %v6997_v37 = vpop.f32.mrf.mxu1 }
 0x179   :  { %12206 = vst [vmem:[#allocation33_spill] sm:$0xff] %v6997_v37  ;;  %v7111_v37 = vld [vmem:[%s11875_s4] sm:$0xff] }
 0x17a   :  { %v6999_v44 = vpop.f32.mrf.mxu1 }
 0x17b   :  { %12207 = vst [vmem:[#allocation34_spill] sm:$0xff] %v6999_v44 }
 0x17c   :  { %v7004_v49 = vpop.f32.mrf.mxu1 }
 0x17d   :  { %12208 = vst [vmem:[#allocation35_spill] sm:$0xff] %v7004_v49 }
 0x17e   :  { %v7008_v12 = vpop.f32.mrf.mxu1 }
 0x17f   :  { %12209 = vst [vmem:[#allocation36_spill] sm:$0xff] %v7008_v12  ;;  %v7105_v12 = vld [vmem:[%s11875_s4 + $0x8] sm:$0xff] }
 0x180   :  { %v825_v17 = vpop.f32.mrf.mxu1 }
 0x181   :  { %v830_v21 = vadd.f32 %v825_v17, %v563_v16  ;;  %v7069_v16 = vld [vmem:[%s11875_s4 + $0x38] sm:$0xff]  ;;  %v7075_v17 = vld [vmem:[%s11875_s4 + $0x30] sm:$0xff] }
 0x182   :  { %v827_v26 = vpop.f32.mrf.mxu1 }
 0x183   :  { %v831_v31 = vadd.f32 %v827_v26, %v564_v18  ;;  %v7081_v18 = vld [vmem:[%s11875_s4 + $0x28] sm:$0xff]  ;;  %v7093_v26 = vld [vmem:[%s11875_s4 + $0x18] sm:$0xff] }
 0x185   :  { %5837 = vtanh.f32 %v831_v31  ;;  %v7099_v31 = vld [vmem:[%s11875_s4 + $0x10] sm:$0xff] }
 0x186   :  { %5839 = vtanh.f32 %v830_v21  ;;  %v7087_v21 = vld [vmem:[%s11875_s4 + $0x20] sm:$0xff] }
 0x192   :  { %v7014_v44 = vpop.eup %5837 }
 0x193   :  { %12210 = vst [vmem:[#allocation37_spill] sm:$0xff] %v7014_v44  ;;  %v7016_v49 = vpop.eup %5839  ;;  %967 = vmatprep.mubr.f32.mxu1 %v7014_v44  ;;  %v7123_v44 = vld [vmem:[%s11875_s4 + $0x1f0] sm:$0xff] }
 0x194   :  { %12211 = vst [vmem:[#allocation38_spill] sm:$0xff] %v7016_v49  ;;  %968 = vmatmul.mubr.f32.vlgmr.msra.gmra.mxu1 %v7016_v49  ;;  %v7117_v49 = vld [vmem:[%s11875_s4 + $0x1f8] sm:$0xff] }
 0x195   :  { %1194 = vmatpush1.msra.mxu1 %v6787_v23 }
 0x196   :  { %1195 = vmatprep.subr.mxu1 %v6792_v24 }
 0x197   :  { %1196 = vmatpush1.msra.mxu1 %v6798_v27 }
 0x198   :  { %1197 = vmatprep.subr.mxu1 %v6805_v28 }
 0x199   :  { %1198 = vmatpush1.msra.mxu1 %v6811_v29 }
 0x19a   :  { %1199 = vmatprep.subr.mxu1 %v6817_v30 }
 0x19b   :  { %1200 = vmatpush1.msra.mxu1 %v6823_v33 }
 0x19c   :  { %1201 = vmatprep.subr.mxu1 %v6829_v34 }
 0x19d   :  { %1202 = vmatpush1.msra.mxu1 %v6835_v63 }
 0x19e   :  { %1203 = vmatprep.subr.mxu1 %v6841_v38 }
 0x19f   :  { %1204 = vmatpush1.msra.mxu1 %v6847_v43 }
 0x1a0   :  { %1205 = vmatprep.subr.mxu1 %v6853_v7 }
 0x1a1   :  { %1206 = vmatpush1.msra.mxu1 %v6859_v5 }
 0x1a2   :  { %1207 = vmatprep.subr.mxu1 %v6865_v62 }
 0x1a3   :  { %1208 = vmatpush1.msra.mxu1 %v6871_v3 }
 0x1a4   :  { %1209 = vmatprep.subr.mxu1 %v6877_v8 }
 0x1a5   :  { %1210 = vmatpush1.msra.mxu1 %v6883_v9 }
 0x1a6   :  { %1211 = vmatprep.subr.mxu1 %v6889_v50 }
 0x1a7   :  { %1212 = vmatpush1.msra.mxu1 %v7041_v55 }
 0x1a8   :  { %1213 = vmatprep.subr.mxu1 %v7046_v57 }
 0x1a9   :  { %1214 = vmatpush1.msra.mxu1 %v7051_v25 }
 0x1aa   :  { %1215 = vmatprep.subr.mxu1 %v7057_v10 }
 0x1ab   :  { %1216 = vmatpush1.msra.mxu1 %v7063_v11 }
 0x1ac   :  { %1217 = vmatprep.subr.mxu1 %v7069_v16 }
 0x1ad   :  { %1218 = vmatpush1.msra.mxu1 %v7075_v17 }
 0x1ae   :  { %1219 = vmatprep.subr.mxu1 %v7081_v18 }
 0x1af   :  { %1220 = vmatpush1.msra.mxu1 %v7087_v21 }
 0x1b0   :  { %1221 = vmatprep.subr.mxu1 %v7093_v26 }
 0x1b1   :  { %1222 = vmatpush1.msra.mxu1 %v7099_v31 }
 0x1b2   :  { %1223 = vmatprep.subr.mxu1 %v7105_v12 }
 0x1b3   :  { %1224 = vmatpush1.msra.mxu1 %v7111_v37 }
 0x1b4   :  { %1225 = vmatprep.subr.mxu1 %v7117_v49 }
 0x1b5   :  { %1226 = vmatpush2.msra.mxu1 %v7123_v44 }
 0x1b6   :  { %1227 = vmatprep.subr.mxu1 %v7129_v32 }
 0x1b7   :  { %1228 = vmatpush2.msra.mxu1 %v7135_v20 }
 0x1b8   :  { %1229 = vmatprep.subr.mxu1 %v7141_v19 }
 0x1b9   :  { %1230 = vmatpush2.msra.mxu1 %v7147_v14 }
 0x1ba   :  { %1231 = vmatprep.subr.mxu1 %v7153_v13 }
 0x1bb   :  { %1232 = vmatpush2.msra.mxu1 %v7159_v6 }
 0x1bc   :  { %1233 = vmatprep.subr.mxu1 %v7165_v2 }
 0x1bd   :  { %1234 = vmatpush2.msra.mxu1 %v7171_v1 }
 0x1be   :  { %1235 = vmatprep.subr.mxu1 %v7177_v0 }
 0x1bf   :  { %1236 = vmatpush2.msra.mxu1 %v7183_v61 }
 0x254   :  { %v969_v56 = vpop.f32.mrf.mxu1 }
 0x255   :  { %v974_v53 = vadd.f32 %v969_v56, %v565_v58  ;;  %v7269_v56 = vld [vmem:[%s11875_s4 + $0x178] sm:$0xff]  ;;  %v7276_v58 = vld [vmem:[%s11875_s4 + $0x170] sm:$0xff] }
 0x256   :  { %v971_v52 = vpop.f32.mrf.mxu1  ;;  %12214 = vst [vmem:[#allocation41_spill] sm:$0xff] %v7276_v58 }
 0x257   :  { %v975_v51 = vadd.f32 %v971_v52, %v566_v54  ;;  %v7248_v52 = vld [vmem:[%s11875_s4 + $0x190] sm:$0xff]  ;;  %v7262_v54 = vld [vmem:[%s11875_s4 + $0x180] sm:$0xff] }
 0x259   :  { %5841 = vtanh.f32 %v975_v51  ;;  %v7242_v51 = vld [vmem:[%s11875_s4 + $0x198] sm:$0xff] }
 0x25a   :  { %5843 = vtanh.f32 %v974_v53  ;;  %1237 = vmatprep.subr.mxu1 %v7242_v51  ;;  %v7255_v53 = vld [vmem:[%s11875_s4 + $0x188] sm:$0xff] }
 0x25b   :  { %1238 = vmatpush2.msra.mxu1 %v7248_v52 }
 0x25c   :  { %1239 = vmatprep.subr.mxu1 %v7255_v53 }
 0x25d   :  { %1240 = vmatpush2.msra.mxu1 %v7262_v54 }
 0x25e   :  { %1241 = vmatprep.subr.mxu1 %v7269_v56 }
 0x25f   :  { %1242 = vmatpush2.msra.mxu1 %v7276_v58 }
 0x260   :  { %1243 = vmatprep.subr.mxu1 %v7283_v59 }
 0x261   :  { %1244 = vmatpush2.msra.mxu1 %v7288_v60 }
 0x266   :  { %v7190_v48 = vpop.eup %5841 }
 0x267   :  { %12212 = vst [vmem:[#allocation39_spill] sm:$0xff] %v7190_v48  ;;  %v7192_v47 = vpop.eup %5843  ;;  %1112 = vmatprep.mubr.f32.mxu0 %v7190_v48  ;;  %v7300_v48 = vld [vmem:[%s11875_s4 + $0x150] sm:$0xff] }
 0x268   :  { %12213 = vst [vmem:[#allocation40_spill] sm:$0xff] %v7192_v47  ;;  %1113 = vmatmul.mubr.f32.vlgmr.msra.gmra.mxu0 %v7192_v47  ;;  %v7293_v47 = vld [vmem:[%s11875_s4 + $0x158] sm:$0xff]  ;;  %12218 = vst [vmem:[#allocation45_spill] sm:$0xff] %v7300_v48 }
 0x269   :  { %1339 = vmatpush1.msra.mxu0 %v6787_v23  ;;  %12217 = vst [vmem:[#allocation44_spill] sm:$0xff] %v7293_v47  ;;  %1245 = vmatprep.subr.mxu1 %v7293_v47 }
 0x26a   :  { %1340 = vmatprep.subr.mxu0 %v6792_v24  ;;  %1246 = vmatpush2.msra.mxu1 %v7300_v48 }
 0x26b   :  { %1341 = vmatpush1.msra.mxu0 %v6798_v27  ;;  %1247 = vmatprep.subr.mxu1 %v7307_v46 }
 0x26c   :  { %1342 = vmatprep.subr.mxu0 %v6805_v28  ;;  %1248 = vmatpush2.msra.mxu1 %v7314_v45 }
 0x26d   :  { %1343 = vmatpush1.msra.mxu0 %v6811_v29  ;;  %1249 = vmatprep.subr.mxu1 %v7321_v42 }
 0x26e   :  { %1344 = vmatprep.subr.mxu0 %v6817_v30  ;;  %1250 = vmatpush2.msra.mxu1 %v7328_v41 }
 0x26f   :  { %1345 = vmatpush1.msra.mxu0 %v6823_v33  ;;  %1251 = vmatprep.subr.mxu1 %v7335_v40 }
 0x270   :  { %1346 = vmatprep.subr.mxu0 %v6829_v34  ;;  %1252 = vmatpush2.msra.mxu1 %v7342_v39 }
 0x271   :  { %1347 = vmatpush1.msra.mxu0 %v6835_v63  ;;  %1253 = vmatprep.subr.mxu1 %v7349_v36 }
 0x272   :  { %1348 = vmatprep.subr.mxu0 %v6841_v38  ;;  %1254 = vmatpush2.msra.mxu1 %v7356_v35 }
 0x273   :  { %1349 = vmatpush1.msra.mxu0 %v6847_v43 }
 0x274   :  { %1350 = vmatprep.subr.mxu0 %v6853_v7 }
 0x275   :  { %1351 = vmatpush1.msra.mxu0 %v6859_v5 }
 0x276   :  { %1352 = vmatprep.subr.mxu0 %v6865_v62 }
 0x277   :  { %1353 = vmatpush1.msra.mxu0 %v6871_v3 }
 0x278   :  { %1354 = vmatprep.subr.mxu0 %v6877_v8 }
 0x279   :  { %1355 = vmatpush1.msra.mxu0 %v6883_v9 }
 0x27a   :  { %1356 = vmatprep.subr.mxu0 %v6889_v50 }
 0x27b   :  { %1357 = vmatpush1.msra.mxu0 %v7041_v55 }
 0x27c   :  { %1358 = vmatprep.subr.mxu0 %v7046_v57 }
 0x27d   :  { %1359 = vmatpush1.msra.mxu0 %v7051_v25 }
 0x27e   :  { %1360 = vmatprep.subr.mxu0 %v7057_v10 }
 0x27f   :  { %1361 = vmatpush1.msra.mxu0 %v7063_v11 }
 0x280   :  { %1362 = vmatprep.subr.mxu0 %v7069_v16 }
 0x281   :  { %1363 = vmatpush1.msra.mxu0 %v7075_v17 }
 0x282   :  { %1364 = vmatprep.subr.mxu0 %v7081_v18 }
 0x283   :  { %1365 = vmatpush1.msra.mxu0 %v7087_v21 }
 0x284   :  { %1366 = vmatprep.subr.mxu0 %v7093_v26 }
 0x285   :  { %1367 = vmatpush1.msra.mxu0 %v7099_v31 }
 0x286   :  { %1368 = vmatprep.subr.mxu0 %v7105_v12 }
 0x287   :  { %1369 = vmatpush1.msra.mxu0 %v7111_v37 }
 0x288   :  { %1370 = vmatprep.subr.mxu0 %v7117_v49 }
 0x289   :  { %1371 = vmatpush2.msra.mxu0 %v7123_v44 }
 0x28a   :  { %1372 = vmatprep.subr.mxu0 %v7129_v32 }
 0x28b   :  { %1373 = vmatpush2.msra.mxu0 %v7135_v20 }
 0x28c   :  { %1374 = vmatprep.subr.mxu0 %v7141_v19 }
 0x28d   :  { %1375 = vmatpush2.msra.mxu0 %v7147_v14 }
 0x28e   :  { %1376 = vmatprep.subr.mxu0 %v7153_v13 }
 0x28f   :  { %1377 = vmatpush2.msra.mxu0 %v7159_v6 }
 0x290   :  { %1378 = vmatprep.subr.mxu0 %v7165_v2 }
 0x291   :  { %1379 = vmatpush2.msra.mxu0 %v7171_v1 }
 0x292   :  { %1380 = vmatprep.subr.mxu0 %v7177_v0 }
 0x293   :  { %1381 = vmatpush2.msra.mxu0 %v7183_v61 }
 0x294   :  { %1382 = vmatprep.subr.mxu0 %v7242_v51 }
 0x295   :  { %1383 = vmatpush2.msra.mxu0 %v7248_v52 }
 0x296   :  { %1384 = vmatprep.subr.mxu0 %v7255_v53 }
 0x297   :  { %1385 = vmatpush2.msra.mxu0 %v7262_v54 }
 0x298   :  { %1386 = vmatprep.subr.mxu0 %v7269_v56 }
 0x299   :  { %1387 = vmatpush2.msra.mxu0 %v7276_v58 }
 0x29a   :  { %1388 = vmatprep.subr.mxu0 %v7283_v59 }
 0x29b   :  { %1389 = vmatpush2.msra.mxu0 %v7288_v60 }
 0x29c   :  { %1390 = vmatprep.subr.mxu0 %v7293_v47 }
 0x29d   :  { %1391 = vmatpush2.msra.mxu0 %v7300_v48 }
 0x29e   :  { %1392 = vmatprep.subr.mxu0 %v7307_v46 }
 0x29f   :  { %1393 = vmatpush2.msra.mxu0 %v7314_v45 }
 0x2a0   :  { %1394 = vmatprep.subr.mxu0 %v7321_v42  ;;  %v7363_v42 = vld [vmem:[%s11875_s4 + $0x108] sm:$0xff] }
 0x2a1   :  { %1395 = vmatpush2.msra.mxu0 %v7328_v41  ;;  %12227 = vst [vmem:[#allocation54_spill] sm:$0xff] %v7363_v42  ;;  %v7370_v41 = vld [vmem:[%s11875_s4 + $0x100] sm:$0xff]  ;;  %1255 = vmatprep.subr.mxu1 %v7363_v42 }
 0x2a2   :  { %1396 = vmatprep.subr.mxu0 %v7335_v40  ;;  %12228 = vst [vmem:[#allocation55_spill] sm:$0xff] %v7370_v41  ;;  %v372_v40 = vpop.f32.mrf.mxu0  ;;  %1256 = vmatpush2.msra.mxu1 %v7370_v41 }
 0x2a3   :  { %1397 = vmatpush2.msra.mxu0 %v7342_v39  ;;  %1483 = vmatprep.subr.mxu1 %v6782_v22 }
 0x2a4   :  { %1398 = vmatprep.subr.mxu0 %v7349_v36  ;;  %v374_v39 = vpop.f32.mrf.mxu0 }
 0x2a5   :  { %1399 = vmatpush2.msra.mxu0 %v7356_v35 }
 0x2a6   :  { %1400 = vmatprep.subr.mxu0 %v7363_v42  ;;  %v7380_v45 = vpop.f32.mrf.mxu0 }
 0x2a7   :  { %1401 = vmatpush2.msra.mxu0 %v7370_v41  ;;  %12229 = vst [vmem:[#allocation56_spill] sm:$0xff] %v7380_v45 }
 0x2a8   :  { %v7382_v46 = vpop.f32.mrf.mxu0 }
 0x2a9   :  { %12230 = vst [vmem:[#allocation57_spill] sm:$0xff] %v7382_v46 }
 0x2aa   :  { %v7384_v36 = vpop.f32.mrf.mxu0 }
 0x2ab   :  { %12231 = vst [vmem:[#allocation58_spill] sm:$0xff] %v7384_v36 }
 0x2ac   :  { %v7386_v48 = vpop.f32.mrf.mxu0 }
 0x2ad   :  { %12232 = vst [vmem:[#allocation59_spill] sm:$0xff] %v7386_v48 }
 0x2ae   :  { %v7388_v35 = vpop.f32.mrf.mxu0 }
 0x2af   :  { %12233 = vst [vmem:[#allocation60_spill] sm:$0xff] %v7388_v35 }
 0x2b0   :  { %v7390_v47 = vpop.f32.mrf.mxu0 }
 0x2b1   :  { %12234 = vst [vmem:[#allocation61_spill] sm:$0xff] %v7390_v47 }
 0x2b2   :  { %v7392_v42 = vpop.f32.mrf.mxu0 }
 0x2b3   :  { %12235 = vst [vmem:[#allocation62_spill] sm:$0xff] %v7392_v42 }
 0x2b4   :  { %v7394_v60 = vpop.f32.mrf.mxu0 }
 0x2b5   :  { %12236 = vst [vmem:[#allocation63_spill] sm:$0xff] %v7394_v60 }
 0x2b6   :  { %v7396_v41 = vpop.f32.mrf.mxu0 }
 0x2b7   :  { %12237 = vst [vmem:[#allocation64_spill] sm:$0xff] %v7396_v41 }
 0x2b8   :  { %v7398_v22 = vpop.f32.mrf.mxu0 }
 0x2b9   :  { %12238 = vst [vmem:[#allocation65_spill] sm:$0xff] %v7398_v22 }
 0x2ba   :  { %v7400_v59 = vpop.f32.mrf.mxu0 }
 0x2bb   :  { %12239 = vst [vmem:[#allocation66_spill] sm:$0xff] %v7400_v59 }
 0x2bc   :  { %v7402_v45 = vpop.f32.mrf.mxu0 }
 0x2bd   :  { %12240 = vst [vmem:[#allocation67_spill] sm:$0xff] %v7402_v45 }
 0x2be   :  { %v7404_v46 = vpop.f32.mrf.mxu0 }
 0x2bf   :  { %12241 = vst [vmem:[#allocation68_spill] sm:$0xff] %v7404_v46 }
 0x2c0   :  { %v7406_v36 = vpop.f32.mrf.mxu0 }
 0x2c1   :  { %12242 = vst [vmem:[#allocation69_spill] sm:$0xff] %v7406_v36 }
 0x2c2   :  { %v7408_v48 = vpop.f32.mrf.mxu0 }
 0x2c3   :  { %12243 = vst [vmem:[#allocation70_spill] sm:$0xff] %v7408_v48 }
 0x2c4   :  { %v7410_v35 = vpop.f32.mrf.mxu0 }
 0x2c5   :  { %12244 = vst [vmem:[#allocation71_spill] sm:$0xff] %v7410_v35 }
 0x2c6   :  { %v7412_v47 = vpop.f32.mrf.mxu0 }
 0x2c7   :  { %12245 = vst [vmem:[#allocation72_spill] sm:$0xff] %v7412_v47  ;;  %v567_v47 = vadd.f32 %v7006_v4, %v372_v40 }
 0x2c8   :  { %v7414_v42 = vpop.f32.mrf.mxu0 }
 0x2c9   :  { %12246 = vst [vmem:[#allocation73_spill] sm:$0xff] %v7414_v42  ;;  %v568_v42 = vadd.f32 %v7010_v15, %v374_v39 }
 0x2ca   :  { %v7416_v60 = vpop.f32.mrf.mxu0 }
 0x2cb   :  { %12247 = vst [vmem:[#allocation74_spill] sm:$0xff] %v7416_v60 }
 0x2cc   :  { %v7418_v41 = vpop.f32.mrf.mxu0 }
 0x2cd   :  { %12248 = vst [vmem:[#allocation75_spill] sm:$0xff] %v7418_v41 }
 0x2ce   :  { %v7420_v22 = vpop.f32.mrf.mxu0 }
 0x2cf   :  { %12249 = vst [vmem:[#allocation76_spill] sm:$0xff] %v7420_v22 }
 0x2d0   :  { %v7422_v59 = vpop.f32.mrf.mxu0 }
 0x2d1   :  { %12250 = vst [vmem:[#allocation77_spill] sm:$0xff] %v7422_v59 }
 0x2d2   :  { %v7424_v45 = vpop.f32.mrf.mxu0 }
 0x2d3   :  { %12251 = vst [vmem:[#allocation78_spill] sm:$0xff] %v7424_v45  ;;  %v7611_v45 = vld [vmem:[%s11875_s4 + $0x78] sm:$0xff] }
 0x2d4   :  { %v7426_v46 = vpop.f32.mrf.mxu0 }
 0x2d5   :  { %12252 = vst [vmem:[#allocation79_spill] sm:$0xff] %v7426_v46  ;;  %v7605_v46 = vld [vmem:[%s11875_s4 + $0x80] sm:$0xff] }
 0x2d6   :  { %v7428_v36 = vpop.f32.mrf.mxu0 }
 0x2d7   :  { %12253 = vst [vmem:[#allocation80_spill] sm:$0xff] %v7428_v36  ;;  %v7599_v36 = vld [vmem:[%s11875_s4 + $0x88] sm:$0xff] }
 0x2d8   :  { %v7430_v48 = vpop.f32.mrf.mxu0 }
 0x2d9   :  { %12254 = vst [vmem:[#allocation81_spill] sm:$0xff] %v7430_v48  ;;  %v7593_v48 = vld [vmem:[%s11875_s4 + $0x90] sm:$0xff] }
 0x328   :  { %v1114_v35 = vpop.f32.mrf.mxu0 }
 0x329   :  { %v1119_v60 = vadd.f32 %v1114_v35, %v567_v47  ;;  %v12273_v35 = vld [vmem:[#allocation57_spill] sm:$0xff] }
 0x32a   :  { %v1116_v58 = vpop.f32.mrf.mxu0  ;;  %v570_v39 = vadd.f32 %v7010_v15, %v12273_v35  ;;  %v7539_v35 = vld [vmem:[%s11875_s4 + $0xd8] sm:$0xff] }
 0x32b   :  { %v1120_v41 = vadd.f32 %v1116_v58, %v568_v42 }
 0x32d   :  { %5845 = vtanh.f32 %v1120_v41 }
 0x32e   :  { %5847 = vtanh.f32 %v1119_v60  ;;  %v7516_v60 = vld [vmem:[%s11875_s4 + $0xf8] sm:$0xff] }
 0x32f   :  { %1628 = vmatprep.subr.mxu0 %v7516_v60 }
 0x33a   :  { %v7434_v22 = vpop.eup %5845 }
 0x33b   :  { %12255 = vst [vmem:[#allocation82_spill] sm:$0xff] %v7434_v22  ;;  %v7436_v59 = vpop.eup %5847  ;;  %1257 = vmatprep.mubr.f32.mxu1 %v7434_v22  ;;  %v7587_v22 = vld [vmem:[%s11875_s4 + $0x98] sm:$0xff] }
 0x33c   :  { %12256 = vst [vmem:[#allocation83_spill] sm:$0xff] %v7436_v59  ;;  %1258 = vmatmul.mubr.f32.vlgmr.msra.gmra.mxu1 %v7436_v59  ;;  %v7581_v59 = vld [vmem:[%s11875_s4 + $0xa0] sm:$0xff] }
 0x33d   :  { %1484 = vmatpush1.msra.mxu1 %v6787_v23  ;;  %v12258_v23 = vld [vmem:[#allocation42_spill] sm:$0xff] }
 0x33e   :  { %1485 = vmatprep.subr.mxu1 %v6792_v24  ;;  %v12259_v24 = vld [vmem:[#allocation43_spill] sm:$0xff] }
 0x33f   :  { %1486 = vmatpush1.msra.mxu1 %v6798_v27  ;;  %v12260_v27 = vld [vmem:[#allocation44_spill] sm:$0xff]  ;;  %12276 = vst [vmem:[#allocation43_spill] sm:$0xff] %v7581_v59 }
 0x340   :  { %1487 = vmatprep.subr.mxu1 %v6805_v28  ;;  %v12261_v28 = vld [vmem:[#allocation45_spill] sm:$0xff]  ;;  %12277 = vst [vmem:[#allocation44_spill] sm:$0xff] %v7587_v22 }
 0x341   :  { %1488 = vmatpush1.msra.mxu1 %v6811_v29  ;;  %v12262_v29 = vld [vmem:[#allocation46_spill] sm:$0xff] }
 0x342   :  { %1489 = vmatprep.subr.mxu1 %v6817_v30  ;;  %v12263_v30 = vld [vmem:[#allocation47_spill] sm:$0xff] }
 0x343   :  { %1490 = vmatpush1.msra.mxu1 %v6823_v33  ;;  %v12264_v33 = vld [vmem:[#allocation48_spill] sm:$0xff] }
 0x344   :  { %1491 = vmatprep.subr.mxu1 %v6829_v34  ;;  %v12265_v34 = vld [vmem:[#allocation49_spill] sm:$0xff] }
 0x345   :  { %1492 = vmatpush1.msra.mxu1 %v6835_v63  ;;  %v12266_v63 = vld [vmem:[#allocation50_spill] sm:$0xff] }
 0x346   :  { %1493 = vmatprep.subr.mxu1 %v6841_v38  ;;  %v12267_v38 = vld [vmem:[#allocation51_spill] sm:$0xff] }
 0x347   :  { %1494 = vmatpush1.msra.mxu1 %v6847_v43  ;;  %v12268_v43 = vld [vmem:[#allocation52_spill] sm:$0xff] }
 0x348   :  { %1495 = vmatprep.subr.mxu1 %v6853_v7  ;;  %v12269_v7 = vld [vmem:[#allocation53_spill] sm:$0xff] }
 0x349   :  { %1496 = vmatpush1.msra.mxu1 %v6859_v5  ;;  %v12270_v5 = vld [vmem:[#allocation54_spill] sm:$0xff] }
 0x34a   :  { %1497 = vmatprep.subr.mxu1 %v6865_v62  ;;  %v12271_v62 = vld [vmem:[#allocation55_spill] sm:$0xff] }
 0x34b   :  { %1498 = vmatpush1.msra.mxu1 %v6871_v3  ;;  %v12272_v3 = vld [vmem:[#allocation56_spill] sm:$0xff] }
 0x34c   :  { %1499 = vmatprep.subr.mxu1 %v6877_v8  ;;  %v569_v8 = vadd.f32 %v7006_v4, %v12272_v3  ;;  %v7521_v3 = vld [vmem:[%s11875_s4 + $0xf0] sm:$0xff] }
 0x34d   :  { %1500 = vmatpush1.msra.mxu1 %v6883_v9 }
 0x34e   :  { %1501 = vmatprep.subr.mxu1 %v6889_v50  ;;  %v12257_v50 = vld [vmem:[#allocation41_spill] sm:$0xff] }
 0x34f   :  { %1502 = vmatpush1.msra.mxu1 %v7041_v55 }
 0x350   :  { %1503 = vmatprep.subr.mxu1 %v7046_v57 }
 0x351   :  { %1504 = vmatpush1.msra.mxu1 %v7051_v25 }
 0x352   :  { %1505 = vmatprep.subr.mxu1 %v7057_v10 }
 0x353   :  { %1506 = vmatpush1.msra.mxu1 %v7063_v11 }
 0x354   :  { %1507 = vmatprep.subr.mxu1 %v7069_v16 }
 0x355   :  { %1508 = vmatpush1.msra.mxu1 %v7075_v17 }
 0x356   :  { %1509 = vmatprep.subr.mxu1 %v7081_v18 }
 0x357   :  { %1510 = vmatpush1.msra.mxu1 %v7087_v21 }
 0x358   :  { %1511 = vmatprep.subr.mxu1 %v7093_v26 }
 0x359   :  { %1512 = vmatpush1.msra.mxu1 %v7099_v31 }
 0x35a   :  { %1513 = vmatprep.subr.mxu1 %v7105_v12 }
 0x35b   :  { %1514 = vmatpush1.msra.mxu1 %v7111_v37 }
 0x35c   :  { %1515 = vmatprep.subr.mxu1 %v7117_v49 }
 0x35d   :  { %1516 = vmatpush2.msra.mxu1 %v7123_v44 }
 0x35e   :  { %1517 = vmatprep.subr.mxu1 %v7129_v32 }
 0x35f   :  { %1518 = vmatpush2.msra.mxu1 %v7135_v20 }
 0x360   :  { %1519 = vmatprep.subr.mxu1 %v7141_v19 }
 0x361   :  { %1520 = vmatpush2.msra.mxu1 %v7147_v14 }
 0x362   :  { %1521 = vmatprep.subr.mxu1 %v7153_v13 }
 0x363   :  { %1522 = vmatpush2.msra.mxu1 %v7159_v6 }
 0x364   :  { %1523 = vmatprep.subr.mxu1 %v7165_v2 }
 0x365   :  { %1524 = vmatpush2.msra.mxu1 %v7171_v1 }
 0x366   :  { %1525 = vmatprep.subr.mxu1 %v7177_v0 }
 0x367   :  { %1526 = vmatpush2.msra.mxu1 %v7183_v61 }
 0x368   :  { %1527 = vmatprep.subr.mxu1 %v7242_v51 }
 0x369   :  { %1528 = vmatpush2.msra.mxu1 %v7248_v52 }
 0x36a   :  { %1529 = vmatprep.subr.mxu1 %v7255_v53 }
 0x36b   :  { %1530 = vmatpush2.msra.mxu1 %v7262_v54 }
 0x36c   :  { %1531 = vmatprep.subr.mxu1 %v7269_v56 }
 0x36d   :  { %1532 = vmatpush2.msra.mxu1 %v12257_v50 }
 0x36e   :  { %1533 = vmatprep.subr.mxu1 %v12258_v23 }
 0x36f   :  { %1534 = vmatpush2.msra.mxu1 %v12259_v24 }
 0x370   :  { %1535 = vmatprep.subr.mxu1 %v12260_v27 }
 0x371   :  { %1536 = vmatpush2.msra.mxu1 %v12261_v28 }
 0x372   :  { %1537 = vmatprep.subr.mxu1 %v12262_v29 }
 0x373   :  { %1538 = vmatpush2.msra.mxu1 %v12263_v30 }
 0x374   :  { %1539 = vmatprep.subr.mxu1 %v12264_v33 }
 0x375   :  { %1540 = vmatpush2.msra.mxu1 %v12265_v34 }
 0x376   :  { %1541 = vmatprep.subr.mxu1 %v12266_v63 }
 0x377   :  { %1542 = vmatpush2.msra.mxu1 %v12267_v38 }
 0x378   :  { %1543 = vmatprep.subr.mxu1 %v12268_v43 }
 0x379   :  { %1544 = vmatpush2.msra.mxu1 %v12269_v7 }
 0x37a   :  { %1545 = vmatprep.subr.mxu1 %v12270_v5 }
 0x37b   :  { %1546 = vmatpush2.msra.mxu1 %v12271_v62 }
 0x37c   :  { %1773 = vmatprep.subr.mxu1 %v7516_v60 }
 0x3fc   :  { %v1259_v9 = vpop.f32.mrf.mxu1 }
 0x3fd   :  { %v1264_v40 = vadd.f32 %v1259_v9, %v569_v8  ;;  %v7526_v8 = vld [vmem:[%s11875_s4 + $0xe8] sm:$0xff]  ;;  %v7532_v9 = vld [vmem:[%s11875_s4 + $0xe0] sm:$0xff] }
 0x3fe   :  { %v1261_v41 = vpop.f32.mrf.mxu1 }
 0x3ff   :  { %v1265_v42 = vadd.f32 %v1261_v41, %v570_v39  ;;  %v7545_v39 = vld [vmem:[%s11875_s4 + $0xd0] sm:$0xff]  ;;  %v7557_v41 = vld [vmem:[%s11875_s4 + $0xc0] sm:$0xff] }
 0x401   :  { %5849 = vtanh.f32 %v1265_v42  ;;  %v7563_v42 = vld [vmem:[%s11875_s4 + $0xb8] sm:$0xff] }
 0x402   :  { %5851 = vtanh.f32 %v1264_v40  ;;  %v7551_v40 = vld [vmem:[%s11875_s4 + $0xc8] sm:$0xff] }
 0x40e   :  { %v7507_v47 = vpop.eup %5849 }
 0x40f   :  { %12274 = vst [vmem:[#allocation41_spill] sm:$0xff] %v7507_v47  ;;  %v7509_v58 = vpop.eup %5851  ;;  %1402 = vmatprep.mubr.f32.mxu0 %v7507_v47  ;;  %v7575_v47 = vld [vmem:[%s11875_s4 + $0xa8] sm:$0xff] }
 0x410   :  { %12275 = vst [vmem:[#allocation42_spill] sm:$0xff] %v7509_v58  ;;  %1403 = vmatmul.mubr.f32.vlgmr.msra.gmra.mxu0 %v7509_v58  ;;  %v7569_v58 = vld [vmem:[%s11875_s4 + $0xb0] sm:$0xff] }
 0x411   :  { %1629 = vmatpush1.msra.mxu0 %v7521_v3 }
 0x412   :  { %1630 = vmatprep.subr.mxu0 %v7526_v8 }
 0x413   :  { %1631 = vmatpush1.msra.mxu0 %v7532_v9 }
 0x414   :  { %1632 = vmatprep.subr.mxu0 %v7539_v35 }
 0x415   :  { %1633 = vmatpush1.msra.mxu0 %v7545_v39 }
 0x416   :  { %1634 = vmatprep.subr.mxu0 %v7551_v40 }
 0x417   :  { %1635 = vmatpush1.msra.mxu0 %v7557_v41 }
 0x418   :  { %1636 = vmatprep.subr.mxu0 %v7563_v42 }
 0x419   :  { %1637 = vmatpush1.msra.mxu0 %v7569_v58 }
 0x41a   :  { %1638 = vmatprep.subr.mxu0 %v7575_v47 }
 0x41b   :  { %1639 = vmatpush1.msra.mxu0 %v7581_v59  ;;  %v7617_v59 = vld [vmem:[%s11875_s4 + $0x70] sm:$0xff] }
 0x41c   :  { %1640 = vmatprep.subr.mxu0 %v7587_v22  ;;  %v7623_v22 = vld [vmem:[%s11875_s4 + $0x68] sm:$0xff] }
 0x41d   :  { %1641 = vmatpush1.msra.mxu0 %v7593_v48 }
 0x41e   :  { %1642 = vmatprep.subr.mxu0 %v7599_v36 }
 0x41f   :  { %1643 = vmatpush1.msra.mxu0 %v7605_v46 }
 0x420   :  { %1644 = vmatprep.subr.mxu0 %v7611_v45 }
 0x421   :  { %1645 = vmatpush1.msra.mxu0 %v7617_v59 }
 0x422   :  { %1646 = vmatprep.subr.mxu0 %v7623_v22 }
 0x423   :  { %1647 = vmatpush1.msra.mxu0 %v7041_v55  ;;  %v7715_v55 = vld [vmem:[%s11875_s4 + $0x50] sm:$0xff] }
 0x424   :  { %1648 = vmatprep.subr.mxu0 %v7046_v57  ;;  %v7721_v57 = vld [vmem:[%s11875_s4 + $0x48] sm:$0xff] }
 0x425   :  { %1649 = vmatpush1.msra.mxu0 %v7051_v25  ;;  %v7727_v25 = vld [vmem:[%s11875_s4 + $0x40] sm:$0xff] }
 0x426   :  { %1650 = vmatprep.subr.mxu0 %v7057_v10  ;;  %v7733_v10 = vld [vmem:[%s11875_s4 + $0x38] sm:$0xff] }
 0x427   :  { %1651 = vmatpush1.msra.mxu0 %v7063_v11  ;;  %v7739_v11 = vld [vmem:[%s11875_s4 + $0x30] sm:$0xff] }
 0x428   :  { %1652 = vmatprep.subr.mxu0 %v7069_v16  ;;  %v7745_v16 = vld [vmem:[%s11875_s4 + $0x28] sm:$0xff] }
 0x429   :  { %1653 = vmatpush1.msra.mxu0 %v7075_v17  ;;  %v7751_v17 = vld [vmem:[%s11875_s4 + $0x20] sm:$0xff] }
 0x42a   :  { %1654 = vmatprep.subr.mxu0 %v7081_v18  ;;  %v7757_v18 = vld [vmem:[%s11875_s4 + $0x18] sm:$0xff] }
 0x42b   :  { %1655 = vmatpush1.msra.mxu0 %v7087_v21  ;;  %v7763_v21 = vld [vmem:[%s11875_s4 + $0x10] sm:$0xff] }
 0x42c   :  { %1656 = vmatprep.subr.mxu0 %v7093_v26  ;;  %v7769_v26 = vld [vmem:[%s11875_s4 + $0x8] sm:$0xff] }
 0x42d   :  { %1657 = vmatpush1.msra.mxu0 %v7099_v31  ;;  %v7775_v31 = vld [vmem:[%s11875_s4] sm:$0xff] }
 0x42e   :  { %1658 = vmatprep.subr.mxu0 %v7105_v12  ;;  %v7710_v12 = vld [vmem:[%s11875_s4 + $0x58] sm:$0xff] }
 0x42f   :  { %1659 = vmatpush1.msra.mxu0 %v7111_v37  ;;  %v12282_v37 = vld [vmem:[#allocation43_spill] sm:$0xff] }
 0x430   :  { %1660 = vmatprep.subr.mxu0 %v7117_v49  ;;  %v7705_v49 = vld [vmem:[%s11875_s4 + $0x60] sm:$0xff] }
 0x431   :  { %1661 = vmatpush2.msra.mxu0 %v7123_v44  ;;  %v12283_v44 = vld [vmem:[#allocation44_spill] sm:$0xff] }
 0x432   :  { %1662 = vmatprep.subr.mxu0 %v7129_v32 }
 0x433   :  { %1663 = vmatpush2.msra.mxu0 %v7135_v20 }
 0x434   :  { %1664 = vmatprep.subr.mxu0 %v7141_v19 }
 0x435   :  { %1665 = vmatpush2.msra.mxu0 %v7147_v14 }
 0x436   :  { %1666 = vmatprep.subr.mxu0 %v7153_v13 }
 0x437   :  { %1667 = vmatpush2.msra.mxu0 %v7159_v6 }
 0x438   :  { %1668 = vmatprep.subr.mxu0 %v7165_v2  ;;  %v12279_v2 = vld [vmem:[#allocation59_spill] sm:$0xff] }
 0x439   :  { %1669 = vmatpush2.msra.mxu0 %v7171_v1  ;;  %v572_v6 = vadd.f32 %v7010_v15, %v12279_v2  ;;  %v7914_v2 = vld [vmem:[%s11875_s4 + $0x190] sm:$0xff] }
 0x43a   :  { %1670 = vmatprep.subr.mxu0 %v7177_v0 }
 0x43b   :  { %1671 = vmatpush2.msra.mxu0 %v7183_v61  ;;  %v12278_v61 = vld [vmem:[#allocation58_spill] sm:$0xff] }
 0x43c   :  { %1672 = vmatprep.subr.mxu0 %v7242_v51  ;;  %v571_v0 = vadd.f32 %v7006_v4, %v12278_v61  ;;  %v7781_v51 = vld [vmem:[%s11875_s4 + $0x1f8] sm:$0xff] }
 0x43d   :  { %1673 = vmatpush2.msra.mxu0 %v7248_v52  ;;  %v7787_v52 = vld [vmem:[%s11875_s4 + $0x1f0] sm:$0xff] }
 0x43e   :  { %1674 = vmatprep.subr.mxu0 %v7255_v53  ;;  %v7793_v53 = vld [vmem:[%s11875_s4 + $0x1e8] sm:$0xff] }
 0x43f   :  { %1675 = vmatpush2.msra.mxu0 %v7262_v54  ;;  %v7799_v54 = vld [vmem:[%s11875_s4 + $0x1e0] sm:$0xff] }
 0x440   :  { %1676 = vmatprep.subr.mxu0 %v7269_v56  ;;  %v7805_v56 = vld [vmem:[%s11875_s4 + $0x1d8] sm:$0xff] }
 0x441   :  { %1677 = vmatpush2.msra.mxu0 %v12257_v50  ;;  %v7811_v50 = vld [vmem:[%s11875_s4 + $0x1d0] sm:$0xff] }
 0x442   :  { %1678 = vmatprep.subr.mxu0 %v12258_v23  ;;  %v7817_v23 = vld [vmem:[%s11875_s4 + $0x1c8] sm:$0xff] }
 0x443   :  { %1679 = vmatpush2.msra.mxu0 %v12259_v24  ;;  %v7823_v24 = vld [vmem:[%s11875_s4 + $0x1c0] sm:$0xff] }
 0x444   :  { %1680 = vmatprep.subr.mxu0 %v12260_v27  ;;  %v7829_v27 = vld [vmem:[%s11875_s4 + $0x1b8] sm:$0xff] }
 0x445   :  { %1681 = vmatpush2.msra.mxu0 %v12261_v28  ;;  %v7835_v28 = vld [vmem:[%s11875_s4 + $0x1b0] sm:$0xff] }
 0x446   :  { %1682 = vmatprep.subr.mxu0 %v12262_v29  ;;  %v7841_v29 = vld [vmem:[%s11875_s4 + $0x1a8] sm:$0xff] }
 0x447   :  { %1683 = vmatpush2.msra.mxu0 %v12263_v30  ;;  %v7847_v30 = vld [vmem:[%s11875_s4 + $0x1a0] sm:$0xff] }
 0x448   :  { %1684 = vmatprep.subr.mxu0 %v12264_v33  ;;  %v12284_v33 = vld [vmem:[#allocation60_spill] sm:$0xff] }
 0x449   :  { %1685 = vmatpush2.msra.mxu0 %v12265_v34  ;;  %v573_v34 = vadd.f32 %v7006_v4, %v12284_v33  ;;  %v7949_v33 = vld [vmem:[%s11875_s4 + $0x168] sm:$0xff] }
 0x44a   :  { %1686 = vmatprep.subr.mxu0 %v12266_v63 }
 0x44b   :  { %1687 = vmatpush2.msra.mxu0 %v12267_v38  ;;  %v12285_v38 = vld [vmem:[#allocation61_spill] sm:$0xff] }
 0x44c   :  { %1688 = vmatprep.subr.mxu0 %v12268_v43  ;;  %v574_v43 = vadd.f32 %v7010_v15, %v12285_v38  ;;  %v7966_v38 = vld [vmem:[%s11875_s4 + $0x150] sm:$0xff] }
 0x44d   :  { %1689 = vmatpush2.msra.mxu0 %v12269_v7  ;;  %12290 = vst [vmem:[#allocation51_spill] sm:$0xff] %v7966_v38 }
 0x44e   :  { %1690 = vmatprep.subr.mxu0 %v12270_v5 }
 0x44f   :  { %1691 = vmatpush2.msra.mxu0 %v12271_v62 }
 0x450   :  { %1918 = vmatprep.subr.mxu0 %v7516_v60 }
 0x4d0   :  { %v1404_v1 = vpop.f32.mrf.mxu0 }
 0x4d1   :  { %v1409_v13 = vadd.f32 %v1404_v1, %v571_v0  ;;  %v7908_v1 = vld [vmem:[%s11875_s4 + $0x198] sm:$0xff] }
 0x4d2   :  { %v1406_v14 = vpop.f32.mrf.mxu0 }
 0x4d3   :  { %v1410_v19 = vadd.f32 %v1406_v14, %v572_v6  ;;  %v7921_v6 = vld [vmem:[%s11875_s4 + $0x188] sm:$0xff]  ;;  %v7935_v14 = vld [vmem:[%s11875_s4 + $0x178] sm:$0xff] }
 0x4d5   :  { %5853 = vtanh.f32 %v1410_v19  ;;  %v7942_v19 = vld [vmem:[%s11875_s4 + $0x170] sm:$0xff] }
 0x4d6   :  { %5855 = vtanh.f32 %v1409_v13  ;;  %v7928_v13 = vld [vmem:[%s11875_s4 + $0x180] sm:$0xff] }
 0x4e2   :  { %v7678_v20 = vpop.eup %5853 }
 0x4e3   :  { %12280 = vst [vmem:[#allocation45_spill] sm:$0xff] %v7678_v20  ;;  %v7680_v32 = vpop.eup %5855  ;;  %1547 = vmatprep.mubr.f32.mxu1 %v7678_v20  ;;  %v8022_v20 = vld [vmem:[%s11875_s4 + $0x110] sm:$0xff] }
 0x4e4   :  { %12281 = vst [vmem:[#allocation46_spill] sm:$0xff] %v7680_v32  ;;  %1548 = vmatmul.mubr.f32.vlgmr.msra.gmra.mxu1 %v7680_v32  ;;  %v8015_v32 = vld [vmem:[%s11875_s4 + $0x118] sm:$0xff]  ;;  %12298 = vst [vmem:[#allocation59_spill] sm:$0xff] %v8022_v20 }
 0x4e5   :  { %1774 = vmatpush1.msra.mxu1 %v7521_v3  ;;  %12297 = vst [vmem:[#allocation58_spill] sm:$0xff] %v8015_v32 }
 0x4e6   :  { %1775 = vmatprep.subr.mxu1 %v7526_v8 }
 0x4e7   :  { %1776 = vmatpush1.msra.mxu1 %v7532_v9 }
 0x4e8   :  { %1777 = vmatprep.subr.mxu1 %v7539_v35 }
 0x4e9   :  { %1778 = vmatpush1.msra.mxu1 %v7545_v39 }
 0x4ea   :  { %1779 = vmatprep.subr.mxu1 %v7551_v40 }
 0x4eb   :  { %1780 = vmatpush1.msra.mxu1 %v7557_v41 }
 0x4ec   :  { %1781 = vmatprep.subr.mxu1 %v7563_v42 }
 0x4ed   :  { %1782 = vmatpush1.msra.mxu1 %v7569_v58 }
 0x4ee   :  { %1783 = vmatprep.subr.mxu1 %v7575_v47 }
 0x4ef   :  { %1784 = vmatpush1.msra.mxu1 %v12282_v37 }
 0x4f0   :  { %1785 = vmatprep.subr.mxu1 %v12283_v44 }
 0x4f1   :  { %1786 = vmatpush1.msra.mxu1 %v7593_v48 }
 0x4f2   :  { %1787 = vmatprep.subr.mxu1 %v7599_v36 }
 0x4f3   :  { %1788 = vmatpush1.msra.mxu1 %v7605_v46 }
 0x4f4   :  { %1789 = vmatprep.subr.mxu1 %v7611_v45 }
 0x4f5   :  { %1790 = vmatpush1.msra.mxu1 %v7617_v59 }
 0x4f6   :  { %1791 = vmatprep.subr.mxu1 %v7623_v22 }
 0x4f7   :  { %1792 = vmatpush1.msra.mxu1 %v7705_v49 }
 0x4f8   :  { %1793 = vmatprep.subr.mxu1 %v7710_v12 }
 0x4f9   :  { %1794 = vmatpush1.msra.mxu1 %v7715_v55 }
 0x4fa   :  { %1795 = vmatprep.subr.mxu1 %v7721_v57 }
 0x4fb   :  { %1796 = vmatpush1.msra.mxu1 %v7727_v25 }
 0x4fc   :  { %1797 = vmatprep.subr.mxu1 %v7733_v10 }
 0x4fd   :  { %1798 = vmatpush1.msra.mxu1 %v7739_v11 }
 0x4fe   :  { %1799 = vmatprep.subr.mxu1 %v7745_v16 }
 0x4ff   :  { %1800 = vmatpush1.msra.mxu1 %v7751_v17 }
 0x500   :  { %1801 = vmatprep.subr.mxu1 %v7757_v18 }
 0x501   :  { %1802 = vmatpush1.msra.mxu1 %v7763_v21 }
 0x502   :  { %1803 = vmatprep.subr.mxu1 %v7769_v26 }
 0x503   :  { %1804 = vmatpush1.msra.mxu1 %v7775_v31 }
 0x504   :  { %1805 = vmatprep.subr.mxu1 %v7781_v51 }
 0x505   :  { %1806 = vmatpush2.msra.mxu1 %v7787_v52 }
 0x506   :  { %1807 = vmatprep.subr.mxu1 %v7793_v53 }
 0x507   :  { %1808 = vmatpush2.msra.mxu1 %v7799_v54 }
 0x508   :  { %1809 = vmatprep.subr.mxu1 %v7805_v56 }
 0x509   :  { %1810 = vmatpush2.msra.mxu1 %v7811_v50 }
 0x50a   :  { %1811 = vmatprep.subr.mxu1 %v7817_v23 }
 0x50b   :  { %1812 = vmatpush2.msra.mxu1 %v7823_v24 }
 0x50c   :  { %1813 = vmatprep.subr.mxu1 %v7829_v27 }
 0x50d   :  { %1814 = vmatpush2.msra.mxu1 %v7835_v28 }
 0x50e   :  { %1815 = vmatprep.subr.mxu1 %v7841_v29 }
 0x50f   :  { %1816 = vmatpush2.msra.mxu1 %v7847_v30 }
 0x510   :  { %1817 = vmatprep.subr.mxu1 %v7908_v1 }
 0x511   :  { %1818 = vmatpush2.msra.mxu1 %v7914_v2 }
 0x512   :  { %1819 = vmatprep.subr.mxu1 %v7921_v6 }
 0x513   :  { %1820 = vmatpush2.msra.mxu1 %v7928_v13 }
 0x514   :  { %1821 = vmatprep.subr.mxu1 %v7935_v14 }
 0x515   :  { %1822 = vmatpush2.msra.mxu1 %v7942_v19 }
 0x516   :  { %1823 = vmatprep.subr.mxu1 %v7949_v33 }
 0x5a4   :  { %v1549_v63 = vpop.f32.mrf.mxu1 }
 0x5a5   :  { %v1554_v7 = vadd.f32 %v1549_v63, %v573_v34  ;;  %v7954_v34 = vld [vmem:[%s11875_s4 + $0x160] sm:$0xff]  ;;  %v7959_v63 = vld [vmem:[%s11875_s4 + $0x158] sm:$0xff] }
 0x5a6   :  { %v1551_v5 = vpop.f32.mrf.mxu1  ;;  %12288 = vst [vmem:[#allocation49_spill] sm:$0xff] %v7954_v34  ;;  %12289 = vst [vmem:[#allocation50_spill] sm:$0xff] %v7959_v63  ;;  %1824 = vmatpush2.msra.mxu1 %v7954_v34 }
 0x5a7   :  { %v1555_v62 = vadd.f32 %v1551_v5, %v574_v43  ;;  %v7973_v43 = vld [vmem:[%s11875_s4 + $0x148] sm:$0xff]  ;;  %1825 = vmatprep.subr.mxu1 %v7959_v63  ;;  %v7987_v5 = vld [vmem:[%s11875_s4 + $0x138] sm:$0xff] }
 0x5a8   :  { %12291 = vst [vmem:[#allocation52_spill] sm:$0xff] %v7973_v43  ;;  %1826 = vmatpush2.msra.mxu1 %v7966_v38  ;;  %12293 = vst [vmem:[#allocation54_spill] sm:$0xff] %v7987_v5 }
 0x5a9   :  { %5857 = vtanh.f32 %v1555_v62  ;;  %1827 = vmatprep.subr.mxu1 %v7973_v43  ;;  %v7994_v62 = vld [vmem:[%s11875_s4 + $0x130] sm:$0xff] }
 0x5aa   :  { %5859 = vtanh.f32 %v1554_v7  ;;  %v7980_v7 = vld [vmem:[%s11875_s4 + $0x140] sm:$0xff]  ;;  %12294 = vst [vmem:[#allocation55_spill] sm:$0xff] %v7994_v62 }
 0x5ab   :  { %12292 = vst [vmem:[#allocation53_spill] sm:$0xff] %v7980_v7  ;;  %1828 = vmatpush2.msra.mxu1 %v7980_v7 }
 0x5ac   :  { %1829 = vmatprep.subr.mxu1 %v7987_v5 }
 0x5ad   :  { %1830 = vmatpush2.msra.mxu1 %v7994_v62 }
 0x5b6   :  { %v7856_v61 = vpop.eup %5857 }
 0x5b7   :  { %12286 = vst [vmem:[#allocation47_spill] sm:$0xff] %v7856_v61  ;;  %v7858_v0 = vpop.eup %5859  ;;  %1692 = vmatprep.mubr.f32.mxu0 %v7856_v61  ;;  %v8008_v61 = vld [vmem:[%s11875_s4 + $0x120] sm:$0xff] }
 0x5b8   :  { %12287 = vst [vmem:[#allocation48_spill] sm:$0xff] %v7858_v0  ;;  %1693 = vmatmul.mubr.f32.vlgmr.msra.gmra.mxu0 %v7858_v0  ;;  %v8001_v0 = vld [vmem:[%s11875_s4 + $0x128] sm:$0xff]  ;;  %12296 = vst [vmem:[#allocation57_spill] sm:$0xff] %v8008_v61 }
 0x5b9   :  { %1919 = vmatpush1.msra.mxu0 %v7521_v3  ;;  %12295 = vst [vmem:[#allocation56_spill] sm:$0xff] %v8001_v0  ;;  %1831 = vmatprep.subr.mxu1 %v8001_v0 }
 0x5ba   :  { %1920 = vmatprep.subr.mxu0 %v7526_v8  ;;  %1832 = vmatpush2.msra.mxu1 %v8008_v61 }
 0x5bb   :  { %1921 = vmatpush1.msra.mxu0 %v7532_v9  ;;  %1833 = vmatprep.subr.mxu1 %v8015_v32 }
 0x5bc   :  { %1922 = vmatprep.subr.mxu0 %v7539_v35  ;;  %1834 = vmatpush2.msra.mxu1 %v8022_v20 }
 0x5bd   :  { %1923 = vmatpush1.msra.mxu0 %v7545_v39 }
 0x5be   :  { %1924 = vmatprep.subr.mxu0 %v7551_v40 }
 0x5bf   :  { %1925 = vmatpush1.msra.mxu0 %v7557_v41 }
 0x5c0   :  { %1926 = vmatprep.subr.mxu0 %v7563_v42 }
 0x5c1   :  { %1927 = vmatpush1.msra.mxu0 %v7569_v58 }
 0x5c2   :  { %1928 = vmatprep.subr.mxu0 %v7575_v47 }
 0x5c3   :  { %1929 = vmatpush1.msra.mxu0 %v12282_v37 }
 0x5c4   :  { %1930 = vmatprep.subr.mxu0 %v12283_v44 }
 0x5c5   :  { %1931 = vmatpush1.msra.mxu0 %v7593_v48 }
 0x5c6   :  { %1932 = vmatprep.subr.mxu0 %v7599_v36 }
 0x5c7   :  { %1933 = vmatpush1.msra.mxu0 %v7605_v46 }
 0x5c8   :  { %1934 = vmatprep.subr.mxu0 %v7611_v45 }
 0x5c9   :  { %1935 = vmatpush1.msra.mxu0 %v7617_v59 }
 0x5ca   :  { %1936 = vmatprep.subr.mxu0 %v7623_v22 }
 0x5cb   :  { %1937 = vmatpush1.msra.mxu0 %v7705_v49 }
 0x5cc   :  { %1938 = vmatprep.subr.mxu0 %v7710_v12 }
 0x5cd   :  { %1939 = vmatpush1.msra.mxu0 %v7715_v55 }
 0x5ce   :  { %1940 = vmatprep.subr.mxu0 %v7721_v57 }
 0x5cf   :  { %1941 = vmatpush1.msra.mxu0 %v7727_v25 }
 0x5d0   :  { %1942 = vmatprep.subr.mxu0 %v7733_v10 }
 0x5d1   :  { %1943 = vmatpush1.msra.mxu0 %v7739_v11 }
 0x5d2   :  { %1944 = vmatprep.subr.mxu0 %v7745_v16 }
 0x5d3   :  { %1945 = vmatpush1.msra.mxu0 %v7751_v17 }
 0x5d4   :  { %1946 = vmatprep.subr.mxu0 %v7757_v18 }
 0x5d5   :  { %1947 = vmatpush1.msra.mxu0 %v7763_v21 }
 0x5d6   :  { %1948 = vmatprep.subr.mxu0 %v7769_v26 }
 0x5d7   :  { %1949 = vmatpush1.msra.mxu0 %v7775_v31 }
 0x5d8   :  { %1950 = vmatprep.subr.mxu0 %v7781_v51 }
 0x5d9   :  { %1951 = vmatpush2.msra.mxu0 %v7787_v52 }
 0x5da   :  { %1952 = vmatprep.subr.mxu0 %v7793_v53 }
 0x5db   :  { %1953 = vmatpush2.msra.mxu0 %v7799_v54 }
 0x5dc   :  { %1954 = vmatprep.subr.mxu0 %v7805_v56 }
 0x5dd   :  { %1955 = vmatpush2.msra.mxu0 %v7811_v50 }
 0x5de   :  { %1956 = vmatprep.subr.mxu0 %v7817_v23 }
 0x5df   :  { %1957 = vmatpush2.msra.mxu0 %v7823_v24 }
 0x5e0   :  { %1958 = vmatprep.subr.mxu0 %v7829_v27 }
 0x5e1   :  { %1959 = vmatpush2.msra.mxu0 %v7835_v28 }
 0x5e2   :  { %1960 = vmatprep.subr.mxu0 %v7841_v29 }
 0x5e3   :  { %1961 = vmatpush2.msra.mxu0 %v7847_v30 }
 0x5e4   :  { %1962 = vmatprep.subr.mxu0 %v7908_v1 }
 0x5e5   :  { %1963 = vmatpush2.msra.mxu0 %v7914_v2 }
 0x5e6   :  { %1964 = vmatprep.subr.mxu0 %v7921_v6 }
 0x5e7   :  { %1965 = vmatpush2.msra.mxu0 %v7928_v13 }
 0x5e8   :  { %1966 = vmatprep.subr.mxu0 %v7935_v14 }
 0x5e9   :  { %1967 = vmatpush2.msra.mxu0 %v7942_v19 }
 0x5ea   :  { %1968 = vmatprep.subr.mxu0 %v7949_v33 }
 0x5eb   :  { %1969 = vmatpush2.msra.mxu0 %v7954_v34 }
 0x5ec   :  { %1970 = vmatprep.subr.mxu0 %v7959_v63 }
 0x5ed   :  { %1971 = vmatpush2.msra.mxu0 %v7966_v38 }
 0x5ee   :  { %1972 = vmatprep.subr.mxu0 %v7973_v43  ;;  %v12301_v43 = vld [vmem:[#allocation63_spill] sm:$0xff] }
 0x5ef   :  { %1973 = vmatpush2.msra.mxu0 %v7980_v7 }
 0x5f0   :  { %1974 = vmatprep.subr.mxu0 %v7987_v5  ;;  %v8029_v5 = vld [vmem:[%s11875_s4 + $0x108] sm:$0xff] }
 0x5f1   :  { %1975 = vmatpush2.msra.mxu0 %v7994_v62  ;;  %12299 = vst [vmem:[#allocation43_spill] sm:$0xff] %v8029_v5  ;;  %v8036_v62 = vld [vmem:[%s11875_s4 + $0x100] sm:$0xff]  ;;  %1835 = vmatprep.subr.mxu1 %v8029_v5 }
 0x5f2   :  { %1976 = vmatprep.subr.mxu0 %v8001_v0  ;;  %1836 = vmatpush2.msra.mxu1 %v8036_v62 }
 0x5f3   :  { %1977 = vmatpush2.msra.mxu0 %v8008_v61  ;;  %2063 = vmatprep.subr.mxu1 %v7516_v60  ;;  %v12300_v61 = vld [vmem:[#allocation62_spill] sm:$0xff]  ;;  %v12312_v60 = vld [vmem:[#allocation57_spill] sm:$0xff] }
 0x5f4   :  { %1978 = vmatprep.subr.mxu0 %v8015_v32  ;;  %v575_v0 = vadd.f32 %v7006_v4, %v12300_v61  ;;  %v576_v32 = vadd.f32 %v7010_v15, %v12301_v43  ;;  %v8148_v43 = vld [vmem:[%s11875_s4 + $0xe0] sm:$0xff] }
 0x5f5   :  { %1979 = vmatpush2.msra.mxu0 %v8022_v20 }
 0x5f6   :  { %1980 = vmatprep.subr.mxu0 %v8029_v5 }
 0x5f7   :  { %1981 = vmatpush2.msra.mxu0 %v8036_v62 }
 0x678   :  { %v1694_v7 = vpop.f32.mrf.mxu0 }
 0x679   :  { %v1699_v38 = vadd.f32 %v1694_v7, %v575_v0  ;;  %v8132_v0 = vld [vmem:[%s11875_s4 + $0xf8] sm:$0xff] }
 0x67a   :  { %v1696_v63 = vpop.f32.mrf.mxu0  ;;  %2208 = vmatprep.subr.mxu0 %v8132_v0  ;;  %v8155_v7 = vld [vmem:[%s11875_s4 + $0xd8] sm:$0xff] }
 0x67b   :  { %v1700_v20 = vadd.f32 %v1696_v63, %v576_v32  ;;  %v8137_v63 = vld [vmem:[%s11875_s4 + $0xf0] sm:$0xff] }
 0x67d   :  { %5861 = vtanh.f32 %v1700_v20 }
 0x67e   :  { %5863 = vtanh.f32 %v1699_v38  ;;  %v8142_v38 = vld [vmem:[%s11875_s4 + $0xe8] sm:$0xff] }
 0x68a   :  { %v8050_v34 = vpop.eup %5861 }
 0x68b   :  { %12302 = vst [vmem:[#allocation44_spill] sm:$0xff] %v8050_v34  ;;  %v8052_v5 = vpop.eup %5863  ;;  %1837 = vmatprep.mubr.f32.mxu1 %v8050_v34  ;;  %v8227_v34 = vld [vmem:[%s11875_s4 + $0x78] sm:$0xff] }
 0x68c   :  { %12303 = vst [vmem:[#allocation60_spill] sm:$0xff] %v8052_v5  ;;  %1838 = vmatmul.mubr.f32.vlgmr.msra.gmra.mxu1 %v8052_v5  ;;  %v8221_v5 = vld [vmem:[%s11875_s4 + $0x80] sm:$0xff] }
 0x68d   :  { %2064 = vmatpush1.msra.mxu1 %v7521_v3  ;;  %v12313_v3 = vld [vmem:[#allocation58_spill] sm:$0xff] }
 0x68e   :  { %2065 = vmatprep.subr.mxu1 %v7526_v8  ;;  %v12314_v8 = vld [vmem:[#allocation59_spill] sm:$0xff] }
 0x68f   :  { %2066 = vmatpush1.msra.mxu1 %v7532_v9  ;;  %v12315_v9 = vld [vmem:[#allocation43_spill] sm:$0xff] }
 0x690   :  { %2067 = vmatprep.subr.mxu1 %v7539_v35  ;;  %v12316_v35 = vld [vmem:[#allocation64_spill] sm:$0xff] }
 0x691   :  { %2068 = vmatpush1.msra.mxu1 %v7545_v39  ;;  %v577_v39 = vadd.f32 %v7006_v4, %v12316_v35  ;;  %v8161_v35 = vld [vmem:[%s11875_s4 + $0xd0] sm:$0xff] }
 0x692   :  { %2069 = vmatprep.subr.mxu1 %v7551_v40 }
 0x693   :  { %2070 = vmatpush1.msra.mxu1 %v7557_v41  ;;  %v12317_v41 = vld [vmem:[#allocation65_spill] sm:$0xff] }
 0x694   :  { %2071 = vmatprep.subr.mxu1 %v7563_v42  ;;  %v578_v42 = vadd.f32 %v7010_v15, %v12317_v41  ;;  %v8179_v41 = vld [vmem:[%s11875_s4 + $0xb8] sm:$0xff] }
 0x695   :  { %2072 = vmatpush1.msra.mxu1 %v7569_v58  ;;  %v12311_v58 = vld [vmem:[#allocation56_spill] sm:$0xff] }
 0x696   :  { %2073 = vmatprep.subr.mxu1 %v7575_v47  ;;  %v12310_v47 = vld [vmem:[#allocation55_spill] sm:$0xff] }
 0x697   :  { %2074 = vmatpush1.msra.mxu1 %v12282_v37 }
 0x698   :  { %2075 = vmatprep.subr.mxu1 %v12283_v44 }
 0x699   :  { %2076 = vmatpush1.msra.mxu1 %v7593_v48  ;;  %v12307_v48 = vld [vmem:[#allocation52_spill] sm:$0xff] }
 0x69a   :  { %2077 = vmatprep.subr.mxu1 %v7599_v36  ;;  %v12304_v36 = vld [vmem:[#allocation49_spill] sm:$0xff] }
 0x69b   :  { %2078 = vmatpush1.msra.mxu1 %v7605_v46  ;;  %v12306_v46 = vld [vmem:[#allocation51_spill] sm:$0xff] }
 0x69c   :  { %2079 = vmatprep.subr.mxu1 %v7611_v45  ;;  %v12305_v45 = vld [vmem:[#allocation50_spill] sm:$0xff] }
 0x69d   :  { %2080 = vmatpush1.msra.mxu1 %v7617_v59  ;;  %v12308_v59 = vld [vmem:[#allocation53_spill] sm:$0xff] }
 0x69e   :  { %2081 = vmatprep.subr.mxu1 %v7623_v22  ;;  %v12309_v22 = vld [vmem:[#allocation54_spill] sm:$0xff] }
 0x69f   :  { %2082 = vmatpush1.msra.mxu1 %v7705_v49 }
 0x6a0   :  { %2083 = vmatprep.subr.mxu1 %v7710_v12 }
 0x6a1   :  { %2084 = vmatpush1.msra.mxu1 %v7715_v55 }
 0x6a2   :  { %2085 = vmatprep.subr.mxu1 %v7721_v57 }
 0x6a3   :  { %2086 = vmatpush1.msra.mxu1 %v7727_v25 }
 0x6a4   :  { %2087 = vmatprep.subr.mxu1 %v7733_v10 }
 0x6a5   :  { %2088 = vmatpush1.msra.mxu1 %v7739_v11 }
 0x6a6   :  { %2089 = vmatprep.subr.mxu1 %v7745_v16 }
 0x6a7   :  { %2090 = vmatpush1.msra.mxu1 %v7751_v17 }
 0x6a8   :  { %2091 = vmatprep.subr.mxu1 %v7757_v18 }
 0x6a9   :  { %2092 = vmatpush1.msra.mxu1 %v7763_v21 }
 0x6aa   :  { %2093 = vmatprep.subr.mxu1 %v7769_v26 }
 0x6ab   :  { %2094 = vmatpush1.msra.mxu1 %v7775_v31 }
 0x6ac   :  { %2095 = vmatprep.subr.mxu1 %v7781_v51 }
 0x6ad   :  { %2096 = vmatpush2.msra.mxu1 %v7787_v52 }
 0x6ae   :  { %2097 = vmatprep.subr.mxu1 %v7793_v53 }
 0x6af   :  { %2098 = vmatpush2.msra.mxu1 %v7799_v54 }
 0x6b0   :  { %2099 = vmatprep.subr.mxu1 %v7805_v56 }
 0x6b1   :  { %2100 = vmatpush2.msra.mxu1 %v7811_v50 }
 0x6b2   :  { %2101 = vmatprep.subr.mxu1 %v7817_v23 }
 0x6b3   :  { %2102 = vmatpush2.msra.mxu1 %v7823_v24 }
 0x6b4   :  { %2103 = vmatprep.subr.mxu1 %v7829_v27 }
 0x6b5   :  { %2104 = vmatpush2.msra.mxu1 %v7835_v28 }
 0x6b6   :  { %2105 = vmatprep.subr.mxu1 %v7841_v29 }
 0x6b7   :  { %2106 = vmatpush2.msra.mxu1 %v7847_v30 }
 0x6b8   :  { %2107 = vmatprep.subr.mxu1 %v7908_v1 }
 0x6b9   :  { %2108 = vmatpush2.msra.mxu1 %v7914_v2 }
 0x6ba   :  { %2109 = vmatprep.subr.mxu1 %v7921_v6 }
 0x6bb   :  { %2110 = vmatpush2.msra.mxu1 %v7928_v13 }
 0x6bc   :  { %2111 = vmatprep.subr.mxu1 %v7935_v14 }
 0x6bd   :  { %2112 = vmatpush2.msra.mxu1 %v7942_v19 }
 0x6be   :  { %2113 = vmatprep.subr.mxu1 %v7949_v33 }
 0x6bf   :  { %2114 = vmatpush2.msra.mxu1 %v12304_v36 }
 0x6c0   :  { %2115 = vmatprep.subr.mxu1 %v12305_v45 }
 0x6c1   :  { %2116 = vmatpush2.msra.mxu1 %v12306_v46 }
 0x6c2   :  { %2117 = vmatprep.subr.mxu1 %v12307_v48 }
 0x6c3   :  { %2118 = vmatpush2.msra.mxu1 %v12308_v59 }
 0x6c4   :  { %2119 = vmatprep.subr.mxu1 %v12309_v22 }
 0x6c5   :  { %2120 = vmatpush2.msra.mxu1 %v12310_v47 }
 0x6c6   :  { %2121 = vmatprep.subr.mxu1 %v12311_v58 }
 0x6c7   :  { %2122 = vmatpush2.msra.mxu1 %v12312_v60 }
 0x6c8   :  { %2123 = vmatprep.subr.mxu1 %v12313_v3 }
 0x6c9   :  { %2124 = vmatpush2.msra.mxu1 %v12314_v8 }
 0x6ca   :  { %2125 = vmatprep.subr.mxu1 %v12315_v9 }
 0x6cb   :  { %2126 = vmatpush2.msra.mxu1 %v8036_v62 }
 0x6cc   :  { %2353 = vmatprep.subr.mxu1 %v8132_v0 }
 0x74c   :  { %v1839_v40 = vpop.f32.mrf.mxu1 }
 0x74d   :  { %v1844_v20 = vadd.f32 %v1839_v40, %v577_v39  ;;  %v8167_v39 = vld [vmem:[%s11875_s4 + $0xc8] sm:$0xff]  ;;  %v8173_v40 = vld [vmem:[%s11875_s4 + $0xc0] sm:$0xff] }
 0x74e   :  { %v1841_v32 = vpop.f32.mrf.mxu1 }
 0x74f   :  { %v1845_v37 = vadd.f32 %v1841_v32, %v578_v42  ;;  %v8185_v42 = vld [vmem:[%s11875_s4 + $0xb0] sm:$0xff]  ;;  %v8197_v32 = vld [vmem:[%s11875_s4 + $0xa0] sm:$0xff] }
 0x750   :  { %12320 = vst [vmem:[#allocation63_spill] sm:$0xff] %v8197_v32 }
 0x751   :  { %5865 = vtanh.f32 %v1845_v37  ;;  %v8203_v37 = vld [vmem:[%s11875_s4 + $0x98] sm:$0xff] }
 0x752   :  { %5867 = vtanh.f32 %v1844_v20  ;;  %v8191_v20 = vld [vmem:[%s11875_s4 + $0xa8] sm:$0xff]  ;;  %12321 = vst [vmem:[#allocation49_spill] sm:$0xff] %v8203_v37 }
 0x75e   :  { %v8123_v44 = vpop.eup %5865 }
 0x75f   :  { %12318 = vst [vmem:[#allocation61_spill] sm:$0xff] %v8123_v44  ;;  %v8125_v61 = vpop.eup %5867  ;;  %1982 = vmatprep.mubr.f32.mxu0 %v8123_v44  ;;  %v8215_v44 = vld [vmem:[%s11875_s4 + $0x88] sm:$0xff] }
 0x760   :  { %12319 = vst [vmem:[#allocation62_spill] sm:$0xff] %v8125_v61  ;;  %1983 = vmatmul.mubr.f32.vlgmr.msra.gmra.mxu0 %v8125_v61  ;;  %v8209_v61 = vld [vmem:[%s11875_s4 + $0x90] sm:$0xff] }
 0x761   :  { %2209 = vmatpush1.msra.mxu0 %v8137_v63 }
 0x762   :  { %2210 = vmatprep.subr.mxu0 %v8142_v38 }
 0x763   :  { %2211 = vmatpush1.msra.mxu0 %v8148_v43 }
 0x764   :  { %2212 = vmatprep.subr.mxu0 %v8155_v7 }
 0x765   :  { %2213 = vmatpush1.msra.mxu0 %v8161_v35 }
 0x766   :  { %2214 = vmatprep.subr.mxu0 %v8167_v39 }
 0x767   :  { %2215 = vmatpush1.msra.mxu0 %v8173_v40 }
 0x768   :  { %2216 = vmatprep.subr.mxu0 %v8179_v41 }
 0x769   :  { %2217 = vmatpush1.msra.mxu0 %v8185_v42 }
 0x76a   :  { %2218 = vmatprep.subr.mxu0 %v8191_v20 }
 0x76b   :  { %2219 = vmatpush1.msra.mxu0 %v8197_v32  ;;  %v8233_v32 = vld [vmem:[%s11875_s4 + $0x70] sm:$0xff] }
 0x76c   :  { %2220 = vmatprep.subr.mxu0 %v8203_v37  ;;  %v8239_v37 = vld [vmem:[%s11875_s4 + $0x68] sm:$0xff] }
 0x76d   :  { %2221 = vmatpush1.msra.mxu0 %v8209_v61 }
 0x76e   :  { %2222 = vmatprep.subr.mxu0 %v8215_v44 }
 0x76f   :  { %2223 = vmatpush1.msra.mxu0 %v8221_v5 }
 0x770   :  { %2224 = vmatprep.subr.mxu0 %v8227_v34 }
 0x771   :  { %2225 = vmatpush1.msra.mxu0 %v8233_v32 }
 0x772   :  { %2226 = vmatprep.subr.mxu0 %v8239_v37 }
 0x773   :  { %2227 = vmatpush1.msra.mxu0 %v7705_v49  ;;  %v12322_v49 = vld [vmem:[#allocation66_spill] sm:$0xff] }
 0x774   :  { %2228 = vmatprep.subr.mxu0 %v7710_v12  ;;  %v579_v12 = vadd.f32 %v7006_v4, %v12322_v49 }
 0x775   :  { %2229 = vmatpush1.msra.mxu0 %v7715_v55 }
 0x776   :  { %2230 = vmatprep.subr.mxu0 %v7721_v57  ;;  %v12323_v57 = vld [vmem:[#allocation67_spill] sm:$0xff] }
 0x777   :  { %2231 = vmatpush1.msra.mxu0 %v7727_v25  ;;  %v580_v25 = vadd.f32 %v7010_v15, %v12323_v57  ;;  %v8530_v57 = vld [vmem:[%s11875_s4 + $0x190] sm:$0xff] }
 0x778   :  { %2232 = vmatprep.subr.mxu0 %v7733_v10 }
 0x779   :  { %2233 = vmatpush1.msra.mxu0 %v7739_v11 }
 0x77a   :  { %2234 = vmatprep.subr.mxu0 %v7745_v16 }
 0x77b   :  { %2235 = vmatpush1.msra.mxu0 %v7751_v17 }
 0x77c   :  { %2236 = vmatprep.subr.mxu0 %v7757_v18 }
 0x77d   :  { %2237 = vmatpush1.msra.mxu0 %v7763_v21  ;;  %v12326_v21 = vld [vmem:[#allocation63_spill] sm:$0xff] }
 0x77e   :  { %2238 = vmatprep.subr.mxu0 %v7769_v26  ;;  %v12327_v26 = vld [vmem:[#allocation49_spill] sm:$0xff] }
 0x77f   :  { %2239 = vmatpush1.msra.mxu0 %v7775_v31  ;;  %v8321_v31 = vld [vmem:[%s11875_s4 + $0x60] sm:$0xff] }
 0x780   :  { %2240 = vmatprep.subr.mxu0 %v7781_v51  ;;  %v8326_v51 = vld [vmem:[%s11875_s4 + $0x58] sm:$0xff] }
 0x781   :  { %2241 = vmatpush2.msra.mxu0 %v7787_v52  ;;  %v8331_v52 = vld [vmem:[%s11875_s4 + $0x50] sm:$0xff] }
 0x782   :  { %2242 = vmatprep.subr.mxu0 %v7793_v53  ;;  %v8337_v53 = vld [vmem:[%s11875_s4 + $0x48] sm:$0xff] }
 0x783   :  { %2243 = vmatpush2.msra.mxu0 %v7799_v54  ;;  %v8343_v54 = vld [vmem:[%s11875_s4 + $0x40] sm:$0xff] }
 0x784   :  { %2244 = vmatprep.subr.mxu0 %v7805_v56  ;;  %v8349_v56 = vld [vmem:[%s11875_s4 + $0x38] sm:$0xff] }
 0x785   :  { %2245 = vmatpush2.msra.mxu0 %v7811_v50  ;;  %v8355_v50 = vld [vmem:[%s11875_s4 + $0x30] sm:$0xff] }
 0x786   :  { %2246 = vmatprep.subr.mxu0 %v7817_v23  ;;  %v8361_v23 = vld [vmem:[%s11875_s4 + $0x28] sm:$0xff] }
 0x787   :  { %2247 = vmatpush2.msra.mxu0 %v7823_v24  ;;  %v8367_v24 = vld [vmem:[%s11875_s4 + $0x20] sm:$0xff] }
 0x788   :  { %2248 = vmatprep.subr.mxu0 %v7829_v27  ;;  %v8373_v27 = vld [vmem:[%s11875_s4 + $0x18] sm:$0xff] }
 0x789   :  { %2249 = vmatpush2.msra.mxu0 %v7835_v28  ;;  %v8379_v28 = vld [vmem:[%s11875_s4 + $0x10] sm:$0xff] }
 0x78a   :  { %2250 = vmatprep.subr.mxu0 %v7841_v29  ;;  %v8385_v29 = vld [vmem:[%s11875_s4 + $0x8] sm:$0xff] }
 0x78b   :  { %2251 = vmatpush2.msra.mxu0 %v7847_v30  ;;  %v8391_v30 = vld [vmem:[%s11875_s4] sm:$0xff] }
 0x78c   :  { %2252 = vmatprep.subr.mxu0 %v7908_v1  ;;  %v8397_v1 = vld [vmem:[%s11875_s4 + $0x1f8] sm:$0xff] }
 0x78d   :  { %2253 = vmatpush2.msra.mxu0 %v7914_v2  ;;  %v8403_v2 = vld [vmem:[%s11875_s4 + $0x1f0] sm:$0xff] }
 0x78e   :  { %2254 = vmatprep.subr.mxu0 %v7921_v6  ;;  %v8409_v6 = vld [vmem:[%s11875_s4 + $0x1e8] sm:$0xff] }
 0x78f   :  { %2255 = vmatpush2.msra.mxu0 %v7928_v13  ;;  %v8415_v13 = vld [vmem:[%s11875_s4 + $0x1e0] sm:$0xff] }
 0x790   :  { %2256 = vmatprep.subr.mxu0 %v7935_v14  ;;  %v8421_v14 = vld [vmem:[%s11875_s4 + $0x1d8] sm:$0xff] }
 0x791   :  { %2257 = vmatpush2.msra.mxu0 %v7942_v19  ;;  %v8427_v19 = vld [vmem:[%s11875_s4 + $0x1d0] sm:$0xff] }
 0x792   :  { %2258 = vmatprep.subr.mxu0 %v7949_v33  ;;  %v8433_v33 = vld [vmem:[%s11875_s4 + $0x1c8] sm:$0xff] }
 0x793   :  { %2259 = vmatpush2.msra.mxu0 %v12304_v36  ;;  %v8445_v36 = vld [vmem:[%s11875_s4 + $0x1b8] sm:$0xff] }
 0x794   :  { %2260 = vmatprep.subr.mxu0 %v12305_v45  ;;  %v8451_v45 = vld [vmem:[%s11875_s4 + $0x1b0] sm:$0xff] }
 0x795   :  { %2261 = vmatpush2.msra.mxu0 %v12306_v46  ;;  %v8457_v46 = vld [vmem:[%s11875_s4 + $0x1a8] sm:$0xff] }
 0x796   :  { %2262 = vmatprep.subr.mxu0 %v12307_v48  ;;  %v8463_v48 = vld [vmem:[%s11875_s4 + $0x1a0] sm:$0xff] }
 0x797   :  { %2263 = vmatpush2.msra.mxu0 %v12308_v59  ;;  %v12328_v59 = vld [vmem:[#allocation68_spill] sm:$0xff] }
 0x798   :  { %2264 = vmatprep.subr.mxu0 %v12309_v22  ;;  %v581_v22 = vadd.f32 %v7006_v4, %v12328_v59  ;;  %v8565_v59 = vld [vmem:[%s11875_s4 + $0x168] sm:$0xff] }
 0x799   :  { %2265 = vmatpush2.msra.mxu0 %v12310_v47 }
 0x79a   :  { %2266 = vmatprep.subr.mxu0 %v12311_v58  ;;  %v12329_v58 = vld [vmem:[#allocation69_spill] sm:$0xff] }
 0x79b   :  { %2267 = vmatpush2.msra.mxu0 %v12312_v60  ;;  %v582_v60 = vadd.f32 %v7010_v15, %v12329_v58  ;;  %v8582_v58 = vld [vmem:[%s11875_s4 + $0x150] sm:$0xff] }
 0x79c   :  { %2268 = vmatprep.subr.mxu0 %v12313_v3  ;;  %12334 = vst [vmem:[#allocation56_spill] sm:$0xff] %v8582_v58 }
 0x79d   :  { %2269 = vmatpush2.msra.mxu0 %v12314_v8 }
 0x79e   :  { %2270 = vmatprep.subr.mxu0 %v12315_v9 }
 0x79f   :  { %2271 = vmatpush2.msra.mxu0 %v8036_v62  ;;  %v8439_v62 = vld [vmem:[%s11875_s4 + $0x1c0] sm:$0xff] }
 0x7a0   :  { %2498 = vmatprep.subr.mxu0 %v8132_v0 }
 0x820   :  { %v1984_v55 = vpop.f32.mrf.mxu0 }
 0x821   :  { %v1989_v10 = vadd.f32 %v1984_v55, %v579_v12  ;;  %v8524_v55 = vld [vmem:[%s11875_s4 + $0x198] sm:$0xff] }
 0x822   :  { %v1986_v11 = vpop.f32.mrf.mxu0 }
 0x823   :  { %v1990_v16 = vadd.f32 %v1986_v11, %v580_v25  ;;  %v8537_v25 = vld [vmem:[%s11875_s4 + $0x188] sm:$0xff]  ;;  %v8551_v11 = vld [vmem:[%s11875_s4 + $0x178] sm:$0xff] }
 0x825   :  { %5869 = vtanh.f32 %v1990_v16  ;;  %v8558_v16 = vld [vmem:[%s11875_s4 + $0x170] sm:$0xff] }
 0x826   :  { %5871 = vtanh.f32 %v1989_v10  ;;  %v8544_v10 = vld [vmem:[%s11875_s4 + $0x180] sm:$0xff] }
 0x832   :  { %v8294_v17 = vpop.eup %5869 }
 0x833   :  { %12324 = vst [vmem:[#allocation50_spill] sm:$0xff] %v8294_v17  ;;  %v8296_v18 = vpop.eup %5871  ;;  %2127 = vmatprep.mubr.f32.mxu1 %v8294_v17  ;;  %v8638_v17 = vld [vmem:[%s11875_s4 + $0x110] sm:$0xff] }
 0x834   :  { %12325 = vst [vmem:[#allocation51_spill] sm:$0xff] %v8296_v18  ;;  %2128 = vmatmul.mubr.f32.vlgmr.msra.gmra.mxu1 %v8296_v18  ;;  %v8631_v18 = vld [vmem:[%s11875_s4 + $0x118] sm:$0xff]  ;;  %12342 = vst [vmem:[#allocation67_spill] sm:$0xff] %v8638_v17 }
 0x835   :  { %2354 = vmatpush1.msra.mxu1 %v8137_v63  ;;  %12341 = vst [vmem:[#allocation66_spill] sm:$0xff] %v8631_v18 }
 0x836   :  { %2355 = vmatprep.subr.mxu1 %v8142_v38 }
 0x837   :  { %2356 = vmatpush1.msra.mxu1 %v8148_v43 }
 0x838   :  { %2357 = vmatprep.subr.mxu1 %v8155_v7 }
 0x839   :  { %2358 = vmatpush1.msra.mxu1 %v8161_v35 }
 0x83a   :  { %2359 = vmatprep.subr.mxu1 %v8167_v39 }
 0x83b   :  { %2360 = vmatpush1.msra.mxu1 %v8173_v40 }
 0x83c   :  { %2361 = vmatprep.subr.mxu1 %v8179_v41 }
 0x83d   :  { %2362 = vmatpush1.msra.mxu1 %v8185_v42 }
 0x83e   :  { %2363 = vmatprep.subr.mxu1 %v8191_v20 }
 0x83f   :  { %2364 = vmatpush1.msra.mxu1 %v12326_v21 }
 0x840   :  { %2365 = vmatprep.subr.mxu1 %v12327_v26 }
 0x841   :  { %2366 = vmatpush1.msra.mxu1 %v8209_v61 }
 0x842   :  { %2367 = vmatprep.subr.mxu1 %v8215_v44 }
 0x843   :  { %2368 = vmatpush1.msra.mxu1 %v8221_v5 }
 0x844   :  { %2369 = vmatprep.subr.mxu1 %v8227_v34 }
 0x845   :  { %2370 = vmatpush1.msra.mxu1 %v8233_v32 }
 0x846   :  { %2371 = vmatprep.subr.mxu1 %v8239_v37 }
 0x847   :  { %2372 = vmatpush1.msra.mxu1 %v8321_v31 }
 0x848   :  { %2373 = vmatprep.subr.mxu1 %v8326_v51 }
 0x849   :  { %2374 = vmatpush1.msra.mxu1 %v8331_v52 }
 0x84a   :  { %2375 = vmatprep.subr.mxu1 %v8337_v53 }
 0x84b   :  { %2376 = vmatpush1.msra.mxu1 %v8343_v54 }
 0x84c   :  { %2377 = vmatprep.subr.mxu1 %v8349_v56 }
 0x84d   :  { %2378 = vmatpush1.msra.mxu1 %v8355_v50 }
 0x84e   :  { %2379 = vmatprep.subr.mxu1 %v8361_v23 }
 0x84f   :  { %2380 = vmatpush1.msra.mxu1 %v8367_v24 }
 0x850   :  { %2381 = vmatprep.subr.mxu1 %v8373_v27 }
 0x851   :  { %2382 = vmatpush1.msra.mxu1 %v8379_v28 }
 0x852   :  { %2383 = vmatprep.subr.mxu1 %v8385_v29 }
 0x853   :  { %2384 = vmatpush1.msra.mxu1 %v8391_v30 }
 0x854   :  { %2385 = vmatprep.subr.mxu1 %v8397_v1 }
 0x855   :  { %2386 = vmatpush2.msra.mxu1 %v8403_v2 }
 0x856   :  { %2387 = vmatprep.subr.mxu1 %v8409_v6 }
 0x857   :  { %2388 = vmatpush2.msra.mxu1 %v8415_v13 }
 0x858   :  { %2389 = vmatprep.subr.mxu1 %v8421_v14 }
 0x859   :  { %2390 = vmatpush2.msra.mxu1 %v8427_v19 }
 0x85a   :  { %2391 = vmatprep.subr.mxu1 %v8433_v33 }
 0x85b   :  { %2392 = vmatpush2.msra.mxu1 %v8439_v62 }
 0x85c   :  { %2393 = vmatprep.subr.mxu1 %v8445_v36 }
 0x85d   :  { %2394 = vmatpush2.msra.mxu1 %v8451_v45 }
 0x85e   :  { %2395 = vmatprep.subr.mxu1 %v8457_v46 }
 0x85f   :  { %2396 = vmatpush2.msra.mxu1 %v8463_v48 }
 0x860   :  { %2397 = vmatprep.subr.mxu1 %v8524_v55 }
 0x861   :  { %2398 = vmatpush2.msra.mxu1 %v8530_v57 }
 0x862   :  { %2399 = vmatprep.subr.mxu1 %v8537_v25 }
 0x863   :  { %2400 = vmatpush2.msra.mxu1 %v8544_v10 }
 0x864   :  { %2401 = vmatprep.subr.mxu1 %v8551_v11 }
 0x865   :  { %2402 = vmatpush2.msra.mxu1 %v8558_v16 }
 0x866   :  { %2403 = vmatprep.subr.mxu1 %v8565_v59 }
 0x8f4   :  { %v2129_v47 = vpop.f32.mrf.mxu1 }
 0x8f5   :  { %v2134_v3 = vadd.f32 %v2129_v47, %v581_v22  ;;  %v8570_v22 = vld [vmem:[%s11875_s4 + $0x160] sm:$0xff]  ;;  %v8575_v47 = vld [vmem:[%s11875_s4 + $0x158] sm:$0xff] }
 0x8f6   :  { %v2131_v8 = vpop.f32.mrf.mxu1  ;;  %12332 = vst [vmem:[#allocation54_spill] sm:$0xff] %v8570_v22  ;;  %12333 = vst [vmem:[#allocation55_spill] sm:$0xff] %v8575_v47  ;;  %2404 = vmatpush2.msra.mxu1 %v8570_v22 }
 0x8f7   :  { %v2135_v9 = vadd.f32 %v2131_v8, %v582_v60  ;;  %v8589_v60 = vld [vmem:[%s11875_s4 + $0x148] sm:$0xff]  ;;  %2405 = vmatprep.subr.mxu1 %v8575_v47  ;;  %v8603_v8 = vld [vmem:[%s11875_s4 + $0x138] sm:$0xff] }
 0x8f8   :  { %12335 = vst [vmem:[#allocation57_spill] sm:$0xff] %v8589_v60  ;;  %2406 = vmatpush2.msra.mxu1 %v8582_v58  ;;  %12337 = vst [vmem:[#allocation59_spill] sm:$0xff] %v8603_v8 }
 0x8f9   :  { %5873 = vtanh.f32 %v2135_v9  ;;  %2407 = vmatprep.subr.mxu1 %v8589_v60  ;;  %v8610_v9 = vld [vmem:[%s11875_s4 + $0x130] sm:$0xff] }
 0x8fa   :  { %5875 = vtanh.f32 %v2134_v3  ;;  %v8596_v3 = vld [vmem:[%s11875_s4 + $0x140] sm:$0xff]  ;;  %12338 = vst [vmem:[#allocation43_spill] sm:$0xff] %v8610_v9 }
 0x8fb   :  { %12336 = vst [vmem:[#allocation58_spill] sm:$0xff] %v8596_v3  ;;  %2408 = vmatpush2.msra.mxu1 %v8596_v3 }
 0x8fc   :  { %2409 = vmatprep.subr.mxu1 %v8603_v8 }
 0x8fd   :  { %2410 = vmatpush2.msra.mxu1 %v8610_v9 }
 0x906   :  { %v8472_v49 = vpop.eup %5873 }
 0x907   :  { %12330 = vst [vmem:[#allocation52_spill] sm:$0xff] %v8472_v49  ;;  %v8474_v12 = vpop.eup %5875  ;;  %2272 = vmatprep.mubr.f32.mxu0 %v8472_v49  ;;  %v8624_v49 = vld [vmem:[%s11875_s4 + $0x120] sm:$0xff] }
 0x908   :  { %12331 = vst [vmem:[#allocation53_spill] sm:$0xff] %v8474_v12  ;;  %2273 = vmatmul.mubr.f32.vlgmr.msra.gmra.mxu0 %v8474_v12  ;;  %v8617_v12 = vld [vmem:[%s11875_s4 + $0x128] sm:$0xff]  ;;  %12340 = vst [vmem:[#allocation65_spill] sm:$0xff] %v8624_v49 }
 0x909   :  { %2499 = vmatpush1.msra.mxu0 %v8137_v63  ;;  %12339 = vst [vmem:[#allocation64_spill] sm:$0xff] %v8617_v12  ;;  %2411 = vmatprep.subr.mxu1 %v8617_v12 }
 0x90a   :  { %2500 = vmatprep.subr.mxu0 %v8142_v38  ;;  %2412 = vmatpush2.msra.mxu1 %v8624_v49 }
 0x90b   :  { %2501 = vmatpush1.msra.mxu0 %v8148_v43  ;;  %2413 = vmatprep.subr.mxu1 %v8631_v18 }
 0x90c   :  { %2502 = vmatprep.subr.mxu0 %v8155_v7  ;;  %2414 = vmatpush2.msra.mxu1 %v8638_v17 }
 0x90d   :  { %2503 = vmatpush1.msra.mxu0 %v8161_v35 }
 0x90e   :  { %2504 = vmatprep.subr.mxu0 %v8167_v39 }
 0x90f   :  { %2505 = vmatpush1.msra.mxu0 %v8173_v40 }
 0x910   :  { %2506 = vmatprep.subr.mxu0 %v8179_v41 }
 0x911   :  { %2507 = vmatpush1.msra.mxu0 %v8185_v42 }
 0x912   :  { %2508 = vmatprep.subr.mxu0 %v8191_v20 }
 0x913   :  { %2509 = vmatpush1.msra.mxu0 %v12326_v21 }
 0x914   :  { %2510 = vmatprep.subr.mxu0 %v12327_v26 }
 0x915   :  { %2511 = vmatpush1.msra.mxu0 %v8209_v61 }
 0x916   :  { %2512 = vmatprep.subr.mxu0 %v8215_v44 }
 0x917   :  { %2513 = vmatpush1.msra.mxu0 %v8221_v5 }
 0x918   :  { %2514 = vmatprep.subr.mxu0 %v8227_v34 }
 0x919   :  { %2515 = vmatpush1.msra.mxu0 %v8233_v32 }
 0x91a   :  { %2516 = vmatprep.subr.mxu0 %v8239_v37 }
 0x91b   :  { %2517 = vmatpush1.msra.mxu0 %v8321_v31 }
 0x91c   :  { %2518 = vmatprep.subr.mxu0 %v8326_v51 }
 0x91d   :  { %2519 = vmatpush1.msra.mxu0 %v8331_v52 }
 0x91e   :  { %2520 = vmatprep.subr.mxu0 %v8337_v53 }
 0x91f   :  { %2521 = vmatpush1.msra.mxu0 %v8343_v54 }
 0x920   :  { %2522 = vmatprep.subr.mxu0 %v8349_v56 }
 0x921   :  { %2523 = vmatpush1.msra.mxu0 %v8355_v50 }
 0x922   :  { %2524 = vmatprep.subr.mxu0 %v8361_v23 }
 0x923   :  { %2525 = vmatpush1.msra.mxu0 %v8367_v24 }
 0x924   :  { %2526 = vmatprep.subr.mxu0 %v8373_v27 }
 0x925   :  { %2527 = vmatpush1.msra.mxu0 %v8379_v28 }
 0x926   :  { %2528 = vmatprep.subr.mxu0 %v8385_v29 }
 0x927   :  { %2529 = vmatpush1.msra.mxu0 %v8391_v30 }
 0x928   :  { %2530 = vmatprep.subr.mxu0 %v8397_v1 }
 0x929   :  { %2531 = vmatpush2.msra.mxu0 %v8403_v2 }
 0x92a   :  { %2532 = vmatprep.subr.mxu0 %v8409_v6 }
 0x92b   :  { %2533 = vmatpush2.msra.mxu0 %v8415_v13 }
 0x92c   :  { %2534 = vmatprep.subr.mxu0 %v8421_v14 }
 0x92d   :  { %2535 = vmatpush2.msra.mxu0 %v8427_v19 }
 0x92e   :  { %2536 = vmatprep.subr.mxu0 %v8433_v33 }
 0x92f   :  { %2537 = vmatpush2.msra.mxu0 %v8439_v62 }
 0x930   :  { %2538 = vmatprep.subr.mxu0 %v8445_v36 }
 0x931   :  { %2539 = vmatpush2.msra.mxu0 %v8451_v45 }
 0x932   :  { %2540 = vmatprep.subr.mxu0 %v8457_v46 }
 0x933   :  { %2541 = vmatpush2.msra.mxu0 %v8463_v48 }
 0x934   :  { %2542 = vmatprep.subr.mxu0 %v8524_v55 }
 0x935   :  { %2543 = vmatpush2.msra.mxu0 %v8530_v57 }
 0x936   :  { %2544 = vmatprep.subr.mxu0 %v8537_v25 }
 0x937   :  { %2545 = vmatpush2.msra.mxu0 %v8544_v10 }
 0x938   :  { %2546 = vmatprep.subr.mxu0 %v8551_v11 }
 0x939   :  { %2547 = vmatpush2.msra.mxu0 %v8558_v16 }
 0x93a   :  { %2548 = vmatprep.subr.mxu0 %v8565_v59 }
 0x93b   :  { %2549 = vmatpush2.msra.mxu0 %v8570_v22 }
 0x93c   :  { %2550 = vmatprep.subr.mxu0 %v8575_v47 }
 0x93d   :  { %2551 = vmatpush2.msra.mxu0 %v8582_v58 }
 0x93e   :  { %2552 = vmatprep.subr.mxu0 %v8589_v60  ;;  %v12345_v60 = vld [vmem:[#allocation71_spill] sm:$0xff] }
 0x93f   :  { %2553 = vmatpush2.msra.mxu0 %v8596_v3 }
 0x940   :  { %2554 = vmatprep.subr.mxu0 %v8603_v8  ;;  %v8645_v8 = vld [vmem:[%s11875_s4 + $0x108] sm:$0xff] }
 0x941   :  { %2555 = vmatpush2.msra.mxu0 %v8610_v9  ;;  %12343 = vst [vmem:[#allocation63_spill] sm:$0xff] %v8645_v8  ;;  %v8652_v9 = vld [vmem:[%s11875_s4 + $0x100] sm:$0xff]  ;;  %2415 = vmatprep.subr.mxu1 %v8645_v8 }
 0x942   :  { %2556 = vmatprep.subr.mxu0 %v8617_v12  ;;  %2416 = vmatpush2.msra.mxu1 %v8652_v9 }
 0x943   :  { %2557 = vmatpush2.msra.mxu0 %v8624_v49  ;;  %2643 = vmatprep.subr.mxu1 %v8132_v0  ;;  %v12344_v49 = vld [vmem:[#allocation70_spill] sm:$0xff] }
 0x944   :  { %2558 = vmatprep.subr.mxu0 %v8631_v18  ;;  %v583_v12 = vadd.f32 %v7006_v4, %v12344_v49  ;;  %v584_v18 = vadd.f32 %v7010_v15, %v12345_v60  ;;  %v12352_v0 = vld [vmem:[#allocation58_spill] sm:$0xff]  ;;  %v8764_v60 = vld [vmem:[%s11875_s4 + $0xe0] sm:$0xff] }
 0x945   :  { %2559 = vmatpush2.msra.mxu0 %v8638_v17 }
 0x946   :  { %2560 = vmatprep.subr.mxu0 %v8645_v8 }
 0x947   :  { %2561 = vmatpush2.msra.mxu0 %v8652_v9 }
 0x9c8   :  { %v2274_v3 = vpop.f32.mrf.mxu0 }
 0x9c9   :  { %v2279_v58 = vadd.f32 %v2274_v3, %v583_v12  ;;  %v8748_v12 = vld [vmem:[%s11875_s4 + $0xf8] sm:$0xff] }
 0x9ca   :  { %v2276_v47 = vpop.f32.mrf.mxu0  ;;  %2788 = vmatprep.subr.mxu0 %v8748_v12  ;;  %v8771_v3 = vld [vmem:[%s11875_s4 + $0xd8] sm:$0xff] }
 0x9cb   :  { %v2280_v17 = vadd.f32 %v2276_v47, %v584_v18  ;;  %v8753_v47 = vld [vmem:[%s11875_s4 + $0xf0] sm:$0xff] }
 0x9cd   :  { %5877 = vtanh.f32 %v2280_v17 }
 0x9ce   :  { %5879 = vtanh.f32 %v2279_v58  ;;  %v8758_v58 = vld [vmem:[%s11875_s4 + $0xe8] sm:$0xff] }
 0x9da   :  { %v8666_v22 = vpop.eup %5877 }
 0x9db   :  { %12346 = vst [vmem:[#allocation49_spill] sm:$0xff] %v8666_v22  ;;  %v8668_v8 = vpop.eup %5879  ;;  %2417 = vmatprep.mubr.f32.mxu1 %v8666_v22  ;;  %v8843_v22 = vld [vmem:[%s11875_s4 + $0x78] sm:$0xff] }
 0x9dc   :  { %12347 = vst [vmem:[#allocation68_spill] sm:$0xff] %v8668_v8  ;;  %2418 = vmatmul.mubr.f32.vlgmr.msra.gmra.mxu1 %v8668_v8  ;;  %v8837_v8 = vld [vmem:[%s11875_s4 + $0x80] sm:$0xff] }
 0x9dd   :  { %2644 = vmatpush1.msra.mxu1 %v8137_v63  ;;  %v12353_v63 = vld [vmem:[#allocation59_spill] sm:$0xff] }
 0x9de   :  { %2645 = vmatprep.subr.mxu1 %v8142_v38  ;;  %v12354_v38 = vld [vmem:[#allocation43_spill] sm:$0xff] }
 0x9df   :  { %2646 = vmatpush1.msra.mxu1 %v8148_v43  ;;  %v12355_v43 = vld [vmem:[#allocation64_spill] sm:$0xff] }
 0x9e0   :  { %2647 = vmatprep.subr.mxu1 %v8155_v7  ;;  %v12356_v7 = vld [vmem:[#allocation65_spill] sm:$0xff] }
 0x9e1   :  { %2648 = vmatpush1.msra.mxu1 %v8161_v35  ;;  %v12357_v35 = vld [vmem:[#allocation66_spill] sm:$0xff] }
 0x9e2   :  { %2649 = vmatprep.subr.mxu1 %v8167_v39  ;;  %v12358_v39 = vld [vmem:[#allocation67_spill] sm:$0xff] }
 0x9e3   :  { %2650 = vmatpush1.msra.mxu1 %v8173_v40  ;;  %v12359_v40 = vld [vmem:[#allocation63_spill] sm:$0xff] }
 0x9e4   :  { %2651 = vmatprep.subr.mxu1 %v8179_v41  ;;  %v12360_v41 = vld [vmem:[#allocation72_spill] sm:$0xff] }
 0x9e5   :  { %2652 = vmatpush1.msra.mxu1 %v8185_v42  ;;  %v585_v42 = vadd.f32 %v7006_v4, %v12360_v41  ;;  %v8777_v41 = vld [vmem:[%s11875_s4 + $0xd0] sm:$0xff] }
 0x9e6   :  { %2653 = vmatprep.subr.mxu1 %v8191_v20 }
 0x9e7   :  { %2654 = vmatpush1.msra.mxu1 %v12326_v21 }
 0x9e8   :  { %2655 = vmatprep.subr.mxu1 %v12327_v26 }
 0x9e9   :  { %2656 = vmatpush1.msra.mxu1 %v8209_v61  ;;  %v12351_v61 = vld [vmem:[#allocation57_spill] sm:$0xff] }
 0x9ea   :  { %2657 = vmatprep.subr.mxu1 %v8215_v44  ;;  %v12350_v44 = vld [vmem:[#allocation56_spill] sm:$0xff] }
 0x9eb   :  { %2658 = vmatpush1.msra.mxu1 %v8221_v5  ;;  %v12349_v5 = vld [vmem:[#allocation55_spill] sm:$0xff] }
 0x9ec   :  { %2659 = vmatprep.subr.mxu1 %v8227_v34  ;;  %v12348_v34 = vld [vmem:[#allocation54_spill] sm:$0xff] }
 0x9ed   :  { %2660 = vmatpush1.msra.mxu1 %v8233_v32  ;;  %v12361_v32 = vld [vmem:[#allocation73_spill] sm:$0xff] }
 0x9ee   :  { %2661 = vmatprep.subr.mxu1 %v8239_v37  ;;  %v586_v37 = vadd.f32 %v7010_v15, %v12361_v32  ;;  %v8795_v32 = vld [vmem:[%s11875_s4 + $0xb8] sm:$0xff] }
 0x9ef   :  { %2662 = vmatpush1.msra.mxu1 %v8321_v31 }
 0x9f0   :  { %2663 = vmatprep.subr.mxu1 %v8326_v51 }
 0x9f1   :  { %2664 = vmatpush1.msra.mxu1 %v8331_v52 }
 0x9f2   :  { %2665 = vmatprep.subr.mxu1 %v8337_v53 }
 0x9f3   :  { %2666 = vmatpush1.msra.mxu1 %v8343_v54 }
 0x9f4   :  { %2667 = vmatprep.subr.mxu1 %v8349_v56 }
 0x9f5   :  { %2668 = vmatpush1.msra.mxu1 %v8355_v50 }
 0x9f6   :  { %2669 = vmatprep.subr.mxu1 %v8361_v23 }
 0x9f7   :  { %2670 = vmatpush1.msra.mxu1 %v8367_v24 }
 0x9f8   :  { %2671 = vmatprep.subr.mxu1 %v8373_v27 }
 0x9f9   :  { %2672 = vmatpush1.msra.mxu1 %v8379_v28 }
 0x9fa   :  { %2673 = vmatprep.subr.mxu1 %v8385_v29 }
 0x9fb   :  { %2674 = vmatpush1.msra.mxu1 %v8391_v30 }
 0x9fc   :  { %2675 = vmatprep.subr.mxu1 %v8397_v1 }
 0x9fd   :  { %2676 = vmatpush2.msra.mxu1 %v8403_v2 }
 0x9fe   :  { %2677 = vmatprep.subr.mxu1 %v8409_v6 }
 0x9ff   :  { %2678 = vmatpush2.msra.mxu1 %v8415_v13 }
 0xa00   :  { %2679 = vmatprep.subr.mxu1 %v8421_v14 }
 0xa01   :  { %2680 = vmatpush2.msra.mxu1 %v8427_v19 }
 0xa02   :  { %2681 = vmatprep.subr.mxu1 %v8433_v33 }
 0xa03   :  { %2682 = vmatpush2.msra.mxu1 %v8439_v62 }
 0xa04   :  { %2683 = vmatprep.subr.mxu1 %v8445_v36 }
 0xa05   :  { %2684 = vmatpush2.msra.mxu1 %v8451_v45 }
 0xa06   :  { %2685 = vmatprep.subr.mxu1 %v8457_v46 }
 0xa07   :  { %2686 = vmatpush2.msra.mxu1 %v8463_v48 }
 0xa08   :  { %2687 = vmatprep.subr.mxu1 %v8524_v55 }
 0xa09   :  { %2688 = vmatpush2.msra.mxu1 %v8530_v57 }
 0xa0a   :  { %2689 = vmatprep.subr.mxu1 %v8537_v25 }
 0xa0b   :  { %2690 = vmatpush2.msra.mxu1 %v8544_v10 }
 0xa0c   :  { %2691 = vmatprep.subr.mxu1 %v8551_v11 }
 0xa0d   :  { %2692 = vmatpush2.msra.mxu1 %v8558_v16 }
 0xa0e   :  { %2693 = vmatprep.subr.mxu1 %v8565_v59 }
 0xa0f   :  { %2694 = vmatpush2.msra.mxu1 %v12348_v34 }
 0xa10   :  { %2695 = vmatprep.subr.mxu1 %v12349_v5 }
 0xa11   :  { %2696 = vmatpush2.msra.mxu1 %v12350_v44 }
 0xa12   :  { %2697 = vmatprep.subr.mxu1 %v12351_v61 }
 0xa13   :  { %2698 = vmatpush2.msra.mxu1 %v12352_v0 }
 0xa14   :  { %2699 = vmatprep.subr.mxu1 %v12353_v63 }
 0xa15   :  { %2700 = vmatpush2.msra.mxu1 %v12354_v38 }
 0xa16   :  { %2701 = vmatprep.subr.mxu1 %v12355_v43 }
 0xa17   :  { %2702 = vmatpush2.msra.mxu1 %v12356_v7 }
 0xa18   :  { %2703 = vmatprep.subr.mxu1 %v12357_v35 }
 0xa19   :  { %2704 = vmatpush2.msra.mxu1 %v12358_v39 }
 0xa1a   :  { %2705 = vmatprep.subr.mxu1 %v12359_v40 }
 0xa1b   :  { %2706 = vmatpush2.msra.mxu1 %v8652_v9 }
 0xa1c   :  { %2933 = vmatprep.subr.mxu1 %v8748_v12 }
 0xa9c   :  { %v2419_v20 = vpop.f32.mrf.mxu1 }
 0xa9d   :  { %v2424_v17 = vadd.f32 %v2419_v20, %v585_v42  ;;  %v8783_v42 = vld [vmem:[%s11875_s4 + $0xc8] sm:$0xff]  ;;  %v8789_v20 = vld [vmem:[%s11875_s4 + $0xc0] sm:$0xff] }
 0xa9e   :  { %v2421_v18 = vpop.f32.mrf.mxu1 }
 0xa9f   :  { %v2425_v21 = vadd.f32 %v2421_v18, %v586_v37  ;;  %v8801_v37 = vld [vmem:[%s11875_s4 + $0xb0] sm:$0xff]  ;;  %v8813_v18 = vld [vmem:[%s11875_s4 + $0xa0] sm:$0xff] }
 0xaa0   :  { %12364 = vst [vmem:[#allocation71_spill] sm:$0xff] %v8813_v18 }
 0xaa1   :  { %5881 = vtanh.f32 %v2425_v21  ;;  %v8819_v21 = vld [vmem:[%s11875_s4 + $0x98] sm:$0xff] }
 0xaa2   :  { %5883 = vtanh.f32 %v2424_v17  ;;  %v8807_v17 = vld [vmem:[%s11875_s4 + $0xa8] sm:$0xff]  ;;  %12365 = vst [vmem:[#allocation54_spill] sm:$0xff] %v8819_v21 }
 0xaae   :  { %v8739_v26 = vpop.eup %5881 }
 0xaaf   :  { %12362 = vst [vmem:[#allocation69_spill] sm:$0xff] %v8739_v26  ;;  %v8741_v49 = vpop.eup %5883  ;;  %2562 = vmatprep.mubr.f32.mxu0 %v8739_v26  ;;  %v8831_v26 = vld [vmem:[%s11875_s4 + $0x88] sm:$0xff] }
 0xab0   :  { %12363 = vst [vmem:[#allocation70_spill] sm:$0xff] %v8741_v49  ;;  %2563 = vmatmul.mubr.f32.vlgmr.msra.gmra.mxu0 %v8741_v49  ;;  %v8825_v49 = vld [vmem:[%s11875_s4 + $0x90] sm:$0xff] }
 0xab1   :  { %2789 = vmatpush1.msra.mxu0 %v8753_v47 }
 0xab2   :  { %2790 = vmatprep.subr.mxu0 %v8758_v58 }
 0xab3   :  { %2791 = vmatpush1.msra.mxu0 %v8764_v60 }
 0xab4   :  { %2792 = vmatprep.subr.mxu0 %v8771_v3 }
 0xab5   :  { %2793 = vmatpush1.msra.mxu0 %v8777_v41 }
 0xab6   :  { %2794 = vmatprep.subr.mxu0 %v8783_v42 }
 0xab7   :  { %2795 = vmatpush1.msra.mxu0 %v8789_v20 }
 0xab8   :  { %2796 = vmatprep.subr.mxu0 %v8795_v32 }
 0xab9   :  { %2797 = vmatpush1.msra.mxu0 %v8801_v37 }
 0xaba   :  { %2798 = vmatprep.subr.mxu0 %v8807_v17 }
 0xabb   :  { %2799 = vmatpush1.msra.mxu0 %v8813_v18  ;;  %v8849_v18 = vld [vmem:[%s11875_s4 + $0x70] sm:$0xff] }
 0xabc   :  { %2800 = vmatprep.subr.mxu0 %v8819_v21  ;;  %v8855_v21 = vld [vmem:[%s11875_s4 + $0x68] sm:$0xff] }
 0xabd   :  { %2801 = vmatpush1.msra.mxu0 %v8825_v49 }
 0xabe   :  { %2802 = vmatprep.subr.mxu0 %v8831_v26 }
 0xabf   :  { %2803 = vmatpush1.msra.mxu0 %v8837_v8 }
 0xac0   :  { %2804 = vmatprep.subr.mxu0 %v8843_v22 }
 0xac1   :  { %2805 = vmatpush1.msra.mxu0 %v8849_v18 }
 0xac2   :  { %2806 = vmatprep.subr.mxu0 %v8855_v21 }
 0xac3   :  { %2807 = vmatpush1.msra.mxu0 %v8321_v31  ;;  %v12366_v31 = vld [vmem:[#allocation74_spill] sm:$0xff] }
 0xac4   :  { %2808 = vmatprep.subr.mxu0 %v8326_v51  ;;  %v587_v51 = vadd.f32 %v7006_v4, %v12366_v31 }
 0xac5   :  { %2809 = vmatpush1.msra.mxu0 %v8331_v52 }
 0xac6   :  { %2810 = vmatprep.subr.mxu0 %v8337_v53  ;;  %v12367_v53 = vld [vmem:[#allocation75_spill] sm:$0xff] }
 0xac7   :  { %2811 = vmatpush1.msra.mxu0 %v8343_v54  ;;  %v588_v54 = vadd.f32 %v7010_v15, %v12367_v53  ;;  %v9146_v53 = vld [vmem:[%s11875_s4 + $0x190] sm:$0xff] }
 0xac8   :  { %2812 = vmatprep.subr.mxu0 %v8349_v56 }
 0xac9   :  { %2813 = vmatpush1.msra.mxu0 %v8355_v50 }
 0xaca   :  { %2814 = vmatprep.subr.mxu0 %v8361_v23 }
 0xacb   :  { %2815 = vmatpush1.msra.mxu0 %v8367_v24 }
 0xacc   :  { %2816 = vmatprep.subr.mxu0 %v8373_v27 }
 0xacd   :  { %2817 = vmatpush1.msra.mxu0 %v8379_v28  ;;  %v12370_v28 = vld [vmem:[#allocation71_spill] sm:$0xff] }
 0xace   :  { %2818 = vmatprep.subr.mxu0 %v8385_v29  ;;  %v12371_v29 = vld [vmem:[#allocation54_spill] sm:$0xff] }
 0xacf   :  { %2819 = vmatpush1.msra.mxu0 %v8391_v30  ;;  %v8937_v30 = vld [vmem:[%s11875_s4 + $0x60] sm:$0xff] }
 0xad0   :  { %2820 = vmatprep.subr.mxu0 %v8397_v1  ;;  %v8942_v1 = vld [vmem:[%s11875_s4 + $0x58] sm:$0xff] }
 0xad1   :  { %2821 = vmatpush2.msra.mxu0 %v8403_v2  ;;  %v8947_v2 = vld [vmem:[%s11875_s4 + $0x50] sm:$0xff] }
 0xad2   :  { %2822 = vmatprep.subr.mxu0 %v8409_v6  ;;  %v8953_v6 = vld [vmem:[%s11875_s4 + $0x48] sm:$0xff] }
 0xad3   :  { %2823 = vmatpush2.msra.mxu0 %v8415_v13  ;;  %v8959_v13 = vld [vmem:[%s11875_s4 + $0x40] sm:$0xff] }
 0xad4   :  { %2824 = vmatprep.subr.mxu0 %v8421_v14  ;;  %v8965_v14 = vld [vmem:[%s11875_s4 + $0x38] sm:$0xff] }
 0xad5   :  { %2825 = vmatpush2.msra.mxu0 %v8427_v19  ;;  %v8971_v19 = vld [vmem:[%s11875_s4 + $0x30] sm:$0xff] }
 0xad6   :  { %2826 = vmatprep.subr.mxu0 %v8433_v33  ;;  %v8977_v33 = vld [vmem:[%s11875_s4 + $0x28] sm:$0xff] }
 0xad7   :  { %2827 = vmatpush2.msra.mxu0 %v8439_v62  ;;  %v8983_v62 = vld [vmem:[%s11875_s4 + $0x20] sm:$0xff] }
 0xad8   :  { %2828 = vmatprep.subr.mxu0 %v8445_v36  ;;  %v8989_v36 = vld [vmem:[%s11875_s4 + $0x18] sm:$0xff] }
 0xad9   :  { %2829 = vmatpush2.msra.mxu0 %v8451_v45  ;;  %v8995_v45 = vld [vmem:[%s11875_s4 + $0x10] sm:$0xff] }
 0xada   :  { %2830 = vmatprep.subr.mxu0 %v8457_v46  ;;  %v9001_v46 = vld [vmem:[%s11875_s4 + $0x8] sm:$0xff] }
 0xadb   :  { %2831 = vmatpush2.msra.mxu0 %v8463_v48  ;;  %v9007_v48 = vld [vmem:[%s11875_s4] sm:$0xff] }
 0xadc   :  { %2832 = vmatprep.subr.mxu0 %v8524_v55  ;;  %v9013_v55 = vld [vmem:[%s11875_s4 + $0x1f8] sm:$0xff] }
 0xadd   :  { %2833 = vmatpush2.msra.mxu0 %v8530_v57  ;;  %v9019_v57 = vld [vmem:[%s11875_s4 + $0x1f0] sm:$0xff] }
 0xade   :  { %2834 = vmatprep.subr.mxu0 %v8537_v25  ;;  %v9025_v25 = vld [vmem:[%s11875_s4 + $0x1e8] sm:$0xff] }
 0xadf   :  { %2835 = vmatpush2.msra.mxu0 %v8544_v10  ;;  %v9031_v10 = vld [vmem:[%s11875_s4 + $0x1e0] sm:$0xff] }
 0xae0   :  { %2836 = vmatprep.subr.mxu0 %v8551_v11  ;;  %v9037_v11 = vld [vmem:[%s11875_s4 + $0x1d8] sm:$0xff] }
 0xae1   :  { %2837 = vmatpush2.msra.mxu0 %v8558_v16  ;;  %v9043_v16 = vld [vmem:[%s11875_s4 + $0x1d0] sm:$0xff] }
 0xae2   :  { %2838 = vmatprep.subr.mxu0 %v8565_v59  ;;  %v9049_v59 = vld [vmem:[%s11875_s4 + $0x1c8] sm:$0xff] }
 0xae3   :  { %2839 = vmatpush2.msra.mxu0 %v12348_v34  ;;  %v9061_v34 = vld [vmem:[%s11875_s4 + $0x1b8] sm:$0xff] }
 0xae4   :  { %2840 = vmatprep.subr.mxu0 %v12349_v5  ;;  %v9067_v5 = vld [vmem:[%s11875_s4 + $0x1b0] sm:$0xff] }
 0xae5   :  { %2841 = vmatpush2.msra.mxu0 %v12350_v44  ;;  %v9073_v44 = vld [vmem:[%s11875_s4 + $0x1a8] sm:$0xff] }
 0xae6   :  { %2842 = vmatprep.subr.mxu0 %v12351_v61  ;;  %v9079_v61 = vld [vmem:[%s11875_s4 + $0x1a0] sm:$0xff] }
 0xae7   :  { %2843 = vmatpush2.msra.mxu0 %v12352_v0  ;;  %v12372_v0 = vld [vmem:[#allocation76_spill] sm:$0xff] }
 0xae8   :  { %2844 = vmatprep.subr.mxu0 %v12353_v63  ;;  %v589_v63 = vadd.f32 %v7006_v4, %v12372_v0  ;;  %v9181_v0 = vld [vmem:[%s11875_s4 + $0x168] sm:$0xff] }
 0xae9   :  { %2845 = vmatpush2.msra.mxu0 %v12354_v38 }
 0xaea   :  { %2846 = vmatprep.subr.mxu0 %v12355_v43  ;;  %v12373_v43 = vld [vmem:[#allocation77_spill] sm:$0xff] }
 0xaeb   :  { %2847 = vmatpush2.msra.mxu0 %v12356_v7  ;;  %v590_v7 = vadd.f32 %v7010_v15, %v12373_v43  ;;  %v9198_v43 = vld [vmem:[%s11875_s4 + $0x150] sm:$0xff] }
 0xaec   :  { %2848 = vmatprep.subr.mxu0 %v12357_v35  ;;  %12378 = vst [vmem:[#allocation64_spill] sm:$0xff] %v9198_v43 }
 0xaed   :  { %2849 = vmatpush2.msra.mxu0 %v12358_v39 }
 0xaee   :  { %2850 = vmatprep.subr.mxu0 %v12359_v40 }
 0xaef   :  { %2851 = vmatpush2.msra.mxu0 %v8652_v9  ;;  %v9055_v9 = vld [vmem:[%s11875_s4 + $0x1c0] sm:$0xff] }
 0xaf0   :  { %3078 = vmatprep.subr.mxu0 %v8748_v12 }
 0xb70   :  { %v2564_v52 = vpop.f32.mrf.mxu0 }
 0xb71   :  { %v2569_v56 = vadd.f32 %v2564_v52, %v587_v51  ;;  %v9140_v52 = vld [vmem:[%s11875_s4 + $0x198] sm:$0xff] }
 0xb72   :  { %v2566_v50 = vpop.f32.mrf.mxu0 }
 0xb73   :  { %v2570_v23 = vadd.f32 %v2566_v50, %v588_v54  ;;  %v9153_v54 = vld [vmem:[%s11875_s4 + $0x188] sm:$0xff]  ;;  %v9167_v50 = vld [vmem:[%s11875_s4 + $0x178] sm:$0xff] }
 0xb75   :  { %5885 = vtanh.f32 %v2570_v23  ;;  %v9174_v23 = vld [vmem:[%s11875_s4 + $0x170] sm:$0xff] }
 0xb76   :  { %5887 = vtanh.f32 %v2569_v56  ;;  %v9160_v56 = vld [vmem:[%s11875_s4 + $0x180] sm:$0xff] }
 0xb82   :  { %v8910_v24 = vpop.eup %5885 }
 0xb83   :  { %12368 = vst [vmem:[#allocation55_spill] sm:$0xff] %v8910_v24  ;;  %v8912_v27 = vpop.eup %5887  ;;  %2707 = vmatprep.mubr.f32.mxu1 %v8910_v24  ;;  %v9254_v24 = vld [vmem:[%s11875_s4 + $0x110] sm:$0xff] }
 0xb84   :  { %12369 = vst [vmem:[#allocation56_spill] sm:$0xff] %v8912_v27  ;;  %2708 = vmatmul.mubr.f32.vlgmr.msra.gmra.mxu1 %v8912_v27  ;;  %v9247_v27 = vld [vmem:[%s11875_s4 + $0x118] sm:$0xff]  ;;  %12386 = vst [vmem:[#allocation75_spill] sm:$0xff] %v9254_v24 }
 0xb85   :  { %2934 = vmatpush1.msra.mxu1 %v8753_v47  ;;  %12385 = vst [vmem:[#allocation74_spill] sm:$0xff] %v9247_v27 }
 0xb86   :  { %2935 = vmatprep.subr.mxu1 %v8758_v58 }
 0xb87   :  { %2936 = vmatpush1.msra.mxu1 %v8764_v60 }
 0xb88   :  { %2937 = vmatprep.subr.mxu1 %v8771_v3 }
 0xb89   :  { %2938 = vmatpush1.msra.mxu1 %v8777_v41 }
 0xb8a   :  { %2939 = vmatprep.subr.mxu1 %v8783_v42 }
 0xb8b   :  { %2940 = vmatpush1.msra.mxu1 %v8789_v20 }
 0xb8c   :  { %2941 = vmatprep.subr.mxu1 %v8795_v32 }
 0xb8d   :  { %2942 = vmatpush1.msra.mxu1 %v8801_v37 }
 0xb8e   :  { %2943 = vmatprep.subr.mxu1 %v8807_v17 }
 0xb8f   :  { %2944 = vmatpush1.msra.mxu1 %v12370_v28 }
 0xb90   :  { %2945 = vmatprep.subr.mxu1 %v12371_v29 }
 0xb91   :  { %2946 = vmatpush1.msra.mxu1 %v8825_v49 }
 0xb92   :  { %2947 = vmatprep.subr.mxu1 %v8831_v26 }
 0xb93   :  { %2948 = vmatpush1.msra.mxu1 %v8837_v8 }
 0xb94   :  { %2949 = vmatprep.subr.mxu1 %v8843_v22 }
 0xb95   :  { %2950 = vmatpush1.msra.mxu1 %v8849_v18 }
 0xb96   :  { %2951 = vmatprep.subr.mxu1 %v8855_v21 }
 0xb97   :  { %2952 = vmatpush1.msra.mxu1 %v8937_v30 }
 0xb98   :  { %2953 = vmatprep.subr.mxu1 %v8942_v1 }
 0xb99   :  { %2954 = vmatpush1.msra.mxu1 %v8947_v2 }
 0xb9a   :  { %2955 = vmatprep.subr.mxu1 %v8953_v6 }
 0xb9b   :  { %2956 = vmatpush1.msra.mxu1 %v8959_v13 }
 0xb9c   :  { %2957 = vmatprep.subr.mxu1 %v8965_v14 }
 0xb9d   :  { %2958 = vmatpush1.msra.mxu1 %v8971_v19 }
 0xb9e   :  { %2959 = vmatprep.subr.mxu1 %v8977_v33 }
 0xb9f   :  { %2960 = vmatpush1.msra.mxu1 %v8983_v62 }
 0xba0   :  { %2961 = vmatprep.subr.mxu1 %v8989_v36 }
 0xba1   :  { %2962 = vmatpush1.msra.mxu1 %v8995_v45 }
 0xba2   :  { %2963 = vmatprep.subr.mxu1 %v9001_v46 }
 0xba3   :  { %2964 = vmatpush1.msra.mxu1 %v9007_v48 }
 0xba4   :  { %2965 = vmatprep.subr.mxu1 %v9013_v55 }
 0xba5   :  { %2966 = vmatpush2.msra.mxu1 %v9019_v57 }
 0xba6   :  { %2967 = vmatprep.subr.mxu1 %v9025_v25 }
 0xba7   :  { %2968 = vmatpush2.msra.mxu1 %v9031_v10 }
 0xba8   :  { %2969 = vmatprep.subr.mxu1 %v9037_v11 }
 0xba9   :  { %2970 = vmatpush2.msra.mxu1 %v9043_v16 }
 0xbaa   :  { %2971 = vmatprep.subr.mxu1 %v9049_v59 }
 0xbab   :  { %2972 = vmatpush2.msra.mxu1 %v9055_v9 }
 0xbac   :  { %2973 = vmatprep.subr.mxu1 %v9061_v34 }
 0xbad   :  { %2974 = vmatpush2.msra.mxu1 %v9067_v5 }
 0xbae   :  { %2975 = vmatprep.subr.mxu1 %v9073_v44 }
 0xbaf   :  { %2976 = vmatpush2.msra.mxu1 %v9079_v61 }
 0xbb0   :  { %2977 = vmatprep.subr.mxu1 %v9140_v52 }
 0xbb1   :  { %2978 = vmatpush2.msra.mxu1 %v9146_v53 }
 0xbb2   :  { %2979 = vmatprep.subr.mxu1 %v9153_v54 }
 0xbb3   :  { %2980 = vmatpush2.msra.mxu1 %v9160_v56 }
 0xbb4   :  { %2981 = vmatprep.subr.mxu1 %v9167_v50 }
 0xbb5   :  { %2982 = vmatpush2.msra.mxu1 %v9174_v23 }
 0xbb6   :  { %2983 = vmatprep.subr.mxu1 %v9181_v0 }
 0xc44   :  { %v2709_v38 = vpop.f32.mrf.mxu1 }
 0xc45   :  { %v2714_v35 = vadd.f32 %v2709_v38, %v589_v63  ;;  %v9186_v63 = vld [vmem:[%s11875_s4 + $0x160] sm:$0xff]  ;;  %v9191_v38 = vld [vmem:[%s11875_s4 + $0x158] sm:$0xff] }
 0xc46   :  { %v2711_v39 = vpop.f32.mrf.mxu1  ;;  %12376 = vst [vmem:[#allocation59_spill] sm:$0xff] %v9186_v63  ;;  %12377 = vst [vmem:[#allocation43_spill] sm:$0xff] %v9191_v38  ;;  %2984 = vmatpush2.msra.mxu1 %v9186_v63 }
 0xc47   :  { %v2715_v40 = vadd.f32 %v2711_v39, %v590_v7  ;;  %v9205_v7 = vld [vmem:[%s11875_s4 + $0x148] sm:$0xff]  ;;  %2985 = vmatprep.subr.mxu1 %v9191_v38  ;;  %v9219_v39 = vld [vmem:[%s11875_s4 + $0x138] sm:$0xff] }
 0xc48   :  { %12379 = vst [vmem:[#allocation65_spill] sm:$0xff] %v9205_v7  ;;  %2986 = vmatpush2.msra.mxu1 %v9198_v43  ;;  %12381 = vst [vmem:[#allocation67_spill] sm:$0xff] %v9219_v39 }
 0xc49   :  { %5889 = vtanh.f32 %v2715_v40  ;;  %2987 = vmatprep.subr.mxu1 %v9205_v7  ;;  %v9226_v40 = vld [vmem:[%s11875_s4 + $0x130] sm:$0xff] }
 0xc4a   :  { %5891 = vtanh.f32 %v2714_v35  ;;  %v9212_v35 = vld [vmem:[%s11875_s4 + $0x140] sm:$0xff]  ;;  %12382 = vst [vmem:[#allocation63_spill] sm:$0xff] %v9226_v40 }
 0xc4b   :  { %12380 = vst [vmem:[#allocation66_spill] sm:$0xff] %v9212_v35  ;;  %2988 = vmatpush2.msra.mxu1 %v9212_v35 }
 0xc4c   :  { %2989 = vmatprep.subr.mxu1 %v9219_v39 }
 0xc4d   :  { %2990 = vmatpush2.msra.mxu1 %v9226_v40 }
 0xc56   :  { %v9088_v31 = vpop.eup %5889 }
 0xc57   :  { %12374 = vst [vmem:[#allocation57_spill] sm:$0xff] %v9088_v31  ;;  %v9090_v51 = vpop.eup %5891  ;;  %2852 = vmatprep.mubr.f32.mxu0 %v9088_v31  ;;  %v9240_v31 = vld [vmem:[%s11875_s4 + $0x120] sm:$0xff] }
 0xc58   :  { %12375 = vst [vmem:[#allocation58_spill] sm:$0xff] %v9090_v51  ;;  %2853 = vmatmul.mubr.f32.vlgmr.msra.gmra.mxu0 %v9090_v51  ;;  %v9233_v51 = vld [vmem:[%s11875_s4 + $0x128] sm:$0xff]  ;;  %12384 = vst [vmem:[#allocation73_spill] sm:$0xff] %v9240_v31 }
 0xc59   :  { %3079 = vmatpush1.msra.mxu0 %v8753_v47  ;;  %12383 = vst [vmem:[#allocation72_spill] sm:$0xff] %v9233_v51  ;;  %2991 = vmatprep.subr.mxu1 %v9233_v51 }
 0xc5a   :  { %3080 = vmatprep.subr.mxu0 %v8758_v58  ;;  %2992 = vmatpush2.msra.mxu1 %v9240_v31 }
 0xc5b   :  { %3081 = vmatpush1.msra.mxu0 %v8764_v60  ;;  %2993 = vmatprep.subr.mxu1 %v9247_v27 }
 0xc5c   :  { %3082 = vmatprep.subr.mxu0 %v8771_v3  ;;  %2994 = vmatpush2.msra.mxu1 %v9254_v24 }
 0xc5d   :  { %3083 = vmatpush1.msra.mxu0 %v8777_v41 }
 0xc5e   :  { %3084 = vmatprep.subr.mxu0 %v8783_v42 }
 0xc5f   :  { %3085 = vmatpush1.msra.mxu0 %v8789_v20 }
 0xc60   :  { %3086 = vmatprep.subr.mxu0 %v8795_v32 }
 0xc61   :  { %3087 = vmatpush1.msra.mxu0 %v8801_v37 }
 0xc62   :  { %3088 = vmatprep.subr.mxu0 %v8807_v17 }
 0xc63   :  { %3089 = vmatpush1.msra.mxu0 %v12370_v28 }
 0xc64   :  { %3090 = vmatprep.subr.mxu0 %v12371_v29 }
 0xc65   :  { %3091 = vmatpush1.msra.mxu0 %v8825_v49 }
 0xc66   :  { %3092 = vmatprep.subr.mxu0 %v8831_v26 }
 0xc67   :  { %3093 = vmatpush1.msra.mxu0 %v8837_v8 }
 0xc68   :  { %3094 = vmatprep.subr.mxu0 %v8843_v22 }
 0xc69   :  { %3095 = vmatpush1.msra.mxu0 %v8849_v18 }
 0xc6a   :  { %3096 = vmatprep.subr.mxu0 %v8855_v21 }
 0xc6b   :  { %3097 = vmatpush1.msra.mxu0 %v8937_v30 }
 0xc6c   :  { %3098 = vmatprep.subr.mxu0 %v8942_v1 }
 0xc6d   :  { %3099 = vmatpush1.msra.mxu0 %v8947_v2 }
 0xc6e   :  { %3100 = vmatprep.subr.mxu0 %v8953_v6 }
 0xc6f   :  { %3101 = vmatpush1.msra.mxu0 %v8959_v13 }
 0xc70   :  { %3102 = vmatprep.subr.mxu0 %v8965_v14 }
 0xc71   :  { %3103 = vmatpush1.msra.mxu0 %v8971_v19 }
 0xc72   :  { %3104 = vmatprep.subr.mxu0 %v8977_v33 }
 0xc73   :  { %3105 = vmatpush1.msra.mxu0 %v8983_v62 }
 0xc74   :  { %3106 = vmatprep.subr.mxu0 %v8989_v36 }
 0xc75   :  { %3107 = vmatpush1.msra.mxu0 %v8995_v45 }
 0xc76   :  { %3108 = vmatprep.subr.mxu0 %v9001_v46 }
 0xc77   :  { %3109 = vmatpush1.msra.mxu0 %v9007_v48 }
 0xc78   :  { %3110 = vmatprep.subr.mxu0 %v9013_v55 }
 0xc79   :  { %3111 = vmatpush2.msra.mxu0 %v9019_v57 }
 0xc7a   :  { %3112 = vmatprep.subr.mxu0 %v9025_v25 }
 0xc7b   :  { %3113 = vmatpush2.msra.mxu0 %v9031_v10 }
 0xc7c   :  { %3114 = vmatprep.subr.mxu0 %v9037_v11 }
 0xc7d   :  { %3115 = vmatpush2.msra.mxu0 %v9043_v16 }
 0xc7e   :  { %3116 = vmatprep.subr.mxu0 %v9049_v59 }
 0xc7f   :  { %3117 = vmatpush2.msra.mxu0 %v9055_v9 }
 0xc80   :  { %3118 = vmatprep.subr.mxu0 %v9061_v34 }
 0xc81   :  { %3119 = vmatpush2.msra.mxu0 %v9067_v5 }
 0xc82   :  { %3120 = vmatprep.subr.mxu0 %v9073_v44 }
 0xc83   :  { %3121 = vmatpush2.msra.mxu0 %v9079_v61 }
 0xc84   :  { %3122 = vmatprep.subr.mxu0 %v9140_v52 }
 0xc85   :  { %3123 = vmatpush2.msra.mxu0 %v9146_v53 }
 0xc86   :  { %3124 = vmatprep.subr.mxu0 %v9153_v54 }
 0xc87   :  { %3125 = vmatpush2.msra.mxu0 %v9160_v56 }
 0xc88   :  { %3126 = vmatprep.subr.mxu0 %v9167_v50 }
 0xc89   :  { %3127 = vmatpush2.msra.mxu0 %v9174_v23 }
 0xc8a   :  { %3128 = vmatprep.subr.mxu0 %v9181_v0 }
 0xc8b   :  { %3129 = vmatpush2.msra.mxu0 %v9186_v63 }
 0xc8c   :  { %3130 = vmatprep.subr.mxu0 %v9191_v38 }
 0xc8d   :  { %3131 = vmatpush2.msra.mxu0 %v9198_v43 }
 0xc8e   :  { %3132 = vmatprep.subr.mxu0 %v9205_v7  ;;  %v12389_v7 = vld [vmem:[#allocation79_spill] sm:$0xff] }
 0xc8f   :  { %3133 = vmatpush2.msra.mxu0 %v9212_v35 }
 0xc90   :  { %3134 = vmatprep.subr.mxu0 %v9219_v39  ;;  %v9261_v39 = vld [vmem:[%s11875_s4 + $0x108] sm:$0xff] }
 0xc91   :  { %3135 = vmatpush2.msra.mxu0 %v9226_v40  ;;  %12387 = vst [vmem:[#allocation71_spill] sm:$0xff] %v9261_v39  ;;  %v9268_v40 = vld [vmem:[%s11875_s4 + $0x100] sm:$0xff]  ;;  %2995 = vmatprep.subr.mxu1 %v9261_v39 }
 0xc92   :  { %3136 = vmatprep.subr.mxu0 %v9233_v51  ;;  %2996 = vmatpush2.msra.mxu1 %v9268_v40 }
 0xc93   :  { %3137 = vmatpush2.msra.mxu0 %v9240_v31  ;;  %3223 = vmatprep.subr.mxu1 %v8748_v12  ;;  %v12388_v31 = vld [vmem:[#allocation78_spill] sm:$0xff] }
 0xc94   :  { %3138 = vmatprep.subr.mxu0 %v9247_v27  ;;  %v591_v51 = vadd.f32 %v7006_v4, %v12388_v31  ;;  %v592_v27 = vadd.f32 %v7010_v15, %v12389_v7  ;;  %v12396_v12 = vld [vmem:[#allocation66_spill] sm:$0xff]  ;;  %v9380_v7 = vld [vmem:[%s11875_s4 + $0xe0] sm:$0xff] }
 0xc95   :  { %3139 = vmatpush2.msra.mxu0 %v9254_v24 }
 0xc96   :  { %3140 = vmatprep.subr.mxu0 %v9261_v39 }
 0xc97   :  { %3141 = vmatpush2.msra.mxu0 %v9268_v40 }
 0xd18   :  { %v2854_v35 = vpop.f32.mrf.mxu0 }
 0xd19   :  { %v2859_v43 = vadd.f32 %v2854_v35, %v591_v51  ;;  %v9364_v51 = vld [vmem:[%s11875_s4 + $0xf8] sm:$0xff] }
 0xd1a   :  { %v2856_v38 = vpop.f32.mrf.mxu0  ;;  %3368 = vmatprep.subr.mxu0 %v9364_v51  ;;  %v9387_v35 = vld [vmem:[%s11875_s4 + $0xd8] sm:$0xff] }
 0xd1b   :  { %v2860_v24 = vadd.f32 %v2856_v38, %v592_v27  ;;  %v9369_v38 = vld [vmem:[%s11875_s4 + $0xf0] sm:$0xff] }
 0xd1d   :  { %5893 = vtanh.f32 %v2860_v24 }
 0xd1e   :  { %5895 = vtanh.f32 %v2859_v43  ;;  %v9374_v43 = vld [vmem:[%s11875_s4 + $0xe8] sm:$0xff] }
 0xd2a   :  { %v9282_v63 = vpop.eup %5893 }
 0xd2b   :  { %12390 = vst [vmem:[#allocation54_spill] sm:$0xff] %v9282_v63  ;;  %v9284_v39 = vpop.eup %5895  ;;  %2997 = vmatprep.mubr.f32.mxu1 %v9282_v63  ;;  %v9459_v63 = vld [vmem:[%s11875_s4 + $0x78] sm:$0xff] }
 0xd2c   :  { %12391 = vst [vmem:[#allocation76_spill] sm:$0xff] %v9284_v39  ;;  %2998 = vmatmul.mubr.f32.vlgmr.msra.gmra.mxu1 %v9284_v39  ;;  %v9453_v39 = vld [vmem:[%s11875_s4 + $0x80] sm:$0xff] }
 0xd2d   :  { %3224 = vmatpush1.msra.mxu1 %v8753_v47  ;;  %v12397_v47 = vld [vmem:[#allocation67_spill] sm:$0xff] }
 0xd2e   :  { %3225 = vmatprep.subr.mxu1 %v8758_v58  ;;  %v12398_v58 = vld [vmem:[#allocation63_spill] sm:$0xff] }
 0xd2f   :  { %3226 = vmatpush1.msra.mxu1 %v8764_v60  ;;  %v12399_v60 = vld [vmem:[#allocation72_spill] sm:$0xff] }
 0xd30   :  { %3227 = vmatprep.subr.mxu1 %v8771_v3  ;;  %v12400_v3 = vld [vmem:[#allocation73_spill] sm:$0xff] }
 0xd31   :  { %3228 = vmatpush1.msra.mxu1 %v8777_v41  ;;  %v12401_v41 = vld [vmem:[#allocation74_spill] sm:$0xff] }
 0xd32   :  { %3229 = vmatprep.subr.mxu1 %v8783_v42  ;;  %v12402_v42 = vld [vmem:[#allocation75_spill] sm:$0xff] }
 0xd33   :  { %3230 = vmatpush1.msra.mxu1 %v8789_v20  ;;  %v12403_v20 = vld [vmem:[#allocation71_spill] sm:$0xff] }
 0xd34   :  { %3231 = vmatprep.subr.mxu1 %v8795_v32  ;;  %v12404_v32 = vld [vmem:[#allocation80_spill] sm:$0xff] }
 0xd35   :  { %3232 = vmatpush1.msra.mxu1 %v8801_v37  ;;  %v593_v37 = vadd.f32 %v7006_v4, %v12404_v32  ;;  %v9393_v32 = vld [vmem:[%s11875_s4 + $0xd0] sm:$0xff] }
 0xd36   :  { %3233 = vmatprep.subr.mxu1 %v8807_v17 }
 0xd37   :  { %3234 = vmatpush1.msra.mxu1 %v12370_v28 }
 0xd38   :  { %3235 = vmatprep.subr.mxu1 %v12371_v29 }
 0xd39   :  { %3236 = vmatpush1.msra.mxu1 %v8825_v49  ;;  %v12395_v49 = vld [vmem:[#allocation65_spill] sm:$0xff] }
 0xd3a   :  { %3237 = vmatprep.subr.mxu1 %v8831_v26  ;;  %v12394_v26 = vld [vmem:[#allocation64_spill] sm:$0xff] }
 0xd3b   :  { %3238 = vmatpush1.msra.mxu1 %v8837_v8  ;;  %v12393_v8 = vld [vmem:[#allocation43_spill] sm:$0xff] }
 0xd3c   :  { %3239 = vmatprep.subr.mxu1 %v8843_v22  ;;  %v12392_v22 = vld [vmem:[#allocation59_spill] sm:$0xff] }
 0xd3d   :  { %3240 = vmatpush1.msra.mxu1 %v8849_v18  ;;  %v12405_v18 = vld [vmem:[#allocation81_spill] sm:$0xff] }
 0xd3e   :  { %3241 = vmatprep.subr.mxu1 %v8855_v21  ;;  %v594_v21 = vadd.f32 %v7010_v15, %v12405_v18  ;;  %v9411_v18 = vld [vmem:[%s11875_s4 + $0xb8] sm:$0xff] }
 0xd3f   :  { %3242 = vmatpush1.msra.mxu1 %v8937_v30 }
 0xd40   :  { %3243 = vmatprep.subr.mxu1 %v8942_v1 }
 0xd41   :  { %3244 = vmatpush1.msra.mxu1 %v8947_v2 }
 0xd42   :  { %3245 = vmatprep.subr.mxu1 %v8953_v6 }
 0xd43   :  { %3246 = vmatpush1.msra.mxu1 %v8959_v13 }
 0xd44   :  { %3247 = vmatprep.subr.mxu1 %v8965_v14 }
 0xd45   :  { %3248 = vmatpush1.msra.mxu1 %v8971_v19 }
 0xd46   :  { %3249 = vmatprep.subr.mxu1 %v8977_v33 }
 0xd47   :  { %3250 = vmatpush1.msra.mxu1 %v8983_v62 }
 0xd48   :  { %3251 = vmatprep.subr.mxu1 %v8989_v36 }
 0xd49   :  { %3252 = vmatpush1.msra.mxu1 %v8995_v45 }
 0xd4a   :  { %3253 = vmatprep.subr.mxu1 %v9001_v46 }
 0xd4b   :  { %3254 = vmatpush1.msra.mxu1 %v9007_v48 }
 0xd4c   :  { %3255 = vmatprep.subr.mxu1 %v9013_v55 }
 0xd4d   :  { %3256 = vmatpush2.msra.mxu1 %v9019_v57 }
 0xd4e   :  { %3257 = vmatprep.subr.mxu1 %v9025_v25 }
 0xd4f   :  { %3258 = vmatpush2.msra.mxu1 %v9031_v10 }
 0xd50   :  { %3259 = vmatprep.subr.mxu1 %v9037_v11 }
 0xd51   :  { %3260 = vmatpush2.msra.mxu1 %v9043_v16 }
 0xd52   :  { %3261 = vmatprep.subr.mxu1 %v9049_v59 }
 0xd53   :  { %3262 = vmatpush2.msra.mxu1 %v9055_v9 }
 0xd54   :  { %3263 = vmatprep.subr.mxu1 %v9061_v34 }
 0xd55   :  { %3264 = vmatpush2.msra.mxu1 %v9067_v5 }
 0xd56   :  { %3265 = vmatprep.subr.mxu1 %v9073_v44 }
 0xd57   :  { %3266 = vmatpush2.msra.mxu1 %v9079_v61 }
 0xd58   :  { %3267 = vmatprep.subr.mxu1 %v9140_v52 }
 0xd59   :  { %3268 = vmatpush2.msra.mxu1 %v9146_v53 }
 0xd5a   :  { %3269 = vmatprep.subr.mxu1 %v9153_v54 }
 0xd5b   :  { %3270 = vmatpush2.msra.mxu1 %v9160_v56 }
 0xd5c   :  { %3271 = vmatprep.subr.mxu1 %v9167_v50 }
 0xd5d   :  { %3272 = vmatpush2.msra.mxu1 %v9174_v23 }
 0xd5e   :  { %3273 = vmatprep.subr.mxu1 %v9181_v0 }
 0xd5f   :  { %3274 = vmatpush2.msra.mxu1 %v12392_v22 }
 0xd60   :  { %3275 = vmatprep.subr.mxu1 %v12393_v8 }
 0xd61   :  { %3276 = vmatpush2.msra.mxu1 %v12394_v26 }
 0xd62   :  { %3277 = vmatprep.subr.mxu1 %v12395_v49 }
 0xd63   :  { %3278 = vmatpush2.msra.mxu1 %v12396_v12 }
 0xd64   :  { %3279 = vmatprep.subr.mxu1 %v12397_v47 }
 0xd65   :  { %3280 = vmatpush2.msra.mxu1 %v12398_v58 }
 0xd66   :  { %3281 = vmatprep.subr.mxu1 %v12399_v60 }
 0xd67   :  { %3282 = vmatpush2.msra.mxu1 %v12400_v3 }
 0xd68   :  { %3283 = vmatprep.subr.mxu1 %v12401_v41 }
 0xd69   :  { %3284 = vmatpush2.msra.mxu1 %v12402_v42 }
 0xd6a   :  { %3285 = vmatprep.subr.mxu1 %v12403_v20 }
 0xd6b   :  { %3286 = vmatpush2.msra.mxu1 %v9268_v40 }
 0xd6c   :  { %3513 = vmatprep.subr.mxu1 %v9364_v51 }
 0xdec   :  { %v2999_v17 = vpop.f32.mrf.mxu1 }
 0xded   :  { %v3004_v24 = vadd.f32 %v2999_v17, %v593_v37  ;;  %v9399_v37 = vld [vmem:[%s11875_s4 + $0xc8] sm:$0xff]  ;;  %v9405_v17 = vld [vmem:[%s11875_s4 + $0xc0] sm:$0xff] }
 0xdee   :  { %v3001_v27 = vpop.f32.mrf.mxu1 }
 0xdef   :  { %v3005_v28 = vadd.f32 %v3001_v27, %v594_v21  ;;  %v9417_v21 = vld [vmem:[%s11875_s4 + $0xb0] sm:$0xff]  ;;  %v9429_v27 = vld [vmem:[%s11875_s4 + $0xa0] sm:$0xff] }
 0xdf0   :  { %12408 = vst [vmem:[#allocation79_spill] sm:$0xff] %v9429_v27 }
 0xdf1   :  { %5897 = vtanh.f32 %v3005_v28  ;;  %v9435_v28 = vld [vmem:[%s11875_s4 + $0x98] sm:$0xff] }
 0xdf2   :  { %5899 = vtanh.f32 %v3004_v24  ;;  %v9423_v24 = vld [vmem:[%s11875_s4 + $0xa8] sm:$0xff]  ;;  %12409 = vst [vmem:[#allocation59_spill] sm:$0xff] %v9435_v28 }
 0xdfe   :  { %v9355_v29 = vpop.eup %5897 }
 0xdff   :  { %12406 = vst [vmem:[#allocation77_spill] sm:$0xff] %v9355_v29  ;;  %v9357_v31 = vpop.eup %5899  ;;  %3142 = vmatprep.mubr.f32.mxu0 %v9355_v29  ;;  %v9447_v29 = vld [vmem:[%s11875_s4 + $0x88] sm:$0xff] }
 0xe00   :  { %12407 = vst [vmem:[#allocation78_spill] sm:$0xff] %v9357_v31  ;;  %3143 = vmatmul.mubr.f32.vlgmr.msra.gmra.mxu0 %v9357_v31  ;;  %v9441_v31 = vld [vmem:[%s11875_s4 + $0x90] sm:$0xff] }
 0xe01   :  { %3369 = vmatpush1.msra.mxu0 %v9369_v38 }
 0xe02   :  { %3370 = vmatprep.subr.mxu0 %v9374_v43 }
 0xe03   :  { %3371 = vmatpush1.msra.mxu0 %v9380_v7 }
 0xe04   :  { %3372 = vmatprep.subr.mxu0 %v9387_v35 }
 0xe05   :  { %3373 = vmatpush1.msra.mxu0 %v9393_v32 }
 0xe06   :  { %3374 = vmatprep.subr.mxu0 %v9399_v37 }
 0xe07   :  { %3375 = vmatpush1.msra.mxu0 %v9405_v17 }
 0xe08   :  { %3376 = vmatprep.subr.mxu0 %v9411_v18 }
 0xe09   :  { %3377 = vmatpush1.msra.mxu0 %v9417_v21 }
 0xe0a   :  { %3378 = vmatprep.subr.mxu0 %v9423_v24 }
 0xe0b   :  { %3379 = vmatpush1.msra.mxu0 %v9429_v27  ;;  %v9465_v27 = vld [vmem:[%s11875_s4 + $0x70] sm:$0xff] }
 0xe0c   :  { %3380 = vmatprep.subr.mxu0 %v9435_v28  ;;  %v9471_v28 = vld [vmem:[%s11875_s4 + $0x68] sm:$0xff] }
 0xe0d   :  { %3381 = vmatpush1.msra.mxu0 %v9441_v31 }
 0xe0e   :  { %3382 = vmatprep.subr.mxu0 %v9447_v29 }
 0xe0f   :  { %3383 = vmatpush1.msra.mxu0 %v9453_v39 }
 0xe10   :  { %3384 = vmatprep.subr.mxu0 %v9459_v63 }
 0xe11   :  { %3385 = vmatpush1.msra.mxu0 %v9465_v27 }
 0xe12   :  { %3386 = vmatprep.subr.mxu0 %v9471_v28 }
 0xe13   :  { %3387 = vmatpush1.msra.mxu0 %v8937_v30  ;;  %v12410_v30 = vld [vmem:[#allocation5_spill] sm:$0xff] }
 0xe14   :  { %3388 = vmatprep.subr.mxu0 %v8942_v1  ;;  %v595_v1 = vadd.f32 %v7006_v4, %v12410_v30 }
 0xe15   :  { %3389 = vmatpush1.msra.mxu0 %v8947_v2 }
 0xe16   :  { %3390 = vmatprep.subr.mxu0 %v8953_v6  ;;  %v12411_v6 = vld [vmem:[#allocation6_spill] sm:$0xff] }
 0xe17   :  { %3391 = vmatpush1.msra.mxu0 %v8959_v13  ;;  %v596_v13 = vadd.f32 %v7010_v15, %v12411_v6  ;;  %v9762_v6 = vld [vmem:[%s11875_s4 + $0x190] sm:$0xff] }
 0xe18   :  { %3392 = vmatprep.subr.mxu0 %v8965_v14 }
 0xe19   :  { %3393 = vmatpush1.msra.mxu0 %v8971_v19 }
 0xe1a   :  { %3394 = vmatprep.subr.mxu0 %v8977_v33 }
 0xe1b   :  { %3395 = vmatpush1.msra.mxu0 %v8983_v62 }
 0xe1c   :  { %3396 = vmatprep.subr.mxu0 %v8989_v36 }
 0xe1d   :  { %3397 = vmatpush1.msra.mxu0 %v8995_v45  ;;  %v12414_v45 = vld [vmem:[#allocation79_spill] sm:$0xff] }
 0xe1e   :  { %3398 = vmatprep.subr.mxu0 %v9001_v46  ;;  %v12415_v46 = vld [vmem:[#allocation59_spill] sm:$0xff] }
 0xe1f   :  { %3399 = vmatpush1.msra.mxu0 %v9007_v48  ;;  %v9553_v48 = vld [vmem:[%s11875_s4 + $0x60] sm:$0xff] }
 0xe20   :  { %3400 = vmatprep.subr.mxu0 %v9013_v55  ;;  %v9558_v55 = vld [vmem:[%s11875_s4 + $0x58] sm:$0xff] }
 0xe21   :  { %3401 = vmatpush2.msra.mxu0 %v9019_v57  ;;  %v9563_v57 = vld [vmem:[%s11875_s4 + $0x50] sm:$0xff] }
 0xe22   :  { %3402 = vmatprep.subr.mxu0 %v9025_v25  ;;  %v9569_v25 = vld [vmem:[%s11875_s4 + $0x48] sm:$0xff] }
 0xe23   :  { %3403 = vmatpush2.msra.mxu0 %v9031_v10  ;;  %v9575_v10 = vld [vmem:[%s11875_s4 + $0x40] sm:$0xff] }
 0xe24   :  { %3404 = vmatprep.subr.mxu0 %v9037_v11  ;;  %v9581_v11 = vld [vmem:[%s11875_s4 + $0x38] sm:$0xff] }
 0xe25   :  { %3405 = vmatpush2.msra.mxu0 %v9043_v16  ;;  %v9587_v16 = vld [vmem:[%s11875_s4 + $0x30] sm:$0xff] }
 0xe26   :  { %3406 = vmatprep.subr.mxu0 %v9049_v59  ;;  %v9593_v59 = vld [vmem:[%s11875_s4 + $0x28] sm:$0xff] }
 0xe27   :  { %3407 = vmatpush2.msra.mxu0 %v9055_v9  ;;  %v9599_v9 = vld [vmem:[%s11875_s4 + $0x20] sm:$0xff] }
 0xe28   :  { %3408 = vmatprep.subr.mxu0 %v9061_v34  ;;  %v9605_v34 = vld [vmem:[%s11875_s4 + $0x18] sm:$0xff] }
 0xe29   :  { %3409 = vmatpush2.msra.mxu0 %v9067_v5  ;;  %v9611_v5 = vld [vmem:[%s11875_s4 + $0x10] sm:$0xff] }
 0xe2a   :  { %3410 = vmatprep.subr.mxu0 %v9073_v44  ;;  %v9617_v44 = vld [vmem:[%s11875_s4 + $0x8] sm:$0xff] }
 0xe2b   :  { %3411 = vmatpush2.msra.mxu0 %v9079_v61  ;;  %v9623_v61 = vld [vmem:[%s11875_s4] sm:$0xff] }
 0xe2c   :  { %3412 = vmatprep.subr.mxu0 %v9140_v52  ;;  %v9629_v52 = vld [vmem:[%s11875_s4 + $0x1f8] sm:$0xff] }
 0xe2d   :  { %3413 = vmatpush2.msra.mxu0 %v9146_v53  ;;  %v9635_v53 = vld [vmem:[%s11875_s4 + $0x1f0] sm:$0xff] }
 0xe2e   :  { %3414 = vmatprep.subr.mxu0 %v9153_v54  ;;  %v9641_v54 = vld [vmem:[%s11875_s4 + $0x1e8] sm:$0xff] }
 0xe2f   :  { %3415 = vmatpush2.msra.mxu0 %v9160_v56  ;;  %v9647_v56 = vld [vmem:[%s11875_s4 + $0x1e0] sm:$0xff] }
 0xe30   :  { %3416 = vmatprep.subr.mxu0 %v9167_v50  ;;  %v9653_v50 = vld [vmem:[%s11875_s4 + $0x1d8] sm:$0xff] }
 0xe31   :  { %3417 = vmatpush2.msra.mxu0 %v9174_v23  ;;  %v9659_v23 = vld [vmem:[%s11875_s4 + $0x1d0] sm:$0xff] }
 0xe32   :  { %3418 = vmatprep.subr.mxu0 %v9181_v0  ;;  %v9665_v0 = vld [vmem:[%s11875_s4 + $0x1c8] sm:$0xff] }
 0xe33   :  { %3419 = vmatpush2.msra.mxu0 %v12392_v22  ;;  %v9677_v22 = vld [vmem:[%s11875_s4 + $0x1b8] sm:$0xff] }
 0xe34   :  { %3420 = vmatprep.subr.mxu0 %v12393_v8  ;;  %v9683_v8 = vld [vmem:[%s11875_s4 + $0x1b0] sm:$0xff] }
 0xe35   :  { %3421 = vmatpush2.msra.mxu0 %v12394_v26  ;;  %v9689_v26 = vld [vmem:[%s11875_s4 + $0x1a8] sm:$0xff] }
 0xe36   :  { %3422 = vmatprep.subr.mxu0 %v12395_v49  ;;  %v9695_v49 = vld [vmem:[%s11875_s4 + $0x1a0] sm:$0xff] }
 0xe37   :  { %3423 = vmatpush2.msra.mxu0 %v12396_v12  ;;  %v12416_v12 = vld [vmem:[#allocation7_spill] sm:$0xff] }
 0xe38   :  { %3424 = vmatprep.subr.mxu0 %v12397_v47  ;;  %v597_v47 = vadd.f32 %v7006_v4, %v12416_v12  ;;  %v9797_v12 = vld [vmem:[%s11875_s4 + $0x168] sm:$0xff] }
 0xe39   :  { %3425 = vmatpush2.msra.mxu0 %v12398_v58 }
 0xe3a   :  { %3426 = vmatprep.subr.mxu0 %v12399_v60  ;;  %v12417_v60 = vld [vmem:[#allocation8_spill] sm:$0xff] }
 0xe3b   :  { %3427 = vmatpush2.msra.mxu0 %v12400_v3  ;;  %v598_v3 = vadd.f32 %v7010_v15, %v12417_v60  ;;  %v9814_v60 = vld [vmem:[%s11875_s4 + $0x150] sm:$0xff] }
 0xe3c   :  { %3428 = vmatprep.subr.mxu0 %v12401_v41  ;;  %12422 = vst [vmem:[#allocation72_spill] sm:$0xff] %v9814_v60 }
 0xe3d   :  { %3429 = vmatpush2.msra.mxu0 %v12402_v42 }
 0xe3e   :  { %3430 = vmatprep.subr.mxu0 %v12403_v20 }
 0xe3f   :  { %3431 = vmatpush2.msra.mxu0 %v9268_v40  ;;  %v9671_v40 = vld [vmem:[%s11875_s4 + $0x1c0] sm:$0xff] }
 0xe40   :  { %3658 = vmatprep.subr.mxu0 %v9364_v51 }
 0xec0   :  { %v3144_v2 = vpop.f32.mrf.mxu0 }
 0xec1   :  { %v3149_v14 = vadd.f32 %v3144_v2, %v595_v1  ;;  %v9756_v2 = vld [vmem:[%s11875_s4 + $0x198] sm:$0xff] }
 0xec2   :  { %v3146_v19 = vpop.f32.mrf.mxu0 }
 0xec3   :  { %v3150_v33 = vadd.f32 %v3146_v19, %v596_v13  ;;  %v9769_v13 = vld [vmem:[%s11875_s4 + $0x188] sm:$0xff]  ;;  %v9783_v19 = vld [vmem:[%s11875_s4 + $0x178] sm:$0xff] }
 0xec5   :  { %5901 = vtanh.f32 %v3150_v33  ;;  %v9790_v33 = vld [vmem:[%s11875_s4 + $0x170] sm:$0xff] }
 0xec6   :  { %5903 = vtanh.f32 %v3149_v14  ;;  %v9776_v14 = vld [vmem:[%s11875_s4 + $0x180] sm:$0xff] }
 0xed2   :  { %v9526_v62 = vpop.eup %5901 }
 0xed3   :  { %12412 = vst [vmem:[#allocation43_spill] sm:$0xff] %v9526_v62  ;;  %v9528_v36 = vpop.eup %5903  ;;  %3287 = vmatprep.mubr.f32.mxu1 %v9526_v62  ;;  %v9870_v62 = vld [vmem:[%s11875_s4 + $0x110] sm:$0xff] }
 0xed4   :  { %12413 = vst [vmem:[#allocation64_spill] sm:$0xff] %v9528_v36  ;;  %3288 = vmatmul.mubr.f32.vlgmr.msra.gmra.mxu1 %v9528_v36  ;;  %v9863_v36 = vld [vmem:[%s11875_s4 + $0x118] sm:$0xff]  ;;  %12430 = vst [vmem:[#allocation6_spill] sm:$0xff] %v9870_v62 }
 0xed5   :  { %3514 = vmatpush1.msra.mxu1 %v9369_v38  ;;  %12429 = vst [vmem:[#allocation5_spill] sm:$0xff] %v9863_v36 }
 0xed6   :  { %3515 = vmatprep.subr.mxu1 %v9374_v43 }
 0xed7   :  { %3516 = vmatpush1.msra.mxu1 %v9380_v7 }
 0xed8   :  { %3517 = vmatprep.subr.mxu1 %v9387_v35 }
 0xed9   :  { %3518 = vmatpush1.msra.mxu1 %v9393_v32 }
 0xeda   :  { %3519 = vmatprep.subr.mxu1 %v9399_v37 }
 0xedb   :  { %3520 = vmatpush1.msra.mxu1 %v9405_v17 }
 0xedc   :  { %3521 = vmatprep.subr.mxu1 %v9411_v18 }
 0xedd   :  { %3522 = vmatpush1.msra.mxu1 %v9417_v21 }
 0xede   :  { %3523 = vmatprep.subr.mxu1 %v9423_v24 }
 0xedf   :  { %3524 = vmatpush1.msra.mxu1 %v12414_v45 }
 0xee0   :  { %3525 = vmatprep.subr.mxu1 %v12415_v46 }
 0xee1   :  { %3526 = vmatpush1.msra.mxu1 %v9441_v31 }
 0xee2   :  { %3527 = vmatprep.subr.mxu1 %v9447_v29 }
 0xee3   :  { %3528 = vmatpush1.msra.mxu1 %v9453_v39 }
 0xee4   :  { %3529 = vmatprep.subr.mxu1 %v9459_v63 }
 0xee5   :  { %3530 = vmatpush1.msra.mxu1 %v9465_v27 }
 0xee6   :  { %3531 = vmatprep.subr.mxu1 %v9471_v28 }
 0xee7   :  { %3532 = vmatpush1.msra.mxu1 %v9553_v48 }
 0xee8   :  { %3533 = vmatprep.subr.mxu1 %v9558_v55 }
 0xee9   :  { %3534 = vmatpush1.msra.mxu1 %v9563_v57 }
 0xeea   :  { %3535 = vmatprep.subr.mxu1 %v9569_v25 }
 0xeeb   :  { %3536 = vmatpush1.msra.mxu1 %v9575_v10 }
 0xeec   :  { %3537 = vmatprep.subr.mxu1 %v9581_v11 }
 0xeed   :  { %3538 = vmatpush1.msra.mxu1 %v9587_v16 }
 0xeee   :  { %3539 = vmatprep.subr.mxu1 %v9593_v59 }
 0xeef   :  { %3540 = vmatpush1.msra.mxu1 %v9599_v9 }
 0xef0   :  { %3541 = vmatprep.subr.mxu1 %v9605_v34 }
 0xef1   :  { %3542 = vmatpush1.msra.mxu1 %v9611_v5 }
 0xef2   :  { %3543 = vmatprep.subr.mxu1 %v9617_v44 }
 0xef3   :  { %3544 = vmatpush1.msra.mxu1 %v9623_v61 }
 0xef4   :  { %3545 = vmatprep.subr.mxu1 %v9629_v52 }
 0xef5   :  { %3546 = vmatpush2.msra.mxu1 %v9635_v53 }
 0xef6   :  { %3547 = vmatprep.subr.mxu1 %v9641_v54 }
 0xef7   :  { %3548 = vmatpush2.msra.mxu1 %v9647_v56 }
 0xef8   :  { %3549 = vmatprep.subr.mxu1 %v9653_v50 }
 0xef9   :  { %3550 = vmatpush2.msra.mxu1 %v9659_v23 }
 0xefa   :  { %3551 = vmatprep.subr.mxu1 %v9665_v0 }
 0xefb   :  { %3552 = vmatpush2.msra.mxu1 %v9671_v40 }
 0xefc   :  { %3553 = vmatprep.subr.mxu1 %v9677_v22 }
 0xefd   :  { %3554 = vmatpush2.msra.mxu1 %v9683_v8 }
 0xefe   :  { %3555 = vmatprep.subr.mxu1 %v9689_v26 }
 0xeff   :  { %3556 = vmatpush2.msra.mxu1 %v9695_v49 }
 0xf00   :  { %3557 = vmatprep.subr.mxu1 %v9756_v2 }
 0xf01   :  { %3558 = vmatpush2.msra.mxu1 %v9762_v6 }
 0xf02   :  { %3559 = vmatprep.subr.mxu1 %v9769_v13 }
 0xf03   :  { %3560 = vmatpush2.msra.mxu1 %v9776_v14 }
 0xf04   :  { %3561 = vmatprep.subr.mxu1 %v9783_v19 }
 0xf05   :  { %3562 = vmatpush2.msra.mxu1 %v9790_v33 }
 0xf06   :  { %3563 = vmatprep.subr.mxu1 %v9797_v12 }
 0xf94   :  { %v3289_v58 = vpop.f32.mrf.mxu1 }
 0xf95   :  { %v3294_v41 = vadd.f32 %v3289_v58, %v597_v47  ;;  %v9802_v47 = vld [vmem:[%s11875_s4 + $0x160] sm:$0xff]  ;;  %v9807_v58 = vld [vmem:[%s11875_s4 + $0x158] sm:$0xff] }
 0xf96   :  { %v3291_v42 = vpop.f32.mrf.mxu1  ;;  %12420 = vst [vmem:[#allocation67_spill] sm:$0xff] %v9802_v47  ;;  %12421 = vst [vmem:[#allocation63_spill] sm:$0xff] %v9807_v58  ;;  %3564 = vmatpush2.msra.mxu1 %v9802_v47 }
 0xf97   :  { %v3295_v20 = vadd.f32 %v3291_v42, %v598_v3  ;;  %v9821_v3 = vld [vmem:[%s11875_s4 + $0x148] sm:$0xff]  ;;  %3565 = vmatprep.subr.mxu1 %v9807_v58  ;;  %v9835_v42 = vld [vmem:[%s11875_s4 + $0x138] sm:$0xff] }
 0xf98   :  { %12423 = vst [vmem:[#allocation73_spill] sm:$0xff] %v9821_v3  ;;  %3566 = vmatpush2.msra.mxu1 %v9814_v60  ;;  %12425 = vst [vmem:[#allocation75_spill] sm:$0xff] %v9835_v42 }
 0xf99   :  { %5905 = vtanh.f32 %v3295_v20  ;;  %3567 = vmatprep.subr.mxu1 %v9821_v3  ;;  %v9842_v20 = vld [vmem:[%s11875_s4 + $0x130] sm:$0xff] }
 0xf9a   :  { %5907 = vtanh.f32 %v3294_v41  ;;  %v9828_v41 = vld [vmem:[%s11875_s4 + $0x140] sm:$0xff]  ;;  %12426 = vst [vmem:[#allocation71_spill] sm:$0xff] %v9842_v20 }
 0xf9b   :  { %12424 = vst [vmem:[#allocation74_spill] sm:$0xff] %v9828_v41  ;;  %3568 = vmatpush2.msra.mxu1 %v9828_v41 }
 0xf9c   :  { %3569 = vmatprep.subr.mxu1 %v9835_v42 }
 0xf9d   :  { %3570 = vmatpush2.msra.mxu1 %v9842_v20 }
 0xfa6   :  { %v9704_v30 = vpop.eup %5905 }
 0xfa7   :  { %12418 = vst [vmem:[#allocation65_spill] sm:$0xff] %v9704_v30  ;;  %v9706_v1 = vpop.eup %5907  ;;  %3432 = vmatprep.mubr.f32.mxu0 %v9704_v30  ;;  %v9856_v30 = vld [vmem:[%s11875_s4 + $0x120] sm:$0xff] }
 0xfa8   :  { %12419 = vst [vmem:[#allocation66_spill] sm:$0xff] %v9706_v1  ;;  %3433 = vmatmul.mubr.f32.vlgmr.msra.gmra.mxu0 %v9706_v1  ;;  %v9849_v1 = vld [vmem:[%s11875_s4 + $0x128] sm:$0xff]  ;;  %12428 = vst [vmem:[#allocation81_spill] sm:$0xff] %v9856_v30 }
 0xfa9   :  { %3659 = vmatpush1.msra.mxu0 %v9369_v38  ;;  %12427 = vst [vmem:[#allocation80_spill] sm:$0xff] %v9849_v1  ;;  %3571 = vmatprep.subr.mxu1 %v9849_v1 }
 0xfaa   :  { %3660 = vmatprep.subr.mxu0 %v9374_v43  ;;  %3572 = vmatpush2.msra.mxu1 %v9856_v30 }
 0xfab   :  { %3661 = vmatpush1.msra.mxu0 %v9380_v7  ;;  %3573 = vmatprep.subr.mxu1 %v9863_v36 }
 0xfac   :  { %3662 = vmatprep.subr.mxu0 %v9387_v35  ;;  %3574 = vmatpush2.msra.mxu1 %v9870_v62 }
 0xfad   :  { %3663 = vmatpush1.msra.mxu0 %v9393_v32 }
 0xfae   :  { %3664 = vmatprep.subr.mxu0 %v9399_v37 }
 0xfaf   :  { %3665 = vmatpush1.msra.mxu0 %v9405_v17 }
 0xfb0   :  { %3666 = vmatprep.subr.mxu0 %v9411_v18 }
 0xfb1   :  { %3667 = vmatpush1.msra.mxu0 %v9417_v21 }
 0xfb2   :  { %3668 = vmatprep.subr.mxu0 %v9423_v24 }
 0xfb3   :  { %3669 = vmatpush1.msra.mxu0 %v12414_v45 }
 0xfb4   :  { %3670 = vmatprep.subr.mxu0 %v12415_v46 }
 0xfb5   :  { %3671 = vmatpush1.msra.mxu0 %v9441_v31 }
 0xfb6   :  { %3672 = vmatprep.subr.mxu0 %v9447_v29 }
 0xfb7   :  { %3673 = vmatpush1.msra.mxu0 %v9453_v39 }
 0xfb8   :  { %3674 = vmatprep.subr.mxu0 %v9459_v63 }
 0xfb9   :  { %3675 = vmatpush1.msra.mxu0 %v9465_v27 }
 0xfba   :  { %3676 = vmatprep.subr.mxu0 %v9471_v28 }
 0xfbb   :  { %3677 = vmatpush1.msra.mxu0 %v9553_v48 }
 0xfbc   :  { %3678 = vmatprep.subr.mxu0 %v9558_v55 }
 0xfbd   :  { %3679 = vmatpush1.msra.mxu0 %v9563_v57 }
 0xfbe   :  { %3680 = vmatprep.subr.mxu0 %v9569_v25 }
 0xfbf   :  { %3681 = vmatpush1.msra.mxu0 %v9575_v10 }
 0xfc0   :  { %3682 = vmatprep.subr.mxu0 %v9581_v11 }
 0xfc1   :  { %3683 = vmatpush1.msra.mxu0 %v9587_v16 }
 0xfc2   :  { %3684 = vmatprep.subr.mxu0 %v9593_v59 }
 0xfc3   :  { %3685 = vmatpush1.msra.mxu0 %v9599_v9 }
 0xfc4   :  { %3686 = vmatprep.subr.mxu0 %v9605_v34 }
 0xfc5   :  { %3687 = vmatpush1.msra.mxu0 %v9611_v5 }
 0xfc6   :  { %3688 = vmatprep.subr.mxu0 %v9617_v44 }
 0xfc7   :  { %3689 = vmatpush1.msra.mxu0 %v9623_v61 }
 0xfc8   :  { %3690 = vmatprep.subr.mxu0 %v9629_v52 }
 0xfc9   :  { %3691 = vmatpush2.msra.mxu0 %v9635_v53 }
 0xfca   :  { %3692 = vmatprep.subr.mxu0 %v9641_v54 }
 0xfcb   :  { %3693 = vmatpush2.msra.mxu0 %v9647_v56 }
 0xfcc   :  { %3694 = vmatprep.subr.mxu0 %v9653_v50 }
 0xfcd   :  { %3695 = vmatpush2.msra.mxu0 %v9659_v23 }
 0xfce   :  { %3696 = vmatprep.subr.mxu0 %v9665_v0 }
 0xfcf   :  { %3697 = vmatpush2.msra.mxu0 %v9671_v40 }
 0xfd0   :  { %3698 = vmatprep.subr.mxu0 %v9677_v22 }
 0xfd1   :  { %3699 = vmatpush2.msra.mxu0 %v9683_v8 }
 0xfd2   :  { %3700 = vmatprep.subr.mxu0 %v9689_v26 }
 0xfd3   :  { %3701 = vmatpush2.msra.mxu0 %v9695_v49 }
 0xfd4   :  { %3702 = vmatprep.subr.mxu0 %v9756_v2 }
 0xfd5   :  { %3703 = vmatpush2.msra.mxu0 %v9762_v6 }
 0xfd6   :  { %3704 = vmatprep.subr.mxu0 %v9769_v13 }
 0xfd7   :  { %3705 = vmatpush2.msra.mxu0 %v9776_v14 }
 0xfd8   :  { %3706 = vmatprep.subr.mxu0 %v9783_v19 }
 0xfd9   :  { %3707 = vmatpush2.msra.mxu0 %v9790_v33 }
 0xfda   :  { %3708 = vmatprep.subr.mxu0 %v9797_v12 }
 0xfdb   :  { %3709 = vmatpush2.msra.mxu0 %v9802_v47 }
 0xfdc   :  { %3710 = vmatprep.subr.mxu0 %v9807_v58 }
 0xfdd   :  { %3711 = vmatpush2.msra.mxu0 %v9814_v60 }
 0xfde   :  { %3712 = vmatprep.subr.mxu0 %v9821_v3  ;;  %v12433_v3 = vld [vmem:[#allocation10_spill] sm:$0xff] }
 0xfdf   :  { %3713 = vmatpush2.msra.mxu0 %v9828_v41 }
 0xfe0   :  { %3714 = vmatprep.subr.mxu0 %v9835_v42  ;;  %v9877_v42 = vld [vmem:[%s11875_s4 + $0x108] sm:$0xff] }
 0xfe1   :  { %3715 = vmatpush2.msra.mxu0 %v9842_v20  ;;  %12431 = vst [vmem:[#allocation79_spill] sm:$0xff] %v9877_v42  ;;  %v9884_v20 = vld [vmem:[%s11875_s4 + $0x100] sm:$0xff]  ;;  %3575 = vmatprep.subr.mxu1 %v9877_v42 }
 0xfe2   :  { %3716 = vmatprep.subr.mxu0 %v9849_v1  ;;  %3576 = vmatpush2.msra.mxu1 %v9884_v20 }
 0xfe3   :  { %3717 = vmatpush2.msra.mxu0 %v9856_v30  ;;  %3803 = vmatprep.subr.mxu1 %v9364_v51  ;;  %v12432_v30 = vld [vmem:[#allocation9_spill] sm:$0xff]  ;;  %v12440_v51 = vld [vmem:[#allocation74_spill] sm:$0xff] }
 0xfe4   :  { %3718 = vmatprep.subr.mxu0 %v9863_v36  ;;  %v599_v1 = vadd.f32 %v7006_v4, %v12432_v30  ;;  %v600_v36 = vadd.f32 %v7010_v15, %v12433_v3  ;;  %v9996_v3 = vld [vmem:[%s11875_s4 + $0xe0] sm:$0xff] }
 0xfe5   :  { %3719 = vmatpush2.msra.mxu0 %v9870_v62 }
 0xfe6   :  { %3720 = vmatprep.subr.mxu0 %v9877_v42 }
 0xfe7   :  { %3721 = vmatpush2.msra.mxu0 %v9884_v20 }
0x1068   :  { %v3434_v41 = vpop.f32.mrf.mxu0 }
0x1069   :  { %v3439_v60 = vadd.f32 %v3434_v41, %v599_v1  ;;  %v9980_v1 = vld [vmem:[%s11875_s4 + $0xf8] sm:$0xff] }
0x106a   :  { %v3436_v58 = vpop.f32.mrf.mxu0  ;;  %3948 = vmatprep.subr.mxu0 %v9980_v1  ;;  %v10003_v41 = vld [vmem:[%s11875_s4 + $0xd8] sm:$0xff] }
0x106b   :  { %v3440_v62 = vadd.f32 %v3436_v58, %v600_v36  ;;  %v9985_v58 = vld [vmem:[%s11875_s4 + $0xf0] sm:$0xff] }
0x106d   :  { %5909 = vtanh.f32 %v3440_v62 }
0x106e   :  { %5911 = vtanh.f32 %v3439_v60  ;;  %v9990_v60 = vld [vmem:[%s11875_s4 + $0xe8] sm:$0xff] }
0x107a   :  { %v9898_v47 = vpop.eup %5909 }
0x107b   :  { %12434 = vst [vmem:[#allocation59_spill] sm:$0xff] %v9898_v47  ;;  %v9900_v42 = vpop.eup %5911  ;;  %3577 = vmatprep.mubr.f32.mxu1 %v9898_v47  ;;  %v10075_v47 = vld [vmem:[%s11875_s4 + $0x78] sm:$0xff] }
0x107c   :  { %12435 = vst [vmem:[#allocation7_spill] sm:$0xff] %v9900_v42  ;;  %3578 = vmatmul.mubr.f32.vlgmr.msra.gmra.mxu1 %v9900_v42  ;;  %v10069_v42 = vld [vmem:[%s11875_s4 + $0x80] sm:$0xff] }
0x107d   :  { %3804 = vmatpush1.msra.mxu1 %v9369_v38  ;;  %v12441_v38 = vld [vmem:[#allocation75_spill] sm:$0xff] }
0x107e   :  { %3805 = vmatprep.subr.mxu1 %v9374_v43  ;;  %v12442_v43 = vld [vmem:[#allocation71_spill] sm:$0xff] }
0x107f   :  { %3806 = vmatpush1.msra.mxu1 %v9380_v7  ;;  %v12443_v7 = vld [vmem:[#allocation80_spill] sm:$0xff] }
0x1080   :  { %3807 = vmatprep.subr.mxu1 %v9387_v35  ;;  %v12444_v35 = vld [vmem:[#allocation81_spill] sm:$0xff] }
0x1081   :  { %3808 = vmatpush1.msra.mxu1 %v9393_v32  ;;  %v12445_v32 = vld [vmem:[#allocation5_spill] sm:$0xff] }
0x1082   :  { %3809 = vmatprep.subr.mxu1 %v9399_v37  ;;  %v12446_v37 = vld [vmem:[#allocation6_spill] sm:$0xff] }
0x1083   :  { %3810 = vmatpush1.msra.mxu1 %v9405_v17  ;;  %v12447_v17 = vld [vmem:[#allocation79_spill] sm:$0xff] }
0x1084   :  { %3811 = vmatprep.subr.mxu1 %v9411_v18  ;;  %v12448_v18 = vld [vmem:[#allocation11_spill] sm:$0xff] }
0x1085   :  { %3812 = vmatpush1.msra.mxu1 %v9417_v21  ;;  %v601_v21 = vadd.f32 %v7006_v4, %v12448_v18  ;;  %v10009_v18 = vld [vmem:[%s11875_s4 + $0xd0] sm:$0xff] }
0x1086   :  { %3813 = vmatprep.subr.mxu1 %v9423_v24 }
0x1087   :  { %3814 = vmatpush1.msra.mxu1 %v12414_v45 }
0x1088   :  { %3815 = vmatprep.subr.mxu1 %v12415_v46 }
0x1089   :  { %3816 = vmatpush1.msra.mxu1 %v9441_v31  ;;  %v12439_v31 = vld [vmem:[#allocation73_spill] sm:$0xff] }
0x108a   :  { %3817 = vmatprep.subr.mxu1 %v9447_v29  ;;  %v12438_v29 = vld [vmem:[#allocation72_spill] sm:$0xff] }
0x108b   :  { %3818 = vmatpush1.msra.mxu1 %v9453_v39  ;;  %v12437_v39 = vld [vmem:[#allocation63_spill] sm:$0xff] }
0x108c   :  { %3819 = vmatprep.subr.mxu1 %v9459_v63  ;;  %v12436_v63 = vld [vmem:[#allocation67_spill] sm:$0xff] }
0x108d   :  { %3820 = vmatpush1.msra.mxu1 %v9465_v27  ;;  %v12449_v27 = vld [vmem:[#allocation12_spill] sm:$0xff] }
0x108e   :  { %3821 = vmatprep.subr.mxu1 %v9471_v28  ;;  %v602_v28 = vadd.f32 %v7010_v15, %v12449_v27  ;;  %v10027_v27 = vld [vmem:[%s11875_s4 + $0xb8] sm:$0xff] }
0x108f   :  { %3822 = vmatpush1.msra.mxu1 %v9553_v48 }
0x1090   :  { %3823 = vmatprep.subr.mxu1 %v9558_v55 }
0x1091   :  { %3824 = vmatpush1.msra.mxu1 %v9563_v57 }
0x1092   :  { %3825 = vmatprep.subr.mxu1 %v9569_v25 }
0x1093   :  { %3826 = vmatpush1.msra.mxu1 %v9575_v10 }
0x1094   :  { %3827 = vmatprep.subr.mxu1 %v9581_v11 }
0x1095   :  { %3828 = vmatpush1.msra.mxu1 %v9587_v16 }
0x1096   :  { %3829 = vmatprep.subr.mxu1 %v9593_v59 }
0x1097   :  { %3830 = vmatpush1.msra.mxu1 %v9599_v9 }
0x1098   :  { %3831 = vmatprep.subr.mxu1 %v9605_v34 }
0x1099   :  { %3832 = vmatpush1.msra.mxu1 %v9611_v5 }
0x109a   :  { %3833 = vmatprep.subr.mxu1 %v9617_v44 }
0x109b   :  { %3834 = vmatpush1.msra.mxu1 %v9623_v61 }
0x109c   :  { %3835 = vmatprep.subr.mxu1 %v9629_v52 }
0x109d   :  { %3836 = vmatpush2.msra.mxu1 %v9635_v53 }
0x109e   :  { %3837 = vmatprep.subr.mxu1 %v9641_v54 }
0x109f   :  { %3838 = vmatpush2.msra.mxu1 %v9647_v56 }
0x10a0   :  { %3839 = vmatprep.subr.mxu1 %v9653_v50 }
0x10a1   :  { %3840 = vmatpush2.msra.mxu1 %v9659_v23 }
0x10a2   :  { %3841 = vmatprep.subr.mxu1 %v9665_v0 }
0x10a3   :  { %3842 = vmatpush2.msra.mxu1 %v9671_v40 }
0x10a4   :  { %3843 = vmatprep.subr.mxu1 %v9677_v22 }
0x10a5   :  { %3844 = vmatpush2.msra.mxu1 %v9683_v8 }
0x10a6   :  { %3845 = vmatprep.subr.mxu1 %v9689_v26 }
0x10a7   :  { %3846 = vmatpush2.msra.mxu1 %v9695_v49 }
0x10a8   :  { %3847 = vmatprep.subr.mxu1 %v9756_v2 }
0x10a9   :  { %3848 = vmatpush2.msra.mxu1 %v9762_v6 }
0x10aa   :  { %3849 = vmatprep.subr.mxu1 %v9769_v13 }
0x10ab   :  { %3850 = vmatpush2.msra.mxu1 %v9776_v14 }
0x10ac   :  { %3851 = vmatprep.subr.mxu1 %v9783_v19 }
0x10ad   :  { %3852 = vmatpush2.msra.mxu1 %v9790_v33 }
0x10ae   :  { %3853 = vmatprep.subr.mxu1 %v9797_v12 }
0x10af   :  { %3854 = vmatpush2.msra.mxu1 %v12436_v63 }
0x10b0   :  { %3855 = vmatprep.subr.mxu1 %v12437_v39 }
0x10b1   :  { %3856 = vmatpush2.msra.mxu1 %v12438_v29 }
0x10b2   :  { %3857 = vmatprep.subr.mxu1 %v12439_v31 }
0x10b3   :  { %3858 = vmatpush2.msra.mxu1 %v12440_v51 }
0x10b4   :  { %3859 = vmatprep.subr.mxu1 %v12441_v38 }
0x10b5   :  { %3860 = vmatpush2.msra.mxu1 %v12442_v43 }
0x10b6   :  { %3861 = vmatprep.subr.mxu1 %v12443_v7 }
0x10b7   :  { %3862 = vmatpush2.msra.mxu1 %v12444_v35 }
0x10b8   :  { %3863 = vmatprep.subr.mxu1 %v12445_v32 }
0x10b9   :  { %3864 = vmatpush2.msra.mxu1 %v12446_v37 }
0x10ba   :  { %3865 = vmatprep.subr.mxu1 %v12447_v17 }
0x10bb   :  { %3866 = vmatpush2.msra.mxu1 %v9884_v20 }
0x10bc   :  { %4093 = vmatprep.subr.mxu1 %v9980_v1 }
0x113c   :  { %v3579_v24 = vpop.f32.mrf.mxu1 }
0x113d   :  { %v3584_v62 = vadd.f32 %v3579_v24, %v601_v21  ;;  %v10015_v21 = vld [vmem:[%s11875_s4 + $0xc8] sm:$0xff]  ;;  %v10021_v24 = vld [vmem:[%s11875_s4 + $0xc0] sm:$0xff] }
0x113e   :  { %v3581_v36 = vpop.f32.mrf.mxu1 }
0x113f   :  { %v3585_v45 = vadd.f32 %v3581_v36, %v602_v28  ;;  %v10033_v28 = vld [vmem:[%s11875_s4 + $0xb0] sm:$0xff]  ;;  %v10045_v36 = vld [vmem:[%s11875_s4 + $0xa0] sm:$0xff] }
0x1140   :  { %12452 = vst [vmem:[#allocation10_spill] sm:$0xff] %v10045_v36 }
0x1141   :  { %5913 = vtanh.f32 %v3585_v45  ;;  %v10051_v45 = vld [vmem:[%s11875_s4 + $0x98] sm:$0xff] }
0x1142   :  { %5915 = vtanh.f32 %v3584_v62  ;;  %v10039_v62 = vld [vmem:[%s11875_s4 + $0xa8] sm:$0xff]  ;;  %12453 = vst [vmem:[#allocation67_spill] sm:$0xff] %v10051_v45 }
0x114e   :  { %v9971_v46 = vpop.eup %5913 }
0x114f   :  { %12450 = vst [vmem:[#allocation8_spill] sm:$0xff] %v9971_v46  ;;  %v9973_v30 = vpop.eup %5915  ;;  %3722 = vmatprep.mubr.f32.mxu0 %v9971_v46  ;;  %v10063_v46 = vld [vmem:[%s11875_s4 + $0x88] sm:$0xff] }
0x1150   :  { %12451 = vst [vmem:[#allocation9_spill] sm:$0xff] %v9973_v30  ;;  %3723 = vmatmul.mubr.f32.vlgmr.msra.gmra.mxu0 %v9973_v30  ;;  %v10057_v30 = vld [vmem:[%s11875_s4 + $0x90] sm:$0xff] }
0x1151   :  { %3949 = vmatpush1.msra.mxu0 %v9985_v58 }
0x1152   :  { %3950 = vmatprep.subr.mxu0 %v9990_v60 }
0x1153   :  { %3951 = vmatpush1.msra.mxu0 %v9996_v3 }
0x1154   :  { %3952 = vmatprep.subr.mxu0 %v10003_v41 }
0x1155   :  { %3953 = vmatpush1.msra.mxu0 %v10009_v18 }
0x1156   :  { %3954 = vmatprep.subr.mxu0 %v10015_v21 }
0x1157   :  { %3955 = vmatpush1.msra.mxu0 %v10021_v24 }
0x1158   :  { %3956 = vmatprep.subr.mxu0 %v10027_v27 }
0x1159   :  { %3957 = vmatpush1.msra.mxu0 %v10033_v28 }
0x115a   :  { %3958 = vmatprep.subr.mxu0 %v10039_v62 }
0x115b   :  { %3959 = vmatpush1.msra.mxu0 %v10045_v36  ;;  %v10081_v36 = vld [vmem:[%s11875_s4 + $0x70] sm:$0xff] }
0x115c   :  { %3960 = vmatprep.subr.mxu0 %v10051_v45  ;;  %v10087_v45 = vld [vmem:[%s11875_s4 + $0x68] sm:$0xff] }
0x115d   :  { %3961 = vmatpush1.msra.mxu0 %v10057_v30 }
0x115e   :  { %3962 = vmatprep.subr.mxu0 %v10063_v46 }
0x115f   :  { %3963 = vmatpush1.msra.mxu0 %v10069_v42 }
0x1160   :  { %3964 = vmatprep.subr.mxu0 %v10075_v47 }
0x1161   :  { %3965 = vmatpush1.msra.mxu0 %v10081_v36 }
0x1162   :  { %3966 = vmatprep.subr.mxu0 %v10087_v45 }
0x1163   :  { %3967 = vmatpush1.msra.mxu0 %v9553_v48  ;;  %v12454_v48 = vld [vmem:[#allocation13_spill] sm:$0xff] }
0x1164   :  { %3968 = vmatprep.subr.mxu0 %v9558_v55  ;;  %v603_v55 = vadd.f32 %v7006_v4, %v12454_v48 }
0x1165   :  { %3969 = vmatpush1.msra.mxu0 %v9563_v57 }
0x1166   :  { %3970 = vmatprep.subr.mxu0 %v9569_v25  ;;  %v12455_v25 = vld [vmem:[#allocation14_spill] sm:$0xff] }
0x1167   :  { %3971 = vmatpush1.msra.mxu0 %v9575_v10  ;;  %v604_v10 = vadd.f32 %v7010_v15, %v12455_v25  ;;  %v10378_v25 = vld [vmem:[%s11875_s4 + $0x190] sm:$0xff] }
0x1168   :  { %3972 = vmatprep.subr.mxu0 %v9581_v11 }
0x1169   :  { %3973 = vmatpush1.msra.mxu0 %v9587_v16 }
0x116a   :  { %3974 = vmatprep.subr.mxu0 %v9593_v59 }
0x116b   :  { %3975 = vmatpush1.msra.mxu0 %v9599_v9 }
0x116c   :  { %3976 = vmatprep.subr.mxu0 %v9605_v34 }
0x116d   :  { %3977 = vmatpush1.msra.mxu0 %v9611_v5  ;;  %v12458_v5 = vld [vmem:[#allocation10_spill] sm:$0xff] }
0x116e   :  { %3978 = vmatprep.subr.mxu0 %v9617_v44  ;;  %v12459_v44 = vld [vmem:[#allocation67_spill] sm:$0xff] }
0x116f   :  { %3979 = vmatpush1.msra.mxu0 %v9623_v61  ;;  %v10169_v61 = vld [vmem:[%s11875_s4 + $0x60] sm:$0xff] }
0x1170   :  { %3980 = vmatprep.subr.mxu0 %v9629_v52  ;;  %v10174_v52 = vld [vmem:[%s11875_s4 + $0x58] sm:$0xff] }
0x1171   :  { %3981 = vmatpush2.msra.mxu0 %v9635_v53  ;;  %v10179_v53 = vld [vmem:[%s11875_s4 + $0x50] sm:$0xff] }
0x1172   :  { %3982 = vmatprep.subr.mxu0 %v9641_v54  ;;  %v10185_v54 = vld [vmem:[%s11875_s4 + $0x48] sm:$0xff] }
0x1173   :  { %3983 = vmatpush2.msra.mxu0 %v9647_v56  ;;  %v10191_v56 = vld [vmem:[%s11875_s4 + $0x40] sm:$0xff] }
0x1174   :  { %3984 = vmatprep.subr.mxu0 %v9653_v50  ;;  %v10197_v50 = vld [vmem:[%s11875_s4 + $0x38] sm:$0xff] }
0x1175   :  { %3985 = vmatpush2.msra.mxu0 %v9659_v23  ;;  %v10203_v23 = vld [vmem:[%s11875_s4 + $0x30] sm:$0xff] }
0x1176   :  { %3986 = vmatprep.subr.mxu0 %v9665_v0  ;;  %v10209_v0 = vld [vmem:[%s11875_s4 + $0x28] sm:$0xff] }
0x1177   :  { %3987 = vmatpush2.msra.mxu0 %v9671_v40  ;;  %v10215_v40 = vld [vmem:[%s11875_s4 + $0x20] sm:$0xff] }
0x1178   :  { %3988 = vmatprep.subr.mxu0 %v9677_v22  ;;  %v10221_v22 = vld [vmem:[%s11875_s4 + $0x18] sm:$0xff] }
0x1179   :  { %3989 = vmatpush2.msra.mxu0 %v9683_v8  ;;  %v10227_v8 = vld [vmem:[%s11875_s4 + $0x10] sm:$0xff] }
0x117a   :  { %3990 = vmatprep.subr.mxu0 %v9689_v26  ;;  %v10233_v26 = vld [vmem:[%s11875_s4 + $0x8] sm:$0xff] }
0x117b   :  { %3991 = vmatpush2.msra.mxu0 %v9695_v49  ;;  %v10239_v49 = vld [vmem:[%s11875_s4] sm:$0xff] }
0x117c   :  { %3992 = vmatprep.subr.mxu0 %v9756_v2  ;;  %v10245_v2 = vld [vmem:[%s11875_s4 + $0x1f8] sm:$0xff] }
0x117d   :  { %3993 = vmatpush2.msra.mxu0 %v9762_v6  ;;  %v10251_v6 = vld [vmem:[%s11875_s4 + $0x1f0] sm:$0xff] }
0x117e   :  { %3994 = vmatprep.subr.mxu0 %v9769_v13  ;;  %v10257_v13 = vld [vmem:[%s11875_s4 + $0x1e8] sm:$0xff] }
0x117f   :  { %3995 = vmatpush2.msra.mxu0 %v9776_v14  ;;  %v10263_v14 = vld [vmem:[%s11875_s4 + $0x1e0] sm:$0xff] }
0x1180   :  { %3996 = vmatprep.subr.mxu0 %v9783_v19  ;;  %v10269_v19 = vld [vmem:[%s11875_s4 + $0x1d8] sm:$0xff] }
0x1181   :  { %3997 = vmatpush2.msra.mxu0 %v9790_v33  ;;  %v10275_v33 = vld [vmem:[%s11875_s4 + $0x1d0] sm:$0xff] }
0x1182   :  { %3998 = vmatprep.subr.mxu0 %v9797_v12  ;;  %v10281_v12 = vld [vmem:[%s11875_s4 + $0x1c8] sm:$0xff] }
0x1183   :  { %3999 = vmatpush2.msra.mxu0 %v12436_v63  ;;  %v10293_v63 = vld [vmem:[%s11875_s4 + $0x1b8] sm:$0xff] }
0x1184   :  { %4000 = vmatprep.subr.mxu0 %v12437_v39  ;;  %v10299_v39 = vld [vmem:[%s11875_s4 + $0x1b0] sm:$0xff] }
0x1185   :  { %4001 = vmatpush2.msra.mxu0 %v12438_v29  ;;  %v10305_v29 = vld [vmem:[%s11875_s4 + $0x1a8] sm:$0xff] }
0x1186   :  { %4002 = vmatprep.subr.mxu0 %v12439_v31  ;;  %v10311_v31 = vld [vmem:[%s11875_s4 + $0x1a0] sm:$0xff] }
0x1187   :  { %4003 = vmatpush2.msra.mxu0 %v12440_v51  ;;  %v12460_v51 = vld [vmem:[#allocation15_spill] sm:$0xff] }
0x1188   :  { %4004 = vmatprep.subr.mxu0 %v12441_v38  ;;  %v605_v38 = vadd.f32 %v7006_v4, %v12460_v51  ;;  %v10413_v51 = vld [vmem:[%s11875_s4 + $0x168] sm:$0xff] }
0x1189   :  { %4005 = vmatpush2.msra.mxu0 %v12442_v43 }
0x118a   :  { %4006 = vmatprep.subr.mxu0 %v12443_v7  ;;  %v12461_v7 = vld [vmem:[#allocation16_spill] sm:$0xff] }
0x118b   :  { %4007 = vmatpush2.msra.mxu0 %v12444_v35  ;;  %v606_v35 = vadd.f32 %v7010_v15, %v12461_v7  ;;  %v10430_v7 = vld [vmem:[%s11875_s4 + $0x150] sm:$0xff] }
0x118c   :  { %4008 = vmatprep.subr.mxu0 %v12445_v32  ;;  %12466 = vst [vmem:[#allocation80_spill] sm:$0xff] %v10430_v7 }
0x118d   :  { %4009 = vmatpush2.msra.mxu0 %v12446_v37 }
0x118e   :  { %4010 = vmatprep.subr.mxu0 %v12447_v17 }
0x118f   :  { %4011 = vmatpush2.msra.mxu0 %v9884_v20  ;;  %v10287_v20 = vld [vmem:[%s11875_s4 + $0x1c0] sm:$0xff] }
0x1190   :  { %4238 = vmatprep.subr.mxu0 %v9980_v1 }
0x1210   :  { %v3724_v57 = vpop.f32.mrf.mxu0 }
0x1211   :  { %v3729_v11 = vadd.f32 %v3724_v57, %v603_v55  ;;  %v10372_v57 = vld [vmem:[%s11875_s4 + $0x198] sm:$0xff] }
0x1212   :  { %v3726_v16 = vpop.f32.mrf.mxu0 }
0x1213   :  { %v3730_v59 = vadd.f32 %v3726_v16, %v604_v10  ;;  %v10385_v10 = vld [vmem:[%s11875_s4 + $0x188] sm:$0xff]  ;;  %v10399_v16 = vld [vmem:[%s11875_s4 + $0x178] sm:$0xff] }
0x1215   :  { %5917 = vtanh.f32 %v3730_v59  ;;  %v10406_v59 = vld [vmem:[%s11875_s4 + $0x170] sm:$0xff] }
0x1216   :  { %5919 = vtanh.f32 %v3729_v11  ;;  %v10392_v11 = vld [vmem:[%s11875_s4 + $0x180] sm:$0xff] }
0x1222   :  { %v10142_v9 = vpop.eup %5917 }
0x1223   :  { %12456 = vst [vmem:[#allocation63_spill] sm:$0xff] %v10142_v9  ;;  %v10144_v34 = vpop.eup %5919  ;;  %3867 = vmatprep.mubr.f32.mxu1 %v10142_v9  ;;  %v10486_v9 = vld [vmem:[%s11875_s4 + $0x110] sm:$0xff] }
0x1224   :  { %12457 = vst [vmem:[#allocation72_spill] sm:$0xff] %v10144_v34  ;;  %3868 = vmatmul.mubr.f32.vlgmr.msra.gmra.mxu1 %v10144_v34  ;;  %v10479_v34 = vld [vmem:[%s11875_s4 + $0x118] sm:$0xff]  ;;  %12474 = vst [vmem:[#allocation14_spill] sm:$0xff] %v10486_v9 }
0x1225   :  { %4094 = vmatpush1.msra.mxu1 %v9985_v58  ;;  %12473 = vst [vmem:[#allocation13_spill] sm:$0xff] %v10479_v34 }
0x1226   :  { %4095 = vmatprep.subr.mxu1 %v9990_v60 }
0x1227   :  { %4096 = vmatpush1.msra.mxu1 %v9996_v3 }
0x1228   :  { %4097 = vmatprep.subr.mxu1 %v10003_v41 }
0x1229   :  { %4098 = vmatpush1.msra.mxu1 %v10009_v18 }
0x122a   :  { %4099 = vmatprep.subr.mxu1 %v10015_v21 }
0x122b   :  { %4100 = vmatpush1.msra.mxu1 %v10021_v24 }
0x122c   :  { %4101 = vmatprep.subr.mxu1 %v10027_v27 }
0x122d   :  { %4102 = vmatpush1.msra.mxu1 %v10033_v28 }
0x122e   :  { %4103 = vmatprep.subr.mxu1 %v10039_v62 }
0x122f   :  { %4104 = vmatpush1.msra.mxu1 %v12458_v5 }
0x1230   :  { %4105 = vmatprep.subr.mxu1 %v12459_v44 }
0x1231   :  { %4106 = vmatpush1.msra.mxu1 %v10057_v30 }
0x1232   :  { %4107 = vmatprep.subr.mxu1 %v10063_v46 }
0x1233   :  { %4108 = vmatpush1.msra.mxu1 %v10069_v42 }
0x1234   :  { %4109 = vmatprep.subr.mxu1 %v10075_v47 }
0x1235   :  { %4110 = vmatpush1.msra.mxu1 %v10081_v36 }
0x1236   :  { %4111 = vmatprep.subr.mxu1 %v10087_v45 }
0x1237   :  { %4112 = vmatpush1.msra.mxu1 %v10169_v61 }
0x1238   :  { %4113 = vmatprep.subr.mxu1 %v10174_v52 }
0x1239   :  { %4114 = vmatpush1.msra.mxu1 %v10179_v53 }
0x123a   :  { %4115 = vmatprep.subr.mxu1 %v10185_v54 }
0x123b   :  { %4116 = vmatpush1.msra.mxu1 %v10191_v56 }
0x123c   :  { %4117 = vmatprep.subr.mxu1 %v10197_v50 }
0x123d   :  { %4118 = vmatpush1.msra.mxu1 %v10203_v23 }
0x123e   :  { %4119 = vmatprep.subr.mxu1 %v10209_v0 }
0x123f   :  { %4120 = vmatpush1.msra.mxu1 %v10215_v40 }
0x1240   :  { %4121 = vmatprep.subr.mxu1 %v10221_v22 }
0x1241   :  { %4122 = vmatpush1.msra.mxu1 %v10227_v8 }
0x1242   :  { %4123 = vmatprep.subr.mxu1 %v10233_v26 }
0x1243   :  { %4124 = vmatpush1.msra.mxu1 %v10239_v49 }
0x1244   :  { %4125 = vmatprep.subr.mxu1 %v10245_v2 }
0x1245   :  { %4126 = vmatpush2.msra.mxu1 %v10251_v6 }
0x1246   :  { %4127 = vmatprep.subr.mxu1 %v10257_v13 }
0x1247   :  { %4128 = vmatpush2.msra.mxu1 %v10263_v14 }
0x1248   :  { %4129 = vmatprep.subr.mxu1 %v10269_v19 }
0x1249   :  { %4130 = vmatpush2.msra.mxu1 %v10275_v33 }
0x124a   :  { %4131 = vmatprep.subr.mxu1 %v10281_v12 }
0x124b   :  { %4132 = vmatpush2.msra.mxu1 %v10287_v20 }
0x124c   :  { %4133 = vmatprep.subr.mxu1 %v10293_v63 }
0x124d   :  { %4134 = vmatpush2.msra.mxu1 %v10299_v39 }
0x124e   :  { %4135 = vmatprep.subr.mxu1 %v10305_v29 }
0x124f   :  { %4136 = vmatpush2.msra.mxu1 %v10311_v31 }
0x1250   :  { %4137 = vmatprep.subr.mxu1 %v10372_v57 }
0x1251   :  { %4138 = vmatpush2.msra.mxu1 %v10378_v25 }
0x1252   :  { %4139 = vmatprep.subr.mxu1 %v10385_v10 }
0x1253   :  { %4140 = vmatpush2.msra.mxu1 %v10392_v11 }
0x1254   :  { %4141 = vmatprep.subr.mxu1 %v10399_v16 }
0x1255   :  { %4142 = vmatpush2.msra.mxu1 %v10406_v59 }
0x1256   :  { %4143 = vmatprep.subr.mxu1 %v10413_v51 }
0x12e4   :  { %v3869_v43 = vpop.f32.mrf.mxu1 }
0x12e5   :  { %v3874_v32 = vadd.f32 %v3869_v43, %v605_v38  ;;  %v10418_v38 = vld [vmem:[%s11875_s4 + $0x160] sm:$0xff]  ;;  %v10423_v43 = vld [vmem:[%s11875_s4 + $0x158] sm:$0xff] }
0x12e6   :  { %v3871_v37 = vpop.f32.mrf.mxu1  ;;  %12464 = vst [vmem:[#allocation75_spill] sm:$0xff] %v10418_v38  ;;  %12465 = vst [vmem:[#allocation71_spill] sm:$0xff] %v10423_v43  ;;  %4144 = vmatpush2.msra.mxu1 %v10418_v38 }
0x12e7   :  { %v3875_v17 = vadd.f32 %v3871_v37, %v606_v35  ;;  %v10437_v35 = vld [vmem:[%s11875_s4 + $0x148] sm:$0xff]  ;;  %4145 = vmatprep.subr.mxu1 %v10423_v43  ;;  %v10451_v37 = vld [vmem:[%s11875_s4 + $0x138] sm:$0xff] }
0x12e8   :  { %12467 = vst [vmem:[#allocation81_spill] sm:$0xff] %v10437_v35  ;;  %4146 = vmatpush2.msra.mxu1 %v10430_v7  ;;  %12469 = vst [vmem:[#allocation6_spill] sm:$0xff] %v10451_v37 }
0x12e9   :  { %5921 = vtanh.f32 %v3875_v17  ;;  %4147 = vmatprep.subr.mxu1 %v10437_v35  ;;  %v10458_v17 = vld [vmem:[%s11875_s4 + $0x130] sm:$0xff] }
0x12ea   :  { %5923 = vtanh.f32 %v3874_v32  ;;  %v10444_v32 = vld [vmem:[%s11875_s4 + $0x140] sm:$0xff]  ;;  %12470 = vst [vmem:[#allocation79_spill] sm:$0xff] %v10458_v17 }
0x12eb   :  { %12468 = vst [vmem:[#allocation5_spill] sm:$0xff] %v10444_v32  ;;  %4148 = vmatpush2.msra.mxu1 %v10444_v32 }
0x12ec   :  { %4149 = vmatprep.subr.mxu1 %v10451_v37 }
0x12ed   :  { %4150 = vmatpush2.msra.mxu1 %v10458_v17 }
0x12f6   :  { %v10320_v48 = vpop.eup %5921 }
0x12f7   :  { %12462 = vst [vmem:[#allocation73_spill] sm:$0xff] %v10320_v48  ;;  %v10322_v55 = vpop.eup %5923  ;;  %4012 = vmatprep.mubr.f32.mxu0 %v10320_v48  ;;  %v10472_v48 = vld [vmem:[%s11875_s4 + $0x120] sm:$0xff] }
0x12f8   :  { %12463 = vst [vmem:[#allocation74_spill] sm:$0xff] %v10322_v55  ;;  %4013 = vmatmul.mubr.f32.vlgmr.msra.gmra.mxu0 %v10322_v55  ;;  %v10465_v55 = vld [vmem:[%s11875_s4 + $0x128] sm:$0xff]  ;;  %12472 = vst [vmem:[#allocation12_spill] sm:$0xff] %v10472_v48 }
0x12f9   :  { %4239 = vmatpush1.msra.mxu0 %v9985_v58  ;;  %12471 = vst [vmem:[#allocation11_spill] sm:$0xff] %v10465_v55  ;;  %4151 = vmatprep.subr.mxu1 %v10465_v55 }
0x12fa   :  { %4240 = vmatprep.subr.mxu0 %v9990_v60  ;;  %4152 = vmatpush2.msra.mxu1 %v10472_v48 }
0x12fb   :  { %4241 = vmatpush1.msra.mxu0 %v9996_v3  ;;  %4153 = vmatprep.subr.mxu1 %v10479_v34 }
0x12fc   :  { %4242 = vmatprep.subr.mxu0 %v10003_v41  ;;  %4154 = vmatpush2.msra.mxu1 %v10486_v9 }
0x12fd   :  { %4243 = vmatpush1.msra.mxu0 %v10009_v18 }
0x12fe   :  { %4244 = vmatprep.subr.mxu0 %v10015_v21 }
0x12ff   :  { %4245 = vmatpush1.msra.mxu0 %v10021_v24 }
0x1300   :  { %4246 = vmatprep.subr.mxu0 %v10027_v27 }
0x1301   :  { %4247 = vmatpush1.msra.mxu0 %v10033_v28 }
0x1302   :  { %4248 = vmatprep.subr.mxu0 %v10039_v62 }
0x1303   :  { %4249 = vmatpush1.msra.mxu0 %v12458_v5 }
0x1304   :  { %4250 = vmatprep.subr.mxu0 %v12459_v44 }
0x1305   :  { %4251 = vmatpush1.msra.mxu0 %v10057_v30 }
0x1306   :  { %4252 = vmatprep.subr.mxu0 %v10063_v46 }
0x1307   :  { %4253 = vmatpush1.msra.mxu0 %v10069_v42 }
0x1308   :  { %4254 = vmatprep.subr.mxu0 %v10075_v47 }
0x1309   :  { %4255 = vmatpush1.msra.mxu0 %v10081_v36 }
0x130a   :  { %4256 = vmatprep.subr.mxu0 %v10087_v45 }
0x130b   :  { %4257 = vmatpush1.msra.mxu0 %v10169_v61 }
0x130c   :  { %4258 = vmatprep.subr.mxu0 %v10174_v52 }
0x130d   :  { %4259 = vmatpush1.msra.mxu0 %v10179_v53 }
0x130e   :  { %4260 = vmatprep.subr.mxu0 %v10185_v54 }
0x130f   :  { %4261 = vmatpush1.msra.mxu0 %v10191_v56 }
0x1310   :  { %4262 = vmatprep.subr.mxu0 %v10197_v50 }
0x1311   :  { %4263 = vmatpush1.msra.mxu0 %v10203_v23 }
0x1312   :  { %4264 = vmatprep.subr.mxu0 %v10209_v0 }
0x1313   :  { %4265 = vmatpush1.msra.mxu0 %v10215_v40 }
0x1314   :  { %4266 = vmatprep.subr.mxu0 %v10221_v22 }
0x1315   :  { %4267 = vmatpush1.msra.mxu0 %v10227_v8 }
0x1316   :  { %4268 = vmatprep.subr.mxu0 %v10233_v26 }
0x1317   :  { %4269 = vmatpush1.msra.mxu0 %v10239_v49 }
0x1318   :  { %4270 = vmatprep.subr.mxu0 %v10245_v2 }
0x1319   :  { %4271 = vmatpush2.msra.mxu0 %v10251_v6 }
0x131a   :  { %4272 = vmatprep.subr.mxu0 %v10257_v13 }
0x131b   :  { %4273 = vmatpush2.msra.mxu0 %v10263_v14 }
0x131c   :  { %4274 = vmatprep.subr.mxu0 %v10269_v19 }
0x131d   :  { %4275 = vmatpush2.msra.mxu0 %v10275_v33 }
0x131e   :  { %4276 = vmatprep.subr.mxu0 %v10281_v12 }
0x131f   :  { %4277 = vmatpush2.msra.mxu0 %v10287_v20 }
0x1320   :  { %4278 = vmatprep.subr.mxu0 %v10293_v63 }
0x1321   :  { %4279 = vmatpush2.msra.mxu0 %v10299_v39 }
0x1322   :  { %4280 = vmatprep.subr.mxu0 %v10305_v29 }
0x1323   :  { %4281 = vmatpush2.msra.mxu0 %v10311_v31 }
0x1324   :  { %4282 = vmatprep.subr.mxu0 %v10372_v57 }
0x1325   :  { %4283 = vmatpush2.msra.mxu0 %v10378_v25 }
0x1326   :  { %4284 = vmatprep.subr.mxu0 %v10385_v10 }
0x1327   :  { %4285 = vmatpush2.msra.mxu0 %v10392_v11 }
0x1328   :  { %4286 = vmatprep.subr.mxu0 %v10399_v16 }
0x1329   :  { %4287 = vmatpush2.msra.mxu0 %v10406_v59 }
0x132a   :  { %4288 = vmatprep.subr.mxu0 %v10413_v51 }
0x132b   :  { %4289 = vmatpush2.msra.mxu0 %v10418_v38 }
0x132c   :  { %4290 = vmatprep.subr.mxu0 %v10423_v43 }
0x132d   :  { %4291 = vmatpush2.msra.mxu0 %v10430_v7 }
0x132e   :  { %4292 = vmatprep.subr.mxu0 %v10437_v35  ;;  %v12477_v35 = vld [vmem:[#allocation18_spill] sm:$0xff] }
0x132f   :  { %4293 = vmatpush2.msra.mxu0 %v10444_v32 }
0x1330   :  { %4294 = vmatprep.subr.mxu0 %v10451_v37  ;;  %v10493_v37 = vld [vmem:[%s11875_s4 + $0x108] sm:$0xff] }
0x1331   :  { %4295 = vmatpush2.msra.mxu0 %v10458_v17  ;;  %12475 = vst [vmem:[#allocation10_spill] sm:$0xff] %v10493_v37  ;;  %v10500_v17 = vld [vmem:[%s11875_s4 + $0x100] sm:$0xff]  ;;  %4155 = vmatprep.subr.mxu1 %v10493_v37 }
0x1332   :  { %4296 = vmatprep.subr.mxu0 %v10465_v55  ;;  %4156 = vmatpush2.msra.mxu1 %v10500_v17 }
0x1333   :  { %4297 = vmatpush2.msra.mxu0 %v10472_v48  ;;  %4383 = vmatprep.subr.mxu1 %v9980_v1  ;;  %v12476_v48 = vld [vmem:[#allocation17_spill] sm:$0xff] }
0x1334   :  { %4298 = vmatprep.subr.mxu0 %v10479_v34  ;;  %v607_v55 = vadd.f32 %v7006_v4, %v12476_v48  ;;  %v608_v34 = vadd.f32 %v7010_v15, %v12477_v35  ;;  %v12484_v1 = vld [vmem:[#allocation5_spill] sm:$0xff] }
0x1335   :  { %4299 = vmatpush2.msra.mxu0 %v10486_v9  ;;  %v10612_v35 = vld [vmem:[%s11875_s4 + $0xe0] sm:$0xff] }
0x1336   :  { %4300 = vmatprep.subr.mxu0 %v10493_v37 }
0x1337   :  { %4301 = vmatpush2.msra.mxu0 %v10500_v17 }
0x13b8   :  { %v4014_v32 = vpop.f32.mrf.mxu0 }
0x13b9   :  { %v4019_v7 = vadd.f32 %v4014_v32, %v607_v55  ;;  %v10596_v55 = vld [vmem:[%s11875_s4 + $0xf8] sm:$0xff] }
0x13ba   :  { %v4016_v43 = vpop.f32.mrf.mxu0  ;;  %4528 = vmatprep.subr.mxu0 %v10596_v55  ;;  %v10619_v32 = vld [vmem:[%s11875_s4 + $0xd8] sm:$0xff] }
0x13bb   :  { %v4020_v9 = vadd.f32 %v4016_v43, %v608_v34  ;;  %v10601_v43 = vld [vmem:[%s11875_s4 + $0xf0] sm:$0xff] }
0x13bd   :  { %5925 = vtanh.f32 %v4020_v9 }
0x13be   :  { %5927 = vtanh.f32 %v4019_v7  ;;  %v10606_v7 = vld [vmem:[%s11875_s4 + $0xe8] sm:$0xff] }
0x13ca   :  { %v10514_v38 = vpop.eup %5925 }
0x13cb   :  { %12478 = vst [vmem:[#allocation67_spill] sm:$0xff] %v10514_v38  ;;  %v10516_v37 = vpop.eup %5927  ;;  %4157 = vmatprep.mubr.f32.mxu1 %v10514_v38  ;;  %v10691_v38 = vld [vmem:[%s11875_s4 + $0x78] sm:$0xff] }
0x13cc   :  { %12479 = vst [vmem:[#allocation15_spill] sm:$0xff] %v10516_v37  ;;  %4158 = vmatmul.mubr.f32.vlgmr.msra.gmra.mxu1 %v10516_v37  ;;  %v10685_v37 = vld [vmem:[%s11875_s4 + $0x80] sm:$0xff] }
0x13cd   :  { %4384 = vmatpush1.msra.mxu1 %v9985_v58  ;;  %v12485_v58 = vld [vmem:[#allocation6_spill] sm:$0xff] }
0x13ce   :  { %4385 = vmatprep.subr.mxu1 %v9990_v60  ;;  %v12486_v60 = vld [vmem:[#allocation79_spill] sm:$0xff] }
0x13cf   :  { %4386 = vmatpush1.msra.mxu1 %v9996_v3  ;;  %v12487_v3 = vld [vmem:[#allocation11_spill] sm:$0xff] }
0x13d0   :  { %4387 = vmatprep.subr.mxu1 %v10003_v41  ;;  %v12488_v41 = vld [vmem:[#allocation12_spill] sm:$0xff] }
0x13d1   :  { %4388 = vmatpush1.msra.mxu1 %v10009_v18  ;;  %v12489_v18 = vld [vmem:[#allocation13_spill] sm:$0xff] }
0x13d2   :  { %4389 = vmatprep.subr.mxu1 %v10015_v21  ;;  %v12490_v21 = vld [vmem:[#allocation14_spill] sm:$0xff] }
0x13d3   :  { %4390 = vmatpush1.msra.mxu1 %v10021_v24  ;;  %v12491_v24 = vld [vmem:[#allocation10_spill] sm:$0xff] }
0x13d4   :  { %4391 = vmatprep.subr.mxu1 %v10027_v27  ;;  %v12492_v27 = vld [vmem:[#allocation19_spill] sm:$0xff] }
0x13d5   :  { %4392 = vmatpush1.msra.mxu1 %v10033_v28  ;;  %v609_v28 = vadd.f32 %v7006_v4, %v12492_v27  ;;  %v10625_v27 = vld [vmem:[%s11875_s4 + $0xd0] sm:$0xff] }
0x13d6   :  { %4393 = vmatprep.subr.mxu1 %v10039_v62 }
0x13d7   :  { %4394 = vmatpush1.msra.mxu1 %v12458_v5 }
0x13d8   :  { %4395 = vmatprep.subr.mxu1 %v12459_v44 }
0x13d9   :  { %4396 = vmatpush1.msra.mxu1 %v10057_v30  ;;  %v12483_v30 = vld [vmem:[#allocation81_spill] sm:$0xff] }
0x13da   :  { %4397 = vmatprep.subr.mxu1 %v10063_v46  ;;  %v12482_v46 = vld [vmem:[#allocation80_spill] sm:$0xff] }
0x13db   :  { %4398 = vmatpush1.msra.mxu1 %v10069_v42  ;;  %v12481_v42 = vld [vmem:[#allocation71_spill] sm:$0xff] }
0x13dc   :  { %4399 = vmatprep.subr.mxu1 %v10075_v47  ;;  %v12480_v47 = vld [vmem:[#allocation75_spill] sm:$0xff] }
0x13dd   :  { %4400 = vmatpush1.msra.mxu1 %v10081_v36  ;;  %v12493_v36 = vld [vmem:[#allocation20_spill] sm:$0xff] }
0x13de   :  { %4401 = vmatprep.subr.mxu1 %v10087_v45  ;;  %v610_v45 = vadd.f32 %v7010_v15, %v12493_v36  ;;  %v10643_v36 = vld [vmem:[%s11875_s4 + $0xb8] sm:$0xff] }
0x13df   :  { %4402 = vmatpush1.msra.mxu1 %v10169_v61 }
0x13e0   :  { %4403 = vmatprep.subr.mxu1 %v10174_v52 }
0x13e1   :  { %4404 = vmatpush1.msra.mxu1 %v10179_v53 }
0x13e2   :  { %4405 = vmatprep.subr.mxu1 %v10185_v54 }
0x13e3   :  { %4406 = vmatpush1.msra.mxu1 %v10191_v56 }
0x13e4   :  { %4407 = vmatprep.subr.mxu1 %v10197_v50 }
0x13e5   :  { %4408 = vmatpush1.msra.mxu1 %v10203_v23 }
0x13e6   :  { %4409 = vmatprep.subr.mxu1 %v10209_v0 }
0x13e7   :  { %4410 = vmatpush1.msra.mxu1 %v10215_v40 }
0x13e8   :  { %4411 = vmatprep.subr.mxu1 %v10221_v22 }
0x13e9   :  { %4412 = vmatpush1.msra.mxu1 %v10227_v8 }
0x13ea   :  { %4413 = vmatprep.subr.mxu1 %v10233_v26 }
0x13eb   :  { %4414 = vmatpush1.msra.mxu1 %v10239_v49 }
0x13ec   :  { %4415 = vmatprep.subr.mxu1 %v10245_v2 }
0x13ed   :  { %4416 = vmatpush2.msra.mxu1 %v10251_v6 }
0x13ee   :  { %4417 = vmatprep.subr.mxu1 %v10257_v13 }
0x13ef   :  { %4418 = vmatpush2.msra.mxu1 %v10263_v14 }
0x13f0   :  { %4419 = vmatprep.subr.mxu1 %v10269_v19 }
0x13f1   :  { %4420 = vmatpush2.msra.mxu1 %v10275_v33 }
0x13f2   :  { %4421 = vmatprep.subr.mxu1 %v10281_v12 }
0x13f3   :  { %4422 = vmatpush2.msra.mxu1 %v10287_v20 }
0x13f4   :  { %4423 = vmatprep.subr.mxu1 %v10293_v63 }
0x13f5   :  { %4424 = vmatpush2.msra.mxu1 %v10299_v39 }
0x13f6   :  { %4425 = vmatprep.subr.mxu1 %v10305_v29 }
0x13f7   :  { %4426 = vmatpush2.msra.mxu1 %v10311_v31 }
0x13f8   :  { %4427 = vmatprep.subr.mxu1 %v10372_v57 }
0x13f9   :  { %4428 = vmatpush2.msra.mxu1 %v10378_v25 }
0x13fa   :  { %4429 = vmatprep.subr.mxu1 %v10385_v10 }
0x13fb   :  { %4430 = vmatpush2.msra.mxu1 %v10392_v11 }
0x13fc   :  { %4431 = vmatprep.subr.mxu1 %v10399_v16 }
0x13fd   :  { %4432 = vmatpush2.msra.mxu1 %v10406_v59 }
0x13fe   :  { %4433 = vmatprep.subr.mxu1 %v10413_v51 }
0x13ff   :  { %4434 = vmatpush2.msra.mxu1 %v12480_v47 }
0x1400   :  { %4435 = vmatprep.subr.mxu1 %v12481_v42 }
0x1401   :  { %4436 = vmatpush2.msra.mxu1 %v12482_v46 }
0x1402   :  { %4437 = vmatprep.subr.mxu1 %v12483_v30 }
0x1403   :  { %4438 = vmatpush2.msra.mxu1 %v12484_v1 }
0x1404   :  { %4439 = vmatprep.subr.mxu1 %v12485_v58 }
0x1405   :  { %4440 = vmatpush2.msra.mxu1 %v12486_v60 }
0x1406   :  { %4441 = vmatprep.subr.mxu1 %v12487_v3 }
0x1407   :  { %4442 = vmatpush2.msra.mxu1 %v12488_v41 }
0x1408   :  { %4443 = vmatprep.subr.mxu1 %v12489_v18 }
0x1409   :  { %4444 = vmatpush2.msra.mxu1 %v12490_v21 }
0x140a   :  { %4445 = vmatprep.subr.mxu1 %v12491_v24 }
0x140b   :  { %4446 = vmatpush2.msra.mxu1 %v10500_v17 }
0x140c   :  { %4673 = vmatprep.subr.mxu1 %v10596_v55 }
0x148c   :  { %v4159_v62 = vpop.f32.mrf.mxu1 }
0x148d   :  { %v4164_v9 = vadd.f32 %v4159_v62, %v609_v28  ;;  %v10631_v28 = vld [vmem:[%s11875_s4 + $0xc8] sm:$0xff]  ;;  %v10637_v62 = vld [vmem:[%s11875_s4 + $0xc0] sm:$0xff] }
0x148e   :  { %v4161_v34 = vpop.f32.mrf.mxu1 }
0x148f   :  { %v4165_v5 = vadd.f32 %v4161_v34, %v610_v45  ;;  %v10649_v45 = vld [vmem:[%s11875_s4 + $0xb0] sm:$0xff]  ;;  %v10661_v34 = vld [vmem:[%s11875_s4 + $0xa0] sm:$0xff] }
0x1490   :  { %12496 = vst [vmem:[#allocation18_spill] sm:$0xff] %v10661_v34 }
0x1491   :  { %5929 = vtanh.f32 %v4165_v5  ;;  %v10667_v5 = vld [vmem:[%s11875_s4 + $0x98] sm:$0xff] }
0x1492   :  { %5931 = vtanh.f32 %v4164_v9  ;;  %v10655_v9 = vld [vmem:[%s11875_s4 + $0xa8] sm:$0xff]  ;;  %12497 = vst [vmem:[#allocation75_spill] sm:$0xff] %v10667_v5 }
0x149e   :  { %v10587_v44 = vpop.eup %5929 }
0x149f   :  { %12494 = vst [vmem:[#allocation16_spill] sm:$0xff] %v10587_v44  ;;  %v10589_v48 = vpop.eup %5931  ;;  %4302 = vmatprep.mubr.f32.mxu0 %v10587_v44  ;;  %v10679_v44 = vld [vmem:[%s11875_s4 + $0x88] sm:$0xff] }
0x14a0   :  { %12495 = vst [vmem:[#allocation17_spill] sm:$0xff] %v10589_v48  ;;  %4303 = vmatmul.mubr.f32.vlgmr.msra.gmra.mxu0 %v10589_v48  ;;  %v10673_v48 = vld [vmem:[%s11875_s4 + $0x90] sm:$0xff] }
0x14a1   :  { %4529 = vmatpush1.msra.mxu0 %v10601_v43 }
0x14a2   :  { %4530 = vmatprep.subr.mxu0 %v10606_v7 }
0x14a3   :  { %4531 = vmatpush1.msra.mxu0 %v10612_v35 }
0x14a4   :  { %4532 = vmatprep.subr.mxu0 %v10619_v32 }
0x14a5   :  { %4533 = vmatpush1.msra.mxu0 %v10625_v27 }
0x14a6   :  { %4534 = vmatprep.subr.mxu0 %v10631_v28 }
0x14a7   :  { %4535 = vmatpush1.msra.mxu0 %v10637_v62 }
0x14a8   :  { %4536 = vmatprep.subr.mxu0 %v10643_v36 }
0x14a9   :  { %4537 = vmatpush1.msra.mxu0 %v10649_v45 }
0x14aa   :  { %4538 = vmatprep.subr.mxu0 %v10655_v9 }
0x14ab   :  { %4539 = vmatpush1.msra.mxu0 %v10661_v34  ;;  %v10697_v34 = vld [vmem:[%s11875_s4 + $0x70] sm:$0xff] }
0x14ac   :  { %4540 = vmatprep.subr.mxu0 %v10667_v5  ;;  %v10703_v5 = vld [vmem:[%s11875_s4 + $0x68] sm:$0xff] }
0x14ad   :  { %4541 = vmatpush1.msra.mxu0 %v10673_v48 }
0x14ae   :  { %4542 = vmatprep.subr.mxu0 %v10679_v44 }
0x14af   :  { %4543 = vmatpush1.msra.mxu0 %v10685_v37 }
0x14b0   :  { %4544 = vmatprep.subr.mxu0 %v10691_v38 }
0x14b1   :  { %4545 = vmatpush1.msra.mxu0 %v10697_v34 }
0x14b2   :  { %4546 = vmatprep.subr.mxu0 %v10703_v5 }
0x14b3   :  { %4547 = vmatpush1.msra.mxu0 %v10169_v61  ;;  %v12498_v61 = vld [vmem:[#allocation21_spill] sm:$0xff] }
0x14b4   :  { %4548 = vmatprep.subr.mxu0 %v10174_v52  ;;  %v611_v52 = vadd.f32 %v7006_v4, %v12498_v61 }
0x14b5   :  { %4549 = vmatpush1.msra.mxu0 %v10179_v53 }
0x14b6   :  { %4550 = vmatprep.subr.mxu0 %v10185_v54  ;;  %v12499_v54 = vld [vmem:[#allocation22_spill] sm:$0xff] }
0x14b7   :  { %4551 = vmatpush1.msra.mxu0 %v10191_v56  ;;  %v612_v56 = vadd.f32 %v7010_v15, %v12499_v54  ;;  %v10994_v54 = vld [vmem:[%s11875_s4 + $0x190] sm:$0xff] }
0x14b8   :  { %4552 = vmatprep.subr.mxu0 %v10197_v50 }
0x14b9   :  { %4553 = vmatpush1.msra.mxu0 %v10203_v23 }
0x14ba   :  { %4554 = vmatprep.subr.mxu0 %v10209_v0 }
0x14bb   :  { %4555 = vmatpush1.msra.mxu0 %v10215_v40 }
0x14bc   :  { %4556 = vmatprep.subr.mxu0 %v10221_v22 }
0x14bd   :  { %4557 = vmatpush1.msra.mxu0 %v10227_v8  ;;  %v12502_v8 = vld [vmem:[#allocation18_spill] sm:$0xff] }
0x14be   :  { %4558 = vmatprep.subr.mxu0 %v10233_v26  ;;  %v12503_v26 = vld [vmem:[#allocation75_spill] sm:$0xff] }
0x14bf   :  { %4559 = vmatpush1.msra.mxu0 %v10239_v49  ;;  %v10785_v49 = vld [vmem:[%s11875_s4 + $0x60] sm:$0xff] }
0x14c0   :  { %4560 = vmatprep.subr.mxu0 %v10245_v2  ;;  %v10790_v2 = vld [vmem:[%s11875_s4 + $0x58] sm:$0xff] }
0x14c1   :  { %4561 = vmatpush2.msra.mxu0 %v10251_v6  ;;  %v10795_v6 = vld [vmem:[%s11875_s4 + $0x50] sm:$0xff] }
0x14c2   :  { %4562 = vmatprep.subr.mxu0 %v10257_v13  ;;  %v10801_v13 = vld [vmem:[%s11875_s4 + $0x48] sm:$0xff] }
0x14c3   :  { %4563 = vmatpush2.msra.mxu0 %v10263_v14  ;;  %v10807_v14 = vld [vmem:[%s11875_s4 + $0x40] sm:$0xff] }
0x14c4   :  { %4564 = vmatprep.subr.mxu0 %v10269_v19  ;;  %v10813_v19 = vld [vmem:[%s11875_s4 + $0x38] sm:$0xff] }
0x14c5   :  { %4565 = vmatpush2.msra.mxu0 %v10275_v33  ;;  %v10819_v33 = vld [vmem:[%s11875_s4 + $0x30] sm:$0xff] }
0x14c6   :  { %4566 = vmatprep.subr.mxu0 %v10281_v12  ;;  %v10825_v12 = vld [vmem:[%s11875_s4 + $0x28] sm:$0xff] }
0x14c7   :  { %4567 = vmatpush2.msra.mxu0 %v10287_v20  ;;  %v10831_v20 = vld [vmem:[%s11875_s4 + $0x20] sm:$0xff] }
0x14c8   :  { %4568 = vmatprep.subr.mxu0 %v10293_v63  ;;  %v10837_v63 = vld [vmem:[%s11875_s4 + $0x18] sm:$0xff] }
0x14c9   :  { %4569 = vmatpush2.msra.mxu0 %v10299_v39  ;;  %v10843_v39 = vld [vmem:[%s11875_s4 + $0x10] sm:$0xff] }
0x14ca   :  { %4570 = vmatprep.subr.mxu0 %v10305_v29  ;;  %v10849_v29 = vld [vmem:[%s11875_s4 + $0x8] sm:$0xff] }
0x14cb   :  { %4571 = vmatpush2.msra.mxu0 %v10311_v31  ;;  %v10855_v31 = vld [vmem:[%s11875_s4] sm:$0xff] }
0x14cc   :  { %4572 = vmatprep.subr.mxu0 %v10372_v57  ;;  %v10861_v57 = vld [vmem:[%s11875_s4 + $0x1f8] sm:$0xff] }
0x14cd   :  { %4573 = vmatpush2.msra.mxu0 %v10378_v25  ;;  %v10867_v25 = vld [vmem:[%s11875_s4 + $0x1f0] sm:$0xff] }
0x14ce   :  { %4574 = vmatprep.subr.mxu0 %v10385_v10  ;;  %v10873_v10 = vld [vmem:[%s11875_s4 + $0x1e8] sm:$0xff] }
0x14cf   :  { %4575 = vmatpush2.msra.mxu0 %v10392_v11  ;;  %v10879_v11 = vld [vmem:[%s11875_s4 + $0x1e0] sm:$0xff] }
0x14d0   :  { %4576 = vmatprep.subr.mxu0 %v10399_v16  ;;  %v10885_v16 = vld [vmem:[%s11875_s4 + $0x1d8] sm:$0xff] }
0x14d1   :  { %4577 = vmatpush2.msra.mxu0 %v10406_v59  ;;  %v10891_v59 = vld [vmem:[%s11875_s4 + $0x1d0] sm:$0xff] }
0x14d2   :  { %4578 = vmatprep.subr.mxu0 %v10413_v51  ;;  %v10897_v51 = vld [vmem:[%s11875_s4 + $0x1c8] sm:$0xff] }
0x14d3   :  { %4579 = vmatpush2.msra.mxu0 %v12480_v47  ;;  %v10909_v47 = vld [vmem:[%s11875_s4 + $0x1b8] sm:$0xff] }
0x14d4   :  { %4580 = vmatprep.subr.mxu0 %v12481_v42  ;;  %v10915_v42 = vld [vmem:[%s11875_s4 + $0x1b0] sm:$0xff] }
0x14d5   :  { %4581 = vmatpush2.msra.mxu0 %v12482_v46  ;;  %v10921_v46 = vld [vmem:[%s11875_s4 + $0x1a8] sm:$0xff] }
0x14d6   :  { %4582 = vmatprep.subr.mxu0 %v12483_v30  ;;  %v10927_v30 = vld [vmem:[%s11875_s4 + $0x1a0] sm:$0xff] }
0x14d7   :  { %4583 = vmatpush2.msra.mxu0 %v12484_v1  ;;  %v12504_v1 = vld [vmem:[#allocation23_spill] sm:$0xff] }
0x14d8   :  { %4584 = vmatprep.subr.mxu0 %v12485_v58  ;;  %v613_v58 = vadd.f32 %v7006_v4, %v12504_v1  ;;  %v11029_v1 = vld [vmem:[%s11875_s4 + $0x168] sm:$0xff] }
0x14d9   :  { %4585 = vmatpush2.msra.mxu0 %v12486_v60 }
0x14da   :  { %4586 = vmatprep.subr.mxu0 %v12487_v3  ;;  %v12505_v3 = vld [vmem:[#allocation24_spill] sm:$0xff] }
0x14db   :  { %4587 = vmatpush2.msra.mxu0 %v12488_v41  ;;  %v614_v41 = vadd.f32 %v7010_v15, %v12505_v3  ;;  %v11046_v3 = vld [vmem:[%s11875_s4 + $0x150] sm:$0xff] }
0x14dc   :  { %4588 = vmatprep.subr.mxu0 %v12489_v18  ;;  %12510 = vst [vmem:[#allocation11_spill] sm:$0xff] %v11046_v3 }
0x14dd   :  { %4589 = vmatpush2.msra.mxu0 %v12490_v21 }
0x14de   :  { %4590 = vmatprep.subr.mxu0 %v12491_v24 }
0x14df   :  { %4591 = vmatpush2.msra.mxu0 %v10500_v17  ;;  %v10903_v17 = vld [vmem:[%s11875_s4 + $0x1c0] sm:$0xff] }
0x14e0   :  { %4818 = vmatprep.subr.mxu0 %v10596_v55 }
0x1560   :  { %v4304_v53 = vpop.f32.mrf.mxu0 }
0x1561   :  { %v4309_v50 = vadd.f32 %v4304_v53, %v611_v52  ;;  %v10988_v53 = vld [vmem:[%s11875_s4 + $0x198] sm:$0xff] }
0x1562   :  { %v4306_v23 = vpop.f32.mrf.mxu0 }
0x1563   :  { %v4310_v0 = vadd.f32 %v4306_v23, %v612_v56  ;;  %v11001_v56 = vld [vmem:[%s11875_s4 + $0x188] sm:$0xff]  ;;  %v11015_v23 = vld [vmem:[%s11875_s4 + $0x178] sm:$0xff] }
0x1565   :  { %5933 = vtanh.f32 %v4310_v0  ;;  %v11022_v0 = vld [vmem:[%s11875_s4 + $0x170] sm:$0xff] }
0x1566   :  { %5935 = vtanh.f32 %v4309_v50  ;;  %v11008_v50 = vld [vmem:[%s11875_s4 + $0x180] sm:$0xff] }
0x1572   :  { %v10758_v40 = vpop.eup %5933 }
0x1573   :  { %12500 = vst [vmem:[#allocation71_spill] sm:$0xff] %v10758_v40  ;;  %v10760_v22 = vpop.eup %5935  ;;  %4447 = vmatprep.mubr.f32.mxu1 %v10758_v40  ;;  %v11102_v40 = vld [vmem:[%s11875_s4 + $0x110] sm:$0xff] }
0x1574   :  { %12501 = vst [vmem:[#allocation80_spill] sm:$0xff] %v10760_v22  ;;  %4448 = vmatmul.mubr.f32.vlgmr.msra.gmra.mxu1 %v10760_v22  ;;  %v11095_v22 = vld [vmem:[%s11875_s4 + $0x118] sm:$0xff]  ;;  %12518 = vst [vmem:[#allocation22_spill] sm:$0xff] %v11102_v40 }
0x1575   :  { %4674 = vmatpush1.msra.mxu1 %v10601_v43  ;;  %12517 = vst [vmem:[#allocation21_spill] sm:$0xff] %v11095_v22 }
0x1576   :  { %4675 = vmatprep.subr.mxu1 %v10606_v7 }
0x1577   :  { %4676 = vmatpush1.msra.mxu1 %v10612_v35 }
0x1578   :  { %4677 = vmatprep.subr.mxu1 %v10619_v32 }
0x1579   :  { %4678 = vmatpush1.msra.mxu1 %v10625_v27 }
0x157a   :  { %4679 = vmatprep.subr.mxu1 %v10631_v28 }
0x157b   :  { %4680 = vmatpush1.msra.mxu1 %v10637_v62 }
0x157c   :  { %4681 = vmatprep.subr.mxu1 %v10643_v36 }
0x157d   :  { %4682 = vmatpush1.msra.mxu1 %v10649_v45 }
0x157e   :  { %4683 = vmatprep.subr.mxu1 %v10655_v9 }
0x157f   :  { %4684 = vmatpush1.msra.mxu1 %v12502_v8 }
0x1580   :  { %4685 = vmatprep.subr.mxu1 %v12503_v26 }
0x1581   :  { %4686 = vmatpush1.msra.mxu1 %v10673_v48 }
0x1582   :  { %4687 = vmatprep.subr.mxu1 %v10679_v44 }
0x1583   :  { %4688 = vmatpush1.msra.mxu1 %v10685_v37 }
0x1584   :  { %4689 = vmatprep.subr.mxu1 %v10691_v38 }
0x1585   :  { %4690 = vmatpush1.msra.mxu1 %v10697_v34 }
0x1586   :  { %4691 = vmatprep.subr.mxu1 %v10703_v5 }
0x1587   :  { %4692 = vmatpush1.msra.mxu1 %v10785_v49 }
0x1588   :  { %4693 = vmatprep.subr.mxu1 %v10790_v2 }
0x1589   :  { %4694 = vmatpush1.msra.mxu1 %v10795_v6 }
0x158a   :  { %4695 = vmatprep.subr.mxu1 %v10801_v13 }
0x158b   :  { %4696 = vmatpush1.msra.mxu1 %v10807_v14 }
0x158c   :  { %4697 = vmatprep.subr.mxu1 %v10813_v19 }
0x158d   :  { %4698 = vmatpush1.msra.mxu1 %v10819_v33 }
0x158e   :  { %4699 = vmatprep.subr.mxu1 %v10825_v12 }
0x158f   :  { %4700 = vmatpush1.msra.mxu1 %v10831_v20 }
0x1590   :  { %4701 = vmatprep.subr.mxu1 %v10837_v63 }
0x1591   :  { %4702 = vmatpush1.msra.mxu1 %v10843_v39 }
0x1592   :  { %4703 = vmatprep.subr.mxu1 %v10849_v29 }
0x1593   :  { %4704 = vmatpush1.msra.mxu1 %v10855_v31 }
0x1594   :  { %4705 = vmatprep.subr.mxu1 %v10861_v57 }
0x1595   :  { %4706 = vmatpush2.msra.mxu1 %v10867_v25 }
0x1596   :  { %4707 = vmatprep.subr.mxu1 %v10873_v10 }
0x1597   :  { %4708 = vmatpush2.msra.mxu1 %v10879_v11 }
0x1598   :  { %4709 = vmatprep.subr.mxu1 %v10885_v16 }
0x1599   :  { %4710 = vmatpush2.msra.mxu1 %v10891_v59 }
0x159a   :  { %4711 = vmatprep.subr.mxu1 %v10897_v51 }
0x159b   :  { %4712 = vmatpush2.msra.mxu1 %v10903_v17 }
0x159c   :  { %4713 = vmatprep.subr.mxu1 %v10909_v47 }
0x159d   :  { %4714 = vmatpush2.msra.mxu1 %v10915_v42 }
0x159e   :  { %4715 = vmatprep.subr.mxu1 %v10921_v46 }
0x159f   :  { %4716 = vmatpush2.msra.mxu1 %v10927_v30 }
0x15a0   :  { %4717 = vmatprep.subr.mxu1 %v10988_v53 }
0x15a1   :  { %4718 = vmatpush2.msra.mxu1 %v10994_v54 }
0x15a2   :  { %4719 = vmatprep.subr.mxu1 %v11001_v56 }
0x15a3   :  { %4720 = vmatpush2.msra.mxu1 %v11008_v50 }
0x15a4   :  { %4721 = vmatprep.subr.mxu1 %v11015_v23 }
0x15a5   :  { %4722 = vmatpush2.msra.mxu1 %v11022_v0 }
0x15a6   :  { %4723 = vmatprep.subr.mxu1 %v11029_v1 }
0x1634   :  { %v4449_v60 = vpop.f32.mrf.mxu1 }
0x1635   :  { %v4454_v18 = vadd.f32 %v4449_v60, %v613_v58  ;;  %v11034_v58 = vld [vmem:[%s11875_s4 + $0x160] sm:$0xff]  ;;  %v11039_v60 = vld [vmem:[%s11875_s4 + $0x158] sm:$0xff] }
0x1636   :  { %v4451_v21 = vpop.f32.mrf.mxu1  ;;  %12508 = vst [vmem:[#allocation6_spill] sm:$0xff] %v11034_v58  ;;  %12509 = vst [vmem:[#allocation79_spill] sm:$0xff] %v11039_v60  ;;  %4724 = vmatpush2.msra.mxu1 %v11034_v58 }
0x1637   :  { %v4455_v24 = vadd.f32 %v4451_v21, %v614_v41  ;;  %v11053_v41 = vld [vmem:[%s11875_s4 + $0x148] sm:$0xff]  ;;  %4725 = vmatprep.subr.mxu1 %v11039_v60  ;;  %v11067_v21 = vld [vmem:[%s11875_s4 + $0x138] sm:$0xff] }
0x1638   :  { %12511 = vst [vmem:[#allocation12_spill] sm:$0xff] %v11053_v41  ;;  %4726 = vmatpush2.msra.mxu1 %v11046_v3  ;;  %12513 = vst [vmem:[#allocation14_spill] sm:$0xff] %v11067_v21 }
0x1639   :  { %5937 = vtanh.f32 %v4455_v24  ;;  %4727 = vmatprep.subr.mxu1 %v11053_v41  ;;  %v11074_v24 = vld [vmem:[%s11875_s4 + $0x130] sm:$0xff] }
0x163a   :  { %5939 = vtanh.f32 %v4454_v18  ;;  %v11060_v18 = vld [vmem:[%s11875_s4 + $0x140] sm:$0xff]  ;;  %12514 = vst [vmem:[#allocation10_spill] sm:$0xff] %v11074_v24 }
0x163b   :  { %12512 = vst [vmem:[#allocation13_spill] sm:$0xff] %v11060_v18  ;;  %4728 = vmatpush2.msra.mxu1 %v11060_v18 }
0x163c   :  { %4729 = vmatprep.subr.mxu1 %v11067_v21 }
0x163d   :  { %4730 = vmatpush2.msra.mxu1 %v11074_v24 }
0x1646   :  { %v10936_v61 = vpop.eup %5937 }
0x1647   :  { %12506 = vst [vmem:[#allocation81_spill] sm:$0xff] %v10936_v61  ;;  %v10938_v52 = vpop.eup %5939  ;;  %4592 = vmatprep.mubr.f32.mxu0 %v10936_v61  ;;  %v11088_v61 = vld [vmem:[%s11875_s4 + $0x120] sm:$0xff] }
0x1648   :  { %12507 = vst [vmem:[#allocation5_spill] sm:$0xff] %v10938_v52  ;;  %4593 = vmatmul.mubr.f32.vlgmr.msra.gmra.mxu0 %v10938_v52  ;;  %v11081_v52 = vld [vmem:[%s11875_s4 + $0x128] sm:$0xff]  ;;  %12516 = vst [vmem:[#allocation20_spill] sm:$0xff] %v11088_v61 }
0x1649   :  { %4819 = vmatpush1.msra.mxu0 %v10601_v43  ;;  %12515 = vst [vmem:[#allocation19_spill] sm:$0xff] %v11081_v52  ;;  %4731 = vmatprep.subr.mxu1 %v11081_v52 }
0x164a   :  { %4820 = vmatprep.subr.mxu0 %v10606_v7  ;;  %4732 = vmatpush2.msra.mxu1 %v11088_v61 }
0x164b   :  { %4821 = vmatpush1.msra.mxu0 %v10612_v35  ;;  %4733 = vmatprep.subr.mxu1 %v11095_v22 }
0x164c   :  { %4822 = vmatprep.subr.mxu0 %v10619_v32  ;;  %4734 = vmatpush2.msra.mxu1 %v11102_v40 }
0x164d   :  { %4823 = vmatpush1.msra.mxu0 %v10625_v27 }
0x164e   :  { %4824 = vmatprep.subr.mxu0 %v10631_v28 }
0x164f   :  { %4825 = vmatpush1.msra.mxu0 %v10637_v62 }
0x1650   :  { %4826 = vmatprep.subr.mxu0 %v10643_v36 }
0x1651   :  { %4827 = vmatpush1.msra.mxu0 %v10649_v45 }
0x1652   :  { %4828 = vmatprep.subr.mxu0 %v10655_v9 }
0x1653   :  { %4829 = vmatpush1.msra.mxu0 %v12502_v8 }
0x1654   :  { %4830 = vmatprep.subr.mxu0 %v12503_v26 }
0x1655   :  { %4831 = vmatpush1.msra.mxu0 %v10673_v48 }
0x1656   :  { %4832 = vmatprep.subr.mxu0 %v10679_v44 }
0x1657   :  { %4833 = vmatpush1.msra.mxu0 %v10685_v37 }
0x1658   :  { %4834 = vmatprep.subr.mxu0 %v10691_v38 }
0x1659   :  { %4835 = vmatpush1.msra.mxu0 %v10697_v34 }
0x165a   :  { %4836 = vmatprep.subr.mxu0 %v10703_v5 }
0x165b   :  { %4837 = vmatpush1.msra.mxu0 %v10785_v49 }
0x165c   :  { %4838 = vmatprep.subr.mxu0 %v10790_v2 }
0x165d   :  { %4839 = vmatpush1.msra.mxu0 %v10795_v6 }
0x165e   :  { %4840 = vmatprep.subr.mxu0 %v10801_v13 }
0x165f   :  { %4841 = vmatpush1.msra.mxu0 %v10807_v14 }
0x1660   :  { %4842 = vmatprep.subr.mxu0 %v10813_v19 }
0x1661   :  { %4843 = vmatpush1.msra.mxu0 %v10819_v33 }
0x1662   :  { %4844 = vmatprep.subr.mxu0 %v10825_v12 }
0x1663   :  { %4845 = vmatpush1.msra.mxu0 %v10831_v20 }
0x1664   :  { %4846 = vmatprep.subr.mxu0 %v10837_v63 }
0x1665   :  { %4847 = vmatpush1.msra.mxu0 %v10843_v39 }
0x1666   :  { %4848 = vmatprep.subr.mxu0 %v10849_v29 }
0x1667   :  { %4849 = vmatpush1.msra.mxu0 %v10855_v31 }
0x1668   :  { %4850 = vmatprep.subr.mxu0 %v10861_v57 }
0x1669   :  { %4851 = vmatpush2.msra.mxu0 %v10867_v25 }
0x166a   :  { %4852 = vmatprep.subr.mxu0 %v10873_v10 }
0x166b   :  { %4853 = vmatpush2.msra.mxu0 %v10879_v11 }
0x166c   :  { %4854 = vmatprep.subr.mxu0 %v10885_v16 }
0x166d   :  { %4855 = vmatpush2.msra.mxu0 %v10891_v59 }
0x166e   :  { %4856 = vmatprep.subr.mxu0 %v10897_v51 }
0x166f   :  { %4857 = vmatpush2.msra.mxu0 %v10903_v17 }
0x1670   :  { %4858 = vmatprep.subr.mxu0 %v10909_v47 }
0x1671   :  { %4859 = vmatpush2.msra.mxu0 %v10915_v42 }
0x1672   :  { %4860 = vmatprep.subr.mxu0 %v10921_v46 }
0x1673   :  { %4861 = vmatpush2.msra.mxu0 %v10927_v30 }
0x1674   :  { %4862 = vmatprep.subr.mxu0 %v10988_v53 }
0x1675   :  { %4863 = vmatpush2.msra.mxu0 %v10994_v54 }
0x1676   :  { %4864 = vmatprep.subr.mxu0 %v11001_v56 }
0x1677   :  { %4865 = vmatpush2.msra.mxu0 %v11008_v50 }
0x1678   :  { %4866 = vmatprep.subr.mxu0 %v11015_v23 }
0x1679   :  { %4867 = vmatpush2.msra.mxu0 %v11022_v0 }
0x167a   :  { %4868 = vmatprep.subr.mxu0 %v11029_v1 }
0x167b   :  { %4869 = vmatpush2.msra.mxu0 %v11034_v58 }
0x167c   :  { %4870 = vmatprep.subr.mxu0 %v11039_v60 }
0x167d   :  { %4871 = vmatpush2.msra.mxu0 %v11046_v3 }
0x167e   :  { %4872 = vmatprep.subr.mxu0 %v11053_v41  ;;  %v12521_v41 = vld [vmem:[#allocation26_spill] sm:$0xff] }
0x167f   :  { %4873 = vmatpush2.msra.mxu0 %v11060_v18 }
0x1680   :  { %4874 = vmatprep.subr.mxu0 %v11067_v21  ;;  %v11109_v21 = vld [vmem:[%s11875_s4 + $0x108] sm:$0xff] }
0x1681   :  { %4875 = vmatpush2.msra.mxu0 %v11074_v24  ;;  %12519 = vst [vmem:[#allocation18_spill] sm:$0xff] %v11109_v21  ;;  %v11116_v24 = vld [vmem:[%s11875_s4 + $0x100] sm:$0xff]  ;;  %4735 = vmatprep.subr.mxu1 %v11109_v21 }
0x1682   :  { %4876 = vmatprep.subr.mxu0 %v11081_v52  ;;  %4736 = vmatpush2.msra.mxu1 %v11116_v24 }
0x1683   :  { %4877 = vmatpush2.msra.mxu0 %v11088_v61  ;;  %4963 = vmatprep.subr.mxu1 %v10596_v55  ;;  %v12520_v61 = vld [vmem:[#allocation25_spill] sm:$0xff] }
0x1684   :  { %4878 = vmatprep.subr.mxu0 %v11095_v22  ;;  %v615_v52 = vadd.f32 %v7006_v4, %v12520_v61  ;;  %v616_v22 = vadd.f32 %v7010_v15, %v12521_v41  ;;  %v12528_v55 = vld [vmem:[#allocation13_spill] sm:$0xff] }
0x1685   :  { %4879 = vmatpush2.msra.mxu0 %v11102_v40  ;;  %v11225_v41 = vld [vmem:[%s11875_s4 + $0xe0] sm:$0xff] }
0x1686   :  { %4880 = vmatprep.subr.mxu0 %v11109_v21 }
0x1687   :  { %4881 = vmatpush2.msra.mxu0 %v11116_v24 }
0x1708   :  { %v4594_v18 = vpop.f32.mrf.mxu0 }
0x1709   :  { %v4599_v3 = vadd.f32 %v4594_v18, %v615_v52  ;;  %v5075_v52 = vld [vmem:[%s11875_s4 + $0xf8] sm:$0xff] }
0x170a   :  { %v4596_v60 = vpop.f32.mrf.mxu0  ;;  %5108 = vmatprep.subr.mxu0 %v5075_v52  ;;  %v11231_v18 = vld [vmem:[%s11875_s4 + $0xd8] sm:$0xff] }
0x170b   :  { %v4600_v40 = vadd.f32 %v4596_v60, %v616_v22  ;;  %v11215_v60 = vld [vmem:[%s11875_s4 + $0xf0] sm:$0xff] }
0x170d   :  { %5941 = vtanh.f32 %v4600_v40 }
0x170e   :  { %5943 = vtanh.f32 %v4599_v3  ;;  %v11220_v3 = vld [vmem:[%s11875_s4 + $0xe8] sm:$0xff] }
0x171a   :  { %v11130_v58 = vpop.eup %5941 }
0x171b   :  { %12522 = vst [vmem:[#allocation75_spill] sm:$0xff] %v11130_v58  ;;  %v11132_v21 = vpop.eup %5943  ;;  %4737 = vmatprep.mubr.f32.mxu1 %v11130_v58  ;;  %v11309_v58 = vld [vmem:[%s11875_s4 + $0x70] sm:$0xff] }
0x171c   :  { %12523 = vst [vmem:[#allocation23_spill] sm:$0xff] %v11132_v21  ;;  %4738 = vmatmul.mubr.f32.vlgmr.msra.gmra.mxu1 %v11132_v21  ;;  %v11303_v21 = vld [vmem:[%s11875_s4 + $0x78] sm:$0xff] }
0x171d   :  { %4964 = vmatpush1.msra.mxu1 %v10601_v43  ;;  %v12529_v43 = vld [vmem:[#allocation14_spill] sm:$0xff] }
0x171e   :  { %4965 = vmatprep.subr.mxu1 %v10606_v7  ;;  %v12530_v7 = vld [vmem:[#allocation10_spill] sm:$0xff] }
0x171f   :  { %4966 = vmatpush1.msra.mxu1 %v10612_v35  ;;  %v12531_v35 = vld [vmem:[#allocation19_spill] sm:$0xff] }
0x1720   :  { %4967 = vmatprep.subr.mxu1 %v10619_v32  ;;  %v12532_v32 = vld [vmem:[#allocation20_spill] sm:$0xff] }
0x1721   :  { %4968 = vmatpush1.msra.mxu1 %v10625_v27  ;;  %v12533_v27 = vld [vmem:[#allocation21_spill] sm:$0xff] }
0x1722   :  { %4969 = vmatprep.subr.mxu1 %v10631_v28  ;;  %v12534_v28 = vld [vmem:[#allocation22_spill] sm:$0xff] }
0x1723   :  { %4970 = vmatpush1.msra.mxu1 %v10637_v62  ;;  %v12535_v62 = vld [vmem:[#allocation18_spill] sm:$0xff] }
0x1724   :  { %4971 = vmatprep.subr.mxu1 %v10643_v36  ;;  %v12536_v36 = vld [vmem:[#allocation27_spill] sm:$0xff] }
0x1725   :  { %4972 = vmatpush1.msra.mxu1 %v10649_v45  ;;  %v617_v45 = vadd.f32 %v7006_v4, %v12536_v36  ;;  %v11237_v36 = vld [vmem:[%s11875_s4 + $0xd0] sm:$0xff] }
0x1726   :  { %4973 = vmatprep.subr.mxu1 %v10655_v9 }
0x1727   :  { %4974 = vmatpush1.msra.mxu1 %v12502_v8 }
0x1728   :  { %4975 = vmatprep.subr.mxu1 %v12503_v26 }
0x1729   :  { %4976 = vmatpush1.msra.mxu1 %v10673_v48  ;;  %v12527_v48 = vld [vmem:[#allocation12_spill] sm:$0xff] }
0x172a   :  { %4977 = vmatprep.subr.mxu1 %v10679_v44  ;;  %v12526_v44 = vld [vmem:[#allocation11_spill] sm:$0xff] }
0x172b   :  { %4978 = vmatpush1.msra.mxu1 %v10685_v37  ;;  %v12525_v37 = vld [vmem:[#allocation79_spill] sm:$0xff] }
0x172c   :  { %4979 = vmatprep.subr.mxu1 %v10691_v38  ;;  %v12524_v38 = vld [vmem:[#allocation6_spill] sm:$0xff] }
0x172d   :  { %4980 = vmatpush1.msra.mxu1 %v10697_v34  ;;  %v12537_v34 = vld [vmem:[#allocation28_spill] sm:$0xff] }
0x172e   :  { %4981 = vmatprep.subr.mxu1 %v10703_v5  ;;  %v618_v5 = vadd.f32 %v7010_v15, %v12537_v34  ;;  %v11255_v34 = vld [vmem:[%s11875_s4 + $0xb8] sm:$0xff] }
0x172f   :  { %4982 = vmatpush1.msra.mxu1 %v10785_v49 }
0x1730   :  { %4983 = vmatprep.subr.mxu1 %v10790_v2 }
0x1731   :  { %4984 = vmatpush1.msra.mxu1 %v10795_v6 }
0x1732   :  { %4985 = vmatprep.subr.mxu1 %v10801_v13 }
0x1733   :  { %4986 = vmatpush1.msra.mxu1 %v10807_v14 }
0x1734   :  { %4987 = vmatprep.subr.mxu1 %v10813_v19 }
0x1735   :  { %4988 = vmatpush1.msra.mxu1 %v10819_v33 }
0x1736   :  { %4989 = vmatprep.subr.mxu1 %v10825_v12 }
0x1737   :  { %4990 = vmatpush1.msra.mxu1 %v10831_v20 }
0x1738   :  { %4991 = vmatprep.subr.mxu1 %v10837_v63 }
0x1739   :  { %4992 = vmatpush1.msra.mxu1 %v10843_v39 }
0x173a   :  { %4993 = vmatprep.subr.mxu1 %v10849_v29 }
0x173b   :  { %4994 = vmatpush1.msra.mxu1 %v10855_v31 }
0x173c   :  { %4995 = vmatprep.subr.mxu1 %v10861_v57 }
0x173d   :  { %4996 = vmatpush2.msra.mxu1 %v10867_v25 }
0x173e   :  { %4997 = vmatprep.subr.mxu1 %v10873_v10 }
0x173f   :  { %4998 = vmatpush2.msra.mxu1 %v10879_v11 }
0x1740   :  { %4999 = vmatprep.subr.mxu1 %v10885_v16 }
0x1741   :  { %5000 = vmatpush2.msra.mxu1 %v10891_v59 }
0x1742   :  { %5001 = vmatprep.subr.mxu1 %v10897_v51 }
0x1743   :  { %5002 = vmatpush2.msra.mxu1 %v10903_v17 }
0x1744   :  { %5003 = vmatprep.subr.mxu1 %v10909_v47 }
0x1745   :  { %5004 = vmatpush2.msra.mxu1 %v10915_v42 }
0x1746   :  { %5005 = vmatprep.subr.mxu1 %v10921_v46 }
0x1747   :  { %5006 = vmatpush2.msra.mxu1 %v10927_v30 }
0x1748   :  { %5007 = vmatprep.subr.mxu1 %v10988_v53 }
0x1749   :  { %5008 = vmatpush2.msra.mxu1 %v10994_v54 }
0x174a   :  { %5009 = vmatprep.subr.mxu1 %v11001_v56 }
0x174b   :  { %5010 = vmatpush2.msra.mxu1 %v11008_v50 }
0x174c   :  { %5011 = vmatprep.subr.mxu1 %v11015_v23 }
0x174d   :  { %5012 = vmatpush2.msra.mxu1 %v11022_v0 }
0x174e   :  { %5013 = vmatprep.subr.mxu1 %v11029_v1 }
0x174f   :  { %5014 = vmatpush2.msra.mxu1 %v12524_v38 }
0x1750   :  { %5015 = vmatprep.subr.mxu1 %v12525_v37 }
0x1751   :  { %5016 = vmatpush2.msra.mxu1 %v12526_v44 }
0x1752   :  { %5017 = vmatprep.subr.mxu1 %v12527_v48 }
0x1753   :  { %5018 = vmatpush2.msra.mxu1 %v12528_v55 }
0x1754   :  { %5019 = vmatprep.subr.mxu1 %v12529_v43 }
0x1755   :  { %5020 = vmatpush2.msra.mxu1 %v12530_v7 }
0x1756   :  { %5021 = vmatprep.subr.mxu1 %v12531_v35 }
0x1757   :  { %5022 = vmatpush2.msra.mxu1 %v12532_v32 }
0x1758   :  { %5023 = vmatprep.subr.mxu1 %v12533_v27 }
0x1759   :  { %5024 = vmatpush2.msra.mxu1 %v12534_v28 }
0x175a   :  { %5025 = vmatprep.subr.mxu1 %v12535_v62 }
0x175b   :  { %5026 = vmatpush2.msra.mxu1 %v11116_v24 }
0x175c   :  { %5253 = vmatprep.subr.mxu1 %v5075_v52  ;;  %v11285_v52 = vld [vmem:[%s11875_s4 + $0x90] sm:$0xff] }
0x17dc   :  { %v4739_v9 = vpop.f32.mrf.mxu1 }
0x17dd   :  { %v4744_v40 = vadd.f32 %v4739_v9, %v617_v45  ;;  %v11243_v45 = vld [vmem:[%s11875_s4 + $0xc8] sm:$0xff]  ;;  %v11249_v9 = vld [vmem:[%s11875_s4 + $0xc0] sm:$0xff] }
0x17de   :  { %v4741_v22 = vpop.f32.mrf.mxu1 }
0x17df   :  { %v4745_v8 = vadd.f32 %v4741_v22, %v618_v5  ;;  %v11261_v5 = vld [vmem:[%s11875_s4 + $0xb0] sm:$0xff]  ;;  %v11273_v22 = vld [vmem:[%s11875_s4 + $0xa0] sm:$0xff] }
0x17e1   :  { %5945 = vtanh.f32 %v4745_v8  ;;  %v11279_v8 = vld [vmem:[%s11875_s4 + $0x98] sm:$0xff] }
0x17e2   :  { %5947 = vtanh.f32 %v4744_v40  ;;  %v11267_v40 = vld [vmem:[%s11875_s4 + $0xa8] sm:$0xff]  ;;  %12540 = vst [vmem:[#allocation26_spill] sm:$0xff] %v11279_v8 }
0x17ee   :  { %v11203_v26 = vpop.eup %5945 }
0x17ef   :  { %12538 = vst [vmem:[#allocation24_spill] sm:$0xff] %v11203_v26  ;;  %v11205_v61 = vpop.eup %5947  ;;  %4882 = vmatprep.mubr.f32.mxu0 %v11203_v26  ;;  %v11297_v26 = vld [vmem:[%s11875_s4 + $0x80] sm:$0xff] }
0x17f0   :  { %12539 = vst [vmem:[#allocation25_spill] sm:$0xff] %v11205_v61  ;;  %4883 = vmatmul.mubr.f32.vlgmr.msra.gmra.mxu0 %v11205_v61  ;;  %v11291_v61 = vld [vmem:[%s11875_s4 + $0x88] sm:$0xff] }
0x17f1   :  { %5109 = vmatpush1.msra.mxu0 %v11215_v60 }
0x17f2   :  { %5110 = vmatprep.subr.mxu0 %v11220_v3 }
0x17f3   :  { %5111 = vmatpush1.msra.mxu0 %v11225_v41 }
0x17f4   :  { %5112 = vmatprep.subr.mxu0 %v11231_v18 }
0x17f5   :  { %5113 = vmatpush1.msra.mxu0 %v11237_v36 }
0x17f6   :  { %5114 = vmatprep.subr.mxu0 %v11243_v45 }
0x17f7   :  { %5115 = vmatpush1.msra.mxu0 %v11249_v9 }
0x17f8   :  { %5116 = vmatprep.subr.mxu0 %v11255_v34 }
0x17f9   :  { %5117 = vmatpush1.msra.mxu0 %v11261_v5 }
0x17fa   :  { %5118 = vmatprep.subr.mxu0 %v11267_v40 }
0x17fb   :  { %5119 = vmatpush1.msra.mxu0 %v11273_v22 }
0x17fc   :  { %5120 = vmatprep.subr.mxu0 %v11279_v8  ;;  %v11315_v8 = vld [vmem:[%s11875_s4 + $0x68] sm:$0xff] }
0x17fd   :  { %5121 = vmatpush1.msra.mxu0 %v11285_v52 }
0x17fe   :  { %5122 = vmatprep.subr.mxu0 %v11291_v61 }
0x17ff   :  { %5123 = vmatpush1.msra.mxu0 %v11297_v26 }
0x1800   :  { %5124 = vmatprep.subr.mxu0 %v11303_v21 }
0x1801   :  { %5125 = vmatpush1.msra.mxu0 %v11309_v58 }
0x1802   :  { %5126 = vmatprep.subr.mxu0 %v11315_v8 }
0x1803   :  { %5127 = vmatpush1.msra.mxu0 %v10785_v49  ;;  %v12541_v49 = vmov 0.0  }
0x1804   :  { %5128 = vmatprep.subr.mxu0 %v10790_v2  ;;  %v12542_v2 = vld [vmem:[#allocation29_spill] sm:$0xff] }
0x1805   :  { %5129 = vmatpush1.msra.mxu0 %v10795_v6  ;;  %v619_v6 = vadd.f32 %v7006_v4, %v12542_v2  ;;  %v5420_v2 = vld [vmem:[%s11878_s5 + $0xa8] sm:$0xff] }
0x1806   :  { %5130 = vmatprep.subr.mxu0 %v10801_v13 }
0x1807   :  { %5131 = vmatpush1.msra.mxu0 %v10807_v14  ;;  %v12543_v14 = vld [vmem:[#allocation30_spill] sm:$0xff] }
0x1808   :  { %5132 = vmatprep.subr.mxu0 %v10813_v19  ;;  %v620_v19 = vadd.f32 %v7010_v15, %v12543_v14  ;;  %v5251_v14 = vld [vmem:[%s11875_s4 + $0x1f0] sm:$0xff] }
0x1809   :  { %5133 = vmatpush1.msra.mxu0 %v10819_v33 }
0x180a   :  { %5134 = vmatprep.subr.mxu0 %v10825_v12 }
0x180b   :  { %5135 = vmatpush1.msra.mxu0 %v10831_v20 }
0x180c   :  { %5136 = vmatprep.subr.mxu0 %v10837_v63 }
0x180d   :  { %5137 = vmatpush1.msra.mxu0 %v10843_v39 }
0x180e   :  { %5138 = vmatprep.subr.mxu0 %v10849_v29  ;;  %v12544_v29 = vld [vmem:[#allocation26_spill] sm:$0xff] }
0x180f   :  { %5139 = vmatpush1.msra.mxu0 %v10855_v31  ;;  %v12545_v31 = vld [vmem:[#allocation31_spill] sm:$0xff] }
0x1810   :  { %5140 = vmatprep.subr.mxu0 %v10861_v57  ;;  %v621_v57 = vadd.f32 %v7006_v4, %v12545_v31  ;;  %v5417_v31 = vld [vmem:[%s11878_s5 + $0x90] sm:$0xff] }
0x1811   :  { %5141 = vmatpush2.msra.mxu0 %v10867_v25 }
0x1812   :  { %5142 = vmatprep.subr.mxu0 %v10873_v10  ;;  %v12546_v10 = vld [vmem:[#allocation32_spill] sm:$0xff] }
0x1813   :  { %5143 = vmatpush2.msra.mxu0 %v10879_v11  ;;  %v622_v11 = vadd.f32 %v7010_v15, %v12546_v10  ;;  %v5416_v10 = vld [vmem:[%s11878_s5 + $0x88] sm:$0xff] }
0x1814   :  { %5144 = vmatprep.subr.mxu0 %v10885_v16 }
0x1815   :  { %5145 = vmatpush2.msra.mxu0 %v10891_v59 }
0x1816   :  { %5146 = vmatprep.subr.mxu0 %v10897_v51 }
0x1817   :  { %5147 = vmatpush2.msra.mxu0 %v10903_v17 }
0x1818   :  { %5148 = vmatprep.subr.mxu0 %v10909_v47  ;;  %v5414_v47 = vld [vmem:[%s11878_s5 + $0x78] sm:$0xff] }
0x1819   :  { %5149 = vmatpush2.msra.mxu0 %v10915_v42 }
0x181a   :  { %5150 = vmatprep.subr.mxu0 %v10921_v46  ;;  %v5413_v46 = vld [vmem:[%s11878_s5 + $0x70] sm:$0xff] }
0x181b   :  { %5151 = vmatpush2.msra.mxu0 %v10927_v30  ;;  %v12547_v30 = vld [vmem:[#allocation37_spill] sm:$0xff] }
0x181c   :  { %5152 = vmatprep.subr.mxu0 %v10988_v53  ;;  %v5412_v53 = vld [vmem:[%s11878_s5 + $0x68] sm:$0xff] }
0x181d   :  { %5153 = vmatpush2.msra.mxu0 %v10994_v54  ;;  %v5411_v54 = vld [vmem:[%s11878_s5 + $0x60] sm:$0xff] }
0x181e   :  { %5154 = vmatprep.subr.mxu0 %v11001_v56  ;;  %v5410_v56 = vld [vmem:[%s11878_s5 + $0x58] sm:$0xff] }
0x181f   :  { %5155 = vmatpush2.msra.mxu0 %v11008_v50  ;;  %v5409_v50 = vld [vmem:[%s11878_s5 + $0x50] sm:$0xff] }
0x1820   :  { %5156 = vmatprep.subr.mxu0 %v11015_v23  ;;  %v5408_v23 = vld [vmem:[%s11878_s5 + $0x48] sm:$0xff] }
0x1821   :  { %5157 = vmatpush2.msra.mxu0 %v11022_v0  ;;  %v5407_v0 = vld [vmem:[%s11878_s5 + $0x40] sm:$0xff] }
0x1822   :  { %5158 = vmatprep.subr.mxu0 %v11029_v1  ;;  %v5406_v1 = vld [vmem:[%s11878_s5 + $0x38] sm:$0xff] }
0x1823   :  { %5159 = vmatpush2.msra.mxu0 %v12524_v38  ;;  %v5402_v38 = vld [vmem:[%s11878_s5 + $0x18] sm:$0xff] }
0x1824   :  { %5160 = vmatprep.subr.mxu0 %v12525_v37  ;;  %v5401_v37 = vld [vmem:[%s11878_s5 + $0x10] sm:$0xff] }
0x1825   :  { %5161 = vmatpush2.msra.mxu0 %v12526_v44  ;;  %v5400_v44 = vld [vmem:[%s11878_s5 + $0x8] sm:$0xff] }
0x1826   :  { %5162 = vmatprep.subr.mxu0 %v12527_v48  ;;  %v5399_v48 = vld [vmem:[%s11878_s5] sm:$0xff] }
0x1827   :  { %5163 = vmatpush2.msra.mxu0 %v12528_v55  ;;  %v5430_v55 = vld [vmem:[%s11878_s5 + $0xf8] sm:$0xff] }
0x1828   :  { %5164 = vmatprep.subr.mxu0 %v12529_v43  ;;  %v5429_v43 = vld [vmem:[%s11878_s5 + $0xf0] sm:$0xff] }
0x1829   :  { %5165 = vmatpush2.msra.mxu0 %v12530_v7  ;;  %v5428_v7 = vld [vmem:[%s11878_s5 + $0xe8] sm:$0xff] }
0x182a   :  { %5166 = vmatprep.subr.mxu0 %v12531_v35  ;;  %v5427_v35 = vld [vmem:[%s11878_s5 + $0xe0] sm:$0xff] }
0x182b   :  { %5167 = vmatpush2.msra.mxu0 %v12532_v32  ;;  %v5201_v32 = vld [vmem:[%s11875_s4 + $0x60] sm:$0xff] }
0x182c   :  { %5168 = vmatprep.subr.mxu0 %v12533_v27  ;;  %v5426_v27 = vld [vmem:[%s11878_s5 + $0xd8] sm:$0xff] }
0x182d   :  { %5169 = vmatpush2.msra.mxu0 %v12534_v28  ;;  %v5425_v28 = vld [vmem:[%s11878_s5 + $0xd0] sm:$0xff] }
0x182e   :  { %5170 = vmatprep.subr.mxu0 %v12535_v62  ;;  %v5200_v62 = vld [vmem:[%s11875_s4 + $0x58] sm:$0xff] }
0x182f   :  { %5171 = vmatpush2.msra.mxu0 %v11116_v24  ;;  %v5403_v24 = vld [vmem:[%s11878_s5 + $0x20] sm:$0xff] }
0x1830   :  { %5431 = vmatprep.subr.mxu0 %v12541_v49 }
0x18b0   :  { %v4884_v13 = vpop.f32.mrf.mxu0 }
0x18b1   :  { %v4889_v33 = vadd.f32 %v4884_v13, %v619_v6  ;;  %v5419_v6 = vld [vmem:[%s11878_s5 + $0xa0] sm:$0xff]  ;;  %v5252_v13 = vld [vmem:[%s11875_s4 + $0x1f8] sm:$0xff] }
0x18b2   :  { %v4886_v12 = vpop.f32.mrf.mxu0 }
0x18b3   :  { %v4890_v20 = vadd.f32 %v4886_v12, %v620_v19  ;;  %v5250_v19 = vld [vmem:[%s11875_s4 + $0x1e8] sm:$0xff]  ;;  %v5418_v12 = vld [vmem:[%s11878_s5 + $0x98] sm:$0xff] }
0x18b5   :  { %5949 = vtanh.f32 %v4890_v20  ;;  %v5248_v20 = vld [vmem:[%s11875_s4 + $0x1d8] sm:$0xff] }
0x18b6   :  { %5951 = vtanh.f32 %v4889_v33  ;;  %v5249_v33 = vld [vmem:[%s11875_s4 + $0x1e0] sm:$0xff] }
0x18c2   :  { %v11370_v63 = vpop.eup %5949 }
0x18c3   :  { %v11372_v39 = vpop.eup %5951  ;;  %5027 = vmatprep.mubr.f32.mxu1 %v11370_v63 }
0x18c4   :  { %5028 = vmatmul.mubr.f32.vlgmr.msra.gmra.mxu1 %v11372_v39 }
0x18c5   :  { %5254 = vmatpush1.msra.mxu1 %v11215_v60  ;;  %v5197_v60 = vld [vmem:[%s11875_s4 + $0x40] sm:$0xff] }
0x18c6   :  { %5255 = vmatprep.subr.mxu1 %v11220_v3  ;;  %v5424_v3 = vld [vmem:[%s11878_s5 + $0xc8] sm:$0xff] }
0x18c7   :  { %5256 = vmatpush1.msra.mxu1 %v11225_v41  ;;  %v5423_v41 = vld [vmem:[%s11878_s5 + $0xc0] sm:$0xff] }
0x18c8   :  { %5257 = vmatprep.subr.mxu1 %v11231_v18  ;;  %v5196_v18 = vld [vmem:[%s11875_s4 + $0x38] sm:$0xff] }
0x18c9   :  { %5258 = vmatpush1.msra.mxu1 %v11237_v36  ;;  %v5195_v36 = vld [vmem:[%s11875_s4 + $0x30] sm:$0xff] }
0x18ca   :  { %5259 = vmatprep.subr.mxu1 %v11243_v45  ;;  %v5194_v45 = vld [vmem:[%s11875_s4 + $0x28] sm:$0xff] }
0x18cb   :  { %5260 = vmatpush1.msra.mxu1 %v11249_v9  ;;  %v5193_v9 = vld [vmem:[%s11875_s4 + $0x20] sm:$0xff] }
0x18cc   :  { %5261 = vmatprep.subr.mxu1 %v11255_v34  ;;  %v5422_v34 = vld [vmem:[%s11878_s5 + $0xb8] sm:$0xff] }
0x18cd   :  { %5262 = vmatpush1.msra.mxu1 %v11261_v5  ;;  %v5421_v5 = vld [vmem:[%s11878_s5 + $0xb0] sm:$0xff] }
0x18ce   :  { %5263 = vmatprep.subr.mxu1 %v11267_v40  ;;  %v5192_v40 = vld [vmem:[%s11875_s4 + $0x18] sm:$0xff] }
0x18cf   :  { %5264 = vmatpush1.msra.mxu1 %v11273_v22  ;;  %v5191_v22 = vld [vmem:[%s11875_s4 + $0x10] sm:$0xff] }
0x18d0   :  { %5265 = vmatprep.subr.mxu1 %v12544_v29  ;;  %v5247_v29 = vld [vmem:[%s11875_s4 + $0x1d0] sm:$0xff] }
0x18d1   :  { %5266 = vmatpush1.msra.mxu1 %v11285_v52  ;;  %v5189_v52 = vld [vmem:[%s11875_s4] sm:$0xff] }
0x18d2   :  { %5267 = vmatprep.subr.mxu1 %v11291_v61  ;;  %v5198_v61 = vld [vmem:[%s11875_s4 + $0x48] sm:$0xff] }
0x18d3   :  { %5268 = vmatpush1.msra.mxu1 %v11297_v26  ;;  %v5199_v26 = vld [vmem:[%s11875_s4 + $0x50] sm:$0xff] }
0x18d4   :  { %5269 = vmatprep.subr.mxu1 %v11303_v21  ;;  %v5404_v21 = vld [vmem:[%s11878_s5 + $0x28] sm:$0xff] }
0x18d5   :  { %5270 = vmatpush1.msra.mxu1 %v11309_v58  ;;  %v5405_v58 = vld [vmem:[%s11878_s5 + $0x30] sm:$0xff] }
0x18d6   :  { %5271 = vmatprep.subr.mxu1 %v11315_v8  ;;  %v5190_v8 = vld [vmem:[%s11875_s4 + $0x8] sm:$0xff] }
0x18d7   :  { %5272 = vmatpush1.msra.mxu1 %v5201_v32  ;;  %v5226_v32 = vld [vmem:[%s11875_s4 + $0x128] sm:$0xff] }
0x18d8   :  { %5273 = vmatprep.subr.mxu1 %v5200_v62  ;;  %v5224_v62 = vld [vmem:[%s11875_s4 + $0x118] sm:$0xff] }
0x18d9   :  { %5274 = vmatpush1.msra.mxu1 %v5199_v26  ;;  %v5223_v26 = vld [vmem:[%s11875_s4 + $0x110] sm:$0xff] }
0x18da   :  { %5275 = vmatprep.subr.mxu1 %v5198_v61  ;;  %v12556_v61 = vld [vmem:[#allocation46_spill] sm:$0xff] }
0x18db   :  { %5276 = vmatpush1.msra.mxu1 %v5197_v60  ;;  %v5222_v60 = vld [vmem:[%s11875_s4 + $0x108] sm:$0xff] }
0x18dc   :  { %5277 = vmatprep.subr.mxu1 %v5196_v18  ;;  %v12558_v18 = vld [vmem:[#allocation48_spill] sm:$0xff] }
0x18dd   :  { %5278 = vmatpush1.msra.mxu1 %v5195_v36  ;;  %v12559_v36 = vld [vmem:[#allocation44_spill] sm:$0xff] }
0x18de   :  { %5279 = vmatprep.subr.mxu1 %v5194_v45  ;;  %v12560_v45 = vld [vmem:[#allocation60_spill] sm:$0xff] }
0x18df   :  { %5280 = vmatpush1.msra.mxu1 %v5193_v9  ;;  %v12561_v9 = vld [vmem:[#allocation61_spill] sm:$0xff] }
0x18e0   :  { %5281 = vmatprep.subr.mxu1 %v5192_v40  ;;  %v12564_v40 = vld [vmem:[#allocation51_spill] sm:$0xff] }
0x18e1   :  { %5282 = vmatpush1.msra.mxu1 %v5191_v22  ;;  %v12565_v22 = vld [vmem:[#allocation52_spill] sm:$0xff] }
0x18e2   :  { %5283 = vmatprep.subr.mxu1 %v5190_v8  ;;  %v12566_v8 = vld [vmem:[#allocation53_spill] sm:$0xff] }
0x18e3   :  { %5284 = vmatpush1.msra.mxu1 %v5189_v52  ;;  %v12567_v52 = vld [vmem:[#allocation49_spill] sm:$0xff] }
0x18e4   :  { %5285 = vmatprep.subr.mxu1 %v5252_v13  ;;  %v12570_v13 = vld [vmem:[#allocation70_spill] sm:$0xff] }
0x18e5   :  { %5286 = vmatpush2.msra.mxu1 %v5251_v14  ;;  %v12571_v14 = vld [vmem:[#allocation55_spill] sm:$0xff] }
0x18e6   :  { %5287 = vmatprep.subr.mxu1 %v5250_v19  ;;  %v12572_v19 = vld [vmem:[#allocation56_spill] sm:$0xff] }
0x18e7   :  { %5288 = vmatpush2.msra.mxu1 %v5249_v33  ;;  %v12573_v33 = vld [vmem:[#allocation57_spill] sm:$0xff] }
0x18e8   :  { %5289 = vmatprep.subr.mxu1 %v5248_v20  ;;  %v12575_v20 = vld [vmem:[#allocation54_spill] sm:$0xff] }
0x18e9   :  { %5290 = vmatpush2.msra.mxu1 %v5247_v29  ;;  %v12576_v29 = vld [vmem:[#allocation76_spill] sm:$0xff] }
0x1984   :  { %v5029_v25 = vpop.f32.mrf.mxu1 }
0x1985   :  { %v5034_v16 = vadd.f32 %v5029_v25, %v621_v57  ;;  %v5246_v57 = vld [vmem:[%s11875_s4 + $0x1c8] sm:$0xff]  ;;  %v5245_v25 = vld [vmem:[%s11875_s4 + $0x1c0] sm:$0xff] }
0x1986   :  { %v5031_v59 = vpop.f32.mrf.mxu1  ;;  %5291 = vmatprep.subr.mxu1 %v5246_v57  ;;  %v12578_v57 = vld [vmem:[#allocation78_spill] sm:$0xff] }
0x1987   :  { %v5035_v51 = vadd.f32 %v5031_v59, %v622_v11  ;;  %v5244_v11 = vld [vmem:[%s11875_s4 + $0x1b8] sm:$0xff]  ;;  %v5415_v59 = vld [vmem:[%s11878_s5 + $0x80] sm:$0xff]  ;;  %5292 = vmatpush2.msra.mxu1 %v5245_v25  ;;  %v12579_v25 = vld [vmem:[#allocation43_spill] sm:$0xff] }
0x1988   :  { %5293 = vmatprep.subr.mxu1 %v5244_v11  ;;  %v12581_v11 = vld [vmem:[#allocation65_spill] sm:$0xff] }
0x1989   :  { %5953 = vtanh.f32 %v5035_v51  ;;  %v5242_v51 = vld [vmem:[%s11875_s4 + $0x1a8] sm:$0xff] }
0x198a   :  { %5955 = vtanh.f32 %v5034_v16  ;;  %v5243_v16 = vld [vmem:[%s11875_s4 + $0x1b0] sm:$0xff] }
0x198b   :  { %5294 = vmatpush2.msra.mxu1 %v5243_v16  ;;  %v12582_v16 = vld [vmem:[#allocation66_spill] sm:$0xff] }
0x198c   :  { %5295 = vmatprep.subr.mxu1 %v5242_v51  ;;  %v12584_v51 = vld [vmem:[#allocation7_spill] sm:$0xff] }
0x1996   :  { %v11398_v17 = vpop.eup %5953 }
0x1997   :  { %v11403_v42 = vpop.eup %5955  ;;  %5172 = vmatprep.mubr.f32.mxu0 %v11398_v17 }
0x1998   :  { %5173 = vmatmul.mubr.f32.vlgmr.msra.gmra.mxu0 %v11403_v42 }
0x1999   :  { %5432 = vmatpush1.msra.mxu0 %v5414_v47  ;;  %5495 = vmatprep.mubr.f32.mxu0 %v12547_v30  ;;  %v5241_v47 = vld [vmem:[%s11875_s4 + $0x1a0] sm:$0xff]  ;;  %v5240_v30 = vld [vmem:[%s11875_s4 + $0x198] sm:$0xff] }
0x199a   :  { %5433 = vmatprep.subr.mxu0 %v12541_v49  ;;  %5296 = vmatpush2.msra.mxu1 %v5241_v47  ;;  %v12585_v47 = vld [vmem:[#allocation8_spill] sm:$0xff] }
0x199b   :  { %5434 = vmatpush1.msra.mxu0 %v5413_v46  ;;  %v12548_v46 = vld [vmem:[#allocation38_spill] sm:$0xff]  ;;  %5297 = vmatprep.subr.mxu1 %v5240_v30  ;;  %v12587_v30 = vld [vmem:[#allocation63_spill] sm:$0xff] }
0x199c   :  { %5435 = vmatprep.subr.mxu0 %v12541_v49 }
0x199d   :  { %5436 = vmatpush1.msra.mxu0 %v5412_v53  ;;  %v12549_v53 = vld [vmem:[#allocation39_spill] sm:$0xff] }
0x199e   :  { %5437 = vmatprep.subr.mxu0 %v12541_v49 }
0x199f   :  { %5438 = vmatpush1.msra.mxu0 %v5411_v54  ;;  %v5239_v54 = vld [vmem:[%s11875_s4 + $0x190] sm:$0xff] }
0x19a0   :  { %5439 = vmatprep.subr.mxu0 %v12541_v49  ;;  %5298 = vmatpush2.msra.mxu1 %v5239_v54  ;;  %v12589_v54 = vld [vmem:[#allocation73_spill] sm:$0xff] }
0x19a1   :  { %5440 = vmatpush1.msra.mxu0 %v5410_v56  ;;  %v5237_v56 = vld [vmem:[%s11875_s4 + $0x180] sm:$0xff] }
0x19a2   :  { %5441 = vmatprep.subr.mxu0 %v12541_v49 }
0x19a3   :  { %5442 = vmatpush1.msra.mxu0 %v5409_v50  ;;  %v12550_v50 = vld [vmem:[#allocation40_spill] sm:$0xff] }
0x19a4   :  { %5443 = vmatprep.subr.mxu0 %v12541_v49 }
0x19a5   :  { %5444 = vmatpush1.msra.mxu0 %v5408_v23  ;;  %v5236_v23 = vld [vmem:[%s11875_s4 + $0x178] sm:$0xff] }
0x19a6   :  { %5445 = vmatprep.subr.mxu0 %v12541_v49 }
0x19a7   :  { %5446 = vmatpush1.msra.mxu0 %v5407_v0  ;;  %v12551_v0 = vld [vmem:[#allocation82_spill] sm:$0xff] }
0x19a8   :  { %5447 = vmatprep.subr.mxu0 %v12541_v49 }
0x19a9   :  { %5448 = vmatpush1.msra.mxu0 %v5406_v1  ;;  %v5235_v1 = vld [vmem:[%s11875_s4 + $0x170] sm:$0xff] }
0x19aa   :  { %5449 = vmatprep.subr.mxu0 %v12541_v49 }
0x19ab   :  { %5450 = vmatpush1.msra.mxu0 %v5405_v58  ;;  %v5234_v58 = vld [vmem:[%s11875_s4 + $0x168] sm:$0xff] }
0x19ac   :  { %5451 = vmatprep.subr.mxu0 %v12541_v49 }
0x19ad   :  { %5452 = vmatpush1.msra.mxu0 %v5404_v21  ;;  %v5233_v21 = vld [vmem:[%s11875_s4 + $0x160] sm:$0xff] }
0x19ae   :  { %5453 = vmatprep.subr.mxu0 %v12541_v49 }
0x19af   :  { %5454 = vmatpush1.msra.mxu0 %v5403_v24  ;;  %v5232_v24 = vld [vmem:[%s11875_s4 + $0x158] sm:$0xff] }
0x19b0   :  { %5455 = vmatprep.subr.mxu0 %v12541_v49 }
0x19b1   :  { %5456 = vmatpush1.msra.mxu0 %v5402_v38  ;;  %v5231_v38 = vld [vmem:[%s11875_s4 + $0x150] sm:$0xff] }
0x19b2   :  { %5457 = vmatprep.subr.mxu0 %v12541_v49 }
0x19b3   :  { %5458 = vmatpush1.msra.mxu0 %v5401_v37  ;;  %v12552_v37 = vld [vmem:[#allocation83_spill] sm:$0xff] }
0x19b4   :  { %5459 = vmatprep.subr.mxu0 %v12541_v49 }
0x19b5   :  { %5460 = vmatpush1.msra.mxu0 %v5400_v44  ;;  %v5230_v44 = vld [vmem:[%s11875_s4 + $0x148] sm:$0xff] }
0x19b6   :  { %5461 = vmatprep.subr.mxu0 %v12541_v49 }
0x19b7   :  { %5462 = vmatpush1.msra.mxu0 %v5399_v48  ;;  %v12553_v48 = vld [vmem:[#allocation41_spill] sm:$0xff] }
0x19b8   :  { %5463 = vmatprep.subr.mxu0 %v12541_v49 }
0x19b9   :  { %5464 = vmatpush2.msra.mxu0 %v5430_v55  ;;  %v5229_v55 = vld [vmem:[%s11875_s4 + $0x140] sm:$0xff] }
0x19ba   :  { %5465 = vmatprep.subr.mxu0 %v12541_v49 }
0x19bb   :  { %5466 = vmatpush2.msra.mxu0 %v5429_v43  ;;  %v5228_v43 = vld [vmem:[%s11875_s4 + $0x138] sm:$0xff] }
0x19bc   :  { %5467 = vmatprep.subr.mxu0 %v12541_v49 }
0x19bd   :  { %5468 = vmatpush2.msra.mxu0 %v5428_v7  ;;  %v5227_v7 = vld [vmem:[%s11875_s4 + $0x130] sm:$0xff] }
0x19be   :  { %5469 = vmatprep.subr.mxu0 %v12541_v49 }
0x19bf   :  { %5470 = vmatpush2.msra.mxu0 %v5427_v35  ;;  %v12554_v35 = vld [vmem:[#allocation42_spill] sm:$0xff] }
0x19c0   :  { %5471 = vmatprep.subr.mxu0 %v12541_v49 }
0x19c1   :  { %5472 = vmatpush2.msra.mxu0 %v5426_v27  ;;  %v12555_v27 = vld [vmem:[#allocation45_spill] sm:$0xff] }
0x19c2   :  { %5473 = vmatprep.subr.mxu0 %v12541_v49 }
0x19c3   :  { %5474 = vmatpush2.msra.mxu0 %v5425_v28  ;;  %v5225_v28 = vld [vmem:[%s11875_s4 + $0x120] sm:$0xff] }
0x19c4   :  { %5475 = vmatprep.subr.mxu0 %v12541_v49 }
0x19c5   :  { %5476 = vmatpush2.msra.mxu0 %v5424_v3  ;;  %v12557_v3 = vld [vmem:[#allocation47_spill] sm:$0xff] }
0x19c6   :  { %5477 = vmatprep.subr.mxu0 %v12541_v49 }
0x19c7   :  { %5478 = vmatpush2.msra.mxu0 %v5423_v41  ;;  %v5221_v41 = vld [vmem:[%s11875_s4 + $0x100] sm:$0xff] }
0x19c8   :  { %5479 = vmatprep.subr.mxu0 %v12541_v49 }
0x19c9   :  { %5480 = vmatpush2.msra.mxu0 %v5422_v34  ;;  %v12562_v34 = vld [vmem:[#allocation62_spill] sm:$0xff] }
0x19ca   :  { %5481 = vmatprep.subr.mxu0 %v12541_v49 }
0x19cb   :  { %5482 = vmatpush2.msra.mxu0 %v5421_v5  ;;  %v12563_v5 = vld [vmem:[#allocation50_spill] sm:$0xff] }
0x19cc   :  { %5483 = vmatprep.subr.mxu0 %v12541_v49 }
0x19cd   :  { %5484 = vmatpush2.msra.mxu0 %v5420_v2  ;;  %v12568_v2 = vld [vmem:[#allocation68_spill] sm:$0xff] }
0x19ce   :  { %5485 = vmatprep.subr.mxu0 %v12541_v49 }
0x19cf   :  { %5486 = vmatpush2.msra.mxu0 %v5419_v6  ;;  %v12569_v6 = vld [vmem:[#allocation69_spill] sm:$0xff] }
0x19d0   :  { %5487 = vmatprep.subr.mxu0 %v12541_v49 }
0x19d1   :  { %5488 = vmatpush2.msra.mxu0 %v5418_v12  ;;  %v12574_v12 = vld [vmem:[#allocation58_spill] sm:$0xff] }
0x19d2   :  { %5489 = vmatprep.subr.mxu0 %v12541_v49 }
0x19d3   :  { %5490 = vmatpush2.msra.mxu0 %v5417_v31  ;;  %v12577_v31 = vld [vmem:[#allocation77_spill] sm:$0xff] }
0x19d4   :  { %5491 = vmatprep.subr.mxu0 %v12541_v49 }
0x19d5   :  { %5492 = vmatpush2.msra.mxu0 %v5416_v10  ;;  %v12580_v10 = vld [vmem:[#allocation64_spill] sm:$0xff] }
0x19d6   :  { %5493 = vmatprep.subr.mxu0 %v12541_v49  ;;  %v5238_v49 = vld [vmem:[%s11875_s4 + $0x188] sm:$0xff] }
0x19d7   :  { %5494 = vmatpush2.msra.mxu0 %v5415_v59  ;;  %5299 = vmatprep.subr.mxu1 %v5238_v49  ;;  %v12583_v59 = vld [vmem:[#allocation59_spill] sm:$0xff]  ;;  %v12590_v49 = vld [vmem:[#allocation74_spill] sm:$0xff] }
0x19d8   :  { %5496 = vmatmul.mubr.f32.vlgmr.msra.gmra.mxu0 %v12548_v46  ;;  %5300 = vmatpush2.msra.mxu1 %v5237_v56  ;;  %v12586_v46 = vld [vmem:[#allocation9_spill] sm:$0xff]  ;;  %v12591_v56 = vld [vmem:[#allocation67_spill] sm:$0xff] }
0x19d9   :  { %5500 = vmatprep.mubr.f32.mxu0 %v12549_v53  ;;  %5301 = vmatprep.subr.mxu1 %v5236_v23  ;;  %v12588_v53 = vld [vmem:[#allocation72_spill] sm:$0xff] }
0x19da   :  { %5302 = vmatpush2.msra.mxu1 %v5235_v1  ;;  %v12593_v23 = vld [vmem:[#allocation16_spill] sm:$0xff]  ;;  %v12595_v1 = vld [vmem:[#allocation71_spill] sm:$0xff] }
0x19db   :  { %5303 = vmatprep.subr.mxu1 %v5234_v58  ;;  %v12596_v58 = vld [vmem:[#allocation80_spill] sm:$0xff] }
0x19dc   :  { %5501 = vmatmul.mubr.f32.gmra.mxu0 %v12550_v50  ;;  %5304 = vmatpush2.msra.mxu1 %v5233_v21  ;;  %v12592_v50 = vld [vmem:[#allocation15_spill] sm:$0xff]  ;;  %v12597_v21 = vld [vmem:[#allocation81_spill] sm:$0xff] }
0x19dd   :  { %5505 = vmatprep.mubr.f32.mxu0 %v12551_v0  ;;  %5305 = vmatprep.subr.mxu1 %v5232_v24  ;;  %v12594_v0 = vld [vmem:[#allocation17_spill] sm:$0xff] }
0x19de   :  { %5306 = vmatpush2.msra.mxu1 %v5231_v38  ;;  %v12598_v24 = vld [vmem:[#allocation5_spill] sm:$0xff]  ;;  %v12599_v38 = vld [vmem:[#allocation75_spill] sm:$0xff] }
0x19df   :  { %5307 = vmatprep.subr.mxu1 %v5230_v44  ;;  %v12601_v44 = vld [vmem:[#allocation24_spill] sm:$0xff] }
0x19e0   :  { %5506 = vmatmul.mubr.f32.gmra.mxu0 %v12552_v37  ;;  %5308 = vmatpush2.msra.mxu1 %v5229_v55  ;;  %v12600_v37 = vld [vmem:[#allocation23_spill] sm:$0xff]  ;;  %v12603_v55 = vld [vmem:[#allocation33_spill] sm:$0xff] }
0x19e1   :  { %5510 = vmatprep.mubr.f32.mxu0 %v12553_v48  ;;  %5309 = vmatprep.subr.mxu1 %v5228_v43  ;;  %v12602_v48 = vld [vmem:[#allocation25_spill] sm:$0xff]  ;;  %v623_v43 = vadd.f32 %v7006_v4, %v12603_v55 }
0x19e2   :  { %5310 = vmatpush2.msra.mxu1 %v5227_v7 }
0x19e3   :  { %5311 = vmatprep.subr.mxu1 %v5226_v32 }
0x19e4   :  { %5511 = vmatmul.mubr.f32.gmra.mxu0 %v12554_v35  ;;  %5312 = vmatpush2.msra.mxu1 %v5225_v28  ;;  %v12604_v35 = vld [vmem:[#allocation34_spill] sm:$0xff] }
0x19e5   :  { %5515 = vmatprep.mubr.f32.mxu0 %v12555_v27  ;;  %5313 = vmatprep.subr.mxu1 %v5224_v62  ;;  %v624_v32 = vadd.f32 %v7010_v15, %v12604_v35 }
0x19e6   :  { %5314 = vmatpush2.msra.mxu1 %v5223_v26 }
0x19e7   :  { %5315 = vmatprep.subr.mxu1 %v5222_v60 }
0x19e8   :  { %5516 = vmatmul.mubr.f32.gmra.mxu0 %v12556_v61  ;;  %5316 = vmatpush2.msra.mxu1 %v5221_v41 }
0x19e9   :  { %5520 = vmatprep.mubr.f32.mxu0 %v12557_v3 }
0x19ec   :  { %5521 = vmatmul.mubr.f32.gmra.mxu0 %v12558_v18 }
0x19ed   :  { %5525 = vmatprep.mubr.f32.mxu0 %v12559_v36 }
0x19f0   :  { %5526 = vmatmul.mubr.f32.gmra.mxu0 %v12560_v45 }
0x19f1   :  { %5530 = vmatprep.mubr.f32.mxu0 %v12561_v9 }
0x19f4   :  { %5531 = vmatmul.mubr.f32.gmra.mxu0 %v12562_v34 }
0x19f5   :  { %5535 = vmatprep.mubr.f32.mxu0 %v12563_v5 }
0x19f8   :  { %5536 = vmatmul.mubr.f32.gmra.mxu0 %v12564_v40 }
0x19f9   :  { %5540 = vmatprep.mubr.f32.mxu0 %v12565_v22 }
0x19fc   :  { %5541 = vmatmul.mubr.f32.gmra.mxu0 %v12566_v8 }
0x19fd   :  { %5545 = vmatprep.mubr.f32.mxu0 %v12567_v52 }
0x1a00   :  { %5546 = vmatmul.mubr.f32.gmra.mxu0 %v12568_v2 }
0x1a01   :  { %5550 = vmatprep.mubr.f32.mxu0 %v12569_v6 }
0x1a04   :  { %5551 = vmatmul.mubr.f32.gmra.mxu0 %v12570_v13 }
0x1a05   :  { %5555 = vmatprep.mubr.f32.mxu0 %v12571_v14 }
0x1a08   :  { %5556 = vmatmul.mubr.f32.gmra.mxu0 %v12572_v19 }
0x1a09   :  { %5560 = vmatprep.mubr.f32.mxu0 %v12573_v33 }
0x1a0c   :  { %5561 = vmatmul.mubr.f32.gmra.mxu0 %v12574_v12 }
0x1a0d   :  { %5565 = vmatprep.mubr.f32.mxu0 %v12575_v20 }
0x1a10   :  { %5566 = vmatmul.mubr.f32.gmra.mxu0 %v12576_v29 }
0x1a11   :  { %5570 = vmatprep.mubr.f32.mxu0 %v12577_v31 }
0x1a14   :  { %5571 = vmatmul.mubr.f32.gmra.mxu0 %v12578_v57 }
0x1a15   :  { %5575 = vmatprep.mubr.f32.mxu0 %v12579_v25 }
0x1a18   :  { %5576 = vmatmul.mubr.f32.gmra.mxu0 %v12580_v10 }
0x1a19   :  { %5580 = vmatprep.mubr.f32.mxu0 %v12581_v11 }
0x1a1c   :  { %5581 = vmatmul.mubr.f32.gmra.mxu0 %v12582_v16 }
0x1a1d   :  { %5585 = vmatprep.mubr.f32.mxu0 %v12583_v59 }
0x1a20   :  { %5586 = vmatmul.mubr.f32.gmra.mxu0 %v12584_v51 }
0x1a21   :  { %5590 = vmatprep.mubr.f32.mxu0 %v12585_v47 }
0x1a24   :  { %5591 = vmatmul.mubr.f32.gmra.mxu0 %v12586_v46 }
0x1a25   :  { %5595 = vmatprep.mubr.f32.mxu0 %v12587_v30 }
0x1a28   :  { %5596 = vmatmul.mubr.f32.gmra.mxu0 %v12588_v53 }
0x1a29   :  { %5600 = vmatprep.mubr.f32.mxu0 %v12589_v54 }
0x1a2c   :  { %5601 = vmatmul.mubr.f32.gmra.mxu0 %v12590_v49 }
0x1a2d   :  { %5605 = vmatprep.mubr.f32.mxu0 %v12591_v56 }
0x1a30   :  { %5606 = vmatmul.mubr.f32.gmra.mxu0 %v12592_v50 }
0x1a31   :  { %5610 = vmatprep.mubr.f32.mxu0 %v12593_v23 }
0x1a34   :  { %5611 = vmatmul.mubr.f32.gmra.mxu0 %v12594_v0 }
0x1a35   :  { %5615 = vmatprep.mubr.f32.mxu0 %v12595_v1 }
0x1a38   :  { %5616 = vmatmul.mubr.f32.gmra.mxu0 %v12596_v58 }
0x1a39   :  { %5620 = vmatprep.mubr.f32.mxu0 %v12597_v21 }
0x1a3c   :  { %5621 = vmatmul.mubr.f32.gmra.mxu0 %v12598_v24 }
0x1a3d   :  { %5625 = vmatprep.mubr.f32.mxu0 %v12599_v38 }
0x1a40   :  { %5626 = vmatmul.mubr.f32.gmra.mxu0 %v12600_v37 }
0x1a41   :  { %5630 = vmatprep.mubr.f32.mxu0 %v12601_v44 }
0x1a44   :  { %5631 = vmatmul.mubr.f32.gmra.mxu0 %v12602_v48 }
0x1a45   :  { %5635 = vmatprep.mubr.f32.mxu0 %v11370_v63 }
0x1a48   :  { %5636 = vmatmul.mubr.f32.gmra.mxu0 %v11372_v39  ;;  %v11733_v39 = vld [vmem:[%s11879_s6] ss:$0 sm:$0xff] }
0x1a49   :  { %5640 = vmatprep.mubr.f32.mxu0 %v11398_v17 }
0x1a4c   :  { %5641 = vmatmul.mubr.f32.gmra.mxu0 %v11403_v42 }
0x1a58   :  { %v5174_v7 = vpop.f32.mrf.mxu0 }
0x1a59   :  { %v5179_v27 = vadd.f32 %v5174_v7, %v623_v43 }
0x1a5a   :  { %v5176_v28 = vpop.f32.mrf.mxu0 }
0x1a5b   :  { %v5180_v62 = vadd.f32 %v5176_v28, %v624_v32 }
0x1a5d   :  { %5957 = vtanh.f32 %v5180_v62 }
0x1a5e   :  { %5959 = vtanh.f32 %v5179_v27 }
0x1a6a   :  { %v5958_v26 = vpop.eup %5957 }
0x1a6b   :  { %v5960_v63 = vpop.eup %5959  ;;  %5317 = vmatprep.mubr.f32.mxu1 %v5958_v26  ;;  %5645 = vmatprep.mubr.f32.mxu0 %v5958_v26 }
0x1a6c   :  { %5318 = vmatmul.mubr.f32.vlgmr.msra.gmra.mxu1 %v5960_v63  ;;  %5646 = vmatmul.mubr.f32.gmra.mxu0 %v5960_v63 }
0x1a98   :  { %v5497_v17 = vpop.f32.mrf.mxu0 }
0x1a99   :  { %v5663_v42 = vadd.f32 %v11733_v39, %v5497_v17 }
0x1a9a   :  { %v5499_v61 = vpop.f32.mrf.mxu0 }
0x1a9b   :  { %5695 = vst [vmem:[%s11880_s7] sm:$0xff] %v5663_v42 }
0x1a9c   :  { %v5502_v60 = vpop.f32.mrf.mxu0 }
0x1a9d   :  { %v5664_v3 = vadd.f32 %v11733_v39, %v5502_v60 }
0x1a9e   :  { %v5504_v41 = vpop.f32.mrf.mxu0 }
0x1a9f   :  { %5696 = vst [vmem:[%s11880_s7 + $0x8] sm:$0xff] %v5664_v3 }
0x1aa0   :  { %v5507_v18 = vpop.f32.mrf.mxu0 }
0x1aa1   :  { %v5665_v36 = vadd.f32 %v11733_v39, %v5507_v18 }
0x1aa2   :  { %v5509_v45 = vpop.f32.mrf.mxu0 }
0x1aa3   :  { %5697 = vst [vmem:[%s11880_s7 + $0x10] sm:$0xff] %v5665_v36 }
0x1aa4   :  { %v5512_v9 = vpop.f32.mrf.mxu0 }
0x1aa5   :  { %v5666_v34 = vadd.f32 %v11733_v39, %v5512_v9 }
0x1aa6   :  { %v5514_v5 = vpop.f32.mrf.mxu0 }
0x1aa7   :  { %5698 = vst [vmem:[%s11880_s7 + $0x18] sm:$0xff] %v5666_v34 }
0x1aa8   :  { %v5517_v40 = vpop.f32.mrf.mxu0 }
0x1aa9   :  { %v5667_v22 = vadd.f32 %v11733_v39, %v5517_v40 }
0x1aaa   :  { %v5519_v8 = vpop.f32.mrf.mxu0 }
0x1aab   :  { %5699 = vst [vmem:[%s11880_s7 + $0x20] sm:$0xff] %v5667_v22 }
0x1aac   :  { %v5522_v52 = vpop.f32.mrf.mxu0 }
0x1aad   :  { %v5668_v2 = vadd.f32 %v11733_v39, %v5522_v52 }
0x1aae   :  { %v5524_v6 = vpop.f32.mrf.mxu0 }
0x1aaf   :  { %5700 = vst [vmem:[%s11880_s7 + $0x28] sm:$0xff] %v5668_v2 }
0x1ab0   :  { %v5527_v13 = vpop.f32.mrf.mxu0 }
0x1ab1   :  { %v5669_v14 = vadd.f32 %v11733_v39, %v5527_v13 }
0x1ab2   :  { %v5529_v19 = vpop.f32.mrf.mxu0 }
0x1ab3   :  { %5701 = vst [vmem:[%s11880_s7 + $0x30] sm:$0xff] %v5669_v14 }
0x1ab4   :  { %v5532_v33 = vpop.f32.mrf.mxu0 }
0x1ab5   :  { %v5670_v12 = vadd.f32 %v11733_v39, %v5532_v33 }
0x1ab6   :  { %v5534_v20 = vpop.f32.mrf.mxu0 }
0x1ab7   :  { %5702 = vst [vmem:[%s11880_s7 + $0x38] sm:$0xff] %v5670_v12 }
0x1ab8   :  { %v5537_v29 = vpop.f32.mrf.mxu0 }
0x1ab9   :  { %v5671_v31 = vadd.f32 %v11733_v39, %v5537_v29 }
0x1aba   :  { %v5539_v57 = vpop.f32.mrf.mxu0 }
0x1abb   :  { %5703 = vst [vmem:[%s11880_s7 + $0x40] sm:$0xff] %v5671_v31 }
0x1abc   :  { %v5542_v25 = vpop.f32.mrf.mxu0 }
0x1abd   :  { %v5672_v10 = vadd.f32 %v11733_v39, %v5542_v25 }
0x1abe   :  { %v5544_v11 = vpop.f32.mrf.mxu0 }
0x1abf   :  { %5704 = vst [vmem:[%s11880_s7 + $0x48] sm:$0xff] %v5672_v10  ;;  %v12605_v11 = vld [vmem:[#allocation35_spill] sm:$0xff] }
0x1ac0   :  { %v5547_v16 = vpop.f32.mrf.mxu0 }
0x1ac1   :  { %v5673_v59 = vadd.f32 %v11733_v39, %v5547_v16  ;;  %v625_v16 = vadd.f32 %v7006_v4, %v12605_v11 }
0x1ac2   :  { %v5549_v51 = vpop.f32.mrf.mxu0 }
0x1ac3   :  { %5705 = vst [vmem:[%s11880_s7 + $0x50] sm:$0xff] %v5673_v59 }
0x1ac4   :  { %v5552_v47 = vpop.f32.mrf.mxu0 }
0x1ac5   :  { %v5674_v46 = vadd.f32 %v11733_v39, %v5552_v47  ;;  %v12606_v47 = vld [vmem:[#allocation36_spill] sm:$0xff] }
0x1ac6   :  { %v5554_v30 = vpop.f32.mrf.mxu0 }
0x1ac7   :  { %5706 = vst [vmem:[%s11880_s7 + $0x58] sm:$0xff] %v5674_v46  ;;  %v626_v46 = vadd.f32 %v7010_v15, %v12606_v47 }
0x1ac8   :  { %v5557_v53 = vpop.f32.mrf.mxu0 }
0x1ac9   :  { %v5675_v54 = vadd.f32 %v11733_v39, %v5557_v53 }
0x1aca   :  { %v5559_v49 = vpop.f32.mrf.mxu0 }
0x1acb   :  { %5707 = vst [vmem:[%s11880_s7 + $0x60] sm:$0xff] %v5675_v54 }
0x1acc   :  { %v5562_v56 = vpop.f32.mrf.mxu0 }
0x1acd   :  { %v5676_v50 = vadd.f32 %v11733_v39, %v5562_v56 }
0x1ace   :  { %v5564_v23 = vpop.f32.mrf.mxu0 }
0x1acf   :  { %5708 = vst [vmem:[%s11880_s7 + $0x68] sm:$0xff] %v5676_v50 }
0x1ad0   :  { %v5567_v0 = vpop.f32.mrf.mxu0 }
0x1ad1   :  { %v5677_v1 = vadd.f32 %v11733_v39, %v5567_v0 }
0x1ad2   :  { %v5569_v58 = vpop.f32.mrf.mxu0 }
0x1ad3   :  { %5709 = vst [vmem:[%s11880_s7 + $0x70] sm:$0xff] %v5677_v1 }
0x1ad4   :  { %v5572_v21 = vpop.f32.mrf.mxu0 }
0x1ad5   :  { %v5678_v24 = vadd.f32 %v11733_v39, %v5572_v21 }
0x1ad6   :  { %v5574_v38 = vpop.f32.mrf.mxu0 }
0x1ad7   :  { %5710 = vst [vmem:[%s11880_s7 + $0x78] sm:$0xff] %v5678_v24 }
0x1ad8   :  { %v5577_v37 = vpop.f32.mrf.mxu0 }
0x1ad9   :  { %v5679_v44 = vadd.f32 %v11733_v39, %v5577_v37 }
0x1ada   :  { %v5579_v48 = vpop.f32.mrf.mxu0 }
0x1adb   :  { %5711 = vst [vmem:[%s11880_s7 + $0x80] sm:$0xff] %v5679_v44 }
0x1adc   :  { %v5582_v55 = vpop.f32.mrf.mxu0 }
0x1add   :  { %v5680_v43 = vadd.f32 %v11733_v39, %v5582_v55 }
0x1ade   :  { %v5584_v7 = vpop.f32.mrf.mxu0 }
0x1adf   :  { %5712 = vst [vmem:[%s11880_s7 + $0x88] sm:$0xff] %v5680_v43 }
0x1ae0   :  { %v5587_v35 = vpop.f32.mrf.mxu0 }
0x1ae1   :  { %v5681_v32 = vadd.f32 %v11733_v39, %v5587_v35 }
0x1ae2   :  { %v5589_v27 = vpop.f32.mrf.mxu0 }
0x1ae3   :  { %5713 = vst [vmem:[%s11880_s7 + $0x90] sm:$0xff] %v5681_v32 }
0x1ae4   :  { %v5592_v28 = vpop.f32.mrf.mxu0 }
0x1ae5   :  { %v5682_v62 = vadd.f32 %v11733_v39, %v5592_v28 }
0x1ae6   :  { %v5594_v26 = vpop.f32.mrf.mxu0 }
0x1ae7   :  { %5714 = vst [vmem:[%s11880_s7 + $0x98] sm:$0xff] %v5682_v62 }
0x1ae8   :  { %v5597_v63 = vpop.f32.mrf.mxu0 }
0x1ae9   :  { %v5683_v17 = vadd.f32 %v11733_v39, %v5597_v63 }
0x1aea   :  { %v5599_v42 = vpop.f32.mrf.mxu0 }
0x1aeb   :  { %5715 = vst [vmem:[%s11880_s7 + $0xa0] sm:$0xff] %v5683_v17 }
0x1aec   :  { %v5602_v61 = vpop.f32.mrf.mxu0 }
0x1aed   :  { %v5684_v60 = vadd.f32 %v11733_v39, %v5602_v61 }
0x1aee   :  { %v5604_v3 = vpop.f32.mrf.mxu0 }
0x1aef   :  { %5716 = vst [vmem:[%s11880_s7 + $0xa8] sm:$0xff] %v5684_v60 }
0x1af0   :  { %v5607_v41 = vpop.f32.mrf.mxu0 }
0x1af1   :  { %v5685_v18 = vadd.f32 %v11733_v39, %v5607_v41 }
0x1af2   :  { %v5609_v36 = vpop.f32.mrf.mxu0 }
0x1af3   :  { %5717 = vst [vmem:[%s11880_s7 + $0xb0] sm:$0xff] %v5685_v18 }
0x1af4   :  { %v5612_v45 = vpop.f32.mrf.mxu0 }
0x1af5   :  { %v5686_v9 = vadd.f32 %v11733_v39, %v5612_v45 }
0x1af6   :  { %v5614_v34 = vpop.f32.mrf.mxu0 }
0x1af7   :  { %5718 = vst [vmem:[%s11880_s7 + $0xb8] sm:$0xff] %v5686_v9 }
0x1af8   :  { %v5617_v5 = vpop.f32.mrf.mxu0 }
0x1af9   :  { %v5687_v40 = vadd.f32 %v11733_v39, %v5617_v5 }
0x1afa   :  { %v5619_v22 = vpop.f32.mrf.mxu0 }
0x1afb   :  { %5719 = vst [vmem:[%s11880_s7 + $0xc0] sm:$0xff] %v5687_v40 }
0x1afc   :  { %v5622_v8 = vpop.f32.mrf.mxu0 }
0x1afd   :  { %v5688_v52 = vadd.f32 %v11733_v39, %v5622_v8 }
0x1afe   :  { %v5624_v2 = vpop.f32.mrf.mxu0 }
0x1aff   :  { %5720 = vst [vmem:[%s11880_s7 + $0xc8] sm:$0xff] %v5688_v52 }
0x1b00   :  { %v5627_v6 = vpop.f32.mrf.mxu0 }
0x1b01   :  { %v5689_v13 = vadd.f32 %v11733_v39, %v5627_v6 }
0x1b02   :  { %v5629_v14 = vpop.f32.mrf.mxu0 }
0x1b03   :  { %5721 = vst [vmem:[%s11880_s7 + $0xd0] sm:$0xff] %v5689_v13 }
0x1b04   :  { %v5632_v19 = vpop.f32.mrf.mxu0 }
0x1b05   :  { %v5690_v33 = vadd.f32 %v11733_v39, %v5632_v19 }
0x1b06   :  { %v5634_v12 = vpop.f32.mrf.mxu0 }
0x1b07   :  { %5722 = vst [vmem:[%s11880_s7 + $0xd8] sm:$0xff] %v5690_v33 }
0x1b08   :  { %v5637_v20 = vpop.f32.mrf.mxu0 }
0x1b09   :  { %v5691_v29 = vadd.f32 %v11733_v39, %v5637_v20 }
0x1b0a   :  { %v5639_v31 = vpop.f32.mrf.mxu0 }
0x1b0b   :  { %5723 = vst [vmem:[%s11880_s7 + $0xe0] sm:$0xff] %v5691_v29 }
0x1b0c   :  { %v5642_v57 = vpop.f32.mrf.mxu0 }
0x1b0d   :  { %v5692_v25 = vadd.f32 %v11733_v39, %v5642_v57 }
0x1b0e   :  { %v5644_v10 = vpop.f32.mrf.mxu0 }
0x1b0f   :  { %5724 = vst [vmem:[%s11880_s7 + $0xe8] sm:$0xff] %v5692_v25 }
0x1b2c   :  { %v5319_v59 = vpop.f32.mrf.mxu1  ;;  %v5647_v51 = vpop.f32.mrf.mxu0 }
0x1b2d   :  { %v5324_v30 = vadd.f32 %v5319_v59, %v625_v16  ;;  %v5693_v53 = vadd.f32 %v11733_v39, %v5647_v51 }
0x1b2e   :  { %v5321_v54 = vpop.f32.mrf.mxu1  ;;  %v5649_v49 = vpop.f32.mrf.mxu0 }
0x1b2f   :  { %5961 = vtanh.f32 %v5324_v30  ;;  %5725 = vst [vmem:[%s11880_s7 + $0xf0] sm:$0xff] %v5693_v53  ;;  %v5325_v56 = vadd.f32 %v5321_v54, %v626_v46 }
0x1b31   :  { %5963 = vtanh.f32 %v5325_v56 }
0x1b3c   :  { %v5962_v50 = vpop.eup %5961 }
0x1b3d   :  { %5333 = vst [vmem:[%s11881_s8] sm:$0xff] %v5962_v50 }
0x1b3e   :  { %v5964_v4 = vpop.eup %5963 }
0x1b3f   :  { %5334 = vst [vmem:[%s11881_s8 + $0x8] sm:$0xff] %v5964_v4  ;;  %5650 = vmatprep.mubr.f32.mxu0 %v5964_v4 }
0x1b40   :  { %5651 = vmatmul.mubr.f32.gmra.mxu0 %v5962_v50 }
0x1c00   :  { %v5652_v15 = vpop.f32.mrf.mxu0 }
0x1c01   :  { %v5694_v23 = vadd.f32 %v11733_v39, %v5652_v15 }
0x1c02   :  { %v5654_v0 = vpop.f32.mrf.mxu0 }
0x1c03   :  { %5726 = vst [vmem:[%s11880_s7 + $0xf8] sm:$0xff] %v5694_v23 }

</bundles_post_ra>
